<compile_context>
chip_gen: v7x
topology: tpu7x:2x2x1
jax: 0.10.0
libtpu: 0.0.40
codegen_flags: <defaults>
</compile_context>

<pallas_src>
import math
import functools

import numpy as np
import jax
import jax.numpy as jnp
from jax.experimental import pallas as pl
from jax.experimental.pallas import tpu as pltpu


# ---------------------------------------------------------------- config ----
class Opt:
    local_noise_dim = 4
    global_noise_dim = 8
    periodic_noise_dim = 4
    hidden_noise_dim = 32
    spatial_size = 4          # spatial size of the input noise tensor
    kernel_size = 4           # stride=2, padding=1 => each deconv doubles H, W
    gen_conv_channels = [32, 16, 3]


VMEM_SPEC = pl.BlockSpec(memory_space=pltpu.MemorySpace.VMEM)
_BN_EPS = 1e-5

# ConvTranspose2d(k=4, s=2, p=1), 1-D structure (identical for rows and columns):
#   out[2p+0] = xpad[p+0]*W[3] + xpad[p+1]*W[1]
#   out[2p+1] = xpad[p+1]*W[2] + xpad[p+2]*W[0]
# i.e. output phase r uses (shift dh, kernel index kh) pairs:
_TAPS = (((0, 3), (1, 1)), ((1, 2), (2, 0)))


def _round_up(x, m):
    return ((x + m - 1) // m) * m


# --------------------------------------------------- host-side weight packing ----
def _pack_toeplitz_weights(w_t, w_in, lanes_out):
    """PyTorch ConvTranspose2d weight (Cin, Cout, K, K) -> 4 matrices M[kh], each
    ((W_in+2)*Cin, lanes_out), Toeplitz over the width axis and phase-fused over the
    output width, matching the kernel's line-major activation layout."""
    cin, cout, K, _ = w_t.shape
    w_out = 2 * w_in
    mats = [np.zeros(((w_in + 2) * cin, lanes_out), np.float32) for _ in range(K)]
    for wp in range(w_out):
        s, q = wp % 2, wp // 2
        for dw, kw in _TAPS[s]:
            v = q + dw                               # padded input column block
            col = (1 + wp) * cout                    # padded output column block
            for kh in range(K):
                mats[kh][v * cin:(v + 1) * cin, col:col + cout] += w_t[:, :, kh, kw]
    return mats


def _pack_bias(b, w_in, cout, lanes_out):
    w_out = 2 * w_in
    bias = np.zeros((1, lanes_out), np.float32)
    for wp in range(w_out):
        bias[0, (1 + wp) * cout:(2 + wp) * cout] = b
    return bias


def _chan_reduce_mats(w_in, cout):
    """R collapses the (width, channel) lane layout to per-channel sums; R^T expands
    per-channel scale/shift back to lanes (zero at the width-padding lanes)."""
    w_out = 2 * w_in
    lanes = (w_out + 2) * cout
    R = np.zeros((lanes, cout), np.float32)
    for wp in range(w_out):
        for c in range(cout):
            R[(1 + wp) * cout + c, c] = 1.0
    return R, np.ascontiguousarray(R.T)


def _input_scatter_mats(S, L, G, P):
    """0/1 matrices scattering z_l / z_g / z_p rows into the padded, lane-packed
    first-layer scratch layout, plus the periodic-phase pattern matrices."""
    C0 = L + G + P
    lanes = (S + 2) * C0
    scl = np.zeros((S * L, lanes), np.float32)
    scg = np.zeros((S * G, lanes), np.float32)
    scp = np.zeros((S * P, lanes), np.float32)
    for m in range(S):
        base = (1 + m) * C0
        for c in range(L):
            scl[m * L + c, base + c] = 1.0
        for g in range(G):
            scg[m * G + g, base + L + g] = 1.0
        for p in range(P):
            scp[m * P + p, base + L + G + p] = 1.0
    pat1 = np.zeros((P, S * P), np.float32)
    patm = np.zeros((P, S * P), np.float32)
    for m in range(S):
        for p in range(P):
            pat1[p, m * P + p] = 1.0
            patm[p, m * P + p] = float(m)
    return scl, scg, scp, pat1, patm


# ----------------------------------------------------------- parameters -----
def init_params(key, opt):
    """Deterministic synthetic init mirroring weights_init() shapes/scales."""
    ks = list(jax.random.split(key, 64))
    ki = iter(ks)
    G, Hn, P = opt.global_noise_dim, opt.hidden_noise_dim, opt.periodic_noise_dim
    params = {}

    def linear(in_f, out_f):
        w = 1.0 + 0.02 * jax.random.normal(next(ki), (in_f, out_f), jnp.float32)
        c = float(jax.random.uniform(next(ki), ())) * math.pi
        b = c + 0.02 * c * jax.random.normal(next(ki), (1, out_f), jnp.float32)
        return w, b

    params['wl'], params['bl'] = linear(G, Hn)
    params['w1'], params['b1'] = linear(Hn, P)
    params['w2'], params['b2'] = linear(Hn, P)

    noise_dim = opt.local_noise_dim + G + P
    ch = opt.gen_conv_channels
    in_chs = [noise_dim] + ch[:-1]
    K = opt.kernel_size

    conv_wt, conv_b, bn_g, bn_b = [], [], [], []
    for li, (cin, cout) in enumerate(zip(in_chs, ch)):
        w_t = 0.02 * jax.random.normal(next(ki), (cin, cout, K, K), jnp.float32)
        bound = 1.0 / math.sqrt(cin * K * K)
        b = jax.random.uniform(next(ki), (cout,), jnp.float32, minval=-bound, maxval=bound)
        conv_wt.append(w_t)
        conv_b.append(b)
        if li < len(ch) - 1:
            bn_g.append(1.0 + 0.02 * jax.random.normal(next(ki), (cout,), jnp.float32))
            bn_b.append(jnp.zeros((cout,), jnp.float32))
    params['conv_wt'], params['conv_b'] = conv_wt, conv_b
    params['bn_g'], params['bn_b'] = bn_g, bn_b
    return params


def pack_params(raw, opt):
    """One-time host-side repacking into the layout the fused kernel consumes."""
    S = opt.spatial_size
    L, G, P = opt.local_noise_dim, opt.global_noise_dim, opt.periodic_noise_dim
    chans = list(opt.gen_conv_channels)
    n_layers = len(chans)
    Hs = [S * 2 ** i for i in range(n_layers)]

    scl, scg, scp, pat1, patm = _input_scatter_mats(S, L, G, P)
    packed = {
        'wl': raw['wl'], 'bl': raw['bl'], 'w1': raw['w1'], 'b1': raw['b1'],
        'w2': raw['w2'], 'b2': raw['b2'],
        'sc_l': jnp.asarray(scl), 'sc_g': jnp.asarray(scg), 'sc_p': jnp.asarray(scp),
        'pat1': jnp.asarray(pat1), 'patm': jnp.asarray(patm),
        'conv_mats': [], 'conv_bias': [],
        'bn_g': [], 'bn_b': [], 'bn_R': [], 'bn_RT': [],
    }
    for li in range(n_layers):
        w_in, cout = Hs[li], chans[li]
        last = li == n_layers - 1
        lanes_nat = (2 * w_in + 2) * cout
        lanes_out = _round_up(lanes_nat, 128) if last else lanes_nat
        w_t = np.asarray(raw['conv_wt'][li], np.float32)
        mats = _pack_toeplitz_weights(w_t, w_in, lanes_out)
        bias = _pack_bias(np.asarray(raw['conv_b'][li], np.float32), w_in, cout, lanes_out)
        packed['conv_mats'].append([jnp.asarray(m) for m in mats])
        packed['conv_bias'].append(jnp.asarray(bias))
        if not last:
            R, RT = _chan_reduce_mats(w_in, cout)
            packed['bn_R'].append(jnp.asarray(R))
            packed['bn_RT'].append(jnp.asarray(RT))
            packed['bn_g'].append(jnp.asarray(np.asarray(raw['bn_g'][li], np.float32).reshape(1, cout)))
            packed['bn_b'].append(jnp.asarray(np.asarray(raw['bn_b'][li], np.float32).reshape(1, cout)))
    return packed


# ------------------------------------------------------ fused Pallas kernel ----
def _make_kernel(opt, B):
    S = opt.spatial_size
    chans = list(opt.gen_conv_channels)
    n_layers = len(chans)
    Hs = [S * 2 ** i for i in range(n_layers)]       # input spatial size per deconv
    n_front = 17
    f32 = jnp.float32

    def kernel(*refs):
        (zl_ref, zg_ref, zgf_ref, phi_ref, erep_ref, lmod_ref,
         wl_ref, bl_ref, w1_ref, b1_ref, w2_ref, b2_ref,
         scl_ref, scg_ref, scp_ref, pat1_ref, patm_ref) = refs[:n_front]
        pos = n_front
        layer_refs = []
        for li in range(n_layers):
            mats = refs[pos:pos + 4]; pos += 4
            bias_ref = refs[pos]; pos += 1
            if li < n_layers - 1:
                gam_ref, bet_ref, r_ref, rt_ref = refs[pos:pos + 4]; pos += 4
            else:
                gam_ref = bet_ref = r_ref = rt_ref = None
            layer_refs.append((mats, bias_ref, gam_ref, bet_ref, r_ref, rt_ref))
        out_ref = refs[pos]; pos += 1
        scr = refs[pos:pos + n_layers]

        # ---- 1. periodic-noise MLP (chained MXU matmuls, all batches at once) ----
        zg = zgf_ref[...]                                                # (B, G)
        h = jnp.maximum(
            jnp.dot(zg, wl_ref[...], preferred_element_type=f32) + bl_ref[...], 0.0)
        k1 = jnp.dot(h, w1_ref[...], preferred_element_type=f32) + b1_ref[...]   # (B, P)
        k2 = jnp.dot(h, w2_ref[...], preferred_element_type=f32) + b2_ref[...]
        phi = phi_ref[...]                                               # (B, P)

        # ---- 2. fused Z_p field + channel concat, batched over B -----------------
        #      Target layout: s0[b, 1+l, (1+m)*C0 + c] = feature[b, l, m, c] (zero pad).
        k1l = jnp.dot(k1, pat1_ref[...], preferred_element_type=f32)        # (B, S*P)
        phase = (jnp.dot(k2, patm_ref[...], preferred_element_type=f32)
                 + jnp.dot(phi, pat1_ref[...], preferred_element_type=f32)) # (B, S*P)
        erep = erep_ref[...]                                                # (B*S, B)
        k1_rep = jnp.dot(erep, k1l, preferred_element_type=f32)             # (B*S, S*P)
        ph_rep = jnp.dot(erep, phase, preferred_element_type=f32)           # (B*S, S*P)
        zp_all = jnp.sin(lmod_ref[...] * k1_rep + ph_rep)                   # (B*S, S*P)
        rows_all = (jnp.dot(zl_ref[...], scl_ref[...], preferred_element_type=f32)
                    + jnp.dot(zg_ref[...], scg_ref[...], preferred_element_type=f32)
                    + jnp.dot(zp_all, scp_ref[...], preferred_element_type=f32))
        s0 = scr[0]
        s0[...] = jnp.zeros(s0.shape, f32)
        for b in range(B):
            s0[b, 1:1 + S, :] = rows_all[b * S:(b + 1) * S, :]

        # ---- 3. deconv stack: row-shifted matmuls vs Toeplitz weights, fused BN ----
        src = s0
        for li in range(n_layers):
            mats, bias_ref, gam_ref, bet_ref, r_ref, rt_ref = layer_refs[li]
            h_in = Hs[li]
            h_out = 2 * h_in
            last = li == n_layers - 1
            dst = out_ref if last else scr[li + 1]
            if not last:
                dst[...] = jnp.zeros(dst.shape, f32)

            bias = bias_ref[...]                                         # (1, lanes)
            lanes = bias.shape[1]
            vs = []
            if not last:
                ssum = jnp.zeros((1, lanes), f32)
                ssq = jnp.zeros((1, lanes), f32)
            for b in range(B):
                for r in range(2):
                    (d1, kh1), (d2, kh2) = _TAPS[r]
                    v = (jnp.dot(src[b, d1:d1 + h_in, :], mats[kh1][...],
                                 preferred_element_type=f32)
                         + jnp.dot(src[b, d2:d2 + h_in, :], mats[kh2][...],
                                   preferred_element_type=f32)
                         + bias)                                         # (h_in, lanes)
                    vs.append(v)
                    if not last:
                        ssum = ssum + jnp.sum(v, axis=0, keepdims=True)
                        ssq = ssq + jnp.sum(v * v, axis=0, keepdims=True)

            if not last:
                # Training-mode BatchNorm2d: batch statistics, biased variance.
                count = float(B * h_out * h_out)
                csum = jnp.dot(ssum, r_ref[...], preferred_element_type=f32)  # (1, Cout)
                csq = jnp.dot(ssq, r_ref[...], preferred_element_type=f32)
                mean = csum / count
                var = csq / count - mean * mean
                scale = gam_ref[...] * jax.lax.rsqrt(var + _BN_EPS)
                shift = bet_ref[...] - mean * scale
                scale_l = jnp.dot(scale, rt_ref[...], preferred_element_type=f32)
                shift_l = jnp.dot(shift, rt_ref[...], preferred_element_type=f32)

            for b in range(B):
                for r in range(2):
                    v = vs[b * 2 + r]
                    if last:
                        y = jnp.tanh(v)
                        base = 0                      # output ref has no row padding
                    else:
                        y = jnp.maximum(v * scale_l + shift_l, 0.0)
                        base = 1                      # next scratch keeps pad rows
                    for p in range(h_in):
                        row = base + 2 * p + r
                        dst[b, row:row + 1, :] = y[p:p + 1, :]
            src = dst

    return kernel


# -------------------------------------------------------------- forward -----
def psgan_generator_forward(packed, z_l, z_g, phi, *, opt):
    """z_l, z_g in NCHW (as in the PyTorch reference); phi: (B, P) uniform(0, 2*pi)."""
    B = z_l.shape[0]
    S = opt.spatial_size
    L, G, P = opt.local_noise_dim, opt.global_noise_dim, opt.periodic_noise_dim
    chans = list(opt.gen_conv_channels)
    n_layers = len(chans)
    Hs = [S * 2 ** i for i in range(n_layers)]
    in_chs = [L + G + P] + chans[:-1]
    H_final = S * 2 ** n_layers
    cout_last = chans[-1]
    out_lanes = _round_up((2 * Hs[-1] + 2) * cout_last, 128)

    # Tiny layout prep (a few hundred floats); the heavy path is fully in-kernel.
    zl2 = jnp.transpose(z_l, (0, 2, 3, 1)).reshape(B * S, S * L)
    zg2 = jnp.transpose(z_g, (0, 2, 3, 1)).reshape(B * S, S * G)
    zg_flat = z_g[:, :, 0, 0]
    # batch-replication matrix and row-index field (compile-time constants)
    erep = jnp.asarray(np.kron(np.eye(B, dtype=np.float32), np.ones((S, 1), np.float32)))
    lmod = jnp.asarray(np.ascontiguousarray(np.broadcast_to(
        np.tile(np.arange(S, dtype=np.float32), B)[:, None], (B * S, S * P))))

    args = [zl2, zg2, zg_flat, phi, erep, lmod,
            packed['wl'], packed['bl'], packed['w1'], packed['b1'],
            packed['w2'], packed['b2'],
            packed['sc_l'], packed['sc_g'], packed['sc_p'],
            packed['pat1'], packed['patm']]
    for li in range(n_layers):
        args += list(packed['conv_mats'][li])
        args += [packed['conv_bias'][li]]
        if li < n_layers - 1:
            args += [packed['bn_g'][li], packed['bn_b'][li],
                     packed['bn_R'][li], packed['bn_RT'][li]]

    kernel = _make_kernel(opt, B)
    out = pl.pallas_call(
        kernel,
        out_shape=jax.ShapeDtypeStruct((B, H_final, out_lanes), jnp.float32),
        in_specs=[VMEM_SPEC] * len(args),
        out_specs=VMEM_SPEC,
        scratch_shapes=[pltpu.VMEM((B, Hs[i] + 2, (Hs[i] + 2) * in_chs[i]), jnp.float32)
                        for i in range(n_layers)],
    )(*args)

    # drop the width-padding / 128-lane padding, back to NCHW
    y = out[:, :, cout_last:cout_last + H_final * cout_last]
    y = y.reshape(B, H_final, H_final, cout_last)
    return jnp.transpose(y, (0, 3, 1, 2))


# --------------------------------------------- pure-JAX reference (validation) ----
def _deconv_patches(x_nhwc, K, stride=2, pad=1):
    B, H, W, C = x_nhwc.shape
    Hd = (H - 1) * stride + 1
    xd = jnp.zeros((B, Hd, Hd, C), x_nhwc.dtype)
    xd = xd.at[:, ::stride, ::stride, :].set(x_nhwc)
    p = K - 1 - pad
    xp = jnp.pad(xd, ((0, 0), (p, p), (p, p), (0, 0)))
    Ho = Hd + 2 * p - K + 1
    cols = []
    for kh in range(K):
        for kw in range(K):
            cols.append(xp[:, kh:kh + Ho, kw:kw + Ho, :])
    patches = jnp.stack(cols, axis=3)
    return patches.reshape(B * Ho * Ho, K * K * C), (B, Ho, Ho)


def _convT_weight_to_matmul(w_t):
    Cin, Cout, K, _ = w_t.shape
    wf = w_t[:, :, ::-1, ::-1]
    wm = jnp.transpose(wf, (2, 3, 0, 1))
    return wm.reshape(K * K * Cin, Cout)


def _reference_forward(raw, z_l, z_g, phi, *, opt):
    S = opt.spatial_size
    zg_flat = z_g[:, :, 0, 0]
    h = jnp.maximum(jnp.dot(zg_flat, raw['wl']) + raw['bl'], 0.0)
    k1 = jnp.dot(h, raw['w1']) + raw['b1']
    k2 = jnp.dot(h, raw['w2']) + raw['b2']
    idx = jnp.arange(S, dtype=jnp.float32)
    zp = jnp.sin(k1[:, :, None, None] * idx[None, None, :, None]
                 + k2[:, :, None, None] * idx[None, None, None, :]
                 + phi[:, :, None, None])
    x = jnp.concatenate([z_l, z_g, zp], axis=1)          # NCHW
    x = jnp.transpose(x, (0, 2, 3, 1))                   # NHWC
    n_layers = len(opt.gen_conv_channels)
    for li in range(n_layers):
        patches, (Bb, Ho, Wo) = _deconv_patches(x, opt.kernel_size)
        wmat = _convT_weight_to_matmul(raw['conv_wt'][li])
        y = jnp.dot(patches, wmat) + raw['conv_b'][li][None, :]
        cout = y.shape[1]
        if li < n_layers - 1:
            mean = jnp.mean(y, axis=0, keepdims=True)
            var = jnp.mean(jnp.square(y - mean), axis=0, keepdims=True)
            y = (y - mean) * jax.lax.rsqrt(var + _BN_EPS)
            y = y * raw['bn_g'][li][None, :] + raw['bn_b'][li][None, :]
            y = jnp.maximum(y, 0.0)
        else:
            y = jnp.tanh(y)
        x = y.reshape(Bb, Ho, Wo, cout)
    return jnp.transpose(x, (0, 3, 1, 2))


# ----------------------------------------------------------------- main -----
if __name__ == "__main__":
    opt = Opt()
    key = jax.random.PRNGKey(0)
    kp, kl, kg, kphi = jax.random.split(key, 4)

    raw = init_params(kp, opt)
    packed = pack_params(raw, opt)

    B = 2
    z_l = jax.random.normal(
        kl, (B, opt.local_noise_dim, opt.spatial_size, opt.spatial_size), jnp.float32)
    z_g_base = jax.random.normal(kg, (B, opt.global_noise_dim, 1, 1), jnp.float32)
    z_g = jnp.tile(z_g_base, (1, 1, opt.spatial_size, opt.spatial_size))
    # TODO(synk): torch.rand() phase drawn inside the PyTorch forward is supplied as an
    # explicit deterministic input here so kernel and reference see the same phi.
    phi = jax.random.uniform(kphi, (B, opt.periodic_noise_dim), jnp.float32) * 2.0 * math.pi

    fwd = jax.jit(functools.partial(psgan_generator_forward, opt=opt))
    out = jax.block_until_ready(fwd(packed, z_l, z_g, phi))

    expected_hw = opt.spatial_size * (2 ** len(opt.gen_conv_channels))
    assert out.shape == (B, opt.gen_conv_channels[-1], expected_hw, expected_hw), out.shape
    assert bool(jnp.all(jnp.isfinite(out)))
    assert bool(jnp.all(jnp.abs(out) <= 1.0 + 1e-6))          # tanh output range

    # numerical validation against the pure-JAX (XLA) reference implementation
    ref = jax.block_until_ready(
        jax.jit(functools.partial(_reference_forward, opt=opt))(raw, z_l, z_g, phi))
    max_err = float(jnp.max(jnp.abs(out - ref)))
    assert max_err < 5e-2, f"mismatch vs reference: max|diff|={max_err}"

    print("KERNEL_OK")
</pallas_src>

<mosaic_0001>
module attributes {stable_mosaic.version = 11 : i64} {
  func.func @kernel(%arg0: memref<8x16xf32, #tpu.memory_space<vmem>>, %arg1: memref<8x32xf32, #tpu.memory_space<vmem>>, %arg2: memref<2x8xf32, #tpu.memory_space<vmem>>, %arg3: memref<2x4xf32, #tpu.memory_space<vmem>>, %arg4: memref<8x2xf32, #tpu.memory_space<vmem>>, %arg5: memref<8x16xf32, #tpu.memory_space<vmem>>, %arg6: memref<8x32xf32, #tpu.memory_space<vmem>>, %arg7: memref<1x32xf32, #tpu.memory_space<vmem>>, %arg8: memref<32x4xf32, #tpu.memory_space<vmem>>, %arg9: memref<1x4xf32, #tpu.memory_space<vmem>>, %arg10: memref<32x4xf32, #tpu.memory_space<vmem>>, %arg11: memref<1x4xf32, #tpu.memory_space<vmem>>, %arg12: memref<16x96xf32, #tpu.memory_space<vmem>>, %arg13: memref<32x96xf32, #tpu.memory_space<vmem>>, %arg14: memref<16x96xf32, #tpu.memory_space<vmem>>, %arg15: memref<4x16xf32, #tpu.memory_space<vmem>>, %arg16: memref<4x16xf32, #tpu.memory_space<vmem>>, %arg17: memref<96x320xf32, #tpu.memory_space<vmem>>, %arg18: memref<96x320xf32, #tpu.memory_space<vmem>>, %arg19: memref<96x320xf32, #tpu.memory_space<vmem>>, %arg20: memref<96x320xf32, #tpu.memory_space<vmem>>, %arg21: memref<1x320xf32, #tpu.memory_space<vmem>>, %arg22: memref<1x32xf32, #tpu.memory_space<vmem>>, %arg23: memref<1x32xf32, #tpu.memory_space<vmem>>, %arg24: memref<320x32xf32, #tpu.memory_space<vmem>>, %arg25: memref<32x320xf32, #tpu.memory_space<vmem>>, %arg26: memref<320x288xf32, #tpu.memory_space<vmem>>, %arg27: memref<320x288xf32, #tpu.memory_space<vmem>>, %arg28: memref<320x288xf32, #tpu.memory_space<vmem>>, %arg29: memref<320x288xf32, #tpu.memory_space<vmem>>, %arg30: memref<1x288xf32, #tpu.memory_space<vmem>>, %arg31: memref<1x16xf32, #tpu.memory_space<vmem>>, %arg32: memref<1x16xf32, #tpu.memory_space<vmem>>, %arg33: memref<288x16xf32, #tpu.memory_space<vmem>>, %arg34: memref<16x288xf32, #tpu.memory_space<vmem>>, %arg35: memref<288x128xf32, #tpu.memory_space<vmem>>, %arg36: memref<288x128xf32, #tpu.memory_space<vmem>>, %arg37: memref<288x128xf32, #tpu.memory_space<vmem>>, %arg38: memref<288x128xf32, #tpu.memory_space<vmem>>, %arg39: memref<1x128xf32, #tpu.memory_space<vmem>>, %arg40: memref<2x32x128xf32, #tpu.memory_space<vmem>>, %arg41: memref<2x6x96xf32, #tpu.memory_space<vmem>>, %arg42: memref<2x10x320xf32, #tpu.memory_space<vmem>>, %arg43: memref<2x18x288xf32, #tpu.memory_space<vmem>>) attributes {dimension_semantics = [], scalar_prefetch = 0 : i64, scratch_operands = 3 : i64, tpu.core_type = #tpu.core_type<tc>} {
    %c0 = arith.constant 0 : index
    %c0_0 = arith.constant 0 : index
    %0 = vector.load %arg2[%c0, %c0_0] : memref<2x8xf32, #tpu.memory_space<vmem>>, vector<2x8xf32>
    %c0_1 = arith.constant 0 : index
    %c0_2 = arith.constant 0 : index
    %1 = vector.load %arg6[%c0_1, %c0_2] : memref<8x32xf32, #tpu.memory_space<vmem>>, vector<8x32xf32>
    %cst = arith.constant dense<0.000000e+00> : vector<2x32xf32>
    %2 = tpu.matmul %0, %1, %cst {dimension_numbers = #tpu.dot_dimension_numbers<[1], [0], [0], [1], [0, 0, 1, 1], [], []>} : vector<2x8xf32>, vector<8x32xf32>, vector<2x32xf32> -> vector<2x32xf32>
    %c0_3 = arith.constant 0 : index
    %c0_4 = arith.constant 0 : index
    %3 = vector.load %arg7[%c0_3, %c0_4] : memref<1x32xf32, #tpu.memory_space<vmem>>, vector<1x32xf32>
    %4 = vector.broadcast %3 : vector<1x32xf32> to vector<2x32xf32>
    %5 = arith.addf %2, %4 : vector<2x32xf32>
    %cst_5 = arith.constant 0.000000e+00 : f32
    %6 = vector.broadcast %cst_5 : f32 to vector<2x32xf32>
    %7 = arith.maximumf %5, %6 : vector<2x32xf32>
    %c0_6 = arith.constant 0 : index
    %c0_7 = arith.constant 0 : index
    %8 = vector.load %arg8[%c0_6, %c0_7] : memref<32x4xf32, #tpu.memory_space<vmem>>, vector<32x4xf32>
    %cst_8 = arith.constant dense<0.000000e+00> : vector<2x4xf32>
    %9 = tpu.matmul %7, %8, %cst_8 {dimension_numbers = #tpu.dot_dimension_numbers<[1], [0], [0], [1], [0, 0, 1, 1], [], []>} : vector<2x32xf32>, vector<32x4xf32>, vector<2x4xf32> -> vector<2x4xf32>
    %c0_9 = arith.constant 0 : index
    %c0_10 = arith.constant 0 : index
    %10 = vector.load %arg9[%c0_9, %c0_10] : memref<1x4xf32, #tpu.memory_space<vmem>>, vector<1x4xf32>
    %11 = vector.broadcast %10 : vector<1x4xf32> to vector<2x4xf32>
    %12 = arith.addf %9, %11 : vector<2x4xf32>
    %c0_11 = arith.constant 0 : index
    %c0_12 = arith.constant 0 : index
    %13 = vector.load %arg10[%c0_11, %c0_12] : memref<32x4xf32, #tpu.memory_space<vmem>>, vector<32x4xf32>
    %cst_13 = arith.constant dense<0.000000e+00> : vector<2x4xf32>
    %14 = tpu.matmul %7, %13, %cst_13 {dimension_numbers = #tpu.dot_dimension_numbers<[1], [0], [0], [1], [0, 0, 1, 1], [], []>} : vector<2x32xf32>, vector<32x4xf32>, vector<2x4xf32> -> vector<2x4xf32>
    %c0_14 = arith.constant 0 : index
    %c0_15 = arith.constant 0 : index
    %15 = vector.load %arg11[%c0_14, %c0_15] : memref<1x4xf32, #tpu.memory_space<vmem>>, vector<1x4xf32>
    %16 = vector.broadcast %15 : vector<1x4xf32> to vector<2x4xf32>
    %17 = arith.addf %14, %16 : vector<2x4xf32>
    %c0_16 = arith.constant 0 : index
    %c0_17 = arith.constant 0 : index
    %18 = vector.load %arg3[%c0_16, %c0_17] : memref<2x4xf32, #tpu.memory_space<vmem>>, vector<2x4xf32>
    %c0_18 = arith.constant 0 : index
    %c0_19 = arith.constant 0 : index
    %19 = vector.load %arg15[%c0_18, %c0_19] : memref<4x16xf32, #tpu.memory_space<vmem>>, vector<4x16xf32>
    %cst_20 = arith.constant dense<0.000000e+00> : vector<2x16xf32>
    %20 = tpu.matmul %12, %19, %cst_20 {dimension_numbers = #tpu.dot_dimension_numbers<[1], [0], [0], [1], [0, 0, 1, 1], [], []>} : vector<2x4xf32>, vector<4x16xf32>, vector<2x16xf32> -> vector<2x16xf32>
    %c0_21 = arith.constant 0 : index
    %c0_22 = arith.constant 0 : index
    %21 = vector.load %arg16[%c0_21, %c0_22] : memref<4x16xf32, #tpu.memory_space<vmem>>, vector<4x16xf32>
    %cst_23 = arith.constant dense<0.000000e+00> : vector<2x16xf32>
    %22 = tpu.matmul %17, %21, %cst_23 {dimension_numbers = #tpu.dot_dimension_numbers<[1], [0], [0], [1], [0, 0, 1, 1], [], []>} : vector<2x4xf32>, vector<4x16xf32>, vector<2x16xf32> -> vector<2x16xf32>
    %c0_24 = arith.constant 0 : index
    %c0_25 = arith.constant 0 : index
    %23 = vector.load %arg15[%c0_24, %c0_25] : memref<4x16xf32, #tpu.memory_space<vmem>>, vector<4x16xf32>
    %cst_26 = arith.constant dense<0.000000e+00> : vector<2x16xf32>
    %24 = tpu.matmul %18, %23, %cst_26 {dimension_numbers = #tpu.dot_dimension_numbers<[1], [0], [0], [1], [0, 0, 1, 1], [], []>} : vector<2x4xf32>, vector<4x16xf32>, vector<2x16xf32> -> vector<2x16xf32>
    %25 = arith.addf %22, %24 : vector<2x16xf32>
    %c0_27 = arith.constant 0 : index
    %c0_28 = arith.constant 0 : index
    %26 = vector.load %arg4[%c0_27, %c0_28] : memref<8x2xf32, #tpu.memory_space<vmem>>, vector<8x2xf32>
    %cst_29 = arith.constant dense<0.000000e+00> : vector<8x16xf32>
    %27 = tpu.matmul %26, %20, %cst_29 {dimension_numbers = #tpu.dot_dimension_numbers<[1], [0], [0], [1], [0, 0, 1, 1], [], []>} : vector<8x2xf32>, vector<2x16xf32>, vector<8x16xf32> -> vector<8x16xf32>
    %cst_30 = arith.constant dense<0.000000e+00> : vector<8x16xf32>
    %28 = tpu.matmul %26, %25, %cst_30 {dimension_numbers = #tpu.dot_dimension_numbers<[1], [0], [0], [1], [0, 0, 1, 1], [], []>} : vector<8x2xf32>, vector<2x16xf32>, vector<8x16xf32> -> vector<8x16xf32>
    %c0_31 = arith.constant 0 : index
    %c0_32 = arith.constant 0 : index
    %29 = vector.load %arg5[%c0_31, %c0_32] : memref<8x16xf32, #tpu.memory_space<vmem>>, vector<8x16xf32>
    %30 = arith.mulf %29, %27 : vector<8x16xf32>
    %31 = arith.addf %30, %28 : vector<8x16xf32>
    %32 = math.sin %31 : vector<8x16xf32>
    %c0_33 = arith.constant 0 : index
    %c0_34 = arith.constant 0 : index
    %33 = vector.load %arg0[%c0_33, %c0_34] : memref<8x16xf32, #tpu.memory_space<vmem>>, vector<8x16xf32>
    %c0_35 = arith.constant 0 : index
    %c0_36 = arith.constant 0 : index
    %34 = vector.load %arg12[%c0_35, %c0_36] : memref<16x96xf32, #tpu.memory_space<vmem>>, vector<16x96xf32>
    %cst_37 = arith.constant dense<0.000000e+00> : vector<8x96xf32>
    %35 = tpu.matmul %33, %34, %cst_37 {dimension_numbers = #tpu.dot_dimension_numbers<[1], [0], [0], [1], [0, 0, 1, 1], [], []>} : vector<8x16xf32>, vector<16x96xf32>, vector<8x96xf32> -> vector<8x96xf32>
    %c0_38 = arith.constant 0 : index
    %c0_39 = arith.constant 0 : index
    %36 = vector.load %arg1[%c0_38, %c0_39] : memref<8x32xf32, #tpu.memory_space<vmem>>, vector<8x32xf32>
    %c0_40 = arith.constant 0 : index
    %c0_41 = arith.constant 0 : index
    %37 = vector.load %arg13[%c0_40, %c0_41] : memref<32x96xf32, #tpu.memory_space<vmem>>, vector<32x96xf32>
    %cst_42 = arith.constant dense<0.000000e+00> : vector<8x96xf32>
    %38 = tpu.matmul %36, %37, %cst_42 {dimension_numbers = #tpu.dot_dimension_numbers<[1], [0], [0], [1], [0, 0, 1, 1], [], []>} : vector<8x32xf32>, vector<32x96xf32>, vector<8x96xf32> -> vector<8x96xf32>
    %39 = arith.addf %35, %38 : vector<8x96xf32>
    %c0_43 = arith.constant 0 : index
    %c0_44 = arith.constant 0 : index
    %40 = vector.load %arg14[%c0_43, %c0_44] : memref<16x96xf32, #tpu.memory_space<vmem>>, vector<16x96xf32>
    %cst_45 = arith.constant dense<0.000000e+00> : vector<8x96xf32>
    %41 = tpu.matmul %32, %40, %cst_45 {dimension_numbers = #tpu.dot_dimension_numbers<[1], [0], [0], [1], [0, 0, 1, 1], [], []>} : vector<8x16xf32>, vector<16x96xf32>, vector<8x96xf32> -> vector<8x96xf32>
    %42 = arith.addf %39, %41 : vector<8x96xf32>
    %cst_46 = arith.constant 0.000000e+00 : f32
    %43 = vector.broadcast %cst_46 : f32 to vector<2x6x96xf32>
    %c0_47 = arith.constant 0 : index
    %c0_48 = arith.constant 0 : index
    %c0_49 = arith.constant 0 : index
    %44 = vector.load %arg41[%c0_47, %c0_48, %c0_49] : memref<2x6x96xf32, #tpu.memory_space<vmem>>, vector<2x6x96xf32>
    tpu.vector_store %arg41[%c0_47, %c0_48, %c0_49], %43 {strides = array<i32>} : memref<2x6x96xf32, #tpu.memory_space<vmem>>, vector<2x6x96xf32>,
    %45 = vector.extract_strided_slice %42 {offsets = [0, 0], sizes = [4, 96], strides = [1, 1]} : vector<8x96xf32> to vector<4x96xf32>
    %c0_50 = arith.constant 0 : index
    %c1 = arith.constant 1 : index
    %c0_51 = arith.constant 0 : index
    %46 = vector.load %arg41[%c0_50, %c1, %c0_51] : memref<2x6x96xf32, #tpu.memory_space<vmem>>, vector<1x4x96xf32>
    %47 = vector.shape_cast %46 : vector<1x4x96xf32> to vector<4x96xf32>
    %48 = vector.shape_cast %45 : vector<4x96xf32> to vector<1x4x96xf32>
    tpu.vector_store %arg41[%c0_50, %c1, %c0_51], %48 {strides = array<i32>} : memref<2x6x96xf32, #tpu.memory_space<vmem>>, vector<1x4x96xf32>,
    %49 = vector.extract_strided_slice %42 {offsets = [4, 0], sizes = [4, 96], strides = [1, 1]} : vector<8x96xf32> to vector<4x96xf32>
    %c1_52 = arith.constant 1 : index
    %c1_53 = arith.constant 1 : index
    %c0_54 = arith.constant 0 : index
    %50 = vector.load %arg41[%c1_52, %c1_53, %c0_54] : memref<2x6x96xf32, #tpu.memory_space<vmem>>, vector<1x4x96xf32>
    %51 = vector.shape_cast %50 : vector<1x4x96xf32> to vector<4x96xf32>
    %52 = vector.shape_cast %49 : vector<4x96xf32> to vector<1x4x96xf32>
    tpu.vector_store %arg41[%c1_52, %c1_53, %c0_54], %52 {strides = array<i32>} : memref<2x6x96xf32, #tpu.memory_space<vmem>>, vector<1x4x96xf32>,
    %cst_55 = arith.constant 0.000000e+00 : f32
    %53 = vector.broadcast %cst_55 : f32 to vector<2x10x320xf32>
    %c0_56 = arith.constant 0 : index
    %c0_57 = arith.constant 0 : index
    %c0_58 = arith.constant 0 : index
    %54 = vector.load %arg42[%c0_56, %c0_57, %c0_58] : memref<2x10x320xf32, #tpu.memory_space<vmem>>, vector<2x10x320xf32>
    tpu.vector_store %arg42[%c0_56, %c0_57, %c0_58], %53 {strides = array<i32>} : memref<2x10x320xf32, #tpu.memory_space<vmem>>, vector<2x10x320xf32>,
    %c0_59 = arith.constant 0 : index
    %c0_60 = arith.constant 0 : index
    %55 = vector.load %arg21[%c0_59, %c0_60] : memref<1x320xf32, #tpu.memory_space<vmem>>, vector<1x320xf32>
    %cst_61 = arith.constant 0.000000e+00 : f32
    %56 = vector.broadcast %cst_61 : f32 to vector<1x320xf32>
    %cst_62 = arith.constant 0.000000e+00 : f32
    %57 = vector.broadcast %cst_62 : f32 to vector<1x320xf32>
    %c0_63 = arith.constant 0 : index
    %c0_64 = arith.constant 0 : index
    %c0_65 = arith.constant 0 : index
    %58 = vector.load %arg41[%c0_63, %c0_64, %c0_65] : memref<2x6x96xf32, #tpu.memory_space<vmem>>, vector<1x4x96xf32>
    %59 = vector.shape_cast %58 : vector<1x4x96xf32> to vector<4x96xf32>
    %c0_66 = arith.constant 0 : index
    %c0_67 = arith.constant 0 : index
    %60 = vector.load %arg20[%c0_66, %c0_67] : memref<96x320xf32, #tpu.memory_space<vmem>>, vector<96x320xf32>
    %cst_68 = arith.constant dense<0.000000e+00> : vector<4x320xf32>
    %61 = tpu.matmul %59, %60, %cst_68 {dimension_numbers = #tpu.dot_dimension_numbers<[1], [0], [0], [1], [0, 0, 1, 1], [], []>} : vector<4x96xf32>, vector<96x320xf32>, vector<4x320xf32> -> vector<4x320xf32>
    %c0_69 = arith.constant 0 : index
    %c1_70 = arith.constant 1 : index
    %c0_71 = arith.constant 0 : index
    %62 = vector.load %arg41[%c0_69, %c1_70, %c0_71] : memref<2x6x96xf32, #tpu.memory_space<vmem>>, vector<1x4x96xf32>
    %63 = vector.shape_cast %62 : vector<1x4x96xf32> to vector<4x96xf32>
    %c0_72 = arith.constant 0 : index
    %c0_73 = arith.constant 0 : index
    %64 = vector.load %arg18[%c0_72, %c0_73] : memref<96x320xf32, #tpu.memory_space<vmem>>, vector<96x320xf32>
    %cst_74 = arith.constant dense<0.000000e+00> : vector<4x320xf32>
    %65 = tpu.matmul %63, %64, %cst_74 {dimension_numbers = #tpu.dot_dimension_numbers<[1], [0], [0], [1], [0, 0, 1, 1], [], []>} : vector<4x96xf32>, vector<96x320xf32>, vector<4x320xf32> -> vector<4x320xf32>
    %66 = arith.addf %61, %65 : vector<4x320xf32>
    %67 = vector.broadcast %55 : vector<1x320xf32> to vector<4x320xf32>
    %68 = arith.addf %66, %67 : vector<4x320xf32>
    %cst_75 = arith.constant dense<0.000000e+00> : vector<320xf32>
    %69 = vector.multi_reduction <add>, %68, %cst_75 [0] : vector<4x320xf32> to vector<320xf32>
    %70 = vector.shape_cast %69 : vector<320xf32> to vector<1x320xf32>
    %71 = arith.addf %56, %70 : vector<1x320xf32>
    %72 = arith.mulf %68, %68 : vector<4x320xf32>
    %cst_76 = arith.constant dense<0.000000e+00> : vector<320xf32>
    %73 = vector.multi_reduction <add>, %72, %cst_76 [0] : vector<4x320xf32> to vector<320xf32>
    %74 = vector.shape_cast %73 : vector<320xf32> to vector<1x320xf32>
    %75 = arith.addf %57, %74 : vector<1x320xf32>
    %c0_77 = arith.constant 0 : index
    %c1_78 = arith.constant 1 : index
    %c0_79 = arith.constant 0 : index
    %76 = vector.load %arg41[%c0_77, %c1_78, %c0_79] : memref<2x6x96xf32, #tpu.memory_space<vmem>>, vector<1x4x96xf32>
    %77 = vector.shape_cast %76 : vector<1x4x96xf32> to vector<4x96xf32>
    %c0_80 = arith.constant 0 : index
    %c0_81 = arith.constant 0 : index
    %78 = vector.load %arg19[%c0_80, %c0_81] : memref<96x320xf32, #tpu.memory_space<vmem>>, vector<96x320xf32>
    %cst_82 = arith.constant dense<0.000000e+00> : vector<4x320xf32>
    %79 = tpu.matmul %77, %78, %cst_82 {dimension_numbers = #tpu.dot_dimension_numbers<[1], [0], [0], [1], [0, 0, 1, 1], [], []>} : vector<4x96xf32>, vector<96x320xf32>, vector<4x320xf32> -> vector<4x320xf32>
    %c0_83 = arith.constant 0 : index
    %c2 = arith.constant 2 : index
    %c0_84 = arith.constant 0 : index
    %80 = vector.load %arg41[%c0_83, %c2, %c0_84] : memref<2x6x96xf32, #tpu.memory_space<vmem>>, vector<1x4x96xf32>
    %81 = vector.shape_cast %80 : vector<1x4x96xf32> to vector<4x96xf32>
    %c0_85 = arith.constant 0 : index
    %c0_86 = arith.constant 0 : index
    %82 = vector.load %arg17[%c0_85, %c0_86] : memref<96x320xf32, #tpu.memory_space<vmem>>, vector<96x320xf32>
    %cst_87 = arith.constant dense<0.000000e+00> : vector<4x320xf32>
    %83 = tpu.matmul %81, %82, %cst_87 {dimension_numbers = #tpu.dot_dimension_numbers<[1], [0], [0], [1], [0, 0, 1, 1], [], []>} : vector<4x96xf32>, vector<96x320xf32>, vector<4x320xf32> -> vector<4x320xf32>
    %84 = arith.addf %79, %83 : vector<4x320xf32>
    %85 = vector.broadcast %55 : vector<1x320xf32> to vector<4x320xf32>
    %86 = arith.addf %84, %85 : vector<4x320xf32>
    %cst_88 = arith.constant dense<0.000000e+00> : vector<320xf32>
    %87 = vector.multi_reduction <add>, %86, %cst_88 [0] : vector<4x320xf32> to vector<320xf32>
    %88 = vector.shape_cast %87 : vector<320xf32> to vector<1x320xf32>
    %89 = arith.addf %71, %88 : vector<1x320xf32>
    %90 = arith.mulf %86, %86 : vector<4x320xf32>
    %cst_89 = arith.constant dense<0.000000e+00> : vector<320xf32>
    %91 = vector.multi_reduction <add>, %90, %cst_89 [0] : vector<4x320xf32> to vector<320xf32>
    %92 = vector.shape_cast %91 : vector<320xf32> to vector<1x320xf32>
    %93 = arith.addf %75, %92 : vector<1x320xf32>
    %c1_90 = arith.constant 1 : index
    %c0_91 = arith.constant 0 : index
    %c0_92 = arith.constant 0 : index
    %94 = vector.load %arg41[%c1_90, %c0_91, %c0_92] : memref<2x6x96xf32, #tpu.memory_space<vmem>>, vector<1x4x96xf32>
    %95 = vector.shape_cast %94 : vector<1x4x96xf32> to vector<4x96xf32>
    %c0_93 = arith.constant 0 : index
    %c0_94 = arith.constant 0 : index
    %96 = vector.load %arg20[%c0_93, %c0_94] : memref<96x320xf32, #tpu.memory_space<vmem>>, vector<96x320xf32>
    %cst_95 = arith.constant dense<0.000000e+00> : vector<4x320xf32>
    %97 = tpu.matmul %95, %96, %cst_95 {dimension_numbers = #tpu.dot_dimension_numbers<[1], [0], [0], [1], [0, 0, 1, 1], [], []>} : vector<4x96xf32>, vector<96x320xf32>, vector<4x320xf32> -> vector<4x320xf32>
    %c1_96 = arith.constant 1 : index
    %c1_97 = arith.constant 1 : index
    %c0_98 = arith.constant 0 : index
    %98 = vector.load %arg41[%c1_96, %c1_97, %c0_98] : memref<2x6x96xf32, #tpu.memory_space<vmem>>, vector<1x4x96xf32>
    %99 = vector.shape_cast %98 : vector<1x4x96xf32> to vector<4x96xf32>
    %c0_99 = arith.constant 0 : index
    %c0_100 = arith.constant 0 : index
    %100 = vector.load %arg18[%c0_99, %c0_100] : memref<96x320xf32, #tpu.memory_space<vmem>>, vector<96x320xf32>
    %cst_101 = arith.constant dense<0.000000e+00> : vector<4x320xf32>
    %101 = tpu.matmul %99, %100, %cst_101 {dimension_numbers = #tpu.dot_dimension_numbers<[1], [0], [0], [1], [0, 0, 1, 1], [], []>} : vector<4x96xf32>, vector<96x320xf32>, vector<4x320xf32> -> vector<4x320xf32>
    %102 = arith.addf %97, %101 : vector<4x320xf32>
    %103 = vector.broadcast %55 : vector<1x320xf32> to vector<4x320xf32>
    %104 = arith.addf %102, %103 : vector<4x320xf32>
    %cst_102 = arith.constant dense<0.000000e+00> : vector<320xf32>
    %105 = vector.multi_reduction <add>, %104, %cst_102 [0] : vector<4x320xf32> to vector<320xf32>
    %106 = vector.shape_cast %105 : vector<320xf32> to vector<1x320xf32>
    %107 = arith.addf %89, %106 : vector<1x320xf32>
    %108 = arith.mulf %104, %104 : vector<4x320xf32>
    %cst_103 = arith.constant dense<0.000000e+00> : vector<320xf32>
    %109 = vector.multi_reduction <add>, %108, %cst_103 [0] : vector<4x320xf32> to vector<320xf32>
    %110 = vector.shape_cast %109 : vector<320xf32> to vector<1x320xf32>
    %111 = arith.addf %93, %110 : vector<1x320xf32>
    %c1_104 = arith.constant 1 : index
    %c1_105 = arith.constant 1 : index
    %c0_106 = arith.constant 0 : index
    %112 = vector.load %arg41[%c1_104, %c1_105, %c0_106] : memref<2x6x96xf32, #tpu.memory_space<vmem>>, vector<1x4x96xf32>
    %113 = vector.shape_cast %112 : vector<1x4x96xf32> to vector<4x96xf32>
    %c0_107 = arith.constant 0 : index
    %c0_108 = arith.constant 0 : index
    %114 = vector.load %arg19[%c0_107, %c0_108] : memref<96x320xf32, #tpu.memory_space<vmem>>, vector<96x320xf32>
    %cst_109 = arith.constant dense<0.000000e+00> : vector<4x320xf32>
    %115 = tpu.matmul %113, %114, %cst_109 {dimension_numbers = #tpu.dot_dimension_numbers<[1], [0], [0], [1], [0, 0, 1, 1], [], []>} : vector<4x96xf32>, vector<96x320xf32>, vector<4x320xf32> -> vector<4x320xf32>
    %c1_110 = arith.constant 1 : index
    %c2_111 = arith.constant 2 : index
    %c0_112 = arith.constant 0 : index
    %116 = vector.load %arg41[%c1_110, %c2_111, %c0_112] : memref<2x6x96xf32, #tpu.memory_space<vmem>>, vector<1x4x96xf32>
    %117 = vector.shape_cast %116 : vector<1x4x96xf32> to vector<4x96xf32>
    %c0_113 = arith.constant 0 : index
    %c0_114 = arith.constant 0 : index
    %118 = vector.load %arg17[%c0_113, %c0_114] : memref<96x320xf32, #tpu.memory_space<vmem>>, vector<96x320xf32>
    %cst_115 = arith.constant dense<0.000000e+00> : vector<4x320xf32>
    %119 = tpu.matmul %117, %118, %cst_115 {dimension_numbers = #tpu.dot_dimension_numbers<[1], [0], [0], [1], [0, 0, 1, 1], [], []>} : vector<4x96xf32>, vector<96x320xf32>, vector<4x320xf32> -> vector<4x320xf32>
    %120 = arith.addf %115, %119 : vector<4x320xf32>
    %121 = vector.broadcast %55 : vector<1x320xf32> to vector<4x320xf32>
    %122 = arith.addf %120, %121 : vector<4x320xf32>
    %cst_116 = arith.constant dense<0.000000e+00> : vector<320xf32>
    %123 = vector.multi_reduction <add>, %122, %cst_116 [0] : vector<4x320xf32> to vector<320xf32>
    %124 = vector.shape_cast %123 : vector<320xf32> to vector<1x320xf32>
    %125 = arith.addf %107, %124 : vector<1x320xf32>
    %126 = arith.mulf %122, %122 : vector<4x320xf32>
    %cst_117 = arith.constant dense<0.000000e+00> : vector<320xf32>
    %127 = vector.multi_reduction <add>, %126, %cst_117 [0] : vector<4x320xf32> to vector<320xf32>
    %128 = vector.shape_cast %127 : vector<320xf32> to vector<1x320xf32>
    %129 = arith.addf %111, %128 : vector<1x320xf32>
    %c0_118 = arith.constant 0 : index
    %c0_119 = arith.constant 0 : index
    %130 = vector.load %arg24[%c0_118, %c0_119] : memref<320x32xf32, #tpu.memory_space<vmem>>, vector<320x32xf32>
    %cst_120 = arith.constant dense<0.000000e+00> : vector<1x32xf32>
    %131 = tpu.matmul %125, %130, %cst_120 {dimension_numbers = #tpu.dot_dimension_numbers<[1], [0], [0], [1], [0, 0, 1, 1], [], []>} : vector<1x320xf32>, vector<320x32xf32>, vector<1x32xf32> -> vector<1x32xf32>
    %c0_121 = arith.constant 0 : index
    %c0_122 = arith.constant 0 : index
    %132 = vector.load %arg24[%c0_121, %c0_122] : memref<320x32xf32, #tpu.memory_space<vmem>>, vector<320x32xf32>
    %cst_123 = arith.constant dense<0.000000e+00> : vector<1x32xf32>
    %133 = tpu.matmul %129, %132, %cst_123 {dimension_numbers = #tpu.dot_dimension_numbers<[1], [0], [0], [1], [0, 0, 1, 1], [], []>} : vector<1x320xf32>, vector<320x32xf32>, vector<1x32xf32> -> vector<1x32xf32>
    %cst_124 = arith.constant 1.280000e+02 : f32
    %134 = vector.broadcast %cst_124 : f32 to vector<1x32xf32>
    %135 = arith.divf %131, %134 : vector<1x32xf32>
    %cst_125 = arith.constant 1.280000e+02 : f32
    %136 = vector.broadcast %cst_125 : f32 to vector<1x32xf32>
    %137 = arith.divf %133, %136 : vector<1x32xf32>
    %138 = arith.mulf %135, %135 : vector<1x32xf32>
    %139 = arith.subf %137, %138 : vector<1x32xf32>
    %c0_126 = arith.constant 0 : index
    %c0_127 = arith.constant 0 : index
    %140 = vector.load %arg22[%c0_126, %c0_127] : memref<1x32xf32, #tpu.memory_space<vmem>>, vector<1x32xf32>
    %cst_128 = arith.constant 9.99999974E-6 : f32
    %141 = vector.broadcast %cst_128 : f32 to vector<1x32xf32>
    %142 = arith.addf %139, %141 : vector<1x32xf32>
    %143 = math.rsqrt %142 : vector<1x32xf32>
    %144 = arith.mulf %140, %143 : vector<1x32xf32>
    %c0_129 = arith.constant 0 : index
    %c0_130 = arith.constant 0 : index
    %145 = vector.load %arg23[%c0_129, %c0_130] : memref<1x32xf32, #tpu.memory_space<vmem>>, vector<1x32xf32>
    %146 = arith.mulf %135, %144 : vector<1x32xf32>
    %147 = arith.subf %145, %146 : vector<1x32xf32>
    %c0_131 = arith.constant 0 : index
    %c0_132 = arith.constant 0 : index
    %148 = vector.load %arg25[%c0_131, %c0_132] : memref<32x320xf32, #tpu.memory_space<vmem>>, vector<32x320xf32>
    %cst_133 = arith.constant dense<0.000000e+00> : vector<1x320xf32>
    %149 = tpu.matmul %144, %148, %cst_133 {dimension_numbers = #tpu.dot_dimension_numbers<[1], [0], [0], [1], [0, 0, 1, 1], [], []>} : vector<1x32xf32>, vector<32x320xf32>, vector<1x320xf32> -> vector<1x320xf32>
    %c0_134 = arith.constant 0 : index
    %c0_135 = arith.constant 0 : index
    %150 = vector.load %arg25[%c0_134, %c0_135] : memref<32x320xf32, #tpu.memory_space<vmem>>, vector<32x320xf32>
    %cst_136 = arith.constant dense<0.000000e+00> : vector<1x320xf32>
    %151 = tpu.matmul %147, %150, %cst_136 {dimension_numbers = #tpu.dot_dimension_numbers<[1], [0], [0], [1], [0, 0, 1, 1], [], []>} : vector<1x32xf32>, vector<32x320xf32>, vector<1x320xf32> -> vector<1x320xf32>
    %152 = vector.broadcast %149 : vector<1x320xf32> to vector<4x320xf32>
    %153 = arith.mulf %68, %152 : vector<4x320xf32>
    %154 = vector.broadcast %151 : vector<1x320xf32> to vector<4x320xf32>
    %155 = arith.addf %153, %154 : vector<4x320xf32>
    %cst_137 = arith.constant 0.000000e+00 : f32
    %156 = vector.broadcast %cst_137 : f32 to vector<4x320xf32>
    %157 = arith.maximumf %155, %156 : vector<4x320xf32>
    %158 = vector.extract_strided_slice %157 {offsets = [0, 0], sizes = [1, 320], strides = [1, 1]} : vector<4x320xf32> to vector<1x320xf32>
    %c0_138 = arith.constant 0 : index
    %c1_139 = arith.constant 1 : index
    %c0_140 = arith.constant 0 : index
    %159 = vector.load %arg42[%c0_138, %c1_139, %c0_140] : memref<2x10x320xf32, #tpu.memory_space<vmem>>, vector<1x1x320xf32>
    %160 = vector.shape_cast %159 : vector<1x1x320xf32> to vector<1x320xf32>
    %161 = vector.shape_cast %158 : vector<1x320xf32> to vector<1x1x320xf32>
    tpu.vector_store %arg42[%c0_138, %c1_139, %c0_140], %161 {strides = array<i32>} : memref<2x10x320xf32, #tpu.memory_space<vmem>>, vector<1x1x320xf32>,
    %162 = vector.extract_strided_slice %157 {offsets = [1, 0], sizes = [1, 320], strides = [1, 1]} : vector<4x320xf32> to vector<1x320xf32>
    %c0_141 = arith.constant 0 : index
    %c3 = arith.constant 3 : index
    %c0_142 = arith.constant 0 : index
    %163 = vector.load %arg42[%c0_141, %c3, %c0_142] : memref<2x10x320xf32, #tpu.memory_space<vmem>>, vector<1x1x320xf32>
    %164 = vector.shape_cast %163 : vector<1x1x320xf32> to vector<1x320xf32>
    %165 = vector.shape_cast %162 : vector<1x320xf32> to vector<1x1x320xf32>
    tpu.vector_store %arg42[%c0_141, %c3, %c0_142], %165 {strides = array<i32>} : memref<2x10x320xf32, #tpu.memory_space<vmem>>, vector<1x1x320xf32>,
    %166 = vector.extract_strided_slice %157 {offsets = [2, 0], sizes = [1, 320], strides = [1, 1]} : vector<4x320xf32> to vector<1x320xf32>
    %c0_143 = arith.constant 0 : index
    %c5 = arith.constant 5 : index
    %c0_144 = arith.constant 0 : index
    %167 = vector.load %arg42[%c0_143, %c5, %c0_144] : memref<2x10x320xf32, #tpu.memory_space<vmem>>, vector<1x1x320xf32>
    %168 = vector.shape_cast %167 : vector<1x1x320xf32> to vector<1x320xf32>
    %169 = vector.shape_cast %166 : vector<1x320xf32> to vector<1x1x320xf32>
    tpu.vector_store %arg42[%c0_143, %c5, %c0_144], %169 {strides = array<i32>} : memref<2x10x320xf32, #tpu.memory_space<vmem>>, vector<1x1x320xf32>,
    %170 = vector.extract_strided_slice %157 {offsets = [3, 0], sizes = [1, 320], strides = [1, 1]} : vector<4x320xf32> to vector<1x320xf32>
    %c0_145 = arith.constant 0 : index
    %c7 = arith.constant 7 : index
    %c0_146 = arith.constant 0 : index
    %171 = vector.load %arg42[%c0_145, %c7, %c0_146] : memref<2x10x320xf32, #tpu.memory_space<vmem>>, vector<1x1x320xf32>
    %172 = vector.shape_cast %171 : vector<1x1x320xf32> to vector<1x320xf32>
    %173 = vector.shape_cast %170 : vector<1x320xf32> to vector<1x1x320xf32>
    tpu.vector_store %arg42[%c0_145, %c7, %c0_146], %173 {strides = array<i32>} : memref<2x10x320xf32, #tpu.memory_space<vmem>>, vector<1x1x320xf32>,
    %174 = vector.broadcast %149 : vector<1x320xf32> to vector<4x320xf32>
    %175 = arith.mulf %86, %174 : vector<4x320xf32>
    %176 = vector.broadcast %151 : vector<1x320xf32> to vector<4x320xf32>
    %177 = arith.addf %175, %176 : vector<4x320xf32>
    %cst_147 = arith.constant 0.000000e+00 : f32
    %178 = vector.broadcast %cst_147 : f32 to vector<4x320xf32>
    %179 = arith.maximumf %177, %178 : vector<4x320xf32>
    %180 = vector.extract_strided_slice %179 {offsets = [0, 0], sizes = [1, 320], strides = [1, 1]} : vector<4x320xf32> to vector<1x320xf32>
    %c0_148 = arith.constant 0 : index
    %c2_149 = arith.constant 2 : index
    %c0_150 = arith.constant 0 : index
    %181 = vector.load %arg42[%c0_148, %c2_149, %c0_150] : memref<2x10x320xf32, #tpu.memory_space<vmem>>, vector<1x1x320xf32>
    %182 = vector.shape_cast %181 : vector<1x1x320xf32> to vector<1x320xf32>
    %183 = vector.shape_cast %180 : vector<1x320xf32> to vector<1x1x320xf32>
    tpu.vector_store %arg42[%c0_148, %c2_149, %c0_150], %183 {strides = array<i32>} : memref<2x10x320xf32, #tpu.memory_space<vmem>>, vector<1x1x320xf32>,
    %184 = vector.extract_strided_slice %179 {offsets = [1, 0], sizes = [1, 320], strides = [1, 1]} : vector<4x320xf32> to vector<1x320xf32>
    %c0_151 = arith.constant 0 : index
    %c4 = arith.constant 4 : index
    %c0_152 = arith.constant 0 : index
    %185 = vector.load %arg42[%c0_151, %c4, %c0_152] : memref<2x10x320xf32, #tpu.memory_space<vmem>>, vector<1x1x320xf32>
    %186 = vector.shape_cast %185 : vector<1x1x320xf32> to vector<1x320xf32>
    %187 = vector.shape_cast %184 : vector<1x320xf32> to vector<1x1x320xf32>
    tpu.vector_store %arg42[%c0_151, %c4, %c0_152], %187 {strides = array<i32>} : memref<2x10x320xf32, #tpu.memory_space<vmem>>, vector<1x1x320xf32>,
    %188 = vector.extract_strided_slice %179 {offsets = [2, 0], sizes = [1, 320], strides = [1, 1]} : vector<4x320xf32> to vector<1x320xf32>
    %c0_153 = arith.constant 0 : index
    %c6 = arith.constant 6 : index
    %c0_154 = arith.constant 0 : index
    %189 = vector.load %arg42[%c0_153, %c6, %c0_154] : memref<2x10x320xf32, #tpu.memory_space<vmem>>, vector<1x1x320xf32>
    %190 = vector.shape_cast %189 : vector<1x1x320xf32> to vector<1x320xf32>
    %191 = vector.shape_cast %188 : vector<1x320xf32> to vector<1x1x320xf32>
    tpu.vector_store %arg42[%c0_153, %c6, %c0_154], %191 {strides = array<i32>} : memref<2x10x320xf32, #tpu.memory_space<vmem>>, vector<1x1x320xf32>,
    %192 = vector.extract_strided_slice %179 {offsets = [3, 0], sizes = [1, 320], strides = [1, 1]} : vector<4x320xf32> to vector<1x320xf32>
    %c0_155 = arith.constant 0 : index
    %c8 = arith.constant 8 : index
    %c0_156 = arith.constant 0 : index
    %193 = vector.load %arg42[%c0_155, %c8, %c0_156] : memref<2x10x320xf32, #tpu.memory_space<vmem>>, vector<1x1x320xf32>
    %194 = vector.shape_cast %193 : vector<1x1x320xf32> to vector<1x320xf32>
    %195 = vector.shape_cast %192 : vector<1x320xf32> to vector<1x1x320xf32>
    tpu.vector_store %arg42[%c0_155, %c8, %c0_156], %195 {strides = array<i32>} : memref<2x10x320xf32, #tpu.memory_space<vmem>>, vector<1x1x320xf32>,
    %196 = vector.broadcast %149 : vector<1x320xf32> to vector<4x320xf32>
    %197 = arith.mulf %104, %196 : vector<4x320xf32>
    %198 = vector.broadcast %151 : vector<1x320xf32> to vector<4x320xf32>
    %199 = arith.addf %197, %198 : vector<4x320xf32>
    %cst_157 = arith.constant 0.000000e+00 : f32
    %200 = vector.broadcast %cst_157 : f32 to vector<4x320xf32>
    %201 = arith.maximumf %199, %200 : vector<4x320xf32>
    %202 = vector.extract_strided_slice %201 {offsets = [0, 0], sizes = [1, 320], strides = [1, 1]} : vector<4x320xf32> to vector<1x320xf32>
    %c1_158 = arith.constant 1 : index
    %c1_159 = arith.constant 1 : index
    %c0_160 = arith.constant 0 : index
    %203 = vector.load %arg42[%c1_158, %c1_159, %c0_160] : memref<2x10x320xf32, #tpu.memory_space<vmem>>, vector<1x1x320xf32>
    %204 = vector.shape_cast %203 : vector<1x1x320xf32> to vector<1x320xf32>
    %205 = vector.shape_cast %202 : vector<1x320xf32> to vector<1x1x320xf32>
    tpu.vector_store %arg42[%c1_158, %c1_159, %c0_160], %205 {strides = array<i32>} : memref<2x10x320xf32, #tpu.memory_space<vmem>>, vector<1x1x320xf32>,
    %206 = vector.extract_strided_slice %201 {offsets = [1, 0], sizes = [1, 320], strides = [1, 1]} : vector<4x320xf32> to vector<1x320xf32>
    %c1_161 = arith.constant 1 : index
    %c3_162 = arith.constant 3 : index
    %c0_163 = arith.constant 0 : index
    %207 = vector.load %arg42[%c1_161, %c3_162, %c0_163] : memref<2x10x320xf32, #tpu.memory_space<vmem>>, vector<1x1x320xf32>
    %208 = vector.shape_cast %207 : vector<1x1x320xf32> to vector<1x320xf32>
    %209 = vector.shape_cast %206 : vector<1x320xf32> to vector<1x1x320xf32>
    tpu.vector_store %arg42[%c1_161, %c3_162, %c0_163], %209 {strides = array<i32>} : memref<2x10x320xf32, #tpu.memory_space<vmem>>, vector<1x1x320xf32>,
    %210 = vector.extract_strided_slice %201 {offsets = [2, 0], sizes = [1, 320], strides = [1, 1]} : vector<4x320xf32> to vector<1x320xf32>
    %c1_164 = arith.constant 1 : index
    %c5_165 = arith.constant 5 : index
    %c0_166 = arith.constant 0 : index
    %211 = vector.load %arg42[%c1_164, %c5_165, %c0_166] : memref<2x10x320xf32, #tpu.memory_space<vmem>>, vector<1x1x320xf32>
    %212 = vector.shape_cast %211 : vector<1x1x320xf32> to vector<1x320xf32>
    %213 = vector.shape_cast %210 : vector<1x320xf32> to vector<1x1x320xf32>
    tpu.vector_store %arg42[%c1_164, %c5_165, %c0_166], %213 {strides = array<i32>} : memref<2x10x320xf32, #tpu.memory_space<vmem>>, vector<1x1x320xf32>,
    %214 = vector.extract_strided_slice %201 {offsets = [3, 0], sizes = [1, 320], strides = [1, 1]} : vector<4x320xf32> to vector<1x320xf32>
    %c1_167 = arith.constant 1 : index
    %c7_168 = arith.constant 7 : index
    %c0_169 = arith.constant 0 : index
    %215 = vector.load %arg42[%c1_167, %c7_168, %c0_169] : memref<2x10x320xf32, #tpu.memory_space<vmem>>, vector<1x1x320xf32>
    %216 = vector.shape_cast %215 : vector<1x1x320xf32> to vector<1x320xf32>
    %217 = vector.shape_cast %214 : vector<1x320xf32> to vector<1x1x320xf32>
    tpu.vector_store %arg42[%c1_167, %c7_168, %c0_169], %217 {strides = array<i32>} : memref<2x10x320xf32, #tpu.memory_space<vmem>>, vector<1x1x320xf32>,
    %218 = vector.broadcast %149 : vector<1x320xf32> to vector<4x320xf32>
    %219 = arith.mulf %122, %218 : vector<4x320xf32>
    %220 = vector.broadcast %151 : vector<1x320xf32> to vector<4x320xf32>
    %221 = arith.addf %219, %220 : vector<4x320xf32>
    %cst_170 = arith.constant 0.000000e+00 : f32
    %222 = vector.broadcast %cst_170 : f32 to vector<4x320xf32>
    %223 = arith.maximumf %221, %222 : vector<4x320xf32>
    %224 = vector.extract_strided_slice %223 {offsets = [0, 0], sizes = [1, 320], strides = [1, 1]} : vector<4x320xf32> to vector<1x320xf32>
    %c1_171 = arith.constant 1 : index
    %c2_172 = arith.constant 2 : index
    %c0_173 = arith.constant 0 : index
    %225 = vector.load %arg42[%c1_171, %c2_172, %c0_173] : memref<2x10x320xf32, #tpu.memory_space<vmem>>, vector<1x1x320xf32>
    %226 = vector.shape_cast %225 : vector<1x1x320xf32> to vector<1x320xf32>
    %227 = vector.shape_cast %224 : vector<1x320xf32> to vector<1x1x320xf32>
    tpu.vector_store %arg42[%c1_171, %c2_172, %c0_173], %227 {strides = array<i32>} : memref<2x10x320xf32, #tpu.memory_space<vmem>>, vector<1x1x320xf32>,
    %228 = vector.extract_strided_slice %223 {offsets = [1, 0], sizes = [1, 320], strides = [1, 1]} : vector<4x320xf32> to vector<1x320xf32>
    %c1_174 = arith.constant 1 : index
    %c4_175 = arith.constant 4 : index
    %c0_176 = arith.constant 0 : index
    %229 = vector.load %arg42[%c1_174, %c4_175, %c0_176] : memref<2x10x320xf32, #tpu.memory_space<vmem>>, vector<1x1x320xf32>
    %230 = vector.shape_cast %229 : vector<1x1x320xf32> to vector<1x320xf32>
    %231 = vector.shape_cast %228 : vector<1x320xf32> to vector<1x1x320xf32>
    tpu.vector_store %arg42[%c1_174, %c4_175, %c0_176], %231 {strides = array<i32>} : memref<2x10x320xf32, #tpu.memory_space<vmem>>, vector<1x1x320xf32>,
    %232 = vector.extract_strided_slice %223 {offsets = [2, 0], sizes = [1, 320], strides = [1, 1]} : vector<4x320xf32> to vector<1x320xf32>
    %c1_177 = arith.constant 1 : index
    %c6_178 = arith.constant 6 : index
    %c0_179 = arith.constant 0 : index
    %233 = vector.load %arg42[%c1_177, %c6_178, %c0_179] : memref<2x10x320xf32, #tpu.memory_space<vmem>>, vector<1x1x320xf32>
    %234 = vector.shape_cast %233 : vector<1x1x320xf32> to vector<1x320xf32>
    %235 = vector.shape_cast %232 : vector<1x320xf32> to vector<1x1x320xf32>
    tpu.vector_store %arg42[%c1_177, %c6_178, %c0_179], %235 {strides = array<i32>} : memref<2x10x320xf32, #tpu.memory_space<vmem>>, vector<1x1x320xf32>,
    %236 = vector.extract_strided_slice %223 {offsets = [3, 0], sizes = [1, 320], strides = [1, 1]} : vector<4x320xf32> to vector<1x320xf32>
    %c1_180 = arith.constant 1 : index
    %c8_181 = arith.constant 8 : index
    %c0_182 = arith.constant 0 : index
    %237 = vector.load %arg42[%c1_180, %c8_181, %c0_182] : memref<2x10x320xf32, #tpu.memory_space<vmem>>, vector<1x1x320xf32>
    %238 = vector.shape_cast %237 : vector<1x1x320xf32> to vector<1x320xf32>
    %239 = vector.shape_cast %236 : vector<1x320xf32> to vector<1x1x320xf32>
    tpu.vector_store %arg42[%c1_180, %c8_181, %c0_182], %239 {strides = array<i32>} : memref<2x10x320xf32, #tpu.memory_space<vmem>>, vector<1x1x320xf32>,
    %cst_183 = arith.constant 0.000000e+00 : f32
    %240 = vector.broadcast %cst_183 : f32 to vector<2x18x288xf32>
    %c0_184 = arith.constant 0 : index
    %c0_185 = arith.constant 0 : index
    %c0_186 = arith.constant 0 : index
    %241 = vector.load %arg43[%c0_184, %c0_185, %c0_186] : memref<2x18x288xf32, #tpu.memory_space<vmem>>, vector<2x18x288xf32>
    tpu.vector_store %arg43[%c0_184, %c0_185, %c0_186], %240 {strides = array<i32>} : memref<2x18x288xf32, #tpu.memory_space<vmem>>, vector<2x18x288xf32>,
    %c0_187 = arith.constant 0 : index
    %c0_188 = arith.constant 0 : index
    %242 = vector.load %arg30[%c0_187, %c0_188] : memref<1x288xf32, #tpu.memory_space<vmem>>, vector<1x288xf32>
    %cst_189 = arith.constant 0.000000e+00 : f32
    %243 = vector.broadcast %cst_189 : f32 to vector<1x288xf32>
    %cst_190 = arith.constant 0.000000e+00 : f32
    %244 = vector.broadcast %cst_190 : f32 to vector<1x288xf32>
    %c0_191 = arith.constant 0 : index
    %c0_192 = arith.constant 0 : index
    %c0_193 = arith.constant 0 : index
    %245 = vector.load %arg42[%c0_191, %c0_192, %c0_193] : memref<2x10x320xf32, #tpu.memory_space<vmem>>, vector<1x8x320xf32>
    %246 = vector.shape_cast %245 : vector<1x8x320xf32> to vector<8x320xf32>
    %c0_194 = arith.constant 0 : index
    %c0_195 = arith.constant 0 : index
    %247 = vector.load %arg29[%c0_194, %c0_195] : memref<320x288xf32, #tpu.memory_space<vmem>>, vector<320x288xf32>
    %cst_196 = arith.constant dense<0.000000e+00> : vector<8x288xf32>
    %248 = tpu.matmul %246, %247, %cst_196 {dimension_numbers = #tpu.dot_dimension_numbers<[1], [0], [0], [1], [0, 0, 1, 1], [], []>} : vector<8x320xf32>, vector<320x288xf32>, vector<8x288xf32> -> vector<8x288xf32>
    %c0_197 = arith.constant 0 : index
    %c1_198 = arith.constant 1 : index
    %c0_199 = arith.constant 0 : index
    %249 = vector.load %arg42[%c0_197, %c1_198, %c0_199] : memref<2x10x320xf32, #tpu.memory_space<vmem>>, vector<1x8x320xf32>
    %250 = vector.shape_cast %249 : vector<1x8x320xf32> to vector<8x320xf32>
    %c0_200 = arith.constant 0 : index
    %c0_201 = arith.constant 0 : index
    %251 = vector.load %arg27[%c0_200, %c0_201] : memref<320x288xf32, #tpu.memory_space<vmem>>, vector<320x288xf32>
    %cst_202 = arith.constant dense<0.000000e+00> : vector<8x288xf32>
    %252 = tpu.matmul %250, %251, %cst_202 {dimension_numbers = #tpu.dot_dimension_numbers<[1], [0], [0], [1], [0, 0, 1, 1], [], []>} : vector<8x320xf32>, vector<320x288xf32>, vector<8x288xf32> -> vector<8x288xf32>
    %253 = arith.addf %248, %252 : vector<8x288xf32>
    %254 = vector.broadcast %242 : vector<1x288xf32> to vector<8x288xf32>
    %255 = arith.addf %253, %254 : vector<8x288xf32>
    %cst_203 = arith.constant dense<0.000000e+00> : vector<288xf32>
    %256 = vector.multi_reduction <add>, %255, %cst_203 [0] : vector<8x288xf32> to vector<288xf32>
    %257 = vector.shape_cast %256 : vector<288xf32> to vector<1x288xf32>
    %258 = arith.addf %243, %257 : vector<1x288xf32>
    %259 = arith.mulf %255, %255 : vector<8x288xf32>
    %cst_204 = arith.constant dense<0.000000e+00> : vector<288xf32>
    %260 = vector.multi_reduction <add>, %259, %cst_204 [0] : vector<8x288xf32> to vector<288xf32>
    %261 = vector.shape_cast %260 : vector<288xf32> to vector<1x288xf32>
    %262 = arith.addf %244, %261 : vector<1x288xf32>
    %c0_205 = arith.constant 0 : index
    %c1_206 = arith.constant 1 : index
    %c0_207 = arith.constant 0 : index
    %263 = vector.load %arg42[%c0_205, %c1_206, %c0_207] : memref<2x10x320xf32, #tpu.memory_space<vmem>>, vector<1x8x320xf32>
    %264 = vector.shape_cast %263 : vector<1x8x320xf32> to vector<8x320xf32>
    %c0_208 = arith.constant 0 : index
    %c0_209 = arith.constant 0 : index
    %265 = vector.load %arg28[%c0_208, %c0_209] : memref<320x288xf32, #tpu.memory_space<vmem>>, vector<320x288xf32>
    %cst_210 = arith.constant dense<0.000000e+00> : vector<8x288xf32>
    %266 = tpu.matmul %264, %265, %cst_210 {dimension_numbers = #tpu.dot_dimension_numbers<[1], [0], [0], [1], [0, 0, 1, 1], [], []>} : vector<8x320xf32>, vector<320x288xf32>, vector<8x288xf32> -> vector<8x288xf32>
    %c0_211 = arith.constant 0 : index
    %c2_212 = arith.constant 2 : index
    %c0_213 = arith.constant 0 : index
    %267 = vector.load %arg42[%c0_211, %c2_212, %c0_213] : memref<2x10x320xf32, #tpu.memory_space<vmem>>, vector<1x8x320xf32>
    %268 = vector.shape_cast %267 : vector<1x8x320xf32> to vector<8x320xf32>
    %c0_214 = arith.constant 0 : index
    %c0_215 = arith.constant 0 : index
    %269 = vector.load %arg26[%c0_214, %c0_215] : memref<320x288xf32, #tpu.memory_space<vmem>>, vector<320x288xf32>
    %cst_216 = arith.constant dense<0.000000e+00> : vector<8x288xf32>
    %270 = tpu.matmul %268, %269, %cst_216 {dimension_numbers = #tpu.dot_dimension_numbers<[1], [0], [0], [1], [0, 0, 1, 1], [], []>} : vector<8x320xf32>, vector<320x288xf32>, vector<8x288xf32> -> vector<8x288xf32>
    %271 = arith.addf %266, %270 : vector<8x288xf32>
    %272 = vector.broadcast %242 : vector<1x288xf32> to vector<8x288xf32>
    %273 = arith.addf %271, %272 : vector<8x288xf32>
    %cst_217 = arith.constant dense<0.000000e+00> : vector<288xf32>
    %274 = vector.multi_reduction <add>, %273, %cst_217 [0] : vector<8x288xf32> to vector<288xf32>
    %275 = vector.shape_cast %274 : vector<288xf32> to vector<1x288xf32>
    %276 = arith.addf %258, %275 : vector<1x288xf32>
    %277 = arith.mulf %273, %273 : vector<8x288xf32>
    %cst_218 = arith.constant dense<0.000000e+00> : vector<288xf32>
    %278 = vector.multi_reduction <add>, %277, %cst_218 [0] : vector<8x288xf32> to vector<288xf32>
    %279 = vector.shape_cast %278 : vector<288xf32> to vector<1x288xf32>
    %280 = arith.addf %262, %279 : vector<1x288xf32>
    %c1_219 = arith.constant 1 : index
    %c0_220 = arith.constant 0 : index
    %c0_221 = arith.constant 0 : index
    %281 = vector.load %arg42[%c1_219, %c0_220, %c0_221] : memref<2x10x320xf32, #tpu.memory_space<vmem>>, vector<1x8x320xf32>
    %282 = vector.shape_cast %281 : vector<1x8x320xf32> to vector<8x320xf32>
    %c0_222 = arith.constant 0 : index
    %c0_223 = arith.constant 0 : index
    %283 = vector.load %arg29[%c0_222, %c0_223] : memref<320x288xf32, #tpu.memory_space<vmem>>, vector<320x288xf32>
    %cst_224 = arith.constant dense<0.000000e+00> : vector<8x288xf32>
    %284 = tpu.matmul %282, %283, %cst_224 {dimension_numbers = #tpu.dot_dimension_numbers<[1], [0], [0], [1], [0, 0, 1, 1], [], []>} : vector<8x320xf32>, vector<320x288xf32>, vector<8x288xf32> -> vector<8x288xf32>
    %c1_225 = arith.constant 1 : index
    %c1_226 = arith.constant 1 : index
    %c0_227 = arith.constant 0 : index
    %285 = vector.load %arg42[%c1_225, %c1_226, %c0_227] : memref<2x10x320xf32, #tpu.memory_space<vmem>>, vector<1x8x320xf32>
    %286 = vector.shape_cast %285 : vector<1x8x320xf32> to vector<8x320xf32>
    %c0_228 = arith.constant 0 : index
    %c0_229 = arith.constant 0 : index
    %287 = vector.load %arg27[%c0_228, %c0_229] : memref<320x288xf32, #tpu.memory_space<vmem>>, vector<320x288xf32>
    %cst_230 = arith.constant dense<0.000000e+00> : vector<8x288xf32>
    %288 = tpu.matmul %286, %287, %cst_230 {dimension_numbers = #tpu.dot_dimension_numbers<[1], [0], [0], [1], [0, 0, 1, 1], [], []>} : vector<8x320xf32>, vector<320x288xf32>, vector<8x288xf32> -> vector<8x288xf32>
    %289 = arith.addf %284, %288 : vector<8x288xf32>
    %290 = vector.broadcast %242 : vector<1x288xf32> to vector<8x288xf32>
    %291 = arith.addf %289, %290 : vector<8x288xf32>
    %cst_231 = arith.constant dense<0.000000e+00> : vector<288xf32>
    %292 = vector.multi_reduction <add>, %291, %cst_231 [0] : vector<8x288xf32> to vector<288xf32>
    %293 = vector.shape_cast %292 : vector<288xf32> to vector<1x288xf32>
    %294 = arith.addf %276, %293 : vector<1x288xf32>
    %295 = arith.mulf %291, %291 : vector<8x288xf32>
    %cst_232 = arith.constant dense<0.000000e+00> : vector<288xf32>
    %296 = vector.multi_reduction <add>, %295, %cst_232 [0] : vector<8x288xf32> to vector<288xf32>
    %297 = vector.shape_cast %296 : vector<288xf32> to vector<1x288xf32>
    %298 = arith.addf %280, %297 : vector<1x288xf32>
    %c1_233 = arith.constant 1 : index
    %c1_234 = arith.constant 1 : index
    %c0_235 = arith.constant 0 : index
    %299 = vector.load %arg42[%c1_233, %c1_234, %c0_235] : memref<2x10x320xf32, #tpu.memory_space<vmem>>, vector<1x8x320xf32>
    %300 = vector.shape_cast %299 : vector<1x8x320xf32> to vector<8x320xf32>
    %c0_236 = arith.constant 0 : index
    %c0_237 = arith.constant 0 : index
    %301 = vector.load %arg28[%c0_236, %c0_237] : memref<320x288xf32, #tpu.memory_space<vmem>>, vector<320x288xf32>
    %cst_238 = arith.constant dense<0.000000e+00> : vector<8x288xf32>
    %302 = tpu.matmul %300, %301, %cst_238 {dimension_numbers = #tpu.dot_dimension_numbers<[1], [0], [0], [1], [0, 0, 1, 1], [], []>} : vector<8x320xf32>, vector<320x288xf32>, vector<8x288xf32> -> vector<8x288xf32>
    %c1_239 = arith.constant 1 : index
    %c2_240 = arith.constant 2 : index
    %c0_241 = arith.constant 0 : index
    %303 = vector.load %arg42[%c1_239, %c2_240, %c0_241] : memref<2x10x320xf32, #tpu.memory_space<vmem>>, vector<1x8x320xf32>
    %304 = vector.shape_cast %303 : vector<1x8x320xf32> to vector<8x320xf32>
    %c0_242 = arith.constant 0 : index
    %c0_243 = arith.constant 0 : index
    %305 = vector.load %arg26[%c0_242, %c0_243] : memref<320x288xf32, #tpu.memory_space<vmem>>, vector<320x288xf32>
    %cst_244 = arith.constant dense<0.000000e+00> : vector<8x288xf32>
    %306 = tpu.matmul %304, %305, %cst_244 {dimension_numbers = #tpu.dot_dimension_numbers<[1], [0], [0], [1], [0, 0, 1, 1], [], []>} : vector<8x320xf32>, vector<320x288xf32>, vector<8x288xf32> -> vector<8x288xf32>
    %307 = arith.addf %302, %306 : vector<8x288xf32>
    %308 = vector.broadcast %242 : vector<1x288xf32> to vector<8x288xf32>
    %309 = arith.addf %307, %308 : vector<8x288xf32>
    %cst_245 = arith.constant dense<0.000000e+00> : vector<288xf32>
    %310 = vector.multi_reduction <add>, %309, %cst_245 [0] : vector<8x288xf32> to vector<288xf32>
    %311 = vector.shape_cast %310 : vector<288xf32> to vector<1x288xf32>
    %312 = arith.addf %294, %311 : vector<1x288xf32>
    %313 = arith.mulf %309, %309 : vector<8x288xf32>
    %cst_246 = arith.constant dense<0.000000e+00> : vector<288xf32>
    %314 = vector.multi_reduction <add>, %313, %cst_246 [0] : vector<8x288xf32> to vector<288xf32>
    %315 = vector.shape_cast %314 : vector<288xf32> to vector<1x288xf32>
    %316 = arith.addf %298, %315 : vector<1x288xf32>
    %c0_247 = arith.constant 0 : index
    %c0_248 = arith.constant 0 : index
    %317 = vector.load %arg33[%c0_247, %c0_248] : memref<288x16xf32, #tpu.memory_space<vmem>>, vector<288x16xf32>
    %cst_249 = arith.constant dense<0.000000e+00> : vector<1x16xf32>
    %318 = tpu.matmul %312, %317, %cst_249 {dimension_numbers = #tpu.dot_dimension_numbers<[1], [0], [0], [1], [0, 0, 1, 1], [], []>} : vector<1x288xf32>, vector<288x16xf32>, vector<1x16xf32> -> vector<1x16xf32>
    %c0_250 = arith.constant 0 : index
    %c0_251 = arith.constant 0 : index
    %319 = vector.load %arg33[%c0_250, %c0_251] : memref<288x16xf32, #tpu.memory_space<vmem>>, vector<288x16xf32>
    %cst_252 = arith.constant dense<0.000000e+00> : vector<1x16xf32>
    %320 = tpu.matmul %316, %319, %cst_252 {dimension_numbers = #tpu.dot_dimension_numbers<[1], [0], [0], [1], [0, 0, 1, 1], [], []>} : vector<1x288xf32>, vector<288x16xf32>, vector<1x16xf32> -> vector<1x16xf32>
    %cst_253 = arith.constant 5.120000e+02 : f32
    %321 = vector.broadcast %cst_253 : f32 to vector<1x16xf32>
    %322 = arith.divf %318, %321 : vector<1x16xf32>
    %cst_254 = arith.constant 5.120000e+02 : f32
    %323 = vector.broadcast %cst_254 : f32 to vector<1x16xf32>
    %324 = arith.divf %320, %323 : vector<1x16xf32>
    %325 = arith.mulf %322, %322 : vector<1x16xf32>
    %326 = arith.subf %324, %325 : vector<1x16xf32>
    %c0_255 = arith.constant 0 : index
    %c0_256 = arith.constant 0 : index
    %327 = vector.load %arg31[%c0_255, %c0_256] : memref<1x16xf32, #tpu.memory_space<vmem>>, vector<1x16xf32>
    %cst_257 = arith.constant 9.99999974E-6 : f32
    %328 = vector.broadcast %cst_257 : f32 to vector<1x16xf32>
    %329 = arith.addf %326, %328 : vector<1x16xf32>
    %330 = math.rsqrt %329 : vector<1x16xf32>
    %331 = arith.mulf %327, %330 : vector<1x16xf32>
    %c0_258 = arith.constant 0 : index
    %c0_259 = arith.constant 0 : index
    %332 = vector.load %arg32[%c0_258, %c0_259] : memref<1x16xf32, #tpu.memory_space<vmem>>, vector<1x16xf32>
    %333 = arith.mulf %322, %331 : vector<1x16xf32>
    %334 = arith.subf %332, %333 : vector<1x16xf32>
    %c0_260 = arith.constant 0 : index
    %c0_261 = arith.constant 0 : index
    %335 = vector.load %arg34[%c0_260, %c0_261] : memref<16x288xf32, #tpu.memory_space<vmem>>, vector<16x288xf32>
    %cst_262 = arith.constant dense<0.000000e+00> : vector<1x288xf32>
    %336 = tpu.matmul %331, %335, %cst_262 {dimension_numbers = #tpu.dot_dimension_numbers<[1], [0], [0], [1], [0, 0, 1, 1], [], []>} : vector<1x16xf32>, vector<16x288xf32>, vector<1x288xf32> -> vector<1x288xf32>
    %c0_263 = arith.constant 0 : index
    %c0_264 = arith.constant 0 : index
    %337 = vector.load %arg34[%c0_263, %c0_264] : memref<16x288xf32, #tpu.memory_space<vmem>>, vector<16x288xf32>
    %cst_265 = arith.constant dense<0.000000e+00> : vector<1x288xf32>
    %338 = tpu.matmul %334, %337, %cst_265 {dimension_numbers = #tpu.dot_dimension_numbers<[1], [0], [0], [1], [0, 0, 1, 1], [], []>} : vector<1x16xf32>, vector<16x288xf32>, vector<1x288xf32> -> vector<1x288xf32>
    %339 = vector.broadcast %336 : vector<1x288xf32> to vector<8x288xf32>
    %340 = arith.mulf %255, %339 : vector<8x288xf32>
    %341 = vector.broadcast %338 : vector<1x288xf32> to vector<8x288xf32>
    %342 = arith.addf %340, %341 : vector<8x288xf32>
    %cst_266 = arith.constant 0.000000e+00 : f32
    %343 = vector.broadcast %cst_266 : f32 to vector<8x288xf32>
    %344 = arith.maximumf %342, %343 : vector<8x288xf32>
    %345 = vector.extract_strided_slice %344 {offsets = [0, 0], sizes = [1, 288], strides = [1, 1]} : vector<8x288xf32> to vector<1x288xf32>
    %c0_267 = arith.constant 0 : index
    %c1_268 = arith.constant 1 : index
    %c0_269 = arith.constant 0 : index
    %346 = vector.load %arg43[%c0_267, %c1_268, %c0_269] : memref<2x18x288xf32, #tpu.memory_space<vmem>>, vector<1x1x288xf32>
    %347 = vector.shape_cast %346 : vector<1x1x288xf32> to vector<1x288xf32>
    %348 = vector.shape_cast %345 : vector<1x288xf32> to vector<1x1x288xf32>
    tpu.vector_store %arg43[%c0_267, %c1_268, %c0_269], %348 {strides = array<i32>} : memref<2x18x288xf32, #tpu.memory_space<vmem>>, vector<1x1x288xf32>,
    %349 = vector.extract_strided_slice %344 {offsets = [1, 0], sizes = [1, 288], strides = [1, 1]} : vector<8x288xf32> to vector<1x288xf32>
    %c0_270 = arith.constant 0 : index
    %c3_271 = arith.constant 3 : index
    %c0_272 = arith.constant 0 : index
    %350 = vector.load %arg43[%c0_270, %c3_271, %c0_272] : memref<2x18x288xf32, #tpu.memory_space<vmem>>, vector<1x1x288xf32>
    %351 = vector.shape_cast %350 : vector<1x1x288xf32> to vector<1x288xf32>
    %352 = vector.shape_cast %349 : vector<1x288xf32> to vector<1x1x288xf32>
    tpu.vector_store %arg43[%c0_270, %c3_271, %c0_272], %352 {strides = array<i32>} : memref<2x18x288xf32, #tpu.memory_space<vmem>>, vector<1x1x288xf32>,
    %353 = vector.extract_strided_slice %344 {offsets = [2, 0], sizes = [1, 288], strides = [1, 1]} : vector<8x288xf32> to vector<1x288xf32>
    %c0_273 = arith.constant 0 : index
    %c5_274 = arith.constant 5 : index
    %c0_275 = arith.constant 0 : index
    %354 = vector.load %arg43[%c0_273, %c5_274, %c0_275] : memref<2x18x288xf32, #tpu.memory_space<vmem>>, vector<1x1x288xf32>
    %355 = vector.shape_cast %354 : vector<1x1x288xf32> to vector<1x288xf32>
    %356 = vector.shape_cast %353 : vector<1x288xf32> to vector<1x1x288xf32>
    tpu.vector_store %arg43[%c0_273, %c5_274, %c0_275], %356 {strides = array<i32>} : memref<2x18x288xf32, #tpu.memory_space<vmem>>, vector<1x1x288xf32>,
    %357 = vector.extract_strided_slice %344 {offsets = [3, 0], sizes = [1, 288], strides = [1, 1]} : vector<8x288xf32> to vector<1x288xf32>
    %c0_276 = arith.constant 0 : index
    %c7_277 = arith.constant 7 : index
    %c0_278 = arith.constant 0 : index
    %358 = vector.load %arg43[%c0_276, %c7_277, %c0_278] : memref<2x18x288xf32, #tpu.memory_space<vmem>>, vector<1x1x288xf32>
    %359 = vector.shape_cast %358 : vector<1x1x288xf32> to vector<1x288xf32>
    %360 = vector.shape_cast %357 : vector<1x288xf32> to vector<1x1x288xf32>
    tpu.vector_store %arg43[%c0_276, %c7_277, %c0_278], %360 {strides = array<i32>} : memref<2x18x288xf32, #tpu.memory_space<vmem>>, vector<1x1x288xf32>,
    %361 = vector.extract_strided_slice %344 {offsets = [4, 0], sizes = [1, 288], strides = [1, 1]} : vector<8x288xf32> to vector<1x288xf32>
    %c0_279 = arith.constant 0 : index
    %c9 = arith.constant 9 : index
    %c0_280 = arith.constant 0 : index
    %362 = vector.load %arg43[%c0_279, %c9, %c0_280] : memref<2x18x288xf32, #tpu.memory_space<vmem>>, vector<1x1x288xf32>
    %363 = vector.shape_cast %362 : vector<1x1x288xf32> to vector<1x288xf32>
    %364 = vector.shape_cast %361 : vector<1x288xf32> to vector<1x1x288xf32>
    tpu.vector_store %arg43[%c0_279, %c9, %c0_280], %364 {strides = array<i32>} : memref<2x18x288xf32, #tpu.memory_space<vmem>>, vector<1x1x288xf32>,
    %365 = vector.extract_strided_slice %344 {offsets = [5, 0], sizes = [1, 288], strides = [1, 1]} : vector<8x288xf32> to vector<1x288xf32>
    %c0_281 = arith.constant 0 : index
    %c11 = arith.constant 11 : index
    %c0_282 = arith.constant 0 : index
    %366 = vector.load %arg43[%c0_281, %c11, %c0_282] : memref<2x18x288xf32, #tpu.memory_space<vmem>>, vector<1x1x288xf32>
    %367 = vector.shape_cast %366 : vector<1x1x288xf32> to vector<1x288xf32>
    %368 = vector.shape_cast %365 : vector<1x288xf32> to vector<1x1x288xf32>
    tpu.vector_store %arg43[%c0_281, %c11, %c0_282], %368 {strides = array<i32>} : memref<2x18x288xf32, #tpu.memory_space<vmem>>, vector<1x1x288xf32>,
    %369 = vector.extract_strided_slice %344 {offsets = [6, 0], sizes = [1, 288], strides = [1, 1]} : vector<8x288xf32> to vector<1x288xf32>
    %c0_283 = arith.constant 0 : index
    %c13 = arith.constant 13 : index
    %c0_284 = arith.constant 0 : index
    %370 = vector.load %arg43[%c0_283, %c13, %c0_284] : memref<2x18x288xf32, #tpu.memory_space<vmem>>, vector<1x1x288xf32>
    %371 = vector.shape_cast %370 : vector<1x1x288xf32> to vector<1x288xf32>
    %372 = vector.shape_cast %369 : vector<1x288xf32> to vector<1x1x288xf32>
    tpu.vector_store %arg43[%c0_283, %c13, %c0_284], %372 {strides = array<i32>} : memref<2x18x288xf32, #tpu.memory_space<vmem>>, vector<1x1x288xf32>,
    %373 = vector.extract_strided_slice %344 {offsets = [7, 0], sizes = [1, 288], strides = [1, 1]} : vector<8x288xf32> to vector<1x288xf32>
    %c0_285 = arith.constant 0 : index
    %c15 = arith.constant 15 : index
    %c0_286 = arith.constant 0 : index
    %374 = vector.load %arg43[%c0_285, %c15, %c0_286] : memref<2x18x288xf32, #tpu.memory_space<vmem>>, vector<1x1x288xf32>
    %375 = vector.shape_cast %374 : vector<1x1x288xf32> to vector<1x288xf32>
    %376 = vector.shape_cast %373 : vector<1x288xf32> to vector<1x1x288xf32>
    tpu.vector_store %arg43[%c0_285, %c15, %c0_286], %376 {strides = array<i32>} : memref<2x18x288xf32, #tpu.memory_space<vmem>>, vector<1x1x288xf32>,
    %377 = vector.broadcast %336 : vector<1x288xf32> to vector<8x288xf32>
    %378 = arith.mulf %273, %377 : vector<8x288xf32>
    %379 = vector.broadcast %338 : vector<1x288xf32> to vector<8x288xf32>
    %380 = arith.addf %378, %379 : vector<8x288xf32>
    %cst_287 = arith.constant 0.000000e+00 : f32
    %381 = vector.broadcast %cst_287 : f32 to vector<8x288xf32>
    %382 = arith.maximumf %380, %381 : vector<8x288xf32>
    %383 = vector.extract_strided_slice %382 {offsets = [0, 0], sizes = [1, 288], strides = [1, 1]} : vector<8x288xf32> to vector<1x288xf32>
    %c0_288 = arith.constant 0 : index
    %c2_289 = arith.constant 2 : index
    %c0_290 = arith.constant 0 : index
    %384 = vector.load %arg43[%c0_288, %c2_289, %c0_290] : memref<2x18x288xf32, #tpu.memory_space<vmem>>, vector<1x1x288xf32>
    %385 = vector.shape_cast %384 : vector<1x1x288xf32> to vector<1x288xf32>
    %386 = vector.shape_cast %383 : vector<1x288xf32> to vector<1x1x288xf32>
    tpu.vector_store %arg43[%c0_288, %c2_289, %c0_290], %386 {strides = array<i32>} : memref<2x18x288xf32, #tpu.memory_space<vmem>>, vector<1x1x288xf32>,
    %387 = vector.extract_strided_slice %382 {offsets = [1, 0], sizes = [1, 288], strides = [1, 1]} : vector<8x288xf32> to vector<1x288xf32>
    %c0_291 = arith.constant 0 : index
    %c4_292 = arith.constant 4 : index
    %c0_293 = arith.constant 0 : index
    %388 = vector.load %arg43[%c0_291, %c4_292, %c0_293] : memref<2x18x288xf32, #tpu.memory_space<vmem>>, vector<1x1x288xf32>
    %389 = vector.shape_cast %388 : vector<1x1x288xf32> to vector<1x288xf32>
    %390 = vector.shape_cast %387 : vector<1x288xf32> to vector<1x1x288xf32>
    tpu.vector_store %arg43[%c0_291, %c4_292, %c0_293], %390 {strides = array<i32>} : memref<2x18x288xf32, #tpu.memory_space<vmem>>, vector<1x1x288xf32>,
    %391 = vector.extract_strided_slice %382 {offsets = [2, 0], sizes = [1, 288], strides = [1, 1]} : vector<8x288xf32> to vector<1x288xf32>
    %c0_294 = arith.constant 0 : index
    %c6_295 = arith.constant 6 : index
    %c0_296 = arith.constant 0 : index
    %392 = vector.load %arg43[%c0_294, %c6_295, %c0_296] : memref<2x18x288xf32, #tpu.memory_space<vmem>>, vector<1x1x288xf32>
    %393 = vector.shape_cast %392 : vector<1x1x288xf32> to vector<1x288xf32>
    %394 = vector.shape_cast %391 : vector<1x288xf32> to vector<1x1x288xf32>
    tpu.vector_store %arg43[%c0_294, %c6_295, %c0_296], %394 {strides = array<i32>} : memref<2x18x288xf32, #tpu.memory_space<vmem>>, vector<1x1x288xf32>,
    %395 = vector.extract_strided_slice %382 {offsets = [3, 0], sizes = [1, 288], strides = [1, 1]} : vector<8x288xf32> to vector<1x288xf32>
    %c0_297 = arith.constant 0 : index
    %c8_298 = arith.constant 8 : index
    %c0_299 = arith.constant 0 : index
    %396 = vector.load %arg43[%c0_297, %c8_298, %c0_299] : memref<2x18x288xf32, #tpu.memory_space<vmem>>, vector<1x1x288xf32>
    %397 = vector.shape_cast %396 : vector<1x1x288xf32> to vector<1x288xf32>
    %398 = vector.shape_cast %395 : vector<1x288xf32> to vector<1x1x288xf32>
    tpu.vector_store %arg43[%c0_297, %c8_298, %c0_299], %398 {strides = array<i32>} : memref<2x18x288xf32, #tpu.memory_space<vmem>>, vector<1x1x288xf32>,
    %399 = vector.extract_strided_slice %382 {offsets = [4, 0], sizes = [1, 288], strides = [1, 1]} : vector<8x288xf32> to vector<1x288xf32>
    %c0_300 = arith.constant 0 : index
    %c10 = arith.constant 10 : index
    %c0_301 = arith.constant 0 : index
    %400 = vector.load %arg43[%c0_300, %c10, %c0_301] : memref<2x18x288xf32, #tpu.memory_space<vmem>>, vector<1x1x288xf32>
    %401 = vector.shape_cast %400 : vector<1x1x288xf32> to vector<1x288xf32>
    %402 = vector.shape_cast %399 : vector<1x288xf32> to vector<1x1x288xf32>
    tpu.vector_store %arg43[%c0_300, %c10, %c0_301], %402 {strides = array<i32>} : memref<2x18x288xf32, #tpu.memory_space<vmem>>, vector<1x1x288xf32>,
    %403 = vector.extract_strided_slice %382 {offsets = [5, 0], sizes = [1, 288], strides = [1, 1]} : vector<8x288xf32> to vector<1x288xf32>
    %c0_302 = arith.constant 0 : index
    %c12 = arith.constant 12 : index
    %c0_303 = arith.constant 0 : index
    %404 = vector.load %arg43[%c0_302, %c12, %c0_303] : memref<2x18x288xf32, #tpu.memory_space<vmem>>, vector<1x1x288xf32>
    %405 = vector.shape_cast %404 : vector<1x1x288xf32> to vector<1x288xf32>
    %406 = vector.shape_cast %403 : vector<1x288xf32> to vector<1x1x288xf32>
    tpu.vector_store %arg43[%c0_302, %c12, %c0_303], %406 {strides = array<i32>} : memref<2x18x288xf32, #tpu.memory_space<vmem>>, vector<1x1x288xf32>,
    %407 = vector.extract_strided_slice %382 {offsets = [6, 0], sizes = [1, 288], strides = [1, 1]} : vector<8x288xf32> to vector<1x288xf32>
    %c0_304 = arith.constant 0 : index
    %c14 = arith.constant 14 : index
    %c0_305 = arith.constant 0 : index
    %408 = vector.load %arg43[%c0_304, %c14, %c0_305] : memref<2x18x288xf32, #tpu.memory_space<vmem>>, vector<1x1x288xf32>
    %409 = vector.shape_cast %408 : vector<1x1x288xf32> to vector<1x288xf32>
    %410 = vector.shape_cast %407 : vector<1x288xf32> to vector<1x1x288xf32>
    tpu.vector_store %arg43[%c0_304, %c14, %c0_305], %410 {strides = array<i32>} : memref<2x18x288xf32, #tpu.memory_space<vmem>>, vector<1x1x288xf32>,
    %411 = vector.extract_strided_slice %382 {offsets = [7, 0], sizes = [1, 288], strides = [1, 1]} : vector<8x288xf32> to vector<1x288xf32>
    %c0_306 = arith.constant 0 : index
    %c16 = arith.constant 16 : index
    %c0_307 = arith.constant 0 : index
    %412 = vector.load %arg43[%c0_306, %c16, %c0_307] : memref<2x18x288xf32, #tpu.memory_space<vmem>>, vector<1x1x288xf32>
    %413 = vector.shape_cast %412 : vector<1x1x288xf32> to vector<1x288xf32>
    %414 = vector.shape_cast %411 : vector<1x288xf32> to vector<1x1x288xf32>
    tpu.vector_store %arg43[%c0_306, %c16, %c0_307], %414 {strides = array<i32>} : memref<2x18x288xf32, #tpu.memory_space<vmem>>, vector<1x1x288xf32>,
    %415 = vector.broadcast %336 : vector<1x288xf32> to vector<8x288xf32>
    %416 = arith.mulf %291, %415 : vector<8x288xf32>
    %417 = vector.broadcast %338 : vector<1x288xf32> to vector<8x288xf32>
    %418 = arith.addf %416, %417 : vector<8x288xf32>
    %cst_308 = arith.constant 0.000000e+00 : f32
    %419 = vector.broadcast %cst_308 : f32 to vector<8x288xf32>
    %420 = arith.maximumf %418, %419 : vector<8x288xf32>
    %421 = vector.extract_strided_slice %420 {offsets = [0, 0], sizes = [1, 288], strides = [1, 1]} : vector<8x288xf32> to vector<1x288xf32>
    %c1_309 = arith.constant 1 : index
    %c1_310 = arith.constant 1 : index
    %c0_311 = arith.constant 0 : index
    %422 = vector.load %arg43[%c1_309, %c1_310, %c0_311] : memref<2x18x288xf32, #tpu.memory_space<vmem>>, vector<1x1x288xf32>
    %423 = vector.shape_cast %422 : vector<1x1x288xf32> to vector<1x288xf32>
    %424 = vector.shape_cast %421 : vector<1x288xf32> to vector<1x1x288xf32>
    tpu.vector_store %arg43[%c1_309, %c1_310, %c0_311], %424 {strides = array<i32>} : memref<2x18x288xf32, #tpu.memory_space<vmem>>, vector<1x1x288xf32>,
    %425 = vector.extract_strided_slice %420 {offsets = [1, 0], sizes = [1, 288], strides = [1, 1]} : vector<8x288xf32> to vector<1x288xf32>
    %c1_312 = arith.constant 1 : index
    %c3_313 = arith.constant 3 : index
    %c0_314 = arith.constant 0 : index
    %426 = vector.load %arg43[%c1_312, %c3_313, %c0_314] : memref<2x18x288xf32, #tpu.memory_space<vmem>>, vector<1x1x288xf32>
    %427 = vector.shape_cast %426 : vector<1x1x288xf32> to vector<1x288xf32>
    %428 = vector.shape_cast %425 : vector<1x288xf32> to vector<1x1x288xf32>
    tpu.vector_store %arg43[%c1_312, %c3_313, %c0_314], %428 {strides = array<i32>} : memref<2x18x288xf32, #tpu.memory_space<vmem>>, vector<1x1x288xf32>,
    %429 = vector.extract_strided_slice %420 {offsets = [2, 0], sizes = [1, 288], strides = [1, 1]} : vector<8x288xf32> to vector<1x288xf32>
    %c1_315 = arith.constant 1 : index
    %c5_316 = arith.constant 5 : index
    %c0_317 = arith.constant 0 : index
    %430 = vector.load %arg43[%c1_315, %c5_316, %c0_317] : memref<2x18x288xf32, #tpu.memory_space<vmem>>, vector<1x1x288xf32>
    %431 = vector.shape_cast %430 : vector<1x1x288xf32> to vector<1x288xf32>
    %432 = vector.shape_cast %429 : vector<1x288xf32> to vector<1x1x288xf32>
    tpu.vector_store %arg43[%c1_315, %c5_316, %c0_317], %432 {strides = array<i32>} : memref<2x18x288xf32, #tpu.memory_space<vmem>>, vector<1x1x288xf32>,
    %433 = vector.extract_strided_slice %420 {offsets = [3, 0], sizes = [1, 288], strides = [1, 1]} : vector<8x288xf32> to vector<1x288xf32>
    %c1_318 = arith.constant 1 : index
    %c7_319 = arith.constant 7 : index
    %c0_320 = arith.constant 0 : index
    %434 = vector.load %arg43[%c1_318, %c7_319, %c0_320] : memref<2x18x288xf32, #tpu.memory_space<vmem>>, vector<1x1x288xf32>
    %435 = vector.shape_cast %434 : vector<1x1x288xf32> to vector<1x288xf32>
    %436 = vector.shape_cast %433 : vector<1x288xf32> to vector<1x1x288xf32>
    tpu.vector_store %arg43[%c1_318, %c7_319, %c0_320], %436 {strides = array<i32>} : memref<2x18x288xf32, #tpu.memory_space<vmem>>, vector<1x1x288xf32>,
    %437 = vector.extract_strided_slice %420 {offsets = [4, 0], sizes = [1, 288], strides = [1, 1]} : vector<8x288xf32> to vector<1x288xf32>
    %c1_321 = arith.constant 1 : index
    %c9_322 = arith.constant 9 : index
    %c0_323 = arith.constant 0 : index
    %438 = vector.load %arg43[%c1_321, %c9_322, %c0_323] : memref<2x18x288xf32, #tpu.memory_space<vmem>>, vector<1x1x288xf32>
    %439 = vector.shape_cast %438 : vector<1x1x288xf32> to vector<1x288xf32>
    %440 = vector.shape_cast %437 : vector<1x288xf32> to vector<1x1x288xf32>
    tpu.vector_store %arg43[%c1_321, %c9_322, %c0_323], %440 {strides = array<i32>} : memref<2x18x288xf32, #tpu.memory_space<vmem>>, vector<1x1x288xf32>,
    %441 = vector.extract_strided_slice %420 {offsets = [5, 0], sizes = [1, 288], strides = [1, 1]} : vector<8x288xf32> to vector<1x288xf32>
    %c1_324 = arith.constant 1 : index
    %c11_325 = arith.constant 11 : index
    %c0_326 = arith.constant 0 : index
    %442 = vector.load %arg43[%c1_324, %c11_325, %c0_326] : memref<2x18x288xf32, #tpu.memory_space<vmem>>, vector<1x1x288xf32>
    %443 = vector.shape_cast %442 : vector<1x1x288xf32> to vector<1x288xf32>
    %444 = vector.shape_cast %441 : vector<1x288xf32> to vector<1x1x288xf32>
    tpu.vector_store %arg43[%c1_324, %c11_325, %c0_326], %444 {strides = array<i32>} : memref<2x18x288xf32, #tpu.memory_space<vmem>>, vector<1x1x288xf32>,
    %445 = vector.extract_strided_slice %420 {offsets = [6, 0], sizes = [1, 288], strides = [1, 1]} : vector<8x288xf32> to vector<1x288xf32>
    %c1_327 = arith.constant 1 : index
    %c13_328 = arith.constant 13 : index
    %c0_329 = arith.constant 0 : index
    %446 = vector.load %arg43[%c1_327, %c13_328, %c0_329] : memref<2x18x288xf32, #tpu.memory_space<vmem>>, vector<1x1x288xf32>
    %447 = vector.shape_cast %446 : vector<1x1x288xf32> to vector<1x288xf32>
    %448 = vector.shape_cast %445 : vector<1x288xf32> to vector<1x1x288xf32>
    tpu.vector_store %arg43[%c1_327, %c13_328, %c0_329], %448 {strides = array<i32>} : memref<2x18x288xf32, #tpu.memory_space<vmem>>, vector<1x1x288xf32>,
    %449 = vector.extract_strided_slice %420 {offsets = [7, 0], sizes = [1, 288], strides = [1, 1]} : vector<8x288xf32> to vector<1x288xf32>
    %c1_330 = arith.constant 1 : index
    %c15_331 = arith.constant 15 : index
    %c0_332 = arith.constant 0 : index
    %450 = vector.load %arg43[%c1_330, %c15_331, %c0_332] : memref<2x18x288xf32, #tpu.memory_space<vmem>>, vector<1x1x288xf32>
    %451 = vector.shape_cast %450 : vector<1x1x288xf32> to vector<1x288xf32>
    %452 = vector.shape_cast %449 : vector<1x288xf32> to vector<1x1x288xf32>
    tpu.vector_store %arg43[%c1_330, %c15_331, %c0_332], %452 {strides = array<i32>} : memref<2x18x288xf32, #tpu.memory_space<vmem>>, vector<1x1x288xf32>,
    %453 = vector.broadcast %336 : vector<1x288xf32> to vector<8x288xf32>
    %454 = arith.mulf %309, %453 : vector<8x288xf32>
    %455 = vector.broadcast %338 : vector<1x288xf32> to vector<8x288xf32>
    %456 = arith.addf %454, %455 : vector<8x288xf32>
    %cst_333 = arith.constant 0.000000e+00 : f32
    %457 = vector.broadcast %cst_333 : f32 to vector<8x288xf32>
    %458 = arith.maximumf %456, %457 : vector<8x288xf32>
    %459 = vector.extract_strided_slice %458 {offsets = [0, 0], sizes = [1, 288], strides = [1, 1]} : vector<8x288xf32> to vector<1x288xf32>
    %c1_334 = arith.constant 1 : index
    %c2_335 = arith.constant 2 : index
    %c0_336 = arith.constant 0 : index
    %460 = vector.load %arg43[%c1_334, %c2_335, %c0_336] : memref<2x18x288xf32, #tpu.memory_space<vmem>>, vector<1x1x288xf32>
    %461 = vector.shape_cast %460 : vector<1x1x288xf32> to vector<1x288xf32>
    %462 = vector.shape_cast %459 : vector<1x288xf32> to vector<1x1x288xf32>
    tpu.vector_store %arg43[%c1_334, %c2_335, %c0_336], %462 {strides = array<i32>} : memref<2x18x288xf32, #tpu.memory_space<vmem>>, vector<1x1x288xf32>,
    %463 = vector.extract_strided_slice %458 {offsets = [1, 0], sizes = [1, 288], strides = [1, 1]} : vector<8x288xf32> to vector<1x288xf32>
    %c1_337 = arith.constant 1 : index
    %c4_338 = arith.constant 4 : index
    %c0_339 = arith.constant 0 : index
    %464 = vector.load %arg43[%c1_337, %c4_338, %c0_339] : memref<2x18x288xf32, #tpu.memory_space<vmem>>, vector<1x1x288xf32>
    %465 = vector.shape_cast %464 : vector<1x1x288xf32> to vector<1x288xf32>
    %466 = vector.shape_cast %463 : vector<1x288xf32> to vector<1x1x288xf32>
    tpu.vector_store %arg43[%c1_337, %c4_338, %c0_339], %466 {strides = array<i32>} : memref<2x18x288xf32, #tpu.memory_space<vmem>>, vector<1x1x288xf32>,
    %467 = vector.extract_strided_slice %458 {offsets = [2, 0], sizes = [1, 288], strides = [1, 1]} : vector<8x288xf32> to vector<1x288xf32>
    %c1_340 = arith.constant 1 : index
    %c6_341 = arith.constant 6 : index
    %c0_342 = arith.constant 0 : index
    %468 = vector.load %arg43[%c1_340, %c6_341, %c0_342] : memref<2x18x288xf32, #tpu.memory_space<vmem>>, vector<1x1x288xf32>
    %469 = vector.shape_cast %468 : vector<1x1x288xf32> to vector<1x288xf32>
    %470 = vector.shape_cast %467 : vector<1x288xf32> to vector<1x1x288xf32>
    tpu.vector_store %arg43[%c1_340, %c6_341, %c0_342], %470 {strides = array<i32>} : memref<2x18x288xf32, #tpu.memory_space<vmem>>, vector<1x1x288xf32>,
    %471 = vector.extract_strided_slice %458 {offsets = [3, 0], sizes = [1, 288], strides = [1, 1]} : vector<8x288xf32> to vector<1x288xf32>
    %c1_343 = arith.constant 1 : index
    %c8_344 = arith.constant 8 : index
    %c0_345 = arith.constant 0 : index
    %472 = vector.load %arg43[%c1_343, %c8_344, %c0_345] : memref<2x18x288xf32, #tpu.memory_space<vmem>>, vector<1x1x288xf32>
    %473 = vector.shape_cast %472 : vector<1x1x288xf32> to vector<1x288xf32>
    %474 = vector.shape_cast %471 : vector<1x288xf32> to vector<1x1x288xf32>
    tpu.vector_store %arg43[%c1_343, %c8_344, %c0_345], %474 {strides = array<i32>} : memref<2x18x288xf32, #tpu.memory_space<vmem>>, vector<1x1x288xf32>,
    %475 = vector.extract_strided_slice %458 {offsets = [4, 0], sizes = [1, 288], strides = [1, 1]} : vector<8x288xf32> to vector<1x288xf32>
    %c1_346 = arith.constant 1 : index
    %c10_347 = arith.constant 10 : index
    %c0_348 = arith.constant 0 : index
    %476 = vector.load %arg43[%c1_346, %c10_347, %c0_348] : memref<2x18x288xf32, #tpu.memory_space<vmem>>, vector<1x1x288xf32>
    %477 = vector.shape_cast %476 : vector<1x1x288xf32> to vector<1x288xf32>
    %478 = vector.shape_cast %475 : vector<1x288xf32> to vector<1x1x288xf32>
    tpu.vector_store %arg43[%c1_346, %c10_347, %c0_348], %478 {strides = array<i32>} : memref<2x18x288xf32, #tpu.memory_space<vmem>>, vector<1x1x288xf32>,
    %479 = vector.extract_strided_slice %458 {offsets = [5, 0], sizes = [1, 288], strides = [1, 1]} : vector<8x288xf32> to vector<1x288xf32>
    %c1_349 = arith.constant 1 : index
    %c12_350 = arith.constant 12 : index
    %c0_351 = arith.constant 0 : index
    %480 = vector.load %arg43[%c1_349, %c12_350, %c0_351] : memref<2x18x288xf32, #tpu.memory_space<vmem>>, vector<1x1x288xf32>
    %481 = vector.shape_cast %480 : vector<1x1x288xf32> to vector<1x288xf32>
    %482 = vector.shape_cast %479 : vector<1x288xf32> to vector<1x1x288xf32>
    tpu.vector_store %arg43[%c1_349, %c12_350, %c0_351], %482 {strides = array<i32>} : memref<2x18x288xf32, #tpu.memory_space<vmem>>, vector<1x1x288xf32>,
    %483 = vector.extract_strided_slice %458 {offsets = [6, 0], sizes = [1, 288], strides = [1, 1]} : vector<8x288xf32> to vector<1x288xf32>
    %c1_352 = arith.constant 1 : index
    %c14_353 = arith.constant 14 : index
    %c0_354 = arith.constant 0 : index
    %484 = vector.load %arg43[%c1_352, %c14_353, %c0_354] : memref<2x18x288xf32, #tpu.memory_space<vmem>>, vector<1x1x288xf32>
    %485 = vector.shape_cast %484 : vector<1x1x288xf32> to vector<1x288xf32>
    %486 = vector.shape_cast %483 : vector<1x288xf32> to vector<1x1x288xf32>
    tpu.vector_store %arg43[%c1_352, %c14_353, %c0_354], %486 {strides = array<i32>} : memref<2x18x288xf32, #tpu.memory_space<vmem>>, vector<1x1x288xf32>,
    %487 = vector.extract_strided_slice %458 {offsets = [7, 0], sizes = [1, 288], strides = [1, 1]} : vector<8x288xf32> to vector<1x288xf32>
    %c1_355 = arith.constant 1 : index
    %c16_356 = arith.constant 16 : index
    %c0_357 = arith.constant 0 : index
    %488 = vector.load %arg43[%c1_355, %c16_356, %c0_357] : memref<2x18x288xf32, #tpu.memory_space<vmem>>, vector<1x1x288xf32>
    %489 = vector.shape_cast %488 : vector<1x1x288xf32> to vector<1x288xf32>
    %490 = vector.shape_cast %487 : vector<1x288xf32> to vector<1x1x288xf32>
    tpu.vector_store %arg43[%c1_355, %c16_356, %c0_357], %490 {strides = array<i32>} : memref<2x18x288xf32, #tpu.memory_space<vmem>>, vector<1x1x288xf32>,
    %c0_358 = arith.constant 0 : index
    %c0_359 = arith.constant 0 : index
    %491 = vector.load %arg39[%c0_358, %c0_359] : memref<1x128xf32, #tpu.memory_space<vmem>>, vector<1x128xf32>
    %c0_360 = arith.constant 0 : index
    %c0_361 = arith.constant 0 : index
    %c0_362 = arith.constant 0 : index
    %492 = vector.load %arg43[%c0_360, %c0_361, %c0_362] : memref<2x18x288xf32, #tpu.memory_space<vmem>>, vector<1x16x288xf32>
    %493 = vector.shape_cast %492 : vector<1x16x288xf32> to vector<16x288xf32>
    %c0_363 = arith.constant 0 : index
    %c0_364 = arith.constant 0 : index
    %494 = vector.load %arg38[%c0_363, %c0_364] : memref<288x128xf32, #tpu.memory_space<vmem>>, vector<288x128xf32>
    %cst_365 = arith.constant dense<0.000000e+00> : vector<16x128xf32>
    %495 = tpu.matmul %493, %494, %cst_365 {dimension_numbers = #tpu.dot_dimension_numbers<[1], [0], [0], [1], [0, 0, 1, 1], [], []>} : vector<16x288xf32>, vector<288x128xf32>, vector<16x128xf32> -> vector<16x128xf32>
    %c0_366 = arith.constant 0 : index
    %c1_367 = arith.constant 1 : index
    %c0_368 = arith.constant 0 : index
    %496 = vector.load %arg43[%c0_366, %c1_367, %c0_368] : memref<2x18x288xf32, #tpu.memory_space<vmem>>, vector<1x16x288xf32>
    %497 = vector.shape_cast %496 : vector<1x16x288xf32> to vector<16x288xf32>
    %c0_369 = arith.constant 0 : index
    %c0_370 = arith.constant 0 : index
    %498 = vector.load %arg36[%c0_369, %c0_370] : memref<288x128xf32, #tpu.memory_space<vmem>>, vector<288x128xf32>
    %cst_371 = arith.constant dense<0.000000e+00> : vector<16x128xf32>
    %499 = tpu.matmul %497, %498, %cst_371 {dimension_numbers = #tpu.dot_dimension_numbers<[1], [0], [0], [1], [0, 0, 1, 1], [], []>} : vector<16x288xf32>, vector<288x128xf32>, vector<16x128xf32> -> vector<16x128xf32>
    %500 = arith.addf %495, %499 : vector<16x128xf32>
    %501 = vector.broadcast %491 : vector<1x128xf32> to vector<16x128xf32>
    %502 = arith.addf %500, %501 : vector<16x128xf32>
    %c0_372 = arith.constant 0 : index
    %c1_373 = arith.constant 1 : index
    %c0_374 = arith.constant 0 : index
    %503 = vector.load %arg43[%c0_372, %c1_373, %c0_374] : memref<2x18x288xf32, #tpu.memory_space<vmem>>, vector<1x16x288xf32>
    %504 = vector.shape_cast %503 : vector<1x16x288xf32> to vector<16x288xf32>
    %c0_375 = arith.constant 0 : index
    %c0_376 = arith.constant 0 : index
    %505 = vector.load %arg37[%c0_375, %c0_376] : memref<288x128xf32, #tpu.memory_space<vmem>>, vector<288x128xf32>
    %cst_377 = arith.constant dense<0.000000e+00> : vector<16x128xf32>
    %506 = tpu.matmul %504, %505, %cst_377 {dimension_numbers = #tpu.dot_dimension_numbers<[1], [0], [0], [1], [0, 0, 1, 1], [], []>} : vector<16x288xf32>, vector<288x128xf32>, vector<16x128xf32> -> vector<16x128xf32>
    %c0_378 = arith.constant 0 : index
    %c2_379 = arith.constant 2 : index
    %c0_380 = arith.constant 0 : index
    %507 = vector.load %arg43[%c0_378, %c2_379, %c0_380] : memref<2x18x288xf32, #tpu.memory_space<vmem>>, vector<1x16x288xf32>
    %508 = vector.shape_cast %507 : vector<1x16x288xf32> to vector<16x288xf32>
    %c0_381 = arith.constant 0 : index
    %c0_382 = arith.constant 0 : index
    %509 = vector.load %arg35[%c0_381, %c0_382] : memref<288x128xf32, #tpu.memory_space<vmem>>, vector<288x128xf32>
    %cst_383 = arith.constant dense<0.000000e+00> : vector<16x128xf32>
    %510 = tpu.matmul %508, %509, %cst_383 {dimension_numbers = #tpu.dot_dimension_numbers<[1], [0], [0], [1], [0, 0, 1, 1], [], []>} : vector<16x288xf32>, vector<288x128xf32>, vector<16x128xf32> -> vector<16x128xf32>
    %511 = arith.addf %506, %510 : vector<16x128xf32>
    %512 = vector.broadcast %491 : vector<1x128xf32> to vector<16x128xf32>
    %513 = arith.addf %511, %512 : vector<16x128xf32>
    %c1_384 = arith.constant 1 : index
    %c0_385 = arith.constant 0 : index
    %c0_386 = arith.constant 0 : index
    %514 = vector.load %arg43[%c1_384, %c0_385, %c0_386] : memref<2x18x288xf32, #tpu.memory_space<vmem>>, vector<1x16x288xf32>
    %515 = vector.shape_cast %514 : vector<1x16x288xf32> to vector<16x288xf32>
    %c0_387 = arith.constant 0 : index
    %c0_388 = arith.constant 0 : index
    %516 = vector.load %arg38[%c0_387, %c0_388] : memref<288x128xf32, #tpu.memory_space<vmem>>, vector<288x128xf32>
    %cst_389 = arith.constant dense<0.000000e+00> : vector<16x128xf32>
    %517 = tpu.matmul %515, %516, %cst_389 {dimension_numbers = #tpu.dot_dimension_numbers<[1], [0], [0], [1], [0, 0, 1, 1], [], []>} : vector<16x288xf32>, vector<288x128xf32>, vector<16x128xf32> -> vector<16x128xf32>
    %c1_390 = arith.constant 1 : index
    %c1_391 = arith.constant 1 : index
    %c0_392 = arith.constant 0 : index
    %518 = vector.load %arg43[%c1_390, %c1_391, %c0_392] : memref<2x18x288xf32, #tpu.memory_space<vmem>>, vector<1x16x288xf32>
    %519 = vector.shape_cast %518 : vector<1x16x288xf32> to vector<16x288xf32>
    %c0_393 = arith.constant 0 : index
    %c0_394 = arith.constant 0 : index
    %520 = vector.load %arg36[%c0_393, %c0_394] : memref<288x128xf32, #tpu.memory_space<vmem>>, vector<288x128xf32>
    %cst_395 = arith.constant dense<0.000000e+00> : vector<16x128xf32>
    %521 = tpu.matmul %519, %520, %cst_395 {dimension_numbers = #tpu.dot_dimension_numbers<[1], [0], [0], [1], [0, 0, 1, 1], [], []>} : vector<16x288xf32>, vector<288x128xf32>, vector<16x128xf32> -> vector<16x128xf32>
    %522 = arith.addf %517, %521 : vector<16x128xf32>
    %523 = vector.broadcast %491 : vector<1x128xf32> to vector<16x128xf32>
    %524 = arith.addf %522, %523 : vector<16x128xf32>
    %c1_396 = arith.constant 1 : index
    %c1_397 = arith.constant 1 : index
    %c0_398 = arith.constant 0 : index
    %525 = vector.load %arg43[%c1_396, %c1_397, %c0_398] : memref<2x18x288xf32, #tpu.memory_space<vmem>>, vector<1x16x288xf32>
    %526 = vector.shape_cast %525 : vector<1x16x288xf32> to vector<16x288xf32>
    %c0_399 = arith.constant 0 : index
    %c0_400 = arith.constant 0 : index
    %527 = vector.load %arg37[%c0_399, %c0_400] : memref<288x128xf32, #tpu.memory_space<vmem>>, vector<288x128xf32>
    %cst_401 = arith.constant dense<0.000000e+00> : vector<16x128xf32>
    %528 = tpu.matmul %526, %527, %cst_401 {dimension_numbers = #tpu.dot_dimension_numbers<[1], [0], [0], [1], [0, 0, 1, 1], [], []>} : vector<16x288xf32>, vector<288x128xf32>, vector<16x128xf32> -> vector<16x128xf32>
    %c1_402 = arith.constant 1 : index
    %c2_403 = arith.constant 2 : index
    %c0_404 = arith.constant 0 : index
    %529 = vector.load %arg43[%c1_402, %c2_403, %c0_404] : memref<2x18x288xf32, #tpu.memory_space<vmem>>, vector<1x16x288xf32>
    %530 = vector.shape_cast %529 : vector<1x16x288xf32> to vector<16x288xf32>
    %c0_405 = arith.constant 0 : index
    %c0_406 = arith.constant 0 : index
    %531 = vector.load %arg35[%c0_405, %c0_406] : memref<288x128xf32, #tpu.memory_space<vmem>>, vector<288x128xf32>
    %cst_407 = arith.constant dense<0.000000e+00> : vector<16x128xf32>
    %532 = tpu.matmul %530, %531, %cst_407 {dimension_numbers = #tpu.dot_dimension_numbers<[1], [0], [0], [1], [0, 0, 1, 1], [], []>} : vector<16x288xf32>, vector<288x128xf32>, vector<16x128xf32> -> vector<16x128xf32>
    %533 = arith.addf %528, %532 : vector<16x128xf32>
    %534 = vector.broadcast %491 : vector<1x128xf32> to vector<16x128xf32>
    %535 = arith.addf %533, %534 : vector<16x128xf32>
    %536 = math.tanh %502 : vector<16x128xf32>
    %537 = vector.extract_strided_slice %536 {offsets = [0, 0], sizes = [1, 128], strides = [1, 1]} : vector<16x128xf32> to vector<1x128xf32>
    %c0_408 = arith.constant 0 : index
    %c0_409 = arith.constant 0 : index
    %c0_410 = arith.constant 0 : index
    %538 = vector.load %arg40[%c0_408, %c0_409, %c0_410] : memref<2x32x128xf32, #tpu.memory_space<vmem>>, vector<1x1x128xf32>
    %539 = vector.shape_cast %538 : vector<1x1x128xf32> to vector<1x128xf32>
    %540 = vector.shape_cast %537 : vector<1x128xf32> to vector<1x1x128xf32>
    tpu.vector_store %arg40[%c0_408, %c0_409, %c0_410], %540 {strides = array<i32>} : memref<2x32x128xf32, #tpu.memory_space<vmem>>, vector<1x1x128xf32>,
    %541 = vector.extract_strided_slice %536 {offsets = [1, 0], sizes = [1, 128], strides = [1, 1]} : vector<16x128xf32> to vector<1x128xf32>
    %c0_411 = arith.constant 0 : index
    %c2_412 = arith.constant 2 : index
    %c0_413 = arith.constant 0 : index
    %542 = vector.load %arg40[%c0_411, %c2_412, %c0_413] : memref<2x32x128xf32, #tpu.memory_space<vmem>>, vector<1x1x128xf32>
    %543 = vector.shape_cast %542 : vector<1x1x128xf32> to vector<1x128xf32>
    %544 = vector.shape_cast %541 : vector<1x128xf32> to vector<1x1x128xf32>
    tpu.vector_store %arg40[%c0_411, %c2_412, %c0_413], %544 {strides = array<i32>} : memref<2x32x128xf32, #tpu.memory_space<vmem>>, vector<1x1x128xf32>,
    %545 = vector.extract_strided_slice %536 {offsets = [2, 0], sizes = [1, 128], strides = [1, 1]} : vector<16x128xf32> to vector<1x128xf32>
    %c0_414 = arith.constant 0 : index
    %c4_415 = arith.constant 4 : index
    %c0_416 = arith.constant 0 : index
    %546 = vector.load %arg40[%c0_414, %c4_415, %c0_416] : memref<2x32x128xf32, #tpu.memory_space<vmem>>, vector<1x1x128xf32>
    %547 = vector.shape_cast %546 : vector<1x1x128xf32> to vector<1x128xf32>
    %548 = vector.shape_cast %545 : vector<1x128xf32> to vector<1x1x128xf32>
    tpu.vector_store %arg40[%c0_414, %c4_415, %c0_416], %548 {strides = array<i32>} : memref<2x32x128xf32, #tpu.memory_space<vmem>>, vector<1x1x128xf32>,
    %549 = vector.extract_strided_slice %536 {offsets = [3, 0], sizes = [1, 128], strides = [1, 1]} : vector<16x128xf32> to vector<1x128xf32>
    %c0_417 = arith.constant 0 : index
    %c6_418 = arith.constant 6 : index
    %c0_419 = arith.constant 0 : index
    %550 = vector.load %arg40[%c0_417, %c6_418, %c0_419] : memref<2x32x128xf32, #tpu.memory_space<vmem>>, vector<1x1x128xf32>
    %551 = vector.shape_cast %550 : vector<1x1x128xf32> to vector<1x128xf32>
    %552 = vector.shape_cast %549 : vector<1x128xf32> to vector<1x1x128xf32>
    tpu.vector_store %arg40[%c0_417, %c6_418, %c0_419], %552 {strides = array<i32>} : memref<2x32x128xf32, #tpu.memory_space<vmem>>, vector<1x1x128xf32>,
    %553 = vector.extract_strided_slice %536 {offsets = [4, 0], sizes = [1, 128], strides = [1, 1]} : vector<16x128xf32> to vector<1x128xf32>
    %c0_420 = arith.constant 0 : index
    %c8_421 = arith.constant 8 : index
    %c0_422 = arith.constant 0 : index
    %554 = vector.load %arg40[%c0_420, %c8_421, %c0_422] : memref<2x32x128xf32, #tpu.memory_space<vmem>>, vector<1x1x128xf32>
    %555 = vector.shape_cast %554 : vector<1x1x128xf32> to vector<1x128xf32>
    %556 = vector.shape_cast %553 : vector<1x128xf32> to vector<1x1x128xf32>
    tpu.vector_store %arg40[%c0_420, %c8_421, %c0_422], %556 {strides = array<i32>} : memref<2x32x128xf32, #tpu.memory_space<vmem>>, vector<1x1x128xf32>,
    %557 = vector.extract_strided_slice %536 {offsets = [5, 0], sizes = [1, 128], strides = [1, 1]} : vector<16x128xf32> to vector<1x128xf32>
    %c0_423 = arith.constant 0 : index
    %c10_424 = arith.constant 10 : index
    %c0_425 = arith.constant 0 : index
    %558 = vector.load %arg40[%c0_423, %c10_424, %c0_425] : memref<2x32x128xf32, #tpu.memory_space<vmem>>, vector<1x1x128xf32>
    %559 = vector.shape_cast %558 : vector<1x1x128xf32> to vector<1x128xf32>
    %560 = vector.shape_cast %557 : vector<1x128xf32> to vector<1x1x128xf32>
    tpu.vector_store %arg40[%c0_423, %c10_424, %c0_425], %560 {strides = array<i32>} : memref<2x32x128xf32, #tpu.memory_space<vmem>>, vector<1x1x128xf32>,
    %561 = vector.extract_strided_slice %536 {offsets = [6, 0], sizes = [1, 128], strides = [1, 1]} : vector<16x128xf32> to vector<1x128xf32>
    %c0_426 = arith.constant 0 : index
    %c12_427 = arith.constant 12 : index
    %c0_428 = arith.constant 0 : index
    %562 = vector.load %arg40[%c0_426, %c12_427, %c0_428] : memref<2x32x128xf32, #tpu.memory_space<vmem>>, vector<1x1x128xf32>
    %563 = vector.shape_cast %562 : vector<1x1x128xf32> to vector<1x128xf32>
    %564 = vector.shape_cast %561 : vector<1x128xf32> to vector<1x1x128xf32>
    tpu.vector_store %arg40[%c0_426, %c12_427, %c0_428], %564 {strides = array<i32>} : memref<2x32x128xf32, #tpu.memory_space<vmem>>, vector<1x1x128xf32>,
    %565 = vector.extract_strided_slice %536 {offsets = [7, 0], sizes = [1, 128], strides = [1, 1]} : vector<16x128xf32> to vector<1x128xf32>
    %c0_429 = arith.constant 0 : index
    %c14_430 = arith.constant 14 : index
    %c0_431 = arith.constant 0 : index
    %566 = vector.load %arg40[%c0_429, %c14_430, %c0_431] : memref<2x32x128xf32, #tpu.memory_space<vmem>>, vector<1x1x128xf32>
    %567 = vector.shape_cast %566 : vector<1x1x128xf32> to vector<1x128xf32>
    %568 = vector.shape_cast %565 : vector<1x128xf32> to vector<1x1x128xf32>
    tpu.vector_store %arg40[%c0_429, %c14_430, %c0_431], %568 {strides = array<i32>} : memref<2x32x128xf32, #tpu.memory_space<vmem>>, vector<1x1x128xf32>,
    %569 = vector.extract_strided_slice %536 {offsets = [8, 0], sizes = [1, 128], strides = [1, 1]} : vector<16x128xf32> to vector<1x128xf32>
    %c0_432 = arith.constant 0 : index
    %c16_433 = arith.constant 16 : index
    %c0_434 = arith.constant 0 : index
    %570 = vector.load %arg40[%c0_432, %c16_433, %c0_434] : memref<2x32x128xf32, #tpu.memory_space<vmem>>, vector<1x1x128xf32>
    %571 = vector.shape_cast %570 : vector<1x1x128xf32> to vector<1x128xf32>
    %572 = vector.shape_cast %569 : vector<1x128xf32> to vector<1x1x128xf32>
    tpu.vector_store %arg40[%c0_432, %c16_433, %c0_434], %572 {strides = array<i32>} : memref<2x32x128xf32, #tpu.memory_space<vmem>>, vector<1x1x128xf32>,
    %573 = vector.extract_strided_slice %536 {offsets = [9, 0], sizes = [1, 128], strides = [1, 1]} : vector<16x128xf32> to vector<1x128xf32>
    %c0_435 = arith.constant 0 : index
    %c18 = arith.constant 18 : index
    %c0_436 = arith.constant 0 : index
    %574 = vector.load %arg40[%c0_435, %c18, %c0_436] : memref<2x32x128xf32, #tpu.memory_space<vmem>>, vector<1x1x128xf32>
    %575 = vector.shape_cast %574 : vector<1x1x128xf32> to vector<1x128xf32>
    %576 = vector.shape_cast %573 : vector<1x128xf32> to vector<1x1x128xf32>
    tpu.vector_store %arg40[%c0_435, %c18, %c0_436], %576 {strides = array<i32>} : memref<2x32x128xf32, #tpu.memory_space<vmem>>, vector<1x1x128xf32>,
    %577 = vector.extract_strided_slice %536 {offsets = [10, 0], sizes = [1, 128], strides = [1, 1]} : vector<16x128xf32> to vector<1x128xf32>
    %c0_437 = arith.constant 0 : index
    %c20 = arith.constant 20 : index
    %c0_438 = arith.constant 0 : index
    %578 = vector.load %arg40[%c0_437, %c20, %c0_438] : memref<2x32x128xf32, #tpu.memory_space<vmem>>, vector<1x1x128xf32>
    %579 = vector.shape_cast %578 : vector<1x1x128xf32> to vector<1x128xf32>
    %580 = vector.shape_cast %577 : vector<1x128xf32> to vector<1x1x128xf32>
    tpu.vector_store %arg40[%c0_437, %c20, %c0_438], %580 {strides = array<i32>} : memref<2x32x128xf32, #tpu.memory_space<vmem>>, vector<1x1x128xf32>,
    %581 = vector.extract_strided_slice %536 {offsets = [11, 0], sizes = [1, 128], strides = [1, 1]} : vector<16x128xf32> to vector<1x128xf32>
    %c0_439 = arith.constant 0 : index
    %c22 = arith.constant 22 : index
    %c0_440 = arith.constant 0 : index
    %582 = vector.load %arg40[%c0_439, %c22, %c0_440] : memref<2x32x128xf32, #tpu.memory_space<vmem>>, vector<1x1x128xf32>
    %583 = vector.shape_cast %582 : vector<1x1x128xf32> to vector<1x128xf32>
    %584 = vector.shape_cast %581 : vector<1x128xf32> to vector<1x1x128xf32>
    tpu.vector_store %arg40[%c0_439, %c22, %c0_440], %584 {strides = array<i32>} : memref<2x32x128xf32, #tpu.memory_space<vmem>>, vector<1x1x128xf32>,
    %585 = vector.extract_strided_slice %536 {offsets = [12, 0], sizes = [1, 128], strides = [1, 1]} : vector<16x128xf32> to vector<1x128xf32>
    %c0_441 = arith.constant 0 : index
    %c24 = arith.constant 24 : index
    %c0_442 = arith.constant 0 : index
    %586 = vector.load %arg40[%c0_441, %c24, %c0_442] : memref<2x32x128xf32, #tpu.memory_space<vmem>>, vector<1x1x128xf32>
    %587 = vector.shape_cast %586 : vector<1x1x128xf32> to vector<1x128xf32>
    %588 = vector.shape_cast %585 : vector<1x128xf32> to vector<1x1x128xf32>
    tpu.vector_store %arg40[%c0_441, %c24, %c0_442], %588 {strides = array<i32>} : memref<2x32x128xf32, #tpu.memory_space<vmem>>, vector<1x1x128xf32>,
    %589 = vector.extract_strided_slice %536 {offsets = [13, 0], sizes = [1, 128], strides = [1, 1]} : vector<16x128xf32> to vector<1x128xf32>
    %c0_443 = arith.constant 0 : index
    %c26 = arith.constant 26 : index
    %c0_444 = arith.constant 0 : index
    %590 = vector.load %arg40[%c0_443, %c26, %c0_444] : memref<2x32x128xf32, #tpu.memory_space<vmem>>, vector<1x1x128xf32>
    %591 = vector.shape_cast %590 : vector<1x1x128xf32> to vector<1x128xf32>
    %592 = vector.shape_cast %589 : vector<1x128xf32> to vector<1x1x128xf32>
    tpu.vector_store %arg40[%c0_443, %c26, %c0_444], %592 {strides = array<i32>} : memref<2x32x128xf32, #tpu.memory_space<vmem>>, vector<1x1x128xf32>,
    %593 = vector.extract_strided_slice %536 {offsets = [14, 0], sizes = [1, 128], strides = [1, 1]} : vector<16x128xf32> to vector<1x128xf32>
    %c0_445 = arith.constant 0 : index
    %c28 = arith.constant 28 : index
    %c0_446 = arith.constant 0 : index
    %594 = vector.load %arg40[%c0_445, %c28, %c0_446] : memref<2x32x128xf32, #tpu.memory_space<vmem>>, vector<1x1x128xf32>
    %595 = vector.shape_cast %594 : vector<1x1x128xf32> to vector<1x128xf32>
    %596 = vector.shape_cast %593 : vector<1x128xf32> to vector<1x1x128xf32>
    tpu.vector_store %arg40[%c0_445, %c28, %c0_446], %596 {strides = array<i32>} : memref<2x32x128xf32, #tpu.memory_space<vmem>>, vector<1x1x128xf32>,
    %597 = vector.extract_strided_slice %536 {offsets = [15, 0], sizes = [1, 128], strides = [1, 1]} : vector<16x128xf32> to vector<1x128xf32>
    %c0_447 = arith.constant 0 : index
    %c30 = arith.constant 30 : index
    %c0_448 = arith.constant 0 : index
    %598 = vector.load %arg40[%c0_447, %c30, %c0_448] : memref<2x32x128xf32, #tpu.memory_space<vmem>>, vector<1x1x128xf32>
    %599 = vector.shape_cast %598 : vector<1x1x128xf32> to vector<1x128xf32>
    %600 = vector.shape_cast %597 : vector<1x128xf32> to vector<1x1x128xf32>
    tpu.vector_store %arg40[%c0_447, %c30, %c0_448], %600 {strides = array<i32>} : memref<2x32x128xf32, #tpu.memory_space<vmem>>, vector<1x1x128xf32>,
    %601 = math.tanh %513 : vector<16x128xf32>
    %602 = vector.extract_strided_slice %601 {offsets = [0, 0], sizes = [1, 128], strides = [1, 1]} : vector<16x128xf32> to vector<1x128xf32>
    %c0_449 = arith.constant 0 : index
    %c1_450 = arith.constant 1 : index
    %c0_451 = arith.constant 0 : index
    %603 = vector.load %arg40[%c0_449, %c1_450, %c0_451] : memref<2x32x128xf32, #tpu.memory_space<vmem>>, vector<1x1x128xf32>
    %604 = vector.shape_cast %603 : vector<1x1x128xf32> to vector<1x128xf32>
    %605 = vector.shape_cast %602 : vector<1x128xf32> to vector<1x1x128xf32>
    tpu.vector_store %arg40[%c0_449, %c1_450, %c0_451], %605 {strides = array<i32>} : memref<2x32x128xf32, #tpu.memory_space<vmem>>, vector<1x1x128xf32>,
    %606 = vector.extract_strided_slice %601 {offsets = [1, 0], sizes = [1, 128], strides = [1, 1]} : vector<16x128xf32> to vector<1x128xf32>
    %c0_452 = arith.constant 0 : index
    %c3_453 = arith.constant 3 : index
    %c0_454 = arith.constant 0 : index
    %607 = vector.load %arg40[%c0_452, %c3_453, %c0_454] : memref<2x32x128xf32, #tpu.memory_space<vmem>>, vector<1x1x128xf32>
    %608 = vector.shape_cast %607 : vector<1x1x128xf32> to vector<1x128xf32>
    %609 = vector.shape_cast %606 : vector<1x128xf32> to vector<1x1x128xf32>
    tpu.vector_store %arg40[%c0_452, %c3_453, %c0_454], %609 {strides = array<i32>} : memref<2x32x128xf32, #tpu.memory_space<vmem>>, vector<1x1x128xf32>,
    %610 = vector.extract_strided_slice %601 {offsets = [2, 0], sizes = [1, 128], strides = [1, 1]} : vector<16x128xf32> to vector<1x128xf32>
    %c0_455 = arith.constant 0 : index
    %c5_456 = arith.constant 5 : index
    %c0_457 = arith.constant 0 : index
    %611 = vector.load %arg40[%c0_455, %c5_456, %c0_457] : memref<2x32x128xf32, #tpu.memory_space<vmem>>, vector<1x1x128xf32>
    %612 = vector.shape_cast %611 : vector<1x1x128xf32> to vector<1x128xf32>
    %613 = vector.shape_cast %610 : vector<1x128xf32> to vector<1x1x128xf32>
    tpu.vector_store %arg40[%c0_455, %c5_456, %c0_457], %613 {strides = array<i32>} : memref<2x32x128xf32, #tpu.memory_space<vmem>>, vector<1x1x128xf32>,
    %614 = vector.extract_strided_slice %601 {offsets = [3, 0], sizes = [1, 128], strides = [1, 1]} : vector<16x128xf32> to vector<1x128xf32>
    %c0_458 = arith.constant 0 : index
    %c7_459 = arith.constant 7 : index
    %c0_460 = arith.constant 0 : index
    %615 = vector.load %arg40[%c0_458, %c7_459, %c0_460] : memref<2x32x128xf32, #tpu.memory_space<vmem>>, vector<1x1x128xf32>
    %616 = vector.shape_cast %615 : vector<1x1x128xf32> to vector<1x128xf32>
    %617 = vector.shape_cast %614 : vector<1x128xf32> to vector<1x1x128xf32>
    tpu.vector_store %arg40[%c0_458, %c7_459, %c0_460], %617 {strides = array<i32>} : memref<2x32x128xf32, #tpu.memory_space<vmem>>, vector<1x1x128xf32>,
    %618 = vector.extract_strided_slice %601 {offsets = [4, 0], sizes = [1, 128], strides = [1, 1]} : vector<16x128xf32> to vector<1x128xf32>
    %c0_461 = arith.constant 0 : index
    %c9_462 = arith.constant 9 : index
    %c0_463 = arith.constant 0 : index
    %619 = vector.load %arg40[%c0_461, %c9_462, %c0_463] : memref<2x32x128xf32, #tpu.memory_space<vmem>>, vector<1x1x128xf32>
    %620 = vector.shape_cast %619 : vector<1x1x128xf32> to vector<1x128xf32>
    %621 = vector.shape_cast %618 : vector<1x128xf32> to vector<1x1x128xf32>
    tpu.vector_store %arg40[%c0_461, %c9_462, %c0_463], %621 {strides = array<i32>} : memref<2x32x128xf32, #tpu.memory_space<vmem>>, vector<1x1x128xf32>,
    %622 = vector.extract_strided_slice %601 {offsets = [5, 0], sizes = [1, 128], strides = [1, 1]} : vector<16x128xf32> to vector<1x128xf32>
    %c0_464 = arith.constant 0 : index
    %c11_465 = arith.constant 11 : index
    %c0_466 = arith.constant 0 : index
    %623 = vector.load %arg40[%c0_464, %c11_465, %c0_466] : memref<2x32x128xf32, #tpu.memory_space<vmem>>, vector<1x1x128xf32>
    %624 = vector.shape_cast %623 : vector<1x1x128xf32> to vector<1x128xf32>
    %625 = vector.shape_cast %622 : vector<1x128xf32> to vector<1x1x128xf32>
    tpu.vector_store %arg40[%c0_464, %c11_465, %c0_466], %625 {strides = array<i32>} : memref<2x32x128xf32, #tpu.memory_space<vmem>>, vector<1x1x128xf32>,
    %626 = vector.extract_strided_slice %601 {offsets = [6, 0], sizes = [1, 128], strides = [1, 1]} : vector<16x128xf32> to vector<1x128xf32>
    %c0_467 = arith.constant 0 : index
    %c13_468 = arith.constant 13 : index
    %c0_469 = arith.constant 0 : index
    %627 = vector.load %arg40[%c0_467, %c13_468, %c0_469] : memref<2x32x128xf32, #tpu.memory_space<vmem>>, vector<1x1x128xf32>
    %628 = vector.shape_cast %627 : vector<1x1x128xf32> to vector<1x128xf32>
    %629 = vector.shape_cast %626 : vector<1x128xf32> to vector<1x1x128xf32>
    tpu.vector_store %arg40[%c0_467, %c13_468, %c0_469], %629 {strides = array<i32>} : memref<2x32x128xf32, #tpu.memory_space<vmem>>, vector<1x1x128xf32>,
    %630 = vector.extract_strided_slice %601 {offsets = [7, 0], sizes = [1, 128], strides = [1, 1]} : vector<16x128xf32> to vector<1x128xf32>
    %c0_470 = arith.constant 0 : index
    %c15_471 = arith.constant 15 : index
    %c0_472 = arith.constant 0 : index
    %631 = vector.load %arg40[%c0_470, %c15_471, %c0_472] : memref<2x32x128xf32, #tpu.memory_space<vmem>>, vector<1x1x128xf32>
    %632 = vector.shape_cast %631 : vector<1x1x128xf32> to vector<1x128xf32>
    %633 = vector.shape_cast %630 : vector<1x128xf32> to vector<1x1x128xf32>
    tpu.vector_store %arg40[%c0_470, %c15_471, %c0_472], %633 {strides = array<i32>} : memref<2x32x128xf32, #tpu.memory_space<vmem>>, vector<1x1x128xf32>,
    %634 = vector.extract_strided_slice %601 {offsets = [8, 0], sizes = [1, 128], strides = [1, 1]} : vector<16x128xf32> to vector<1x128xf32>
    %c0_473 = arith.constant 0 : index
    %c17 = arith.constant 17 : index
    %c0_474 = arith.constant 0 : index
    %635 = vector.load %arg40[%c0_473, %c17, %c0_474] : memref<2x32x128xf32, #tpu.memory_space<vmem>>, vector<1x1x128xf32>
    %636 = vector.shape_cast %635 : vector<1x1x128xf32> to vector<1x128xf32>
    %637 = vector.shape_cast %634 : vector<1x128xf32> to vector<1x1x128xf32>
    tpu.vector_store %arg40[%c0_473, %c17, %c0_474], %637 {strides = array<i32>} : memref<2x32x128xf32, #tpu.memory_space<vmem>>, vector<1x1x128xf32>,
    %638 = vector.extract_strided_slice %601 {offsets = [9, 0], sizes = [1, 128], strides = [1, 1]} : vector<16x128xf32> to vector<1x128xf32>
    %c0_475 = arith.constant 0 : index
    %c19 = arith.constant 19 : index
    %c0_476 = arith.constant 0 : index
    %639 = vector.load %arg40[%c0_475, %c19, %c0_476] : memref<2x32x128xf32, #tpu.memory_space<vmem>>, vector<1x1x128xf32>
    %640 = vector.shape_cast %639 : vector<1x1x128xf32> to vector<1x128xf32>
    %641 = vector.shape_cast %638 : vector<1x128xf32> to vector<1x1x128xf32>
    tpu.vector_store %arg40[%c0_475, %c19, %c0_476], %641 {strides = array<i32>} : memref<2x32x128xf32, #tpu.memory_space<vmem>>, vector<1x1x128xf32>,
    %642 = vector.extract_strided_slice %601 {offsets = [10, 0], sizes = [1, 128], strides = [1, 1]} : vector<16x128xf32> to vector<1x128xf32>
    %c0_477 = arith.constant 0 : index
    %c21 = arith.constant 21 : index
    %c0_478 = arith.constant 0 : index
    %643 = vector.load %arg40[%c0_477, %c21, %c0_478] : memref<2x32x128xf32, #tpu.memory_space<vmem>>, vector<1x1x128xf32>
    %644 = vector.shape_cast %643 : vector<1x1x128xf32> to vector<1x128xf32>
    %645 = vector.shape_cast %642 : vector<1x128xf32> to vector<1x1x128xf32>
    tpu.vector_store %arg40[%c0_477, %c21, %c0_478], %645 {strides = array<i32>} : memref<2x32x128xf32, #tpu.memory_space<vmem>>, vector<1x1x128xf32>,
    %646 = vector.extract_strided_slice %601 {offsets = [11, 0], sizes = [1, 128], strides = [1, 1]} : vector<16x128xf32> to vector<1x128xf32>
    %c0_479 = arith.constant 0 : index
    %c23 = arith.constant 23 : index
    %c0_480 = arith.constant 0 : index
    %647 = vector.load %arg40[%c0_479, %c23, %c0_480] : memref<2x32x128xf32, #tpu.memory_space<vmem>>, vector<1x1x128xf32>
    %648 = vector.shape_cast %647 : vector<1x1x128xf32> to vector<1x128xf32>
    %649 = vector.shape_cast %646 : vector<1x128xf32> to vector<1x1x128xf32>
    tpu.vector_store %arg40[%c0_479, %c23, %c0_480], %649 {strides = array<i32>} : memref<2x32x128xf32, #tpu.memory_space<vmem>>, vector<1x1x128xf32>,
    %650 = vector.extract_strided_slice %601 {offsets = [12, 0], sizes = [1, 128], strides = [1, 1]} : vector<16x128xf32> to vector<1x128xf32>
    %c0_481 = arith.constant 0 : index
    %c25 = arith.constant 25 : index
    %c0_482 = arith.constant 0 : index
    %651 = vector.load %arg40[%c0_481, %c25, %c0_482] : memref<2x32x128xf32, #tpu.memory_space<vmem>>, vector<1x1x128xf32>
    %652 = vector.shape_cast %651 : vector<1x1x128xf32> to vector<1x128xf32>
    %653 = vector.shape_cast %650 : vector<1x128xf32> to vector<1x1x128xf32>
    tpu.vector_store %arg40[%c0_481, %c25, %c0_482], %653 {strides = array<i32>} : memref<2x32x128xf32, #tpu.memory_space<vmem>>, vector<1x1x128xf32>,
    %654 = vector.extract_strided_slice %601 {offsets = [13, 0], sizes = [1, 128], strides = [1, 1]} : vector<16x128xf32> to vector<1x128xf32>
    %c0_483 = arith.constant 0 : index
    %c27 = arith.constant 27 : index
    %c0_484 = arith.constant 0 : index
    %655 = vector.load %arg40[%c0_483, %c27, %c0_484] : memref<2x32x128xf32, #tpu.memory_space<vmem>>, vector<1x1x128xf32>
    %656 = vector.shape_cast %655 : vector<1x1x128xf32> to vector<1x128xf32>
    %657 = vector.shape_cast %654 : vector<1x128xf32> to vector<1x1x128xf32>
    tpu.vector_store %arg40[%c0_483, %c27, %c0_484], %657 {strides = array<i32>} : memref<2x32x128xf32, #tpu.memory_space<vmem>>, vector<1x1x128xf32>,
    %658 = vector.extract_strided_slice %601 {offsets = [14, 0], sizes = [1, 128], strides = [1, 1]} : vector<16x128xf32> to vector<1x128xf32>
    %c0_485 = arith.constant 0 : index
    %c29 = arith.constant 29 : index
    %c0_486 = arith.constant 0 : index
    %659 = vector.load %arg40[%c0_485, %c29, %c0_486] : memref<2x32x128xf32, #tpu.memory_space<vmem>>, vector<1x1x128xf32>
    %660 = vector.shape_cast %659 : vector<1x1x128xf32> to vector<1x128xf32>
    %661 = vector.shape_cast %658 : vector<1x128xf32> to vector<1x1x128xf32>
    tpu.vector_store %arg40[%c0_485, %c29, %c0_486], %661 {strides = array<i32>} : memref<2x32x128xf32, #tpu.memory_space<vmem>>, vector<1x1x128xf32>,
    %662 = vector.extract_strided_slice %601 {offsets = [15, 0], sizes = [1, 128], strides = [1, 1]} : vector<16x128xf32> to vector<1x128xf32>
    %c0_487 = arith.constant 0 : index
    %c31 = arith.constant 31 : index
    %c0_488 = arith.constant 0 : index
    %663 = vector.load %arg40[%c0_487, %c31, %c0_488] : memref<2x32x128xf32, #tpu.memory_space<vmem>>, vector<1x1x128xf32>
    %664 = vector.shape_cast %663 : vector<1x1x128xf32> to vector<1x128xf32>
    %665 = vector.shape_cast %662 : vector<1x128xf32> to vector<1x1x128xf32>
    tpu.vector_store %arg40[%c0_487, %c31, %c0_488], %665 {strides = array<i32>} : memref<2x32x128xf32, #tpu.memory_space<vmem>>, vector<1x1x128xf32>,
    %666 = math.tanh %524 : vector<16x128xf32>
    %667 = vector.extract_strided_slice %666 {offsets = [0, 0], sizes = [1, 128], strides = [1, 1]} : vector<16x128xf32> to vector<1x128xf32>
    %c1_489 = arith.constant 1 : index
    %c0_490 = arith.constant 0 : index
    %c0_491 = arith.constant 0 : index
    %668 = vector.load %arg40[%c1_489, %c0_490, %c0_491] : memref<2x32x128xf32, #tpu.memory_space<vmem>>, vector<1x1x128xf32>
    %669 = vector.shape_cast %668 : vector<1x1x128xf32> to vector<1x128xf32>
    %670 = vector.shape_cast %667 : vector<1x128xf32> to vector<1x1x128xf32>
    tpu.vector_store %arg40[%c1_489, %c0_490, %c0_491], %670 {strides = array<i32>} : memref<2x32x128xf32, #tpu.memory_space<vmem>>, vector<1x1x128xf32>,
    %671 = vector.extract_strided_slice %666 {offsets = [1, 0], sizes = [1, 128], strides = [1, 1]} : vector<16x128xf32> to vector<1x128xf32>
    %c1_492 = arith.constant 1 : index
    %c2_493 = arith.constant 2 : index
    %c0_494 = arith.constant 0 : index
    %672 = vector.load %arg40[%c1_492, %c2_493, %c0_494] : memref<2x32x128xf32, #tpu.memory_space<vmem>>, vector<1x1x128xf32>
    %673 = vector.shape_cast %672 : vector<1x1x128xf32> to vector<1x128xf32>
    %674 = vector.shape_cast %671 : vector<1x128xf32> to vector<1x1x128xf32>
    tpu.vector_store %arg40[%c1_492, %c2_493, %c0_494], %674 {strides = array<i32>} : memref<2x32x128xf32, #tpu.memory_space<vmem>>, vector<1x1x128xf32>,
    %675 = vector.extract_strided_slice %666 {offsets = [2, 0], sizes = [1, 128], strides = [1, 1]} : vector<16x128xf32> to vector<1x128xf32>
    %c1_495 = arith.constant 1 : index
    %c4_496 = arith.constant 4 : index
    %c0_497 = arith.constant 0 : index
    %676 = vector.load %arg40[%c1_495, %c4_496, %c0_497] : memref<2x32x128xf32, #tpu.memory_space<vmem>>, vector<1x1x128xf32>
    %677 = vector.shape_cast %676 : vector<1x1x128xf32> to vector<1x128xf32>
    %678 = vector.shape_cast %675 : vector<1x128xf32> to vector<1x1x128xf32>
    tpu.vector_store %arg40[%c1_495, %c4_496, %c0_497], %678 {strides = array<i32>} : memref<2x32x128xf32, #tpu.memory_space<vmem>>, vector<1x1x128xf32>,
    %679 = vector.extract_strided_slice %666 {offsets = [3, 0], sizes = [1, 128], strides = [1, 1]} : vector<16x128xf32> to vector<1x128xf32>
    %c1_498 = arith.constant 1 : index
    %c6_499 = arith.constant 6 : index
    %c0_500 = arith.constant 0 : index
    %680 = vector.load %arg40[%c1_498, %c6_499, %c0_500] : memref<2x32x128xf32, #tpu.memory_space<vmem>>, vector<1x1x128xf32>
    %681 = vector.shape_cast %680 : vector<1x1x128xf32> to vector<1x128xf32>
    %682 = vector.shape_cast %679 : vector<1x128xf32> to vector<1x1x128xf32>
    tpu.vector_store %arg40[%c1_498, %c6_499, %c0_500], %682 {strides = array<i32>} : memref<2x32x128xf32, #tpu.memory_space<vmem>>, vector<1x1x128xf32>,
    %683 = vector.extract_strided_slice %666 {offsets = [4, 0], sizes = [1, 128], strides = [1, 1]} : vector<16x128xf32> to vector<1x128xf32>
    %c1_501 = arith.constant 1 : index
    %c8_502 = arith.constant 8 : index
    %c0_503 = arith.constant 0 : index
    %684 = vector.load %arg40[%c1_501, %c8_502, %c0_503] : memref<2x32x128xf32, #tpu.memory_space<vmem>>, vector<1x1x128xf32>
    %685 = vector.shape_cast %684 : vector<1x1x128xf32> to vector<1x128xf32>
    %686 = vector.shape_cast %683 : vector<1x128xf32> to vector<1x1x128xf32>
    tpu.vector_store %arg40[%c1_501, %c8_502, %c0_503], %686 {strides = array<i32>} : memref<2x32x128xf32, #tpu.memory_space<vmem>>, vector<1x1x128xf32>,
    %687 = vector.extract_strided_slice %666 {offsets = [5, 0], sizes = [1, 128], strides = [1, 1]} : vector<16x128xf32> to vector<1x128xf32>
    %c1_504 = arith.constant 1 : index
    %c10_505 = arith.constant 10 : index
    %c0_506 = arith.constant 0 : index
    %688 = vector.load %arg40[%c1_504, %c10_505, %c0_506] : memref<2x32x128xf32, #tpu.memory_space<vmem>>, vector<1x1x128xf32>
    %689 = vector.shape_cast %688 : vector<1x1x128xf32> to vector<1x128xf32>
    %690 = vector.shape_cast %687 : vector<1x128xf32> to vector<1x1x128xf32>
    tpu.vector_store %arg40[%c1_504, %c10_505, %c0_506], %690 {strides = array<i32>} : memref<2x32x128xf32, #tpu.memory_space<vmem>>, vector<1x1x128xf32>,
    %691 = vector.extract_strided_slice %666 {offsets = [6, 0], sizes = [1, 128], strides = [1, 1]} : vector<16x128xf32> to vector<1x128xf32>
    %c1_507 = arith.constant 1 : index
    %c12_508 = arith.constant 12 : index
    %c0_509 = arith.constant 0 : index
    %692 = vector.load %arg40[%c1_507, %c12_508, %c0_509] : memref<2x32x128xf32, #tpu.memory_space<vmem>>, vector<1x1x128xf32>
    %693 = vector.shape_cast %692 : vector<1x1x128xf32> to vector<1x128xf32>
    %694 = vector.shape_cast %691 : vector<1x128xf32> to vector<1x1x128xf32>
    tpu.vector_store %arg40[%c1_507, %c12_508, %c0_509], %694 {strides = array<i32>} : memref<2x32x128xf32, #tpu.memory_space<vmem>>, vector<1x1x128xf32>,
    %695 = vector.extract_strided_slice %666 {offsets = [7, 0], sizes = [1, 128], strides = [1, 1]} : vector<16x128xf32> to vector<1x128xf32>
    %c1_510 = arith.constant 1 : index
    %c14_511 = arith.constant 14 : index
    %c0_512 = arith.constant 0 : index
    %696 = vector.load %arg40[%c1_510, %c14_511, %c0_512] : memref<2x32x128xf32, #tpu.memory_space<vmem>>, vector<1x1x128xf32>
    %697 = vector.shape_cast %696 : vector<1x1x128xf32> to vector<1x128xf32>
    %698 = vector.shape_cast %695 : vector<1x128xf32> to vector<1x1x128xf32>
    tpu.vector_store %arg40[%c1_510, %c14_511, %c0_512], %698 {strides = array<i32>} : memref<2x32x128xf32, #tpu.memory_space<vmem>>, vector<1x1x128xf32>,
    %699 = vector.extract_strided_slice %666 {offsets = [8, 0], sizes = [1, 128], strides = [1, 1]} : vector<16x128xf32> to vector<1x128xf32>
    %c1_513 = arith.constant 1 : index
    %c16_514 = arith.constant 16 : index
    %c0_515 = arith.constant 0 : index
    %700 = vector.load %arg40[%c1_513, %c16_514, %c0_515] : memref<2x32x128xf32, #tpu.memory_space<vmem>>, vector<1x1x128xf32>
    %701 = vector.shape_cast %700 : vector<1x1x128xf32> to vector<1x128xf32>
    %702 = vector.shape_cast %699 : vector<1x128xf32> to vector<1x1x128xf32>
    tpu.vector_store %arg40[%c1_513, %c16_514, %c0_515], %702 {strides = array<i32>} : memref<2x32x128xf32, #tpu.memory_space<vmem>>, vector<1x1x128xf32>,
    %703 = vector.extract_strided_slice %666 {offsets = [9, 0], sizes = [1, 128], strides = [1, 1]} : vector<16x128xf32> to vector<1x128xf32>
    %c1_516 = arith.constant 1 : index
    %c18_517 = arith.constant 18 : index
    %c0_518 = arith.constant 0 : index
    %704 = vector.load %arg40[%c1_516, %c18_517, %c0_518] : memref<2x32x128xf32, #tpu.memory_space<vmem>>, vector<1x1x128xf32>
    %705 = vector.shape_cast %704 : vector<1x1x128xf32> to vector<1x128xf32>
    %706 = vector.shape_cast %703 : vector<1x128xf32> to vector<1x1x128xf32>
    tpu.vector_store %arg40[%c1_516, %c18_517, %c0_518], %706 {strides = array<i32>} : memref<2x32x128xf32, #tpu.memory_space<vmem>>, vector<1x1x128xf32>,
    %707 = vector.extract_strided_slice %666 {offsets = [10, 0], sizes = [1, 128], strides = [1, 1]} : vector<16x128xf32> to vector<1x128xf32>
    %c1_519 = arith.constant 1 : index
    %c20_520 = arith.constant 20 : index
    %c0_521 = arith.constant 0 : index
    %708 = vector.load %arg40[%c1_519, %c20_520, %c0_521] : memref<2x32x128xf32, #tpu.memory_space<vmem>>, vector<1x1x128xf32>
    %709 = vector.shape_cast %708 : vector<1x1x128xf32> to vector<1x128xf32>
    %710 = vector.shape_cast %707 : vector<1x128xf32> to vector<1x1x128xf32>
    tpu.vector_store %arg40[%c1_519, %c20_520, %c0_521], %710 {strides = array<i32>} : memref<2x32x128xf32, #tpu.memory_space<vmem>>, vector<1x1x128xf32>,
    %711 = vector.extract_strided_slice %666 {offsets = [11, 0], sizes = [1, 128], strides = [1, 1]} : vector<16x128xf32> to vector<1x128xf32>
    %c1_522 = arith.constant 1 : index
    %c22_523 = arith.constant 22 : index
    %c0_524 = arith.constant 0 : index
    %712 = vector.load %arg40[%c1_522, %c22_523, %c0_524] : memref<2x32x128xf32, #tpu.memory_space<vmem>>, vector<1x1x128xf32>
    %713 = vector.shape_cast %712 : vector<1x1x128xf32> to vector<1x128xf32>
    %714 = vector.shape_cast %711 : vector<1x128xf32> to vector<1x1x128xf32>
    tpu.vector_store %arg40[%c1_522, %c22_523, %c0_524], %714 {strides = array<i32>} : memref<2x32x128xf32, #tpu.memory_space<vmem>>, vector<1x1x128xf32>,
    %715 = vector.extract_strided_slice %666 {offsets = [12, 0], sizes = [1, 128], strides = [1, 1]} : vector<16x128xf32> to vector<1x128xf32>
    %c1_525 = arith.constant 1 : index
    %c24_526 = arith.constant 24 : index
    %c0_527 = arith.constant 0 : index
    %716 = vector.load %arg40[%c1_525, %c24_526, %c0_527] : memref<2x32x128xf32, #tpu.memory_space<vmem>>, vector<1x1x128xf32>
    %717 = vector.shape_cast %716 : vector<1x1x128xf32> to vector<1x128xf32>
    %718 = vector.shape_cast %715 : vector<1x128xf32> to vector<1x1x128xf32>
    tpu.vector_store %arg40[%c1_525, %c24_526, %c0_527], %718 {strides = array<i32>} : memref<2x32x128xf32, #tpu.memory_space<vmem>>, vector<1x1x128xf32>,
    %719 = vector.extract_strided_slice %666 {offsets = [13, 0], sizes = [1, 128], strides = [1, 1]} : vector<16x128xf32> to vector<1x128xf32>
    %c1_528 = arith.constant 1 : index
    %c26_529 = arith.constant 26 : index
    %c0_530 = arith.constant 0 : index
    %720 = vector.load %arg40[%c1_528, %c26_529, %c0_530] : memref<2x32x128xf32, #tpu.memory_space<vmem>>, vector<1x1x128xf32>
    %721 = vector.shape_cast %720 : vector<1x1x128xf32> to vector<1x128xf32>
    %722 = vector.shape_cast %719 : vector<1x128xf32> to vector<1x1x128xf32>
    tpu.vector_store %arg40[%c1_528, %c26_529, %c0_530], %722 {strides = array<i32>} : memref<2x32x128xf32, #tpu.memory_space<vmem>>, vector<1x1x128xf32>,
    %723 = vector.extract_strided_slice %666 {offsets = [14, 0], sizes = [1, 128], strides = [1, 1]} : vector<16x128xf32> to vector<1x128xf32>
    %c1_531 = arith.constant 1 : index
    %c28_532 = arith.constant 28 : index
    %c0_533 = arith.constant 0 : index
    %724 = vector.load %arg40[%c1_531, %c28_532, %c0_533] : memref<2x32x128xf32, #tpu.memory_space<vmem>>, vector<1x1x128xf32>
    %725 = vector.shape_cast %724 : vector<1x1x128xf32> to vector<1x128xf32>
    %726 = vector.shape_cast %723 : vector<1x128xf32> to vector<1x1x128xf32>
    tpu.vector_store %arg40[%c1_531, %c28_532, %c0_533], %726 {strides = array<i32>} : memref<2x32x128xf32, #tpu.memory_space<vmem>>, vector<1x1x128xf32>,
    %727 = vector.extract_strided_slice %666 {offsets = [15, 0], sizes = [1, 128], strides = [1, 1]} : vector<16x128xf32> to vector<1x128xf32>
    %c1_534 = arith.constant 1 : index
    %c30_535 = arith.constant 30 : index
    %c0_536 = arith.constant 0 : index
    %728 = vector.load %arg40[%c1_534, %c30_535, %c0_536] : memref<2x32x128xf32, #tpu.memory_space<vmem>>, vector<1x1x128xf32>
    %729 = vector.shape_cast %728 : vector<1x1x128xf32> to vector<1x128xf32>
    %730 = vector.shape_cast %727 : vector<1x128xf32> to vector<1x1x128xf32>
    tpu.vector_store %arg40[%c1_534, %c30_535, %c0_536], %730 {strides = array<i32>} : memref<2x32x128xf32, #tpu.memory_space<vmem>>, vector<1x1x128xf32>,
    %731 = math.tanh %535 : vector<16x128xf32>
    %732 = vector.extract_strided_slice %731 {offsets = [0, 0], sizes = [1, 128], strides = [1, 1]} : vector<16x128xf32> to vector<1x128xf32>
    %c1_537 = arith.constant 1 : index
    %c1_538 = arith.constant 1 : index
    %c0_539 = arith.constant 0 : index
    %733 = vector.load %arg40[%c1_537, %c1_538, %c0_539] : memref<2x32x128xf32, #tpu.memory_space<vmem>>, vector<1x1x128xf32>
    %734 = vector.shape_cast %733 : vector<1x1x128xf32> to vector<1x128xf32>
    %735 = vector.shape_cast %732 : vector<1x128xf32> to vector<1x1x128xf32>
    tpu.vector_store %arg40[%c1_537, %c1_538, %c0_539], %735 {strides = array<i32>} : memref<2x32x128xf32, #tpu.memory_space<vmem>>, vector<1x1x128xf32>,
    %736 = vector.extract_strided_slice %731 {offsets = [1, 0], sizes = [1, 128], strides = [1, 1]} : vector<16x128xf32> to vector<1x128xf32>
    %c1_540 = arith.constant 1 : index
    %c3_541 = arith.constant 3 : index
    %c0_542 = arith.constant 0 : index
    %737 = vector.load %arg40[%c1_540, %c3_541, %c0_542] : memref<2x32x128xf32, #tpu.memory_space<vmem>>, vector<1x1x128xf32>
    %738 = vector.shape_cast %737 : vector<1x1x128xf32> to vector<1x128xf32>
    %739 = vector.shape_cast %736 : vector<1x128xf32> to vector<1x1x128xf32>
    tpu.vector_store %arg40[%c1_540, %c3_541, %c0_542], %739 {strides = array<i32>} : memref<2x32x128xf32, #tpu.memory_space<vmem>>, vector<1x1x128xf32>,
    %740 = vector.extract_strided_slice %731 {offsets = [2, 0], sizes = [1, 128], strides = [1, 1]} : vector<16x128xf32> to vector<1x128xf32>
    %c1_543 = arith.constant 1 : index
    %c5_544 = arith.constant 5 : index
    %c0_545 = arith.constant 0 : index
    %741 = vector.load %arg40[%c1_543, %c5_544, %c0_545] : memref<2x32x128xf32, #tpu.memory_space<vmem>>, vector<1x1x128xf32>
    %742 = vector.shape_cast %741 : vector<1x1x128xf32> to vector<1x128xf32>
    %743 = vector.shape_cast %740 : vector<1x128xf32> to vector<1x1x128xf32>
    tpu.vector_store %arg40[%c1_543, %c5_544, %c0_545], %743 {strides = array<i32>} : memref<2x32x128xf32, #tpu.memory_space<vmem>>, vector<1x1x128xf32>,
    %744 = vector.extract_strided_slice %731 {offsets = [3, 0], sizes = [1, 128], strides = [1, 1]} : vector<16x128xf32> to vector<1x128xf32>
    %c1_546 = arith.constant 1 : index
    %c7_547 = arith.constant 7 : index
    %c0_548 = arith.constant 0 : index
    %745 = vector.load %arg40[%c1_546, %c7_547, %c0_548] : memref<2x32x128xf32, #tpu.memory_space<vmem>>, vector<1x1x128xf32>
    %746 = vector.shape_cast %745 : vector<1x1x128xf32> to vector<1x128xf32>
    %747 = vector.shape_cast %744 : vector<1x128xf32> to vector<1x1x128xf32>
    tpu.vector_store %arg40[%c1_546, %c7_547, %c0_548], %747 {strides = array<i32>} : memref<2x32x128xf32, #tpu.memory_space<vmem>>, vector<1x1x128xf32>,
    %748 = vector.extract_strided_slice %731 {offsets = [4, 0], sizes = [1, 128], strides = [1, 1]} : vector<16x128xf32> to vector<1x128xf32>
    %c1_549 = arith.constant 1 : index
    %c9_550 = arith.constant 9 : index
    %c0_551 = arith.constant 0 : index
    %749 = vector.load %arg40[%c1_549, %c9_550, %c0_551] : memref<2x32x128xf32, #tpu.memory_space<vmem>>, vector<1x1x128xf32>
    %750 = vector.shape_cast %749 : vector<1x1x128xf32> to vector<1x128xf32>
    %751 = vector.shape_cast %748 : vector<1x128xf32> to vector<1x1x128xf32>
    tpu.vector_store %arg40[%c1_549, %c9_550, %c0_551], %751 {strides = array<i32>} : memref<2x32x128xf32, #tpu.memory_space<vmem>>, vector<1x1x128xf32>,
    %752 = vector.extract_strided_slice %731 {offsets = [5, 0], sizes = [1, 128], strides = [1, 1]} : vector<16x128xf32> to vector<1x128xf32>
    %c1_552 = arith.constant 1 : index
    %c11_553 = arith.constant 11 : index
    %c0_554 = arith.constant 0 : index
    %753 = vector.load %arg40[%c1_552, %c11_553, %c0_554] : memref<2x32x128xf32, #tpu.memory_space<vmem>>, vector<1x1x128xf32>
    %754 = vector.shape_cast %753 : vector<1x1x128xf32> to vector<1x128xf32>
    %755 = vector.shape_cast %752 : vector<1x128xf32> to vector<1x1x128xf32>
    tpu.vector_store %arg40[%c1_552, %c11_553, %c0_554], %755 {strides = array<i32>} : memref<2x32x128xf32, #tpu.memory_space<vmem>>, vector<1x1x128xf32>,
    %756 = vector.extract_strided_slice %731 {offsets = [6, 0], sizes = [1, 128], strides = [1, 1]} : vector<16x128xf32> to vector<1x128xf32>
    %c1_555 = arith.constant 1 : index
    %c13_556 = arith.constant 13 : index
    %c0_557 = arith.constant 0 : index
    %757 = vector.load %arg40[%c1_555, %c13_556, %c0_557] : memref<2x32x128xf32, #tpu.memory_space<vmem>>, vector<1x1x128xf32>
    %758 = vector.shape_cast %757 : vector<1x1x128xf32> to vector<1x128xf32>
    %759 = vector.shape_cast %756 : vector<1x128xf32> to vector<1x1x128xf32>
    tpu.vector_store %arg40[%c1_555, %c13_556, %c0_557], %759 {strides = array<i32>} : memref<2x32x128xf32, #tpu.memory_space<vmem>>, vector<1x1x128xf32>,
    %760 = vector.extract_strided_slice %731 {offsets = [7, 0], sizes = [1, 128], strides = [1, 1]} : vector<16x128xf32> to vector<1x128xf32>
    %c1_558 = arith.constant 1 : index
    %c15_559 = arith.constant 15 : index
    %c0_560 = arith.constant 0 : index
    %761 = vector.load %arg40[%c1_558, %c15_559, %c0_560] : memref<2x32x128xf32, #tpu.memory_space<vmem>>, vector<1x1x128xf32>
    %762 = vector.shape_cast %761 : vector<1x1x128xf32> to vector<1x128xf32>
    %763 = vector.shape_cast %760 : vector<1x128xf32> to vector<1x1x128xf32>
    tpu.vector_store %arg40[%c1_558, %c15_559, %c0_560], %763 {strides = array<i32>} : memref<2x32x128xf32, #tpu.memory_space<vmem>>, vector<1x1x128xf32>,
    %764 = vector.extract_strided_slice %731 {offsets = [8, 0], sizes = [1, 128], strides = [1, 1]} : vector<16x128xf32> to vector<1x128xf32>
    %c1_561 = arith.constant 1 : index
    %c17_562 = arith.constant 17 : index
    %c0_563 = arith.constant 0 : index
    %765 = vector.load %arg40[%c1_561, %c17_562, %c0_563] : memref<2x32x128xf32, #tpu.memory_space<vmem>>, vector<1x1x128xf32>
    %766 = vector.shape_cast %765 : vector<1x1x128xf32> to vector<1x128xf32>
    %767 = vector.shape_cast %764 : vector<1x128xf32> to vector<1x1x128xf32>
    tpu.vector_store %arg40[%c1_561, %c17_562, %c0_563], %767 {strides = array<i32>} : memref<2x32x128xf32, #tpu.memory_space<vmem>>, vector<1x1x128xf32>,
    %768 = vector.extract_strided_slice %731 {offsets = [9, 0], sizes = [1, 128], strides = [1, 1]} : vector<16x128xf32> to vector<1x128xf32>
    %c1_564 = arith.constant 1 : index
    %c19_565 = arith.constant 19 : index
    %c0_566 = arith.constant 0 : index
    %769 = vector.load %arg40[%c1_564, %c19_565, %c0_566] : memref<2x32x128xf32, #tpu.memory_space<vmem>>, vector<1x1x128xf32>
    %770 = vector.shape_cast %769 : vector<1x1x128xf32> to vector<1x128xf32>
    %771 = vector.shape_cast %768 : vector<1x128xf32> to vector<1x1x128xf32>
    tpu.vector_store %arg40[%c1_564, %c19_565, %c0_566], %771 {strides = array<i32>} : memref<2x32x128xf32, #tpu.memory_space<vmem>>, vector<1x1x128xf32>,
    %772 = vector.extract_strided_slice %731 {offsets = [10, 0], sizes = [1, 128], strides = [1, 1]} : vector<16x128xf32> to vector<1x128xf32>
    %c1_567 = arith.constant 1 : index
    %c21_568 = arith.constant 21 : index
    %c0_569 = arith.constant 0 : index
    %773 = vector.load %arg40[%c1_567, %c21_568, %c0_569] : memref<2x32x128xf32, #tpu.memory_space<vmem>>, vector<1x1x128xf32>
    %774 = vector.shape_cast %773 : vector<1x1x128xf32> to vector<1x128xf32>
    %775 = vector.shape_cast %772 : vector<1x128xf32> to vector<1x1x128xf32>
    tpu.vector_store %arg40[%c1_567, %c21_568, %c0_569], %775 {strides = array<i32>} : memref<2x32x128xf32, #tpu.memory_space<vmem>>, vector<1x1x128xf32>,
    %776 = vector.extract_strided_slice %731 {offsets = [11, 0], sizes = [1, 128], strides = [1, 1]} : vector<16x128xf32> to vector<1x128xf32>
    %c1_570 = arith.constant 1 : index
    %c23_571 = arith.constant 23 : index
    %c0_572 = arith.constant 0 : index
    %777 = vector.load %arg40[%c1_570, %c23_571, %c0_572] : memref<2x32x128xf32, #tpu.memory_space<vmem>>, vector<1x1x128xf32>
    %778 = vector.shape_cast %777 : vector<1x1x128xf32> to vector<1x128xf32>
    %779 = vector.shape_cast %776 : vector<1x128xf32> to vector<1x1x128xf32>
    tpu.vector_store %arg40[%c1_570, %c23_571, %c0_572], %779 {strides = array<i32>} : memref<2x32x128xf32, #tpu.memory_space<vmem>>, vector<1x1x128xf32>,
    %780 = vector.extract_strided_slice %731 {offsets = [12, 0], sizes = [1, 128], strides = [1, 1]} : vector<16x128xf32> to vector<1x128xf32>
    %c1_573 = arith.constant 1 : index
    %c25_574 = arith.constant 25 : index
    %c0_575 = arith.constant 0 : index
    %781 = vector.load %arg40[%c1_573, %c25_574, %c0_575] : memref<2x32x128xf32, #tpu.memory_space<vmem>>, vector<1x1x128xf32>
    %782 = vector.shape_cast %781 : vector<1x1x128xf32> to vector<1x128xf32>
    %783 = vector.shape_cast %780 : vector<1x128xf32> to vector<1x1x128xf32>
    tpu.vector_store %arg40[%c1_573, %c25_574, %c0_575], %783 {strides = array<i32>} : memref<2x32x128xf32, #tpu.memory_space<vmem>>, vector<1x1x128xf32>,
    %784 = vector.extract_strided_slice %731 {offsets = [13, 0], sizes = [1, 128], strides = [1, 1]} : vector<16x128xf32> to vector<1x128xf32>
    %c1_576 = arith.constant 1 : index
    %c27_577 = arith.constant 27 : index
    %c0_578 = arith.constant 0 : index
    %785 = vector.load %arg40[%c1_576, %c27_577, %c0_578] : memref<2x32x128xf32, #tpu.memory_space<vmem>>, vector<1x1x128xf32>
    %786 = vector.shape_cast %785 : vector<1x1x128xf32> to vector<1x128xf32>
    %787 = vector.shape_cast %784 : vector<1x128xf32> to vector<1x1x128xf32>
    tpu.vector_store %arg40[%c1_576, %c27_577, %c0_578], %787 {strides = array<i32>} : memref<2x32x128xf32, #tpu.memory_space<vmem>>, vector<1x1x128xf32>,
    %788 = vector.extract_strided_slice %731 {offsets = [14, 0], sizes = [1, 128], strides = [1, 1]} : vector<16x128xf32> to vector<1x128xf32>
    %c1_579 = arith.constant 1 : index
    %c29_580 = arith.constant 29 : index
    %c0_581 = arith.constant 0 : index
    %789 = vector.load %arg40[%c1_579, %c29_580, %c0_581] : memref<2x32x128xf32, #tpu.memory_space<vmem>>, vector<1x1x128xf32>
    %790 = vector.shape_cast %789 : vector<1x1x128xf32> to vector<1x128xf32>
    %791 = vector.shape_cast %788 : vector<1x128xf32> to vector<1x1x128xf32>
    tpu.vector_store %arg40[%c1_579, %c29_580, %c0_581], %791 {strides = array<i32>} : memref<2x32x128xf32, #tpu.memory_space<vmem>>, vector<1x1x128xf32>,
    %792 = vector.extract_strided_slice %731 {offsets = [15, 0], sizes = [1, 128], strides = [1, 1]} : vector<16x128xf32> to vector<1x128xf32>
    %c1_582 = arith.constant 1 : index
    %c31_583 = arith.constant 31 : index
    %c0_584 = arith.constant 0 : index
    %793 = vector.load %arg40[%c1_582, %c31_583, %c0_584] : memref<2x32x128xf32, #tpu.memory_space<vmem>>, vector<1x1x128xf32>
    %794 = vector.shape_cast %793 : vector<1x1x128xf32> to vector<1x128xf32>
    %795 = vector.shape_cast %792 : vector<1x128xf32> to vector<1x1x128xf32>
    tpu.vector_store %arg40[%c1_582, %c31_583, %c0_584], %795 {strides = array<i32>} : memref<2x32x128xf32, #tpu.memory_space<vmem>>, vector<1x1x128xf32>,
    return
  }
}

</mosaic_0001>

<bundles_post_ra>
// kernel: psgan_generator_forward.1
= control target key start
LH: loop header
LB: loop body
LE: loop exit
PB: predicated region body
PF: predicated region fallthrough
CT: control target
= control target key end

     0   :  { %v13246_v0 = vmov 0.0   ;;  %s13247_s3 = smov 6   ;;  %vm13248_vm0 = vmmov 0   ;;  %s13249_s7 = smov 2   ;;  %v17046_v1 = vmov 0.0|0.0   ;;  %vm175_vm1 = vcmask 64512   ;;  %s17021_s0 = inlined_call_operand.smem [shape: u32[41], index: -1, kind: input, shape index: {}] }
   0x1   :  { %10594 = vmatprep.subr.mxu0 %v13246_v0  ;;  %1144 = vst [vmem:[#allocation3] sm:$0xff] %v13246_v0  ;;  %1145 = vst [vmem:[#allocation3 + $0x8] sm:$0xff] %v13246_v0  ;;  %s9418_s6 = sld [smem:[%s17021_s0 + %s13247_s3]]   ;;  %10596 = vmatprep.mubr.msk.f32.mxu0 %vm13248_vm0, %v13246_v0  ;;  %s13251_s11 = smov 8   ;;  %vm261_vm2 = vcmask 261120   ;;  %vm422_vm3 = vcmask 1043456   ;;  %vm418_vm4 = vcmask 31744  }
   0x2   :  { %1148 = vst [vmem:[#allocation3 + $0x18] sm:$0x3] %v13246_v0  ;;  %1149 = vst [vmem:[#allocation3 + $0x20] sm:$0x3] %v13246_v0  ;;  %s9414_s10 = sld [smem:[%s17021_s0 + %s13249_s7]]   ;;  %11223 = vmatprep.subr.bf16.mxu1 %v17046_v1  ;;  %10607 = vmatprep.mubr.msk.f32.mxu1 %vm13248_vm0, %v13246_v0  ;;  %s13252_s15 = smov 10   ;;  %vm651_vm5 = vcmask 1041408  }
   0x3   :  { %1152 = vst [vmem:[#allocation3 + $0x30] sm:$0xff] %v13246_v0  ;;  %1153 = vst [vmem:[#allocation3 + $0x38] sm:$0xff] %v13246_v0  ;;  %s9420_s14 = sld [smem:[%s17021_s0 + %s13251_s11]]   ;;  %s13253_s19 = smov 7   ;;  %vm647_vm6 = vcmask 15360   ;;  %vm986_vm7 = vcmask 130048  }
   0x4   :  { %1155 = vst [vmem:[#allocation3 + $0x48] sm:$0x3] %v13246_v0  ;;  %1156 = vst [vmem:[#allocation3 + $0x50] sm:$0x3] %v13246_v0  ;;  %s9422_s18 = sld [smem:[%s17021_s0 + %s13252_s15]]   ;;  %s13254_s23 = smov 15  }
   0x5   :  { %3600 = vst [vmem:[#allocation4] sm:$0xff] %v13246_v0  ;;  %3601 = vst [vmem:[#allocation4 + $0x8] sm:$0xff] %v13246_v0  ;;  %s9419_s22 = sld [smem:[%s17021_s0 + %s13253_s19]]   ;;  %s13255_s27 = smov 3  }
   0x6   :  { %3603 = vst [vmem:[#allocation4 + $0x18] sm:$0xff] %v13246_v0  ;;  %3604 = vst [vmem:[#allocation4 + $0x20] sm:$0xff] %v13246_v0  ;;  %s9427_s26 = sld [smem:[%s17021_s0 + %s13254_s23]]   ;;  %s13256_s1 = smov 16  }
   0x7   :  { %3606 = vst [vmem:[#allocation4 + $0x30] sm:$0x3] %v13246_v0  ;;  %3607 = vst [vmem:[#allocation4 + $0x38] sm:$0x3] %v13246_v0  ;;  %v167_v2 = vld [vmem:[%s9418_s6] sm:$0xff]  ;;  %s9415_s30 = sld [smem:[%s17021_s0 + %s13255_s27]]   ;;  %s13257_s5 = smov 9  }
   0x8   :  { %3610 = vst [vmem:[#allocation4 + $0x48] sm:$0xff] %v13246_v0  ;;  %3611 = vst [vmem:[#allocation4 + $0x50] sm:$0xff] %v13246_v0  ;;  %v166_v3 = vld [vmem:[%s9414_s10] sm:$0x3]  ;;  %10595 = vmatpush3.msra.mxu0 %v167_v2  ;;  %s9428_s4 = sld [smem:[%s17021_s0 + %s13256_s1]]   ;;  %s13258_s9 = smov 11  }
   0x9   :  { %3613 = vst [vmem:[#allocation4 + $0x60] sm:$0xff] %v13246_v0  ;;  %3614 = vst [vmem:[#allocation4 + $0x68] sm:$0xff] %v13246_v0  ;;  %10597 = vmatmul.mubr.msk.f32.vlgmr.msra.gmra.mrb[0].mxu0 %vm175_vm1, %v166_v3  ;;  %11229 = vmatprep.subr.bf16.mxu0 %v17046_v1  ;;  %v250_v4 = vld [vmem:[%s9420_s14] sm:$0xff]  ;;  %v251_v5 = vld [vmem:[%s9420_s14 + $0x8] sm:$0xff]  ;;  %s9421_s8 = sld [smem:[%s17021_s0 + %s13257_s5]]   ;;  %s13259_s13 = smov 4  }
   0xa   :  { %3616 = vst [vmem:[#allocation4 + $0x78] sm:$0x3] %v13246_v0  ;;  %3617 = vst [vmem:[#allocation4 + $0x80] sm:$0x3] %v13246_v0  ;;  %v335_v6 = vld [vmem:[%s9422_s18] sm:$0xff]  ;;  %v11224_v7 = vpack.c.bf16 %v251_v5, %v250_v4  ;;  %v336_v8 = vld [vmem:[%s9422_s18 + $0x8] sm:$0xff]  ;;  %10618 = vmatprep.mubr.msk.f32.mxu0 %vm13248_vm0, %v13246_v0  ;;  %s9423_s12 = sld [smem:[%s17021_s0 + %s13258_s9]]  }
   0xb   :  { %v11230_v9 = vpack.c.bf16 %v336_v8, %v335_v6  ;;  %v252_v10 = vld [vmem:[%s9420_s14 + $0x10] sm:$0xff]  ;;  %v253_v11 = vld [vmem:[%s9420_s14 + $0x18] sm:$0xff]  ;;  %3602 = vst.msk [vmem:[#allocation4 + $0x10] sm:$0xff] %vm261_vm2, %v13246_v0  ;;  %3605 = vst.msk [vmem:[#allocation4 + $0x28] sm:$0xff] %vm261_vm2, %v13246_v0  ;;  %s9416_s16 = sld [smem:[%s17021_s0 + %s13259_s13]]   ;;  %s13260_s17 = smov 13  }
   0xc   :  { %11225 = vmatpush3.bf16.msra.mxu1 %v11224_v7  ;;  %v337_v12 = vld [vmem:[%s9422_s18 + $0x10] sm:$0xff]  ;;  %v11227_v13 = vpack.c.bf16 %v253_v11, %v252_v10  ;;  %v338_v14 = vld [vmem:[%s9422_s18 + $0x18] sm:$0xff]  ;;  %3612 = vst.msk [vmem:[#allocation4 + $0x58] sm:$0xff] %vm261_vm2, %v13246_v0  ;;  %3615 = vst.msk [vmem:[#allocation4 + $0x70] sm:$0xff] %vm261_vm2, %v13246_v0  ;;  %s9425_s20 = sld [smem:[%s17021_s0 + %s13260_s17]]   ;;  %s13261_s21 = smov 1  }
   0xd   :  { %11231 = vmatpush3.bf16.msra.mxu0 %v11230_v9  ;;  %11226 = vmatprep.subr.bf16.mxu1 %v17046_v1  ;;  %v11233_v15 = vpack.c.bf16 %v338_v14, %v337_v12  ;;  %v9453_v16 = vld [vmem:[%s9419_s22] ss:$0 sm:$0xff]  ;;  %s9413_s24 = sld [smem:[%s17021_s0 + %s13261_s21]]   ;;  %s13262_s25 = smov 12  }
   0xe   :  { %11232 = vmatprep.subr.bf16.mxu0 %v17046_v1  ;;  %v417_v21 = vld [vmem:[%s9427_s26] sm:$0xf]  ;;  %s9424_s28 = sld [smem:[%s17021_s0 + %s13262_s25]]   ;;  %s13263_s2 = smov 14  }
   0xf   :  { %v416_v22 = vld [vmem:[%s9415_s30] sm:$0x3]  ;;  %s1_s1 = sld [smem:[%s17021_s0]]   ;;  %s13264_s6 = smov 18  }
  0x10   :  { %11228 = vmatpush3.bf16.msra.mxu1 %v11227_v13  ;;  %v496_v23 = vld [vmem:[%s9428_s4] sm:$0xf]  ;;  %s9426_s5 = sld [smem:[%s17021_s0 + %s13263_s2]]   ;;  %s13265_s10 = smov 5  }
  0x11   :  { %11234 = vmatpush3.bf16.msra.mxu0 %v11233_v15  ;;  %10621 = vmatprep.subr.mxu1 %v13246_v0  ;;  %v9455_v24 = vld [vmem:[%s9421_s8] ss:$0 sm:$0xff]  ;;  %s13428_s9 = sld [smem:[%s17021_s0 + %s13264_s6]]   ;;  %s13272_s14 = smov 20  }
  0x12   :  { %10626 = vmatprep.subr.mxu0 %v13246_v0  ;;  %v9457_v25 = vld [vmem:[%s9423_s12] ss:$0 sm:$0xff]  ;;  %v910_v38 = vld [vmem:[%s9425_s20 + $0x8] sm:$0xff]  ;;  %v911_v40 = vld [vmem:[%s9425_s20 + $0x10] sm:$0xff]  ;;  %s9417_s13 = sld [smem:[%s17021_s0 + %s13265_s10]]   ;;  %s13273_s18 = smov 17  }
  0x13   :  { %v646_v32 = vld [vmem:[%s9416_s16] sm:$0xff]  ;;  %v912_v41 = vld [vmem:[%s9425_s20 + $0x18] sm:$0xff]  ;;  %s13534_s17 = sld [smem:[%s17021_s0 + %s13272_s14]]   ;;  %s13274_s22 = smov 19  }
  0x14   :  { %v909_v37 = vld [vmem:[%s9425_s20] sm:$0xff]  ;;  %v11239_v42 = vpack.c.bf16 %v912_v41, %v911_v40  ;;  %v907_v45 = vld [vmem:[%s9424_s28 + $0x8] sm:$0xff]  ;;  %v13270_v41 = vmov 920167782   ;;  %s13627_s21 = sld [smem:[%s17021_s0 + %s13273_s18]]   ;;  %s13275_s26 = smov 24  }
  0x15   :  { %v11236_v39 = vpack.c.bf16 %v910_v38, %v909_v37  ;;  %v908_v43 = vld [vmem:[%s9413_s24] sm:$0xff]  ;;  %v13269_v38 = vmov 2102212464   ;;  %s13733_s25 = sld [smem:[%s17021_s0 + %s13274_s22]]   ;;  %s13276_s30 = smov 21  }
  0x16   :  { %v906_v44 = vld [vmem:[%s9424_s28] sm:$0xff]  ;;  %v1061_v49 = vld [vmem:[%s9426_s5 + $0x8] sm:$0xff]  ;;  %s14010_s29 = sld [smem:[%s17021_s0 + %s13275_s26]]   ;;  %s13277_s4 = smov 25  }
  0x17   :  { %v11242_v46 = vpack.c.bf16 %v907_v45, %v906_v44  ;;  %v905_v47 = vld [vmem:[%s1_s1] sm:$0xff]  ;;  %v1198_v51 = vld [vmem:[%s13428_s9 + $0x8] sm:$0xff]  ;;  %v1200_v55 = vld [vmem:[%s13428_s9 + $0x18] sm:$0xff]  ;;  %v13271_v44 = vmov 1326507024   ;;  %s9433_s3 = sld [smem:[%s17021_s0 + %s13276_s30]]   ;;  %s13278_s8 = smov 27  }
  0x18   :  { %v1060_v48 = vld [vmem:[%s9426_s5] sm:$0xff]  ;;  %v1204_v57 = vld [vmem:[%s13428_s9 + $0x38] sm:$0xff]  ;;  %v1207_v58 = vld [vmem:[%s13428_s9 + $0x50] sm:$0xff]  ;;  %s14290_s7 = sld [smem:[%s17021_s0 + %s13277_s4]]   ;;  %s13279_s12 = smov 22  }
  0x19   :  { %v11245_v50 = vpack.c.bf16 %v1061_v49, %v1060_v48  ;;  %v1201_v52 = vld [vmem:[%s13428_s9 + $0x20] sm:$0xff]  ;;  %v1203_v59 = vld [vmem:[%s13428_s9 + $0x30] sm:$0xff]  ;;  %v13442_v60 = vpack.c.bf16 %v1207_v58, %v1204_v57  ;;  %v1206_v61 = vld [vmem:[%s13428_s9 + $0x48] sm:$0xff]  ;;  %s14304_s11 = sld [smem:[%s17021_s0 + %s13278_s8]]   ;;  %s13280_s16 = smov 23  }
  0x1a   :  { %v1197_v53 = vld [vmem:[%s13428_s9] sm:$0xff]  ;;  %v13433_v54 = vpack.c.bf16 %v1201_v52, %v1198_v51  ;;  %v13446_v62 = vpack.c.bf16 %v1206_v61, %v1203_v59  ;;  %v1210_v63 = vld [vmem:[%s13428_s9 + $0x68] sm:$0xff]  ;;  %v1212_v5 = vld [vmem:[%s13428_s9 + $0x78] sm:$0xff]  ;;  %s9434_s15 = sld [smem:[%s17021_s0 + %s13279_s12]]   ;;  %s13282_s20 = smov 29  }
  0x1b   :  { %v13436_v56 = vpack.c.bf16 %v1200_v55, %v1197_v53  ;;  %v1213_v2 = vld [vmem:[%s13428_s9 + $0x80] sm:$0xff]  ;;  %v1216_v6 = vld [vmem:[%s13428_s9 + $0x98] sm:$0xff]  ;;  %v1219_v7 = vld [vmem:[%s13428_s9 + $0xb0] sm:$0xff]  ;;  %s9435_s19 = sld [smem:[%s17021_s0 + %s13280_s16]]   ;;  %s13283_s24 = smov 26  }
  0x1c   :  { %v13451_v3 = vpack.c.bf16 %v1213_v2, %v1210_v63  ;;  %v1209_v4 = vld [vmem:[%s13428_s9 + $0x60] sm:$0xff]  ;;  %v13461_v9 = vpack.c.bf16 %v1219_v7, %v1216_v6  ;;  %v1215_v10 = vld [vmem:[%s13428_s9 + $0x90] sm:$0xff]  ;;  %v1218_v11 = vld [vmem:[%s13428_s9 + $0xa8] sm:$0xff]  ;;  %s14671_s23 = sld [smem:[%s17021_s0 + %s13282_s20]]   ;;  %s13284_s28 = smov 28  }
  0x1d   :  { %v13458_v8 = vpack.c.bf16 %v1212_v5, %v1209_v4  ;;  %v13466_v12 = vpack.c.bf16 %v1218_v11, %v1215_v10  ;;  %v798_v14 = vld [vmem:[%s9417_s13] sm:$0xff]  ;;  %s14921_s27 = sld [smem:[%s17021_s0 + %s13283_s24]]   ;;  %s13285_s2 = smov 33  }
  0x1e   :  { %s15256_s1 = sld [smem:[%s17021_s0 + %s13284_s28]]   ;;  %s13286_s6 = smov 30  }
  0x1f   :  { %s16012_s5 = sld [smem:[%s17021_s0 + %s13285_s2]]   ;;  %s13287_s10 = smov 34  }
  0x20   :  { %s16214_s13 = sld [smem:[%s17021_s0 + %s13287_s10]]   ;;  %s13288_s14 = smov 31  }
  0x21   :  { %s13289_s18 = smov 32   ;;  %s13290_s22 = smov 36  }
  0x22   :  { %s13291_s26 = smov 38   ;;  %s13292_s30 = smov 35  }
  0x23   :  { %s13293_s4 = smov 37   ;;  %s13294_s8 = smov 39  }
  0x24   :  { %s13295_s12 = smov 40  }
  0xdc   :  { %v245_v17 = vpop.f32.mrb[0].mxu0 }
  0xdd   :  { %v246_v18 = vadd.f32 %v9453_v16, %v245_v17  ;;  %v10598_v19 = vpop.f32.mrb[1].mxu0 }
  0xdf   :  { %v249_v20 = vmax.f32 %v246_v18, 0.0 }
  0xe1   :  { %10608 = vmatmul.mubr.msk.f32.vlgmr.msra.gmra.mrb[0].mxu1 %vm261_vm2, %v249_v20  ;;  %10619 = vmatmul.mubr.msk.f32.vlgmr.msra.gmra.mrb[2].mxu0 %vm261_vm2, %v249_v20 }
  0xe2   :  { %10627 = vmatpush3.msk.msra.mxu0 %vm422_vm3, %v417_v21  ;;  %10628 = vmatprep.mubr.msk.f32.mxu0 %vm13248_vm0, %v13246_v0 }
  0xe3   :  { %10631 = vmatprep.subr.mxu0 %v13246_v0  ;;  %10622 = vmatpush3.msk.msra.mxu1 %vm422_vm3, %v417_v21 }
  0xe4   :  { %10623 = vmatprep.mubr.msk.f32.mxu1 %vm13248_vm0, %v13246_v0  ;;  %10636 = vmatprep.subr.mxu1 %v13246_v0 }
  0xe5   :  { %10629 = vmatmul.mubr.msk.f32.vlgmr.msra.gmra.mrb[4].mxu0 %vm418_vm4, %v416_v22 }
  0xe6   :  { %10633 = vmatprep.mubr.msk.f32.mxu0 %vm13248_vm0, %v13246_v0  ;;  %10632 = vmatpush3.msk.msra.mxu0 %vm422_vm3, %v496_v23 }
  0xe7   :  { %11235 = vmatprep.subr.bf16.mxu0 %v17046_v1 }
 0x1b4   :  { %v331_v26 = vpop.f32.mrb[0].mxu1  ;;  %v412_v27 = vpop.f32.mrb[2].mxu0 }
 0x1b5   :  { %v332_v28 = vadd.f32 %v9455_v24, %v331_v26  ;;  %v413_v29 = vadd.f32 %v9457_v25, %v412_v27  ;;  %v10609_v30 = vpop.f32.mrb[1].mxu1  ;;  %v10620_v31 = vpop.f32.mrb[3].mxu0 }
 0x1b6   :  { %v13266_v30 = vmov 683565275  }
 0x1b7   :  { %10624 = vmatmul.mubr.msk.f32.vlgmr.msra.gmra.mrb[2].mxu1 %vm418_vm4, %v332_v28  ;;  %10634 = vmatmul.mubr.msk.f32.vlgmr.msra.gmra.mrb[4].mxu0 %vm418_vm4, %v413_v29 }
 0x1b8   :  { %10638 = vmatprep.mubr.msk.f32.mxu1 %vm13248_vm0, %v13246_v0  ;;  %10654 = vmatprep.mubr.msk.f32.mxu0 %vm13248_vm0, %v13246_v0 }
 0x1b9   :  { %11237 = vmatpush3.bf16.msra.mxu0 %v11236_v39 }
 0x1ba   :  { %11238 = vmatprep.subr.bf16.mxu0 %v17046_v1 }
 0x1bd   :  { %11240 = vmatpush3.bf16.msra.mxu0 %v11239_v42 }
 0x1be   :  { %11241 = vmatprep.subr.bf16.mxu0 %v17046_v1 }
 0x1c0   :  { %10655 = vmatmul.mubr.msk.f32.vlgmr.msra.gmra.mrb[6].mxu0 %vm261_vm2, %v908_v43 }
 0x1c1   :  { %10661 = vmatprep.mubr.msk.f32.mxu0 %vm13248_vm0, %v13246_v0  ;;  %11243 = vmatpush3.bf16.msra.mxu0 %v11242_v46 }
 0x1c2   :  { %11244 = vmatprep.subr.bf16.mxu0 %v17046_v1 }
 0x1c8   :  { %10662 = vmatmul.mubr.msk.f32.vlgmr.msra.gmra.mrb[6].mxu0 %vm986_vm7, %v905_v47 }
 0x1c9   :  { %11246 = vmatpush3.bf16.msra.mxu0 %v11245_v50  ;;  %10668 = vmatprep.mubr.msk.f32.mxu0 %vm13248_vm0, %v13246_v0 }
 0x1ca   :  { %11271 = vmatprep.subr.bf16.mxu0 %v17046_v1 }
 0x28a   :  { %v492_v33 = vpop.f32.mrb[2].mxu1  ;;  %v642_v34 = vpop.f32.mrb[4].mxu0 }
 0x28b   :  { %v10625_v35 = vpop.f32.mrb[3].mxu1  ;;  %v10635_v36 = vpop.f32.mrb[5].mxu0  ;;  %10637 = vmatpush3.msk.msra.mxu1 %vm651_vm5, %v492_v33 }
 0x28c   :  { %10639 = vmatmul.mubr.msk.f32.vlgmr.msra.gmra.mrb[4].mxu1 %vm647_vm6, %v646_v32  ;;  %10641 = vmatprep.subr.mxu1 %v13246_v0  ;;  %v13268_v35 = vmov 2131351028  }
 0x28d   :  { %10642 = vmatpush3.msk.msra.mxu1 %vm651_vm5, %v642_v34  ;;  %10643 = vmatprep.mubr.msk.f32.mxu1 %vm13248_vm0, %v13246_v0 }
 0x28e   :  { %11248 = vmatprep.subr.bf16.mxu1 %v13433_v54 }
 0x290   :  { %10644 = vmatmul.mubr.msk.f32.vlgmr.msra.gmra.mrb[6].mxu1 %vm647_vm6, %v646_v32  ;;  %v13267_v32 = vmov 2475754826  }
 0x291   :  { %1301 = vmatprep.mubr.f32.mxu1 %v13246_v0  ;;  %11250 = vmatpush1.bf16.msra.mxu1 %v13436_v56 }
 0x292   :  { %11252 = vmatprep.subr.bf16.mxu1 %v13442_v60 }
 0x295   :  { %11254 = vmatpush1.bf16.msra.mxu1 %v13446_v62 }
 0x296   :  { %11256 = vmatprep.subr.bf16.mxu1 %v13451_v3 }
 0x299   :  { %11258 = vmatpush1.bf16.msra.mxu1 %v13458_v8 }
 0x29a   :  { %11260 = vmatprep.subr.bf16.mxu1 %v13461_v9 }
 0x29d   :  { %11262 = vmatpush1.bf16.msra.mxu1 %v13466_v12 }
 0x35f   :  { %v721_v13 = vpop.f32.mrb[4].mxu1 }
 0x360   :  { %v10640_v15 = vpop.f32.mrb[5].mxu1  ;;  %v799_v16 = vmul.f32 %v798_v14, %v721_v13 }
 0x363   :  { %v794_v17 = vpop.f32.mrb[6].mxu1 }
 0x364   :  { %v13473_v18 = vadd.f32 %v799_v16, %v794_v17  ;;  %v10645_v19 = vpop.f32.mrb[7].mxu1 }
 0x366   :  { %v804_v20 = vand.u32 2139095040, %v13473_v18  ;;  %v801_v24 = vand.u32 2147483647, %v13473_v18  ;;  %vm803_vm15 = vcmp.lt.s32.totalorder %v13473_v18, 0 }
 0x368   :  { %v805_v21 = vshrl.u32 %v804_v20, 23  ;;  %v808_v27 = vand.u32 8388607, %v801_v24  ;;  %vm802_vm1 = vcmp.le.f32.partialorder %v801_v24, 0.7853982 }
 0x36a   :  { %v9469_v22 = vadd.s32 4294967169, %v805_v21  ;;  %v809_v46 = vor.u32 8388608, %v808_v27 }
 0x36c   :  { %v811_v23 = vadd.s32 1, %v9469_v22  ;;  %v849_v2 = vshll.u32 %v809_v46, 8 }
 0x36e   :  { %vm812_vm8 = vcmp.gt.s32.totalorder %v811_v23, 0 }
 0x36f   :  { %v813_v25 = vsel %vm812_vm8, %v811_v23, 0  ;;  %vm893_vm8 = vweird.f32 %v13473_v18 }
 0x370   :  { %v815_v26 = vand.u32 31, %v813_v25  ;;  %v814_v29 = vshrl.u32 %v813_v25, 5 }
 0x372   :  { %v816_v28 = vsub.s32 32, %v815_v26  ;;  %v818_v31 = vshll.u32 %v13266_v30, %v815_v26  ;;  %v821_v33 = vshll.u32 %v13267_v32, %v815_v26  ;;  %v824_v37 = vshll.u32 %v13268_v35, %v815_v26 }
 0x373   :  { %v827_v40 = vshll.u32 %v13269_v38, %v815_v26  ;;  %v830_v43 = vshll.u32 %v13270_v41, %v815_v26  ;;  %vm833_vm9 = vcmp.lt.s32.totalorder %v814_v29, 1  ;;  %vm836_vm10 = vcmp.lt.s32.totalorder %v814_v29, 4 }
 0x374   :  { %v819_v34 = vshrl.u32 %v13267_v32, %v816_v28  ;;  %v822_v36 = vshrl.u32 %v13268_v35, %v816_v28  ;;  %v825_v39 = vshrl.u32 %v13269_v38, %v816_v28  ;;  %v828_v42 = vshrl.u32 %v13270_v41, %v816_v28 }
 0x375   :  { %v831_v45 = vshrl.u32 %v13271_v44, %v816_v28  ;;  %v817_v57 = vshrl.u32 %v13266_v30, %v816_v28  ;;  %vm835_vm11 = vcmp.lt.s32.totalorder %v814_v29, 3  ;;  %vm834_vm12 = vcmp.lt.s32.totalorder %v814_v29, 2 }
 0x376   :  { %v820_v47 = vor.u32 %v819_v34, %v818_v31  ;;  %v823_v48 = vor.u32 %v822_v36, %v821_v33  ;;  %v826_v49 = vor.u32 %v825_v39, %v824_v37  ;;  %v829_v50 = vor.u32 %v828_v42, %v827_v40 }
 0x377   :  { %v832_v51 = vor.u32 %v831_v45, %v830_v43 }
 0x378   :  { %v838_v52 = vsel %vm836_vm10, %v826_v49, 2102212464  ;;  %v841_v53 = vsel %vm833_vm9, %v820_v47, %v823_v48  ;;  %v845_v55 = vsel %vm833_vm9, %v823_v48, %v826_v49  ;;  %v842_v58 = vsel %vm836_vm10, %v829_v50, 920167782 }
 0x379   :  { %v846_v59 = vsel %vm836_vm10, %v832_v51, 1326507024  ;;  %v843_v61 = vsel %vm835_vm11, %v826_v49, %v842_v58  ;;  %v837_v4 = vsel %vm833_vm9, %v817_v57, %v820_v47  ;;  %v839_v5 = vsel %vm835_vm11, %v823_v48, %v838_v52  ;;  %v1202_v57 = vld [vmem:[%s13428_s9 + $0x28] sm:$0xff] }
 0x37a   :  { %v847_v63 = vsel %vm835_vm11, %v829_v50, %v846_v59  ;;  %v844_v6 = vsel %vm834_vm12, %v841_v53, %v843_v61  ;;  %v840_v15 = vsel %vm834_vm12, %v837_v4, %v839_v5  ;;  %v1208_v4 = vld [vmem:[%s13428_s9 + $0x58] sm:$0xff]  ;;  %vm1136_vm9 = vcmask 783360  }
 0x37b   :  { %v848_v7 = vsel %vm834_vm12, %v845_v55, %v847_v63  ;;  %v13482_v13 = vmul.u32.u64.low %v849_v2, %v844_v6  ;;  %v13483_v14 = vmul.u32.u64.high %v849_v2, %v844_v6, %v13482_v13  ;;  %v856_v17 = vmul.u32 %v849_v2, %v840_v15  ;;  %v1199_v55 = vld [vmem:[%s13428_s9 + $0x10] sm:$0xff]  ;;  %v1222_v15 = vld [vmem:[%s13428_s9 + $0xc8] sm:$0xff]  ;;  %1137 = vst.msk [vmem:[#allocation2] sm:$0x3f] %vm1136_vm9, %v13246_v0  ;;  %1138 = vst.msk [vmem:[#allocation2 + $0x8] sm:$0x3f] %vm1136_vm9, %v13246_v0 }
 0x37c   :  { %v13479_v10 = vmul.u32.u64.low %v849_v2, %v848_v7  ;;  %v13480_v11 = vmul.u32.u64.high %v849_v2, %v848_v7, %v13479_v10  ;;  %v13495_v61 = vpack.c.bf16 %v1202_v57, %v1199_v55  ;;  %v1205_v2 = vld [vmem:[%s13428_s9 + $0x40] sm:$0xff]  ;;  %v1214_v7 = vld [vmem:[%s13428_s9 + $0x88] sm:$0xff]  ;;  %vm1139_vm10 = vcmask 781312  }
 0x37d   :  { %v859_v16 = vadd.s32 1, %v13483_v14  ;;  %v13502_v6 = vpack.c.bf16 %v1208_v4, %v1205_v2  ;;  %vm1142_vm11 = vcmask 785412   ;;  %vm1233_vm12 = vcmask 785408   ;;  %v1173_v55 = vld [vmem:[%s13534_s17 + $0x68] sm:$0xff]  ;;  %v1176_v57 = vld [vmem:[%s13534_s17 + $0x80] sm:$0xff]  ;;  %v1175_v2 = vld [vmem:[%s13534_s17 + $0x78] sm:$0xff] }
 0x37e   :  { %vm858_vm13 = vc.u32 %v13480_v11, %v13482_v13  ;;  %v857_v31 = vadd.s32 %v13482_v13, %v13480_v11  ;;  %v1217_v11 = vld [vmem:[%s13428_s9 + $0xa0] sm:$0xff]  ;;  %v1220_v13 = vld [vmem:[%s13428_s9 + $0xb8] sm:$0xff]  ;;  %v1174_v4 = vld [vmem:[%s13534_s17 + $0x70] sm:$0xff] }
 0x37f   :  { %v860_v19 = vsel %vm858_vm13, %v859_v16, %v13483_v14  ;;  %v13516_v14 = vpack.c.bf16 %v1220_v13, %v1217_v11  ;;  %v1225_v16 = vld [vmem:[%s13428_s9 + $0xe0] sm:$0xff]  ;;  %vm1146_vm13 = vcmask 523264  }
 0x380   :  { %v861_v20 = vadd.s32 %v860_v19, %v856_v17  ;;  %v13523_v17 = vpack.c.bf16 %v1225_v16, %v1222_v15  ;;  %v1221_v19 = vld [vmem:[%s13428_s9 + $0xc0] sm:$0xff]  ;;  %v1178_v15 = vld [vmem:[%s13534_s17 + $0x90] sm:$0xff] }
 0x382   :  { %v862_v21 = vadd.s32 536870912, %v861_v20  ;;  %11264 = vmatprep.subr.bf16.mxu1 %v13523_v17 }
 0x384   :  { %v863_v22 = vshrl.u32 %v862_v21, 30  ;;  %v1223_v21 = vld [vmem:[%s13428_s9 + $0xd0] sm:$0xff] }
 0x386   :  { %v864_v23 = vshll.u32 %v863_v22, 30  ;;  %v887_v43 = vsub.s32 4, %v863_v22 }
 0x388   :  { %v865_v25 = vsub.s32 %v861_v20, %v864_v23  ;;  %v888_v46 = vsel %vm803_vm15, %v887_v43, %v863_v22  ;;  %v1224_v20 = vld [vmem:[%s13428_s9 + $0xd8] sm:$0xff]  ;;  %v1226_v23 = vld [vmem:[%s13428_s9 + $0xe8] sm:$0xff] }
 0x389   :  { %v890_v48 = vsel %vm802_vm1, 0, %v888_v46  ;;  %v13528_v22 = vpack.c.bf16 %v1224_v20, %v1221_v19  ;;  %v1165_v43 = vld [vmem:[%s13534_s17 + $0x28] sm:$0xff]  ;;  %v1180_v20 = vld [vmem:[%s13534_s17 + $0xa0] sm:$0xff] }
 0x38a   :  { %v867_v26 = vsub.s32 0, %v865_v25  ;;  %v894_v49 = vadd.s32 3, %v890_v48  ;;  %v1166_v48 = vld [vmem:[%s13534_s17 + $0x30] sm:$0xff]  ;;  %v1181_v19 = vld [vmem:[%s13534_s17 + $0xa8] sm:$0xff] }
 0x38b   :  { %11266 = vmatpush1.bf16.msra.mxu1 %v13528_v22 }
 0x38c   :  { %v9470_v27 = vmin.u32 %v867_v26, %v865_v25  ;;  %v895_v50 = vand.u32 3, %v894_v49  ;;  %v1228_v26 = vld [vmem:[%s13428_s9 + $0xf8] sm:$0xff] }
 0x38e   :  { %v869_v28 = vclz %v9470_v27  ;;  %vm900_vm4 = vcmp.eq.s32.totalorder %v895_v50, 2  ;;  %vm897_vm5 = vcmp.eq.s32.totalorder %v895_v50, 0  ;;  %vm896_vm6 = vcmp.lt.s32.totalorder %v895_v50, 2  ;;  %v1231_v27 = vld [vmem:[%s13428_s9 + $0x110] sm:$0xff]  ;;  %v1169_v50 = vld [vmem:[%s13534_s17 + $0x48] sm:$0xff] }
 0x390   :  { %v9471_v29 = vadd.s32 4294967294, %v869_v28  ;;  %v1227_v28 = vld [vmem:[%s13428_s9 + $0xf0] sm:$0xff] }
 0x392   :  { %vm9472_vm14 = vcmp.lt.s32.totalorder %v9471_v29, 0 }
 0x393   :  { %v872_v30 = vsel %vm9472_vm14, 0, %v9471_v29  ;;  %v13545_v29 = vpack.c.bf16 %v1231_v27, %v1228_v26  ;;  %v1188_v26 = vld [vmem:[%s13534_s17 + $0xe0] sm:$0xff]  ;;  %v13631_v27 = vpack.c.bf16 %v1181_v19, %v1178_v15  ;;  %vm1555_vm14 = vcmask 519168  }
 0x394   :  { %v873_v32 = vsub.s32 32, %v872_v30  ;;  %v877_v33 = vsub.s32 4294967266, %v872_v30  ;;  %v874_v34 = vshll.u32 %v865_v25, %v872_v30  ;;  %v13539_v25 = vpack.c.bf16 %v1226_v23, %v1223_v21  ;;  %v1230_v30 = vld [vmem:[%s13428_s9 + $0x108] sm:$0xff]  ;;  %v1183_v21 = vld [vmem:[%s13534_s17 + $0xb8] sm:$0xff] }
 0x395   :  { %11268 = vmatprep.subr.bf16.mxu1 %v13545_v29  ;;  %v1185_v23 = vld [vmem:[%s13534_s17 + $0xc8] sm:$0xff] }
 0x396   :  { %v875_v35 = vshrl.u32 %v857_v31, %v873_v32  ;;  %v878_v36 = vadd.s32 127, %v877_v33  ;;  %v1229_v31 = vld [vmem:[%s13428_s9 + $0x100] sm:$0xff]  ;;  %v1232_v32 = vld [vmem:[%s13428_s9 + $0x118] sm:$0xff]  ;;  %v13551_v33 = vpack.c.bf16 %v1230_v30, %v1227_v28  ;;  %v13633_v28 = vpack.c.bf16 %v1183_v21, %v1180_v20  ;;  %v1636_v20 = vld [vmem:[%s13627_s21 + $0x30] sm:$0xff] }
 0x397   :  { %v1184_v30 = vld [vmem:[%s13534_s17 + $0xc0] sm:$0xff] }
 0x398   :  { %v876_v37 = vor.u32 %v875_v35, %v874_v34  ;;  %v879_v38 = vshll.u32 %v878_v36, 23  ;;  %v13553_v34 = vpack.c.bf16 %v1232_v32, %v1229_v31  ;;  %11270 = vmatpush1.bf16.msra.mxu1 %v13551_v33  ;;  %v1161_v35 = vld [vmem:[%s13534_s17 + $0x8] sm:$0xff]  ;;  %v1164_v36 = vld [vmem:[%s13534_s17 + $0x20] sm:$0xff]  ;;  %v13638_v31 = vpack.c.bf16 %v1188_v26, %v1185_v23  ;;  %v1187_v32 = vld [vmem:[%s13534_s17 + $0xd8] sm:$0xff] }
 0x399   :  { %v1639_v23 = vld [vmem:[%s13627_s21 + $0x48] sm:$0xff]  ;;  %v1638_v26 = vld [vmem:[%s13627_s21 + $0x40] sm:$0xff] }
 0x39a   :  { %v880_v39 = vor.u32 4788187, %v879_v38  ;;  %v883_v41 = vcvt.s32.f32 %v876_v37  ;;  %v13561_v37 = vpack.c.bf16 %v1164_v36, %v1161_v35  ;;  %v1186_v35 = vld [vmem:[%s13534_s17 + $0xd0] sm:$0xff]  ;;  %v1189_v36 = vld [vmem:[%s13534_s17 + $0xe8] sm:$0xff] }
 0x39c   :  { %v881_v40 = vand.u32 2147483647, %v880_v39  ;;  %11290 = vmatprep.subr.bf16.mxu1 %v13561_v37 }
 0x39e   :  { %v884_v42 = vmul.f32 %v883_v41, %v881_v40  ;;  %v1160_v40 = vld [vmem:[%s13534_s17] sm:$0xff]  ;;  %v1163_v41 = vld [vmem:[%s13534_s17 + $0x18] sm:$0xff] }
 0x39f   :  { %v13571_v46 = vpack.c.bf16 %v1163_v41, %v1160_v40  ;;  %v13647_v40 = vpack.c.bf16 %v1187_v32, %v1184_v30  ;;  %v13649_v41 = vpack.c.bf16 %v1189_v36, %v1186_v35  ;;  %v1641_v30 = vld [vmem:[%s13627_s21 + $0x58] sm:$0xff]  ;;  %v1643_v35 = vld [vmem:[%s13627_s21 + $0x68] sm:$0xff]  ;;  %v1646_v36 = vld [vmem:[%s13627_s21 + $0x80] sm:$0xff] }
 0x3a0   :  { %v885_v44 = vxor.u32 2147483648, %v884_v42 }
 0x3a2   :  { %v886_v45 = vsel %vm803_vm15, %v885_v44, %v884_v42  ;;  %v1162_v42 = vld [vmem:[%s13534_s17 + $0x10] sm:$0xff]  ;;  %v1167_v44 = vld [vmem:[%s13534_s17 + $0x38] sm:$0xff] }
 0x3a3   :  { %v889_v47 = vsel %vm802_vm1, %v13473_v18, %v886_v45  ;;  %v1211_v18 = vld [vmem:[%s13428_s9 + $0x70] sm:$0xff]  ;;  %vm3875_vm1 = vcmask 1046528   ;;  %s9442_s9 = sld [smem:[%s17021_s0 + %s13286_s6]]  }
 0x3a4   :  { %13217 = vcosq.f32 %v889_v47  ;;  %v13510_v10 = vpack.c.bf16 %v1214_v7, %v1211_v18  ;;  %v1170_v45 = vld [vmem:[%s13534_s17 + $0x50] sm:$0xff]  ;;  %v1179_v18 = vld [vmem:[%s13534_s17 + $0x98] sm:$0xff] }
 0x3a5   :  { %13219 = vsinq.f32 %v889_v47  ;;  %v13573_v47 = vpack.c.bf16 %v1165_v43, %v1162_v42  ;;  %v13576_v49 = vpack.c.bf16 %v1170_v45, %v1167_v44  ;;  %v1182_v7 = vld [vmem:[%s13534_s17 + $0xb0] sm:$0xff]  ;;  %v1193_v44 = vld [vmem:[%s13534_s17 + $0x108] sm:$0xff]  ;;  %v1192_v45 = vld [vmem:[%s13534_s17 + $0x100] sm:$0xff] }
 0x3a6   :  { %v13617_v16 = vpack.c.bf16 %v1182_v7, %v1179_v18  ;;  %v1190_v42 = vld [vmem:[%s13534_s17 + $0xf0] sm:$0xff]  ;;  %v1637_v18 = vld [vmem:[%s13627_s21 + $0x38] sm:$0xff] }
 0x3a7   :  { %v1640_v7 = vld [vmem:[%s13627_s21 + $0x50] sm:$0xff] }
 0x3a8   :  { %v13686_v21 = vpack.c.bf16 %v1640_v7, %v1637_v18  ;;  %v1651_v7 = vld [vmem:[%s13627_s21 + $0xa8] sm:$0xff] }
 0x3ae   :  { %v13218_v51 = vpop.eup %13217 }
 0x3af   :  { %v13220_v52 = vpop.eup %13219  ;;  %v901_v53 = vxor.u32 2147483648, %v13218_v51 }
 0x3b0   :  { %v898_v58 = vxor.u32 2147483648, %v13220_v52 }
 0x3b1   :  { %v902_v24 = vsel %vm900_vm4, %v901_v53, %v13220_v52  ;;  %v1171_v52 = vld [vmem:[%s13534_s17 + $0x58] sm:$0xff]  ;;  %vm4774_vm4 = vcmask 1045504  }
 0x3b2   :  { %v899_v59 = vsel %vm897_vm5, %v13218_v51, %v898_v58  ;;  %v1168_v51 = vld [vmem:[%s13534_s17 + $0x40] sm:$0xff]  ;;  %v13591_v58 = vpack.c.bf16 %v1169_v50, %v1166_v48  ;;  %v1195_v48 = vld [vmem:[%s13534_s17 + $0x118] sm:$0xff]  ;;  %v1631_v50 = vld [vmem:[%s13627_s21 + $0x8] sm:$0xff]  ;;  %vm3608_vm5 = vcmask 254976  }
 0x3b3   :  { %v903_v63 = vsel %vm896_vm6, %v899_v59, %v902_v24  ;;  %v13593_v24 = vpack.c.bf16 %v1171_v52, %v1168_v51  ;;  %v1172_v59 = vld [vmem:[%s13534_s17 + $0x60] sm:$0xff]  ;;  %v13663_v52 = vpack.c.bf16 %v1193_v44, %v1190_v42  ;;  %v13704_v44 = vpack.c.bf16 %v1646_v36, %v1643_v35 }
 0x3b4   :  { %v904_v5 = vsel %vm893_vm8, nan, %v903_v63  ;;  %v13598_v63 = vpack.c.bf16 %v1176_v57, %v1173_v55  ;;  %v13610_v11 = vpack.c.bf16 %v1175_v2, %v1172_v59  ;;  %v1634_v51 = vld [vmem:[%s13627_s21 + $0x20] sm:$0xff]  ;;  %v13665_v55 = vpack.c.bf16 %v1195_v48, %v1192_v45  ;;  %v1633_v2 = vld [vmem:[%s13627_s21 + $0x18] sm:$0xff]  ;;  %v1644_v48 = vld [vmem:[%s13627_s21 + $0x70] sm:$0xff] }
 0x3b5   :  { %10669 = vmatmul.mubr.msk.f32.vlgmr.msra.gmra.mrb[6].mxu0 %vm986_vm7, %v904_v5  ;;  %v1177_v5 = vld [vmem:[%s13534_s17 + $0x88] sm:$0xff]  ;;  %v1630_v57 = vld [vmem:[%s13627_s21] sm:$0xff]  ;;  %v13670_v59 = vpack.c.bf16 %v1634_v51, %v1631_v50  ;;  %v1645_v45 = vld [vmem:[%s13627_s21 + $0x78] sm:$0xff] }
 0x3b6   :  { %11273 = vmatpush3.bf16.msra.mxu0 %v13495_v61  ;;  %10695 = vmatprep.mubr.msk.f32.mxu0 %vm13248_vm0, %v13246_v0  ;;  %v13612_v13 = vpack.c.bf16 %v1177_v5, %v1174_v4  ;;  %v1632_v4 = vld [vmem:[%s13627_s21 + $0x10] sm:$0xff]  ;;  %v1635_v5 = vld [vmem:[%s13627_s21 + $0x28] sm:$0xff]  ;;  %v13679_v15 = vpack.c.bf16 %v1633_v2, %v1630_v57  ;;  %v1642_v42 = vld [vmem:[%s13627_s21 + $0x60] sm:$0xff] }
 0x3b7   :  { %11274 = vmatprep.subr.bf16.mxu0 %v17046_v1  ;;  %v13681_v19 = vpack.c.bf16 %v1635_v5, %v1632_v4  ;;  %v1647_v50 = vld [vmem:[%s13627_s21 + $0x88] sm:$0xff]  ;;  %v1649_v51 = vld [vmem:[%s13627_s21 + $0x98] sm:$0xff]  ;;  %v1652_v57 = vld [vmem:[%s13627_s21 + $0xb0] sm:$0xff]  ;;  %v13716_v2 = vpack.c.bf16 %v1645_v45, %v1642_v42 }
 0x3b8   :  { %v13718_v4 = vpack.c.bf16 %v1647_v50, %v1644_v48  ;;  %v1648_v5 = vld [vmem:[%s13627_s21 + $0x90] sm:$0xff]  ;;  %v13723_v18 = vpack.c.bf16 %v1652_v57, %v1649_v51  ;;  %v1654_v35 = vld [vmem:[%s13627_s21 + $0xc0] sm:$0xff]  ;;  %v1657_v42 = vld [vmem:[%s13627_s21 + $0xd8] sm:$0xff] }
 0x3b9   :  { %v1656_v45 = vld [vmem:[%s13627_s21 + $0xd0] sm:$0xff]  ;;  %v1659_v48 = vld [vmem:[%s13627_s21 + $0xe8] sm:$0xff]  ;;  %v1661_v50 = vld [vmem:[%s13627_s21 + $0xf8] sm:$0xff]  ;;  %v13753_v57 = vpack.c.bf16 %v1657_v42, %v1654_v35 }
 0x3ba   :  { %11276 = vmatpush3.bf16.msra.mxu0 %v13502_v6  ;;  %17250 = vst [vmem:[#allocation5_spill] sm:$0xff] %v13723_v18  ;;  %v1664_v51 = vld [vmem:[%s13627_s21 + $0x110] sm:$0xff]  ;;  %v1597_v35 = vld [vmem:[%s13733_s25 + $0x20] sm:$0xff] }
 0x3bb   :  { %11277 = vmatprep.subr.bf16.mxu0 %v17046_v1  ;;  %17254 = vst [vmem:[#allocation9_spill] sm:$0xff] %v13753_v57 }
 0x3be   :  { %11279 = vmatpush3.bf16.msra.mxu0 %v13510_v10 }
 0x3bf   :  { %11280 = vmatprep.subr.bf16.mxu0 %v17046_v1 }
 0x3c2   :  { %11282 = vmatpush3.bf16.msra.mxu0 %v13516_v14 }
 0x3c3   :  { %11283 = vmatprep.subr.bf16.mxu0 %v17046_v1 }
 0x3c6   :  { %11285 = vmatpush3.bf16.msra.mxu0 %v13539_v25 }
 0x3c7   :  { %11286 = vmatprep.subr.bf16.mxu0 %v17046_v1 }
 0x3ca   :  { %11288 = vmatpush3.bf16.msra.mxu0 %v13553_v34 }
 0x3cb   :  { %11313 = vmatprep.subr.bf16.mxu0 %v17046_v1 }
 0x488   :  { %v1131_v38 = vpop.f32.mrb[6].mxu0 }
 0x489   :  { %1140 = vst.msk [vmem:[#allocation2 + $0x1] sm:$0xf] %vm1139_vm10, %v1131_v38  ;;  %v10670_v39 = vpop.f32.mrb[7].mxu0 }
 0x48a   :  { %1143 = vst.msk [vmem:[#allocation2 + $0x5] sm:$0xf0] %vm1142_vm11, %v1131_v38  ;;  %v1191_v38 = vld [vmem:[%s13534_s17 + $0xf8] sm:$0xff]  ;;  %v1194_v39 = vld [vmem:[%s13534_s17 + $0x110] sm:$0xff]  ;;  %s9443_s17 = sld [smem:[%s17021_s0 + %s13288_s14]]  }
 0x48b   :  { %v13654_v43 = vpack.c.bf16 %v1194_v39, %v1191_v38  ;;  %v13697_v38 = vpack.c.bf16 %v1639_v23, %v1636_v20  ;;  %v13699_v39 = vpack.c.bf16 %v1641_v30, %v1638_v26  ;;  %v1653_v20 = vld [vmem:[%s13627_s21 + $0xb8] sm:$0xff]  ;;  %v1655_v23 = vld [vmem:[%s13627_s21 + $0xc8] sm:$0xff]  ;;  %v1658_v26 = vld [vmem:[%s13627_s21 + $0xe0] sm:$0xff]  ;;  %v13737_v30 = vpack.c.bf16 %v1651_v7, %v1648_v5 }
 0x48c   :  { %v13744_v36 = vpack.c.bf16 %v1658_v26, %v1655_v23  ;;  %v13755_v5 = vpack.c.bf16 %v1659_v48, %v1656_v45  ;;  %v1660_v7 = vld [vmem:[%s13627_s21 + $0xf0] sm:$0xff]  ;;  %v1662_v23 = vld [vmem:[%s13627_s21 + $0x100] sm:$0xff]  ;;  %v1665_v26 = vld [vmem:[%s13627_s21 + $0x118] sm:$0xff] }
 0x48d   :  { %17251 = vst [vmem:[#allocation6_spill] sm:$0xff] %v13737_v30  ;;  %v13771_v45 = vpack.c.bf16 %v1665_v26, %v1662_v23  ;;  %v1593_v48 = vld [vmem:[%s13733_s25] sm:$0xff]  ;;  %v1599_v26 = vld [vmem:[%s13733_s25 + $0x30] sm:$0xff] }
 0x48e   :  { %17253 = vst [vmem:[#allocation8_spill] sm:$0xff] %v13744_v36  ;;  %17255 = vst [vmem:[#allocation10_spill] sm:$0xff] %v13755_v5 }
 0x48f   :  { %17258 = vst [vmem:[#allocation13_spill] sm:$0xff] %v13771_v45 }
 0x490   :  { %v13581_v53 = vld [vmem:[#allocation2 + $0x1] sm:$0xf] }
 0x491   :  { %9476 = vmatmul.mubr.msk.f32.vlgmr.msra.gmra.mrb[8].mxu1 %vm1233_vm12, %v13581_v53  ;;  %10696 = vmatmul.mubr.msk.f32.vlgmr.msra.gmra.mrb[8].mxu0 %vm1233_vm12, %v13581_v53  ;;  %v1159_v32 = vld [vmem:[#allocation2] sm:$0xf] }
 0x492   :  { %11292 = vmatpush1.bf16.msra.mxu1 %v13571_v46  ;;  %11315 = vmatpush3.bf16.msra.mxu0 %v13573_v47 }
 0x493   :  { %11294 = vmatprep.subr.bf16.mxu1 %v13576_v49  ;;  %11316 = vmatprep.subr.bf16.mxu0 %v17046_v1 }
 0x494   :  { %1445 = vmatprep.mubr.f32.mxu1 %v13246_v0  ;;  %10722 = vmatprep.mubr.msk.f32.mxu0 %vm13248_vm0, %v13246_v0 }
 0x496   :  { %11296 = vmatpush1.bf16.msra.mxu1 %v13591_v58  ;;  %11318 = vmatpush3.bf16.msra.mxu0 %v13593_v24 }
 0x497   :  { %11298 = vmatprep.subr.bf16.mxu1 %v13598_v63  ;;  %11319 = vmatprep.subr.bf16.mxu0 %v17046_v1 }
 0x49a   :  { %11300 = vmatpush1.bf16.msra.mxu1 %v13610_v11  ;;  %11321 = vmatpush3.bf16.msra.mxu0 %v13612_v13 }
 0x49b   :  { %11302 = vmatprep.subr.bf16.mxu1 %v13617_v16  ;;  %11322 = vmatprep.subr.bf16.mxu0 %v17046_v1 }
 0x49e   :  { %11304 = vmatpush1.bf16.msra.mxu1 %v13631_v27  ;;  %11324 = vmatpush3.bf16.msra.mxu0 %v13633_v28 }
 0x49f   :  { %11306 = vmatprep.subr.bf16.mxu1 %v13638_v31  ;;  %11325 = vmatprep.subr.bf16.mxu0 %v17046_v1 }
 0x4a2   :  { %11308 = vmatpush1.bf16.msra.mxu1 %v13647_v40  ;;  %11327 = vmatpush3.bf16.msra.mxu0 %v13649_v41 }
 0x4a3   :  { %11310 = vmatprep.subr.bf16.mxu1 %v13654_v43  ;;  %11328 = vmatprep.subr.bf16.mxu0 %v17046_v1 }
 0x4a6   :  { %11312 = vmatpush1.bf16.msra.mxu1 %v13663_v52  ;;  %11330 = vmatpush3.bf16.msra.mxu0 %v13665_v55 }
 0x4a7   :  { %11332 = vmatprep.subr.bf16.mxu1 %v13670_v59  ;;  %11355 = vmatprep.subr.bf16.mxu0 %v17046_v1 }
 0x4a9   :  { %9478 = vmatmul.mubr.msk.f32.vlgmr.msra.gmra.mrb[8].mxu1 %vm1233_vm12, %v1159_v32  ;;  %10723 = vmatmul.mubr.msk.f32.vlgmr.msra.gmra.mrb[10].mxu0 %vm1233_vm12, %v1159_v32 }
 0x4aa   :  { %11334 = vmatpush1.bf16.msra.mxu1 %v13679_v15  ;;  %11357 = vmatpush3.bf16.msra.mxu0 %v13681_v19 }
 0x4ab   :  { %11336 = vmatprep.subr.bf16.mxu1 %v13686_v21  ;;  %11358 = vmatprep.subr.bf16.mxu0 %v17046_v1 }
 0x4ac   :  { %1733 = vmatprep.mubr.f32.mxu1 %v13246_v0  ;;  %10749 = vmatprep.mubr.msk.f32.mxu0 %vm13248_vm0, %v13246_v0  ;;  %v1650_v0 = vld [vmem:[%s13627_s21 + $0xa0] sm:$0xff] }
 0x4ad   :  { %v13739_v32 = vpack.c.bf16 %v1653_v20, %v1650_v0  ;;  %v13760_v0 = vpack.c.bf16 %v1664_v51, %v1661_v50  ;;  %v1663_v20 = vld [vmem:[%s13627_s21 + $0x108] sm:$0xff]  ;;  %v1596_v51 = vld [vmem:[%s13733_s25 + $0x18] sm:$0xff]  ;;  %s9444_s21 = sld [smem:[%s17021_s0 + %s13289_s18]]  }
 0x4ae   :  { %11338 = vmatpush1.bf16.msra.mxu1 %v13697_v38  ;;  %11360 = vmatpush3.bf16.msra.mxu0 %v13699_v39  ;;  %v13769_v42 = vpack.c.bf16 %v1663_v20, %v1660_v7  ;;  %v1603_v7 = vld [vmem:[%s13733_s25 + $0x50] sm:$0xff]  ;;  %v13785_v20 = vpack.c.bf16 %v1596_v51, %v1593_v48  ;;  %v1606_v48 = vld [vmem:[%s13733_s25 + $0x68] sm:$0xff]  ;;  %v1605_v51 = vld [vmem:[%s13733_s25 + $0x60] sm:$0xff] }
 0x4af   :  { %11340 = vmatprep.subr.bf16.mxu1 %v13704_v44  ;;  %11361 = vmatprep.subr.bf16.mxu0 %v17046_v1  ;;  %17252 = vst [vmem:[#allocation7_spill] sm:$0xff] %v13739_v32  ;;  %17256 = vst [vmem:[#allocation11_spill] sm:$0xff] %v13760_v0 }
 0x4b0   :  { %17257 = vst [vmem:[#allocation12_spill] sm:$0xff] %v13769_v42  ;;  %17260 = vst [vmem:[#allocation15_spill] sm:$0xff] %v13785_v20 }
 0x4b2   :  { %11342 = vmatpush1.bf16.msra.mxu1 %v13716_v2  ;;  %11363 = vmatpush3.bf16.msra.mxu0 %v13718_v4 }
 0x4b3   :  { %11344 = vmatprep.subr.bf16.mxu1 %v13723_v18  ;;  %11364 = vmatprep.subr.bf16.mxu0 %v17046_v1  ;;  %v1624_v18 = vld [vmem:[%s13733_s25 + $0xf8] sm:$0xff] }
 0x4b6   :  { %11346 = vmatpush1.bf16.msra.mxu1 %v13737_v30  ;;  %11366 = vmatpush3.bf16.msra.mxu0 %v13739_v32  ;;  %v1594_v32 = vld [vmem:[%s13733_s25 + $0x8] sm:$0xff]  ;;  %v1604_v30 = vld [vmem:[%s13733_s25 + $0x58] sm:$0xff] }
 0x4b7   :  { %11348 = vmatprep.subr.bf16.mxu1 %v13744_v36  ;;  %11367 = vmatprep.subr.bf16.mxu0 %v17046_v1  ;;  %v13776_v50 = vpack.c.bf16 %v1597_v35, %v1594_v32  ;;  %v1595_v36 = vld [vmem:[%s13733_s25 + $0x10] sm:$0xff]  ;;  %v1602_v35 = vld [vmem:[%s13733_s25 + $0x48] sm:$0xff] }
 0x4b9   :  { %17259 = vst [vmem:[#allocation14_spill] sm:$0xff] %v13776_v50 }
 0x4ba   :  { %11350 = vmatpush1.bf16.msra.mxu1 %v13753_v57  ;;  %11369 = vmatpush3.bf16.msra.mxu0 %v13755_v5  ;;  %v1598_v57 = vld [vmem:[%s13733_s25 + $0x28] sm:$0xff]  ;;  %v1600_v5 = vld [vmem:[%s13733_s25 + $0x38] sm:$0xff] }
 0x4bb   :  { %11352 = vmatprep.subr.bf16.mxu1 %v13760_v0  ;;  %11370 = vmatprep.subr.bf16.mxu0 %v17046_v1  ;;  %v13787_v23 = vpack.c.bf16 %v1598_v57, %v1595_v36  ;;  %v13792_v32 = vpack.c.bf16 %v1603_v7, %v1600_v5  ;;  %v1601_v0 = vld [vmem:[%s13733_s25 + $0x40] sm:$0xff]  ;;  %v13803_v57 = vpack.c.bf16 %v1602_v35, %v1599_v26  ;;  %v1615_v26 = vld [vmem:[%s13733_s25 + $0xb0] sm:$0xff] }
 0x4bc   :  { %v1609_v36 = vld [vmem:[%s13733_s25 + $0x80] sm:$0xff]  ;;  %v13805_v5 = vpack.c.bf16 %v1604_v30, %v1601_v0  ;;  %v13817_v30 = vld [vmem:[#allocation3] sm:$0xff] }
 0x4bd   :  { %17261 = vst [vmem:[#allocation16_spill] sm:$0xff] %v13787_v23  ;;  %17262 = vst [vmem:[#allocation17_spill] sm:$0xff] %v13792_v32  ;;  %v13810_v7 = vpack.c.bf16 %v1609_v36, %v1606_v48  ;;  %v1611_v48 = vld [vmem:[%s13733_s25 + $0x90] sm:$0xff] }
 0x4be   :  { %11354 = vmatpush1.bf16.msra.mxu1 %v13769_v42  ;;  %11372 = vmatpush3.bf16.msra.mxu0 %v13771_v45  ;;  %v1629_v42 = vld [vmem:[#allocation2 + $0x2] sm:$0xf]  ;;  %17263 = vst [vmem:[#allocation18_spill] sm:$0xff] %v13803_v57  ;;  %17264 = vst [vmem:[#allocation19_spill] sm:$0xff] %v13805_v5  ;;  %v1607_v45 = vld [vmem:[%s13733_s25 + $0x70] sm:$0xff] }
 0x4bf   :  { %11374 = vmatprep.subr.bf16.mxu1 %v13776_v50  ;;  %11397 = vmatprep.subr.bf16.mxu0 %v17046_v1  ;;  %17265 = vst [vmem:[#allocation20_spill] sm:$0xff] %v13810_v7  ;;  %v1608_v50 = vld [vmem:[%s13733_s25 + $0x78] sm:$0xff]  ;;  %1147 = vst.msk [vmem:[#allocation3 + $0x10] sm:$0xff] %vm1146_vm13, %v13817_v30 }
 0x4c0   :  { %v13824_v0 = vpack.c.bf16 %v1608_v50, %v1605_v51  ;;  %v1621_v50 = vld [vmem:[%s13733_s25 + $0xe0] sm:$0xff]  ;;  %1154 = vst.msk [vmem:[#allocation3 + $0x40] sm:$0xff] %vm1146_vm13, %v13817_v30 }
 0x4c1   :  { %9480 = vmatmul.mubr.msk.f32.vlgmr.msra.gmra.mrb[10].mxu1 %vm1233_vm12, %v1629_v42  ;;  %10750 = vmatmul.mubr.msk.f32.vlgmr.msra.gmra.mrb[12].mxu0 %vm1233_vm12, %v1629_v42  ;;  %v1610_v42 = vld [vmem:[%s13733_s25 + $0x88] sm:$0xff] }
 0x4c2   :  { %11376 = vmatpush1.bf16.msra.mxu1 %v13785_v20  ;;  %11399 = vmatpush3.bf16.msra.mxu0 %v13787_v23  ;;  %v1612_v20 = vld [vmem:[%s13733_s25 + $0x98] sm:$0xff]  ;;  %17266 = vst [vmem:[#allocation21_spill] sm:$0xff] %v13824_v0  ;;  %v13826_v35 = vpack.c.bf16 %v1610_v42, %v1607_v45  ;;  %v1618_v23 = vld [vmem:[%s13733_s25 + $0xc8] sm:$0xff]  ;;  %v1617_v42 = vld [vmem:[%s13733_s25 + $0xc0] sm:$0xff] }
 0x4c3   :  { %11378 = vmatprep.subr.bf16.mxu1 %v13792_v32  ;;  %11400 = vmatprep.subr.bf16.mxu0 %v17046_v1  ;;  %v13831_v36 = vpack.c.bf16 %v1615_v26, %v1612_v20  ;;  %v1614_v32 = vld [vmem:[%s13733_s25 + $0xa8] sm:$0xff]  ;;  %v13847_v20 = vpack.c.bf16 %v1621_v50, %v1618_v23  ;;  %v1620_v26 = vld [vmem:[%s13733_s25 + $0xd8] sm:$0xff]  ;;  %v1625_v50 = vld [vmem:[%s13733_s25 + $0x100] sm:$0xff] }
 0x4c4   :  { %1874 = vmatprep.mubr.f32.mxu1 %v13817_v30  ;;  %10776 = vmatprep.mubr.msk.f32.mxu0 %vm13248_vm0, %v13817_v30  ;;  %17267 = vst [vmem:[#allocation22_spill] sm:$0xff] %v13826_v35  ;;  %v13840_v45 = vpack.c.bf16 %v1614_v32, %v1611_v48  ;;  %v13856_v32 = vpack.c.bf16 %v1620_v26, %v1617_v42  ;;  %v1626_v48 = vld [vmem:[%s13733_s25 + $0x108] sm:$0xff]  ;;  %v2713_v26 = vld [vmem:[%s14010_s29 + $0xc0] sm:$0xff] }
 0x4c5   :  { %17268 = vst [vmem:[#allocation23_spill] sm:$0xff] %v13831_v36 }
 0x4c6   :  { %11380 = vmatpush1.bf16.msra.mxu1 %v13803_v57  ;;  %11402 = vmatpush3.bf16.msra.mxu0 %v13805_v5  ;;  %v1613_v57 = vld [vmem:[%s13733_s25 + $0xa0] sm:$0xff]  ;;  %v1616_v5 = vld [vmem:[%s13733_s25 + $0xb8] sm:$0xff]  ;;  %17269 = vst [vmem:[#allocation24_spill] sm:$0xff] %v13840_v45 }
 0x4c7   :  { %11382 = vmatprep.subr.bf16.mxu1 %v13810_v7  ;;  %11403 = vmatprep.subr.bf16.mxu0 %v17046_v1  ;;  %v13842_v51 = vpack.c.bf16 %v1616_v5, %v1613_v57  ;;  %v1619_v7 = vld [vmem:[%s13733_s25 + $0xd0] sm:$0xff] }
 0x4c8   :  { %v1623_v5 = vld [vmem:[%s13733_s25 + $0xf0] sm:$0xff] }
 0x4ca   :  { %11384 = vmatpush1.bf16.msra.mxu1 %v13824_v0  ;;  %11405 = vmatpush3.bf16.msra.mxu0 %v13826_v35  ;;  %v1622_v0 = vld [vmem:[%s13733_s25 + $0xe8] sm:$0xff]  ;;  %v1627_v35 = vld [vmem:[%s13733_s25 + $0x110] sm:$0xff] }
 0x4cb   :  { %11386 = vmatprep.subr.bf16.mxu1 %v13831_v36  ;;  %11406 = vmatprep.subr.bf16.mxu0 %v17046_v1  ;;  %v13858_v57 = vpack.c.bf16 %v1622_v0, %v1619_v7  ;;  %v13863_v23 = vpack.c.bf16 %v1627_v35, %v1624_v18  ;;  %v1628_v36 = vld [vmem:[%s13733_s25 + $0x118] sm:$0xff]  ;;  %v2694_v18 = vld [vmem:[%s14010_s29 + $0x28] sm:$0xff]  ;;  %v2711_v0 = vld [vmem:[%s14010_s29 + $0xb0] sm:$0xff]  ;;  %s16242_s25 = sld [smem:[%s17021_s0 + %s13290_s22]]  }
 0x4cc   :  { %v13872_v42 = vpack.c.bf16 %v1628_v36, %v1625_v50  ;;  %v2712_v35 = vld [vmem:[%s14010_s29 + $0xb8] sm:$0xff]  ;;  %v2695_v36 = vld [vmem:[%s14010_s29 + $0x30] sm:$0xff]  ;;  %v2698_v50 = vld [vmem:[%s14010_s29 + $0x48] sm:$0xff] }
 0x4ce   :  { %11388 = vmatpush1.bf16.msra.mxu1 %v13840_v45  ;;  %11408 = vmatpush3.bf16.msra.mxu0 %v13842_v51  ;;  %v13870_v45 = vpack.c.bf16 %v1626_v48, %v1623_v5  ;;  %v2697_v48 = vld [vmem:[%s14010_s29 + $0x40] sm:$0xff] }
 0x4cf   :  { %11390 = vmatprep.subr.bf16.mxu1 %v13847_v20  ;;  %11409 = vmatprep.subr.bf16.mxu0 %v17046_v1 }
 0x4d2   :  { %11392 = vmatpush1.bf16.msra.mxu1 %v13856_v32  ;;  %11411 = vmatpush3.bf16.msra.mxu0 %v13858_v57 }
 0x4d3   :  { %11394 = vmatprep.subr.bf16.mxu1 %v13863_v23  ;;  %11412 = vmatprep.subr.bf16.mxu0 %v17046_v1 }
 0x4d6   :  { %11396 = vmatpush1.bf16.msra.mxu1 %v13870_v45  ;;  %11414 = vmatpush3.bf16.msra.mxu0 %v13872_v42 }
 0x4d7   :  { %11416 = vmatprep.subr.bf16.mxu1 %v13433_v54  ;;  %11439 = vmatprep.subr.bf16.mxu0 %v17046_v1  ;;  %v13911_v54 = vld [vmem:[#allocation2 + $0x9] sm:$0xf] }
 0x4d9   :  { %9482 = vmatmul.mubr.msk.f32.vlgmr.msra.gmra.mrb[10].mxu1 %vm1233_vm12, %v13581_v53  ;;  %10777 = vmatmul.mubr.msk.f32.vlgmr.msra.gmra.mrb[14].mxu0 %vm1233_vm12, %v13581_v53  ;;  %v17289_v53 = vld [vmem:[#allocation24_spill] sm:$0xff] }
 0x4da   :  { %11418 = vmatpush1.bf16.msra.mxu1 %v13436_v56  ;;  %11441 = vmatpush3.bf16.msra.mxu0 %v13495_v61  ;;  %v2005_v56 = vld [vmem:[#allocation2 + $0x8] sm:$0xf]  ;;  %v17276_v61 = vld [vmem:[#allocation11_spill] sm:$0xff] }
 0x4db   :  { %11420 = vmatprep.subr.bf16.mxu1 %v13442_v60  ;;  %11442 = vmatprep.subr.bf16.mxu0 %v17046_v1  ;;  %v17270_v60 = vld [vmem:[#allocation5_spill] sm:$0xff] }
 0x4dc   :  { %2074 = vmatprep.mubr.f32.mxu1 %v13817_v30  ;;  %10803 = vmatprep.mubr.msk.f32.mxu0 %vm13248_vm0, %v13817_v30 }
 0x4de   :  { %11422 = vmatpush1.bf16.msra.mxu1 %v13446_v62  ;;  %11444 = vmatpush3.bf16.msra.mxu0 %v13502_v6  ;;  %v17271_v62 = vld [vmem:[#allocation6_spill] sm:$0xff]  ;;  %v17277_v6 = vld [vmem:[#allocation12_spill] sm:$0xff] }
 0x4df   :  { %11424 = vmatprep.subr.bf16.mxu1 %v13451_v3  ;;  %11445 = vmatprep.subr.bf16.mxu0 %v17046_v1  ;;  %v17272_v3 = vld [vmem:[#allocation7_spill] sm:$0xff] }
 0x4e2   :  { %11426 = vmatpush1.bf16.msra.mxu1 %v13458_v8  ;;  %11447 = vmatpush3.bf16.msra.mxu0 %v13510_v10  ;;  %v17273_v8 = vld [vmem:[#allocation8_spill] sm:$0xff]  ;;  %v17278_v10 = vld [vmem:[#allocation13_spill] sm:$0xff] }
 0x4e3   :  { %11428 = vmatprep.subr.bf16.mxu1 %v13461_v9  ;;  %11448 = vmatprep.subr.bf16.mxu0 %v17046_v1  ;;  %v17274_v9 = vld [vmem:[#allocation9_spill] sm:$0xff] }
 0x4e6   :  { %11430 = vmatpush1.bf16.msra.mxu1 %v13466_v12  ;;  %11450 = vmatpush3.bf16.msra.mxu0 %v13516_v14  ;;  %v17275_v12 = vld [vmem:[#allocation10_spill] sm:$0xff] }
 0x4e7   :  { %11432 = vmatprep.subr.bf16.mxu1 %v13523_v17  ;;  %11451 = vmatprep.subr.bf16.mxu0 %v17046_v1  ;;  %v17279_v14 = vld [vmem:[#allocation14_spill] sm:$0xff] }
 0x4e8   :  { %v2349_v17 = vld [vmem:[#allocation2 + $0xa] sm:$0xf] }
 0x4ea   :  { %11434 = vmatpush1.bf16.msra.mxu1 %v13528_v22  ;;  %11453 = vmatpush3.bf16.msra.mxu0 %v13539_v25  ;;  %v17280_v22 = vld [vmem:[#allocation15_spill] sm:$0xff]  ;;  %v17281_v25 = vld [vmem:[#allocation16_spill] sm:$0xff] }
 0x4eb   :  { %11436 = vmatprep.subr.bf16.mxu1 %v13545_v29  ;;  %11454 = vmatprep.subr.bf16.mxu0 %v17046_v1  ;;  %v17282_v29 = vld [vmem:[#allocation17_spill] sm:$0xff] }
 0x4ee   :  { %11438 = vmatpush1.bf16.msra.mxu1 %v13551_v33  ;;  %11456 = vmatpush3.bf16.msra.mxu0 %v13553_v34  ;;  %v17283_v33 = vld [vmem:[#allocation18_spill] sm:$0xff]  ;;  %v17284_v34 = vld [vmem:[#allocation19_spill] sm:$0xff] }
 0x4ef   :  { %11458 = vmatprep.subr.bf16.mxu1 %v13561_v37  ;;  %11481 = vmatprep.subr.bf16.mxu0 %v17046_v1  ;;  %v17285_v37 = vld [vmem:[#allocation20_spill] sm:$0xff] }
 0x4f1   :  { %9484 = vmatmul.mubr.msk.f32.vlgmr.msra.gmra.mrb[12].mxu1 %vm1233_vm12, %v13911_v54  ;;  %10804 = vmatmul.mubr.msk.f32.vlgmr.msra.gmra.mrb[16].mxu0 %vm1233_vm12, %v13911_v54 }
 0x4f2   :  { %11460 = vmatpush1.bf16.msra.mxu1 %v13571_v46  ;;  %11483 = vmatpush3.bf16.msra.mxu0 %v13573_v47  ;;  %v17286_v46 = vld [vmem:[#allocation21_spill] sm:$0xff]  ;;  %v17287_v47 = vld [vmem:[#allocation22_spill] sm:$0xff] }
 0x4f3   :  { %11462 = vmatprep.subr.bf16.mxu1 %v13576_v49  ;;  %11484 = vmatprep.subr.bf16.mxu0 %v17046_v1  ;;  %v17288_v49 = vld [vmem:[#allocation23_spill] sm:$0xff] }
 0x4f4   :  { %2218 = vmatprep.mubr.f32.mxu1 %v13817_v30  ;;  %10830 = vmatprep.mubr.msk.f32.mxu0 %vm13248_vm0, %v13817_v30 }
 0x4f6   :  { %11464 = vmatpush1.bf16.msra.mxu1 %v13591_v58  ;;  %11486 = vmatpush3.bf16.msra.mxu0 %v13593_v24 }
 0x4f7   :  { %11466 = vmatprep.subr.bf16.mxu1 %v13598_v63  ;;  %11487 = vmatprep.subr.bf16.mxu0 %v17046_v1 }
 0x4fa   :  { %11468 = vmatpush1.bf16.msra.mxu1 %v13610_v11  ;;  %11489 = vmatpush3.bf16.msra.mxu0 %v13612_v13  ;;  %v2705_v13 = vld [vmem:[%s14010_s29 + $0x80] sm:$0xff] }
 0x4fb   :  { %11470 = vmatprep.subr.bf16.mxu1 %v13617_v16  ;;  %11490 = vmatprep.subr.bf16.mxu0 %v17046_v1  ;;  %v2706_v16 = vld [vmem:[%s14010_s29 + $0x88] sm:$0xff] }
 0x4fe   :  { %11472 = vmatpush1.bf16.msra.mxu1 %v13631_v27  ;;  %11492 = vmatpush3.bf16.msra.mxu0 %v13633_v28  ;;  %v2689_v27 = vld [vmem:[%s14010_s29] sm:$0xff] }
 0x4ff   :  { %11474 = vmatprep.subr.bf16.mxu1 %v13638_v31  ;;  %11493 = vmatprep.subr.bf16.mxu0 %v17046_v1 }
 0x502   :  { %11476 = vmatpush1.bf16.msra.mxu1 %v13647_v40  ;;  %11495 = vmatpush3.bf16.msra.mxu0 %v13649_v41  ;;  %v14021_v41 = vpack.c.bf16 %v2706_v16, %v2705_v13  ;;  %v2703_v13 = vld [vmem:[%s14010_s29 + $0x70] sm:$0xff]  ;;  %v2704_v16 = vld [vmem:[%s14010_s29 + $0x78] sm:$0xff] }
 0x503   :  { %11478 = vmatprep.subr.bf16.mxu1 %v13654_v43  ;;  %11496 = vmatprep.subr.bf16.mxu0 %v17046_v1  ;;  %v2690_v43 = vld [vmem:[%s14010_s29 + $0x8] sm:$0xff] }
 0x506   :  { %11480 = vmatpush1.bf16.msra.mxu1 %v13663_v52  ;;  %11498 = vmatpush3.bf16.msra.mxu0 %v13665_v55  ;;  %v2707_v52 = vld [vmem:[%s14010_s29 + $0x90] sm:$0xff]  ;;  %v2708_v55 = vld [vmem:[%s14010_s29 + $0x98] sm:$0xff] }
 0x507   :  { %11500 = vmatprep.subr.bf16.mxu1 %v13670_v59  ;;  %11523 = vmatprep.subr.bf16.mxu0 %v17046_v1  ;;  %v14026_v59 = vpack.c.bf16 %v2690_v43, %v2689_v27 }
 0x509   :  { %9486 = vmatmul.mubr.msk.f32.vlgmr.msra.gmra.mrb[12].mxu1 %vm1233_vm12, %v2005_v56  ;;  %10831 = vmatmul.mubr.msk.f32.vlgmr.msra.gmra.mrb[18].mxu0 %vm1233_vm12, %v2005_v56  ;;  %v2715_v56 = vld [vmem:[%s14010_s29 + $0xd0] sm:$0xff] }
 0x50a   :  { %11502 = vmatpush1.bf16.msra.mxu1 %v13679_v15  ;;  %11525 = vmatpush3.bf16.msra.mxu0 %v13681_v19  ;;  %v14028_v15 = vpack.c.bf16 %v2708_v55, %v2707_v52  ;;  %v2691_v19 = vld [vmem:[%s14010_s29 + $0x10] sm:$0xff] }
 0x50b   :  { %11504 = vmatprep.subr.bf16.mxu1 %v13686_v21  ;;  %11526 = vmatprep.subr.bf16.mxu0 %v17046_v1  ;;  %v2692_v21 = vld [vmem:[%s14010_s29 + $0x18] sm:$0xff] }
 0x50c   :  { %2417 = vmatprep.mubr.f32.mxu1 %v13817_v30  ;;  %10857 = vmatprep.mubr.msk.f32.mxu0 %vm13248_vm0, %v13817_v30 }
 0x50e   :  { %11506 = vmatpush1.bf16.msra.mxu1 %v13697_v38  ;;  %11528 = vmatpush3.bf16.msra.mxu0 %v13699_v39  ;;  %v2709_v38 = vld [vmem:[%s14010_s29 + $0xa0] sm:$0xff]  ;;  %v2710_v39 = vld [vmem:[%s14010_s29 + $0xa8] sm:$0xff] }
 0x50f   :  { %11508 = vmatprep.subr.bf16.mxu1 %v13704_v44  ;;  %11529 = vmatprep.subr.bf16.mxu0 %v17046_v1  ;;  %v14036_v44 = vpack.c.bf16 %v2692_v21, %v2691_v19 }
 0x512   :  { %11510 = vmatpush1.bf16.msra.mxu1 %v13716_v2  ;;  %11531 = vmatpush3.bf16.msra.mxu0 %v13718_v4  ;;  %v14039_v2 = vpack.c.bf16 %v2710_v39, %v2709_v38  ;;  %v2693_v4 = vld [vmem:[%s14010_s29 + $0x20] sm:$0xff] }
 0x513   :  { %11512 = vmatprep.subr.bf16.mxu1 %v17270_v60  ;;  %11532 = vmatprep.subr.bf16.mxu0 %v17046_v1  ;;  %v14044_v7 = vpack.c.bf16 %v2694_v18, %v2693_v4  ;;  %v2716_v60 = vld [vmem:[%s14010_s29 + $0xd8] sm:$0xff] }
 0x516   :  { %11514 = vmatpush1.bf16.msra.mxu1 %v17271_v62  ;;  %11534 = vmatpush3.bf16.msra.mxu0 %v17272_v3  ;;  %v2723_v62 = vld [vmem:[%s14010_s29 + $0x110] sm:$0xff]  ;;  %v14077_v3 = vpack.c.bf16 %v2716_v60, %v2715_v56 }
 0x517   :  { %11516 = vmatprep.subr.bf16.mxu1 %v17273_v8  ;;  %11535 = vmatprep.subr.bf16.mxu0 %v17046_v1  ;;  %v2724_v8 = vld [vmem:[%s14010_s29 + $0x118] sm:$0xff] }
 0x518   :  { %17291 = vst [vmem:[#allocation6_spill] sm:$0xff] %v14077_v3 }
 0x51a   :  { %11518 = vmatpush1.bf16.msra.mxu1 %v17274_v9  ;;  %11537 = vmatpush3.bf16.msra.mxu0 %v17275_v12  ;;  %v2699_v9 = vld [vmem:[%s14010_s29 + $0x50] sm:$0xff]  ;;  %v2700_v12 = vld [vmem:[%s14010_s29 + $0x58] sm:$0xff] }
 0x51b   :  { %11520 = vmatprep.subr.bf16.mxu1 %v17276_v61  ;;  %11538 = vmatprep.subr.bf16.mxu0 %v17046_v1  ;;  %v14082_v61 = vpack.c.bf16 %v2724_v8, %v2723_v62 }
 0x51d   :  { %17292 = vst [vmem:[#allocation7_spill] sm:$0xff] %v14082_v61 }
 0x51e   :  { %11522 = vmatpush1.bf16.msra.mxu1 %v17277_v6  ;;  %11540 = vmatpush3.bf16.msra.mxu0 %v17278_v10  ;;  %v14084_v6 = vpack.c.bf16 %v2700_v12, %v2699_v9 }
 0x51f   :  { %11542 = vmatprep.subr.bf16.mxu1 %v17279_v14  ;;  %11565 = vmatprep.subr.bf16.mxu0 %v17046_v1 }
 0x520   :  { %17293 = vst [vmem:[#allocation8_spill] sm:$0xff] %v14084_v6 }
 0x521   :  { %9488 = vmatmul.mubr.msk.f32.vlgmr.msra.gmra.mrb[14].mxu1 %vm1233_vm12, %v2349_v17  ;;  %10858 = vmatmul.mubr.msk.f32.vlgmr.msra.gmra.mrb[20].mxu0 %vm1233_vm12, %v2349_v17  ;;  %v2717_v17 = vld [vmem:[%s14010_s29 + $0xe0] sm:$0xff] }
 0x522   :  { %11544 = vmatpush1.bf16.msra.mxu1 %v17280_v22  ;;  %11567 = vmatpush3.bf16.msra.mxu0 %v17281_v25  ;;  %v2718_v22 = vld [vmem:[%s14010_s29 + $0xe8] sm:$0xff]  ;;  %v2725_v25 = vld [vmem:[%s14010_s29 + $0x120] sm:$0xff] }
 0x523   :  { %11546 = vmatprep.subr.bf16.mxu1 %v17282_v29  ;;  %11568 = vmatprep.subr.bf16.mxu0 %v17046_v1  ;;  %v14093_v29 = vpack.c.bf16 %v2718_v22, %v2717_v17 }
 0x524   :  { %2558 = vmatprep.mubr.f32.mxu1 %v13817_v30  ;;  %10884 = vmatprep.mubr.msk.f32.mxu0 %vm13248_vm0, %v13817_v30 }
 0x525   :  { %17294 = vst [vmem:[#allocation9_spill] sm:$0xff] %v14093_v29 }
 0x526   :  { %11548 = vmatpush1.bf16.msra.mxu1 %v17283_v33  ;;  %11570 = vmatpush3.bf16.msra.mxu0 %v17284_v34  ;;  %v2726_v33 = vld [vmem:[%s14010_s29 + $0x128] sm:$0xff]  ;;  %v2701_v34 = vld [vmem:[%s14010_s29 + $0x60] sm:$0xff] }
 0x527   :  { %11550 = vmatprep.subr.bf16.mxu1 %v17285_v37  ;;  %11571 = vmatprep.subr.bf16.mxu0 %v17046_v1  ;;  %v2702_v37 = vld [vmem:[%s14010_s29 + $0x68] sm:$0xff] }
 0x52a   :  { %11552 = vmatpush1.bf16.msra.mxu1 %v17286_v46  ;;  %11573 = vmatpush3.bf16.msra.mxu0 %v17287_v47  ;;  %v14098_v46 = vpack.c.bf16 %v2726_v33, %v2725_v25  ;;  %v14100_v47 = vpack.c.bf16 %v2702_v37, %v2701_v34 }
 0x52b   :  { %11554 = vmatprep.subr.bf16.mxu1 %v17288_v49  ;;  %11574 = vmatprep.subr.bf16.mxu0 %v17046_v1  ;;  %v2719_v49 = vld [vmem:[%s14010_s29 + $0xf0] sm:$0xff] }
 0x52c   :  { %17295 = vst [vmem:[#allocation10_spill] sm:$0xff] %v14098_v46  ;;  %17296 = vst [vmem:[#allocation11_spill] sm:$0xff] %v14100_v47 }
 0x52e   :  { %11556 = vmatpush1.bf16.msra.mxu1 %v17289_v53  ;;  %11576 = vmatpush3.bf16.msra.mxu0 %v13842_v51  ;;  %v14052_v51 = vpack.c.bf16 %v2712_v35, %v2711_v0  ;;  %v2720_v53 = vld [vmem:[%s14010_s29 + $0xf8] sm:$0xff]  ;;  %v17044_v0 = vlaneseq }
 0x52f   :  { %11558 = vmatprep.subr.bf16.mxu1 %v13847_v20  ;;  %11577 = vmatprep.subr.bf16.mxu0 %v17046_v1 }
 0x532   :  { %11560 = vmatpush1.bf16.msra.mxu1 %v13856_v32  ;;  %11579 = vmatpush3.bf16.msra.mxu0 %v13858_v57  ;;  %v2714_v32 = vld [vmem:[%s14010_s29 + $0xc8] sm:$0xff]  ;;  %v2721_v57 = vld [vmem:[%s14010_s29 + $0x100] sm:$0xff] }
 0x533   :  { %11562 = vmatprep.subr.bf16.mxu1 %v13863_v23  ;;  %11580 = vmatprep.subr.bf16.mxu0 %v17046_v1  ;;  %v14061_v5 = vpack.c.bf16 %v2714_v32, %v2713_v26  ;;  %v2722_v23 = vld [vmem:[%s14010_s29 + $0x108] sm:$0xff]  ;;  %v1158_v32 = vld [vmem:[%s9433_s3] sm:$0x7]  ;;  %s16317_s3 = sld [smem:[%s17021_s0 + %s13292_s30]]  }
 0x536   :  { %11564 = vmatpush1.bf16.msra.mxu1 %v13870_v45  ;;  %11582 = vmatpush3.bf16.msra.mxu0 %v13872_v42  ;;  %v2696_v45 = vld [vmem:[%s14010_s29 + $0x38] sm:$0xff]  ;;  %v14066_v42 = vpack.c.bf16 %v2722_v23, %v2721_v57 }
 0x537   :  { %11615 = vmatprep.subr.bf16.mxu0 %v17046_v1  ;;  %11584 = vmatprep.subr.bf16.mxu1 %v14021_v41  ;;  %v14054_v20 = vpack.c.bf16 %v2696_v45, %v2695_v36  ;;  %v14130_v45 = vshrl.u32 %v17044_v0, 7 }
 0x538   :  { %17290 = vst [vmem:[#allocation5_spill] sm:$0xff] %v14066_v42 }
 0x539   :  { %9490 = vmatmul.mubr.msk.f32.vlgmr.msra.gmra.mrb[14].mxu1 %vm1233_vm12, %v13911_v54  ;;  %10885 = vmatmul.mubr.msk.f32.vlgmr.msra.gmra.mrb[22].mxu0 %vm1233_vm12, %v13911_v54  ;;  %v14068_v54 = vpack.c.bf16 %v2698_v50, %v2697_v48  ;;  %17300 = vst [vmem:[#allocation15_spill] sm:$0xff] %v14130_v45  ;;  %v17042_v26 = vsub.s32 1, %v14130_v45  ;;  %v14134_v57 = vsub.s32 0, %v14130_v45  ;;  %v17043_v23 = vsub.s32 2, %v14130_v45 }
 0x53a   :  { %10903 = vmatprep.mubr.msk.f32.mxu0 %vm13248_vm0, %v13817_v30  ;;  %11586 = vmatpush3.bf16.msra.mxu1 %v14026_v59 }
 0x53b   :  { %11588 = vmatprep.subr.bf16.mxu1 %v14028_v15  ;;  %11617 = vmatpush3.bf16.msra.mxu0 %v14066_v42  ;;  %17301 = vst [vmem:[#allocation16_spill] sm:$0xff] %v14134_v57  ;;  %v14139_v48 = vrot.slane %v1158_v32, %v17042_v26  ;;  %v14142_v50 = vrot.slane %v1158_v32, %v14134_v57 }
 0x53c   :  { %11618 = vmatprep.subr.bf16.mxu0 %v17046_v1  ;;  %v14146_v56 = vrot.slane %v1158_v32, %v17043_v23 }
 0x53e   :  { %11590 = vmatpush3.bf16.msra.mxu1 %v14036_v44 }
 0x53f   :  { %11592 = vmatprep.subr.bf16.mxu1 %v14039_v2  ;;  %11620 = vmatpush3.bf16.msra.mxu0 %v14082_v61 }
 0x540   :  { %11621 = vmatprep.subr.bf16.mxu0 %v17046_v1 }
 0x542   :  { %11594 = vmatpush3.bf16.msra.mxu1 %v14044_v7 }
 0x543   :  { %11596 = vmatprep.subr.bf16.mxu1 %v14052_v51  ;;  %11623 = vmatpush3.bf16.msra.mxu0 %v14098_v46 }
 0x544   :  { %11624 = vmatprep.subr.bf16.mxu0 %v17046_v1 }
 0x546   :  { %11598 = vmatpush3.bf16.msra.mxu1 %v14054_v20 }
 0x547   :  { %11600 = vmatprep.subr.bf16.mxu1 %v14061_v5 }
 0x54a   :  { %11602 = vmatpush3.bf16.msra.mxu1 %v14068_v54 }
 0x54b   :  { %11604 = vmatprep.subr.bf16.mxu1 %v14077_v3 }
 0x54e   :  { %11606 = vmatpush3.bf16.msra.mxu1 %v14084_v6 }
 0x54f   :  { %11608 = vmatprep.subr.bf16.mxu1 %v14093_v29 }
 0x552   :  { %11610 = vmatpush3.bf16.msra.mxu1 %v14100_v47 }
 0x564   :  { %v1374_v58 = vpop.f32.mrb[8].mxu0 }
 0x565   :  { %v10697_v24 = vpop.f32.mrb[9].mxu0 }
 0x566   :  { %v14109_v24 = vpack.c.bf16 %v2720_v53, %v2719_v49 }
 0x568   :  { %17297 = vst [vmem:[#allocation12_spill] sm:$0xff] %v14109_v24  ;;  %11612 = vmatprep.subr.bf16.mxu1 %v14109_v24 }
 0x57c   :  { %v14012_v63 = vpop.f32.mrb[8].mxu1  ;;  %v1518_v11 = vpop.f32.mrb[10].mxu0 }
 0x57d   :  { %v14017_v28 = vadd.f32 %v1518_v11, %v1374_v58  ;;  %v14019_v31 = vpop.f32.mrb[9].mxu1  ;;  %v10724_v40 = vpop.f32.mrb[11].mxu0  ;;  %v2727_v58 = vld [vmem:[%s14010_s29 + $0x130] sm:$0xff]  ;;  %v2728_v11 = vld [vmem:[%s14010_s29 + $0x138] sm:$0xff]  ;;  %v14154_v62 = vadd.f32 %v14142_v50, %v14012_v63  ;;  %s16312_s29 = sld [smem:[%s17021_s0 + %s13291_s26]]  }
 0x57e   :  { %v14114_v27 = vpack.c.bf16 %v2728_v11, %v2727_v58  ;;  %v14116_v40 = vpack.c.bf16 %v2704_v16, %v2703_v13  ;;  %v14150_v60 = vadd.f32 %v14139_v48, %v14019_v31 }
 0x57f   :  { %v14158_v8 = vadd.f32 %v14146_v56, %v14017_v28  ;;  %v1541_v12 = vsel %vm422_vm3, %v14154_v62, 0.0 }
 0x580   :  { %17298 = vst [vmem:[#allocation13_spill] sm:$0xff] %v14114_v27  ;;  %17299 = vst [vmem:[#allocation14_spill] sm:$0xff] %v14116_v40  ;;  %11626 = vmatpush3.bf16.msra.mxu0 %v14114_v27  ;;  %11614 = vmatpush3.bf16.msra.mxu1 %v14116_v40  ;;  %v1567_v9 = vmul.f32 %v14150_v60, %v14150_v60  ;;  %v1542_v28 = vrot.slane %v1541_v12, 4 }
 0x581   :  { %11628 = vmatprep.subr.bf16.mxu0 %v14021_v41  ;;  %17302 = vst [vmem:[#allocation17_spill] sm:$0xff] %v14150_v60  ;;  %v1556_v63 = vsel %vm1555_vm14, %v14158_v8, 0.0 }
 0x582   :  { %v1557_v34 = vrot.slane %v1556_v63, 4  ;;  %v1543_v49 = vadd.f32 %v1542_v28, %v1541_v12 }
 0x594   :  { %v1806_v10 = vpop.f32.mrb[12].mxu0 }
 0x595   :  { %v10751_v14 = vpop.f32.mrb[13].mxu0 }
 0x596   :  { %v1576_v14 = vsel %vm422_vm3, %v1567_v9, 0.0 }
 0x597   :  { %v1577_v37 = vrot.slane %v1576_v14, 4 }
 0x5ac   :  { %v1876_v43 = vpop.f32.mrb[10].mxu1  ;;  %v1947_v52 = vpop.f32.mrb[14].mxu0 }
 0x5ad   :  { %v1948_v55 = vadd.f32 %v1947_v52, %v1806_v10  ;;  %v1878_v19 = vpop.f32.mrb[11].mxu1  ;;  %v10778_v21 = vpop.f32.mrb[15].mxu0  ;;  %v1548_v10 = vsel %vm422_vm3, %v14150_v60, 0.0  ;;  %v14172_v25 = vadd.f32 %v1876_v43, %v14142_v50  ;;  %v1558_v43 = vadd.f32 %v1557_v34, %v1556_v63 }
 0x5ae   :  { %v1549_v22 = vrot.slane %v1548_v10, 4  ;;  %v14175_v33 = vadd.f32 %v1878_v19, %v14139_v48  ;;  %v1578_v52 = vadd.f32 %v1577_v37, %v1576_v14 }
 0x5af   :  { %17303 = vst [vmem:[#allocation18_spill] sm:$0xff] %v14172_v25  ;;  %v1954_v11 = vsel %vm422_vm3, %v14172_v25, 0.0  ;;  %v14183_v13 = vadd.f32 %v1948_v55, %v14146_v56  ;;  %v1544_v55 = vrot.slane %v1543_v49, 2  ;;  %v1559_v9 = vrot.slane %v1558_v43, 2 }
 0x5b0   :  { %17304 = vst [vmem:[#allocation19_spill] sm:$0xff] %v14175_v33  ;;  %v1550_v58 = vadd.f32 %v1549_v22, %v1548_v10  ;;  %v1979_v16 = vmul.f32 %v14175_v33, %v14175_v33 }
 0x5b1   :  { %v1545_v34 = vadd.f32 %v1544_v55, %v1543_v49  ;;  %v1560_v23 = vadd.f32 %v1559_v9, %v1558_v43 }
 0x5b2   :  { %v1988_v32 = vsel %vm422_vm3, %v1979_v16, 0.0 }
 0x5b3   :  { %v1989_v28 = vrot.slane %v1988_v32, 4  ;;  %v1546_v27 = vrot.slane %v1545_v34, 1 }
 0x5b5   :  { %v1990_v57 = vadd.f32 %v1989_v28, %v1988_v32  ;;  %v14207_v43 = vadd.f32 %v1546_v27, %v1545_v34 }
 0x5c4   :  { %v2147_v38 = vpop.f32.mrb[16].mxu0 }
 0x5c5   :  { %v10805_v39 = vpop.f32.mrb[17].mxu0 }
 0x5c6   :  { %v1961_v39 = vsel %vm422_vm3, %v14175_v33, 0.0 }
 0x5c7   :  { %v1962_v10 = vrot.slane %v1961_v39, 4 }
 0x5c9   :  { %v1963_v45 = vadd.f32 %v1962_v10, %v1961_v39 }
 0x5dc   :  { %v2220_v4 = vpop.f32.mrb[12].mxu1  ;;  %v2291_v18 = vpop.f32.mrb[18].mxu0 }
 0x5dd   :  { %v2292_v35 = vadd.f32 %v2291_v18, %v2147_v38  ;;  %v2222_v36 = vpop.f32.mrb[13].mxu1  ;;  %v10832_v41 = vpop.f32.mrb[19].mxu0  ;;  %v14188_v19 = vadd.f32 %v2220_v4, %v14142_v50  ;;  %v1955_v38 = vrot.slane %v1954_v11, 4  ;;  %v1579_v4 = vrot.slane %v1578_v52, 2 }
 0x5de   :  { %v14178_v53 = vadd.f32 %v2222_v36, %v14139_v48  ;;  %v1551_v36 = vrot.slane %v1550_v58, 2  ;;  %v1968_v41 = vsel %vm1555_vm14, %v14183_v13, 0.0 }
 0x5df   :  { %v14191_v21 = vadd.f32 %v2292_v35, %v14146_v56  ;;  %v2298_v35 = vsel %vm422_vm3, %v14188_v19, 0.0  ;;  %v1956_v14 = vadd.f32 %v1955_v38, %v1954_v11  ;;  %v1580_v0 = vadd.f32 %v1579_v4, %v1578_v52 }
 0x5e0   :  { %17305 = vst [vmem:[#allocation20_spill] sm:$0xff] %v14178_v53  ;;  %v2323_v18 = vmul.f32 %v14178_v53, %v14178_v53  ;;  %v2305_v12 = vsel %vm422_vm3, %v14178_v53, 0.0  ;;  %v1552_v37 = vadd.f32 %v1551_v36, %v1550_v58  ;;  %v2299_v16 = vrot.slane %v2298_v35, 4 }
 0x5e1   :  { %v2312_v63 = vsel %vm1555_vm14, %v14191_v21, 0.0  ;;  %v2306_v26 = vrot.slane %v2305_v12, 4  ;;  %v1957_v60 = vrot.slane %v1956_v14, 2  ;;  %v1561_v38 = vrot.slane %v1560_v23, 1 }
 0x5e2   :  { %v2332_v22 = vsel %vm422_vm3, %v2323_v18, 0.0  ;;  %v2313_v1 = vrot.slane %v2312_v63, 4  ;;  %v1553_v46 = vrot.slane %v1552_v37, 1  ;;  %v2300_v61 = vadd.f32 %v2299_v16, %v2298_v35 }
 0x5e3   :  { %v2333_v33 = vrot.slane %v2332_v22, 4  ;;  %v2307_v11 = vadd.f32 %v2306_v26, %v2305_v12  ;;  %v1581_v40 = vrot.slane %v1580_v0, 1  ;;  %v1964_v18 = vrot.slane %v1963_v45, 2 }
 0x5e4   :  { %v2314_v42 = vadd.f32 %v2313_v1, %v2312_v63  ;;  %v1958_v58 = vadd.f32 %v1957_v60, %v1956_v14  ;;  %v1991_v36 = vrot.slane %v1990_v57, 2  ;;  %v2301_v52 = vrot.slane %v2300_v61, 2 }
 0x5e5   :  { %v2334_v49 = vadd.f32 %v2333_v33, %v2332_v22  ;;  %v2308_v39 = vrot.slane %v2307_v11, 2  ;;  %v1554_v9 = vadd.f32 %v1553_v46, %v1552_v37  ;;  %v1562_v4 = vadd.f32 %v1561_v38, %v1560_v23 }
 0x5e6   :  { %v2315_v32 = vrot.slane %v2314_v42, 2  ;;  %v1582_v1 = vadd.f32 %v1581_v40, %v1580_v0  ;;  %v1965_v12 = vadd.f32 %v1964_v18, %v1963_v45  ;;  %v1959_v14 = vrot.slane %v1958_v58, 1 }
 0x5e7   :  { %v2335_v10 = vrot.slane %v2334_v49, 2  ;;  %v1992_v23 = vadd.f32 %v1991_v36, %v1990_v57  ;;  %v2302_v28 = vadd.f32 %v2301_v52, %v2300_v61  ;;  %v2309_v22 = vadd.f32 %v2308_v39, %v2307_v11 }
 0x5e8   :  { %v2316_v45 = vadd.f32 %v2315_v32, %v2314_v42  ;;  %v1966_v57 = vrot.slane %v1965_v12, 1 }
 0x5e9   :  { %v2336_v34 = vadd.f32 %v2335_v10, %v2334_v49  ;;  %v2310_v18 = vrot.slane %v2309_v22, 1  ;;  %v2303_v36 = vrot.slane %v2302_v28, 1 }
 0x5ea   :  { %v2317_v52 = vrot.slane %v2316_v45, 1 }
 0x5f4   :  { %v14166_v31 = vpop.f32.mrb[20].mxu0 }
 0x5f5   :  { %v10859_v17 = vpop.f32.mrb[21].mxu0 }
 0x5f6   :  { %v1969_v17 = vrot.slane %v1968_v41, 4 }
 0x5f8   :  { %v1970_v53 = vadd.f32 %v1969_v17, %v1968_v41  ;;  %v14211_v41 = vmul.f32 %v14172_v25, %v14172_v25 }
 0x5fa   :  { %v1971_v55 = vrot.slane %v1970_v53, 2 }
 0x5fc   :  { %v1972_v46 = vadd.f32 %v1971_v55, %v1970_v53  ;;  %v1993_v55 = vrot.slane %v1992_v23, 1 }
 0x5fe   :  { %v1973_v37 = vrot.slane %v1972_v46, 1  ;;  %v1994_v25 = vadd.f32 %v1993_v55, %v1992_v23  ;;  %v1566_v23 = vmul.f32 %v14154_v62, %v14154_v62 }
 0x60c   :  { %v2560_v26 = vpop.f32.mrb[14].mxu1  ;;  %v2631_v35 = vpop.f32.mrb[22].mxu0 }
 0x60d   :  { %v14214_v60 = vadd.f32 %v2560_v26, %v14142_v50  ;;  %v2632_v27 = vadd.f32 %v2631_v35, %v14166_v31  ;;  %v2562_v33 = vpop.f32.mrb[15].mxu1  ;;  %v10886_v63 = vpop.f32.mrb[23].mxu0 }
 0x60e   :  { %v14218_v17 = vadd.f32 %v2562_v33, %v14139_v48  ;;  %v2337_v33 = vrot.slane %v2336_v34, 1  ;;  %v1960_v63 = vadd.f32 %v1959_v14, %v1958_v58 }
 0x60f   :  { %v2638_v40 = vsel %vm422_vm3, %v14214_v60, 0.0  ;;  %v14223_v0 = vadd.f32 %v2632_v27, %v14146_v56  ;;  %v1967_v27 = vadd.f32 %v1966_v57, %v1965_v12  ;;  %v2003_v57 = vadd.f32 %v1994_v25, %v1582_v1 }
 0x610   :  { %17306 = vst [vmem:[#allocation21_spill] sm:$0xff] %v14218_v17  ;;  %v2639_v50 = vrot.slane %v2638_v40, 4  ;;  %v2645_v31 = vsel %vm422_vm3, %v14218_v17, 0.0  ;;  %v2663_v53 = vmul.f32 %v14218_v17, %v14218_v17  ;;  %v1974_v17 = vadd.f32 %v1973_v37, %v1972_v46 }
 0x611   :  { %v2652_v48 = vsel %vm1555_vm14, %v14223_v0, 0.0  ;;  %v2646_v61 = vrot.slane %v2645_v31, 4  ;;  %v1976_v29 = vadd.f32 %v1967_v27, %v1554_v9  ;;  %v2338_v3 = vadd.f32 %v2337_v33, %v2336_v34 }
 0x612   :  { %v2640_v16 = vadd.f32 %v2639_v50, %v2638_v40  ;;  %v2653_v11 = vrot.slane %v2652_v48, 4  ;;  %v2672_v56 = vsel %vm422_vm3, %v2663_v53, 0.0  ;;  %v2311_v40 = vadd.f32 %v2310_v18, %v2309_v22 }
 0x613   :  { %v2647_v38 = vadd.f32 %v2646_v61, %v2645_v31  ;;  %v2673_v42 = vrot.slane %v2672_v56, 4  ;;  %v2304_v31 = vadd.f32 %v2303_v36, %v2302_v28  ;;  %v2318_v61 = vadd.f32 %v2317_v52, %v2316_v45 }
 0x614   :  { %v2641_v39 = vrot.slane %v2640_v16, 2  ;;  %v2654_v32 = vadd.f32 %v2653_v11, %v2652_v48  ;;  %v1977_v11 = vadd.f32 %v1974_v17, %v1562_v4  ;;  %v1975_v12 = vadd.f32 %v1960_v63, %v14207_v43 }
 0x615   :  { %v2648_v26 = vrot.slane %v2647_v38, 2  ;;  %v2674_v35 = vadd.f32 %v2673_v42, %v2672_v56  ;;  %v2320_v14 = vadd.f32 %v2311_v40, %v1976_v29  ;;  %v2322_v9 = vmul.f32 %v14188_v19, %v14188_v19  ;;  %v17307_v40 = vld [vmem:[#allocation6_spill] sm:$0xff] }
 0x616   :  { %v2642_v49 = vadd.f32 %v2641_v39, %v2640_v16  ;;  %v2655_v10 = vrot.slane %v2654_v32, 2  ;;  %v2319_v45 = vadd.f32 %v2304_v31, %v1975_v12  ;;  %v2321_v37 = vadd.f32 %v2318_v61, %v1977_v11 }
 0x617   :  { %v2649_v50 = vadd.f32 %v2648_v26, %v2647_v38  ;;  %v2675_v53 = vrot.slane %v2674_v35, 2  ;;  %v2347_v16 = vadd.f32 %v2338_v3, %v2003_v57  ;;  %v1981_v29 = vsel %vm422_vm3, %v14211_v41, 0.0 }
 0x618   :  { %v2643_v24 = vrot.slane %v2642_v49, 1  ;;  %v2656_v47 = vadd.f32 %v2655_v10, %v2654_v32  ;;  %v2325_v25 = vsel %vm422_vm3, %v2322_v9, 0.0  ;;  %v1982_v3 = vrot.slane %v1981_v29, 4 }
 0x619   :  { %v2650_v6 = vrot.slane %v2649_v50, 1  ;;  %v2676_v48 = vadd.f32 %v2675_v53, %v2674_v35  ;;  %v2326_v1 = vrot.slane %v2325_v25, 4  ;;  %v2324_v32 = vmul.f32 %v14191_v21, %v14191_v21 }
 0x61a   :  { %v2657_v56 = vrot.slane %v2656_v47, 1  ;;  %v2644_v58 = vadd.f32 %v2643_v24, %v2642_v49  ;;  %v1983_v42 = vadd.f32 %v1982_v3, %v1981_v29 }
 0x61b   :  { %v2651_v46 = vadd.f32 %v2650_v6, %v2649_v50  ;;  %v2677_v22 = vrot.slane %v2676_v48, 1  ;;  %v2662_v6 = vmul.f32 %v14214_v60, %v14214_v60  ;;  %v2327_v36 = vadd.f32 %v2326_v1, %v2325_v25 }
 0x61c   :  { %v2658_v28 = vadd.f32 %v2657_v56, %v2656_v47  ;;  %v2659_v17 = vadd.f32 %v2644_v58, %v2319_v45  ;;  %v1569_v47 = vsel %vm422_vm3, %v1566_v23, 0.0  ;;  %v2339_v63 = vsel %vm1555_vm14, %v2324_v32, 0.0  ;;  %v17309_v58 = vld [vmem:[#allocation9_spill] sm:$0xff]  ;;  %v17310_v23 = vld [vmem:[#allocation11_spill] sm:$0xff] }
 0x61d   :  { %v2660_v34 = vadd.f32 %v2651_v46, %v2320_v14  ;;  %v2678_v4 = vadd.f32 %v2677_v22, %v2676_v48  ;;  %v2665_v43 = vsel %vm422_vm3, %v2662_v6, 0.0  ;;  %v1570_v41 = vrot.slane %v1569_v47, 4  ;;  %v17308_v48 = vld [vmem:[#allocation8_spill] sm:$0xff] }
 0x61e   :  { %v2661_v38 = vadd.f32 %v2658_v28, %v2321_v37  ;;  %v2666_v18 = vrot.slane %v2665_v43, 4  ;;  %v2328_v39 = vrot.slane %v2327_v36, 2  ;;  %v2340_v61 = vrot.slane %v2339_v63, 4  ;;  %v17311_v37 = vld [vmem:[#allocation12_spill] sm:$0xff] }
 0x61f   :  { %2796 = vmatprep.mubr.f32.mxu1 %v2660_v34  ;;  %v2687_v24 = vadd.f32 %v2678_v4, %v2347_v16  ;;  %v1571_v55 = vadd.f32 %v1570_v41, %v1569_v47  ;;  %v17313_v47 = vmov 0.0|0.0   ;;  %v14275_v41 = vld [vmem:[#allocation3] sm:$0xff]  ;;  %vm1150_vm3 = vcmask 517120  }
 0x620   :  { %2797 = vmatmul.mubr.f32.vlgmr.msra.gmra.mrb[16].mxu1 %v2659_v17  ;;  %10904 = vmatmul.mubr.msk.f32.vlgmr.msra.gmra.mrb[24].mxu0 %vm1146_vm13, %v2661_v38  ;;  %v2667_v52 = vadd.f32 %v2666_v18, %v2665_v43  ;;  %v2329_v27 = vadd.f32 %v2328_v39, %v2327_v36  ;;  %v2341_v57 = vadd.f32 %v2340_v61, %v2339_v63  ;;  %v17312_v38 = vld [vmem:[#allocation14_spill] sm:$0xff]  ;;  %v17314_v43 = vld [vmem:[#allocation5_spill] sm:$0xff]  ;;  %v17315_v36 = vld [vmem:[#allocation7_spill] sm:$0xff] }
 0x621   :  { %11630 = vmatpush3.bf16.msra.mxu0 %v14026_v59  ;;  %2939 = vmatprep.mubr.f32.mxu0 %v2687_v24  ;;  %v1984_v59 = vrot.slane %v1983_v42, 2  ;;  %v17316_v39 = vld [vmem:[#allocation10_spill] sm:$0xff]  ;;  %v3030_v63 = vld [vmem:[%s14290_s7 + $0x18] sm:$0xff]  ;;  %v3753_v61 = vld [vmem:[%s14304_s11 + $0x20] sm:$0xff]  ;;  %1151 = vst.msk [vmem:[#allocation3 + $0x28] sm:$0x3] %vm1150_vm3, %v14275_v41 }
 0x622   :  { %11632 = vmatprep.subr.bf16.mxu0 %v14028_v15  ;;  %3106 = vmatprep.mubr.f32.mxu1 %v13817_v30  ;;  %v1980_v30 = vmul.f32 %v14183_v13, %v14183_v13  ;;  %v1572_v15 = vrot.slane %v1571_v55, 2  ;;  %v2668_v26 = vrot.slane %v2667_v52, 2  ;;  %v2330_v31 = vrot.slane %v2329_v27, 1  ;;  %1157 = vst.msk [vmem:[#allocation3 + $0x58] sm:$0x3] %vm1150_vm3, %v14275_v41 }
 0x623   :  { %v2342_v4 = vrot.slane %v2341_v57, 2 }
 0x624   :  { %v1573_v35 = vadd.f32 %v1572_v15, %v1571_v55  ;;  %v2331_v22 = vadd.f32 %v2330_v31, %v2329_v27  ;;  %v3027_v27 = vld [vmem:[%s14290_s7] sm:$0xff]  ;;  %v3750_v31 = vld [vmem:[%s14304_s11 + $0x8] sm:$0xff] }
 0x625   :  { %11634 = vmatpush3.bf16.msra.mxu0 %v14036_v44  ;;  %v1568_v44 = vmul.f32 %v14158_v8, %v14158_v8  ;;  %v2343_v3 = vadd.f32 %v2342_v4, %v2341_v57 }
 0x626   :  { %11636 = vmatprep.subr.bf16.mxu0 %v14039_v2  ;;  %v1985_v2 = vadd.f32 %v1984_v59, %v1983_v42  ;;  %v1574_v50 = vrot.slane %v1573_v35, 1 }
 0x627   :  { %v1583_v33 = vsel %vm1555_vm14, %v1568_v44, 0.0  ;;  %v2344_v55 = vrot.slane %v2343_v3, 1 }
 0x628   :  { %v1986_v49 = vrot.slane %v1985_v2, 1  ;;  %v1584_v53 = vrot.slane %v1583_v33, 4 }
 0x629   :  { %11638 = vmatpush3.bf16.msra.mxu0 %v14044_v7  ;;  %v1995_v7 = vsel %vm1555_vm14, %v1980_v30, 0.0  ;;  %v2345_v15 = vadd.f32 %v2344_v55, %v2343_v3  ;;  %v3756_v55 = vld [vmem:[%s14304_s11 + $0x38] sm:$0xff] }
 0x62a   :  { %11640 = vmatprep.subr.bf16.mxu0 %v14052_v51  ;;  %v2664_v51 = vmul.f32 %v14223_v0, %v14223_v0  ;;  %v1996_v10 = vrot.slane %v1995_v7, 4  ;;  %v1987_v11 = vadd.f32 %v1986_v49, %v1985_v2  ;;  %v1585_v46 = vadd.f32 %v1584_v53, %v1583_v33  ;;  %v3034_v49 = vld [vmem:[%s14290_s7 + $0x38] sm:$0xff] }
 0x62c   :  { %v1997_v56 = vadd.f32 %v1996_v10, %v1995_v7  ;;  %v1586_v16 = vrot.slane %v1585_v46, 2  ;;  %v3037_v10 = vld [vmem:[%s14290_s7 + $0x50] sm:$0xff] }
 0x62d   :  { %11642 = vmatpush3.bf16.msra.mxu0 %v14054_v20  ;;  %v2669_v20 = vadd.f32 %v2668_v26, %v2667_v52  ;;  %v17317_v26 = vld [vmem:[#allocation13_spill] sm:$0xff] }
 0x62e   :  { %11644 = vmatprep.subr.bf16.mxu0 %v14061_v5  ;;  %v2679_v5 = vsel %vm1555_vm14, %v2664_v51, 0.0  ;;  %v1998_v28 = vrot.slane %v1997_v56, 2  ;;  %v1587_v25 = vadd.f32 %v1586_v16, %v1585_v46  ;;  %v3028_v51 = vld [vmem:[%s14290_s7 + $0x8] sm:$0xff] }
 0x62f   :  { %v2680_v12 = vrot.slane %v2679_v5, 4  ;;  %v2670_v14 = vrot.slane %v2669_v20, 1 }
 0x630   :  { %v1999_v29 = vadd.f32 %v1998_v28, %v1997_v56  ;;  %v1588_v18 = vrot.slane %v1587_v25, 1 }
 0x631   :  { %11646 = vmatpush3.bf16.msra.mxu0 %v14068_v54  ;;  %v1575_v54 = vadd.f32 %v1574_v50, %v1573_v35  ;;  %v2681_v45 = vadd.f32 %v2680_v12, %v2679_v5  ;;  %v2671_v34 = vadd.f32 %v2670_v14, %v2669_v20  ;;  %v3031_v35 = vld [vmem:[%s14290_s7 + $0x20] sm:$0xff]  ;;  %v11673_v20 = vpack.c.bf16 %v3030_v63, %v3027_v27  ;;  %v3033_v5 = vld [vmem:[%s14290_s7 + $0x30] sm:$0xff]  ;;  %v3036_v50 = vld [vmem:[%s14290_s7 + $0x48] sm:$0xff] }
 0x632   :  { %11648 = vmatprep.subr.bf16.mxu0 %v17307_v40  ;;  %v2000_v1 = vrot.slane %v1999_v29, 1  ;;  %v1589_v30 = vadd.f32 %v1588_v18, %v1587_v25  ;;  %v11671_v33 = vpack.c.bf16 %v3031_v35, %v3028_v51  ;;  %v11675_v40 = vpack.c.bf16 %v3037_v10, %v3034_v49  ;;  %v3035_v25 = vld [vmem:[%s14290_s7 + $0x40] sm:$0xff]  ;;  %v3764_v27 = vld [vmem:[%s14304_s11 + $0x78] sm:$0xff]  ;;  %v3771_v63 = vld [vmem:[%s14304_s11 + $0xb0] sm:$0xff] }
 0x633   :  { %v2002_v9 = vadd.f32 %v1987_v11, %v1575_v54  ;;  %v2682_v6 = vrot.slane %v2681_v45, 2  ;;  %v11677_v53 = vpack.c.bf16 %v3036_v50, %v3033_v5  ;;  %v3024_v18 = vld [vmem:[%s9435_s19] sm:$0x1]  ;;  %v3774_v5 = vld [vmem:[%s14304_s11 + $0xc8] sm:$0xff] }
 0x634   :  { %v2001_v59 = vadd.f32 %v2000_v1, %v1999_v29  ;;  %11672 = vmatprep.subr.bf16.mxu1 %v11671_v33  ;;  %v3020_v29 = vld [vmem:[%s9434_s15] sm:$0x1]  ;;  %s16981_s15 = sld [smem:[%s17021_s0 + %s13295_s12]]  }
 0x635   :  { %11650 = vmatpush3.bf16.msra.mxu0 %v17308_v48  ;;  %v2346_v17 = vadd.f32 %v2331_v22, %v2002_v9  ;;  %v2683_v42 = vadd.f32 %v2682_v6, %v2681_v45  ;;  %11674 = vmatpush1.bf16.msra.mxu1 %v11673_v20  ;;  %v14308_v48 = vpack.c.bf16 %v3753_v61, %v3750_v31  ;;  %v3749_v1 = vld [vmem:[%s14304_s11] sm:$0xff] }
 0x636   :  { %11652 = vmatprep.subr.bf16.mxu0 %v17309_v58  ;;  %v2004_v44 = vadd.f32 %v2001_v59, %v1589_v30  ;;  %11676 = vmatprep.subr.bf16.mxu1 %v11675_v40  ;;  %v3761_v35 = vld [vmem:[%s14304_s11 + $0x60] sm:$0xff] }
 0x637   :  { %v2686_v24 = vadd.f32 %v2671_v34, %v2346_v17  ;;  %v2684_v52 = vrot.slane %v2683_v42, 1  ;;  %v3029_v17 = vld [vmem:[%s14290_s7 + $0x10] sm:$0xff]  ;;  %v14354_v49 = vpack.c.bf16 %v3764_v27, %v3761_v35  ;;  %v3777_v50 = vld [vmem:[%s14304_s11 + $0xe0] sm:$0xff]  ;;  %v3806_v27 = vld [vmem:[%s14304_s11 + $0x1c8] sm:$0xff] }
 0x638   :  { %v2348_v2 = vadd.f32 %v2345_v15, %v2004_v44  ;;  %v3755_v44 = vld [vmem:[%s14304_s11 + $0x30] sm:$0xff]  ;;  %v14367_v31 = vpack.c.bf16 %v3777_v50, %v3774_v5  ;;  %v3773_v61 = vld [vmem:[%s14304_s11 + $0xc0] sm:$0xff]  ;;  %v3810_v50 = vld [vmem:[%s14304_s11 + $0x1e8] sm:$0xff] }
 0x639   :  { %11654 = vmatpush3.bf16.msra.mxu0 %v17310_v23  ;;  %v2685_v32 = vadd.f32 %v2684_v52, %v2683_v42  ;;  %11678 = vmatpush1.bf16.msra.mxu1 %v11677_v53  ;;  %v3752_v42 = vld [vmem:[%s14304_s11 + $0x18] sm:$0xff]  ;;  %v3803_v35 = vld [vmem:[%s14304_s11 + $0x1b0] sm:$0xff] }
 0x63a   :  { %11656 = vmatprep.subr.bf16.mxu0 %v17311_v37  ;;  %11679 = vmatprep.subr.bf16.mxu1 %v17313_v47  ;;  %v14328_v30 = vpack.c.bf16 %v3752_v42, %v3749_v1  ;;  %v3797_v1 = vld [vmem:[%s14304_s11 + $0x180] sm:$0xff]  ;;  %v3800_v42 = vld [vmem:[%s14304_s11 + $0x198] sm:$0xff] }
 0x63b   :  { %v2688_v7 = vadd.f32 %v2685_v32, %v2348_v2  ;;  %v3758_v32 = vld [vmem:[%s14304_s11 + $0x48] sm:$0xff] }
 0x63c   :  { %v3762_v2 = vld [vmem:[%s14304_s11 + $0x68] sm:$0xff] }
 0x63d   :  { %11658 = vmatpush3.bf16.msra.mxu0 %v17312_v38  ;;  %v3032_v38 = vld [vmem:[%s14290_s7 + $0x28] sm:$0xff] }
 0x63e   :  { %11659 = vmatprep.subr.bf16.mxu0 %v17313_v47 }
 0x640   :  { %2940 = vmatmul.mubr.f32.vlgmr.msra.gmra.mrb[26].mxu0 %v2686_v24  ;;  %v11680_v24 = vpack.c.bf16 %v3032_v38, %v3029_v17  ;;  %v3791_v17 = vld [vmem:[%s14304_s11 + $0x150] sm:$0xff]  ;;  %v3794_v38 = vld [vmem:[%s14304_s11 + $0x168] sm:$0xff] }
 0x641   :  { %11661 = vmatpush3.bf16.msra.mxu0 %v17314_v43  ;;  %10922 = vmatprep.mubr.msk.f32.mxu0 %vm13248_vm0, %v14275_v41  ;;  %v3038_v43 = vld [vmem:[%s14290_s7 + $0x58] sm:$0xff]  ;;  %s16700_s7 = sld [smem:[%s17021_s0 + %s13293_s4]]  }
 0x642   :  { %11662 = vmatprep.subr.bf16.mxu0 %v17313_v47  ;;  %v11683_v52 = vpack.c.bf16 %v3038_v43, %v3035_v25  ;;  %v3799_v25 = vld [vmem:[%s14304_s11 + $0x190] sm:$0xff]  ;;  %v3802_v43 = vld [vmem:[%s14304_s11 + $0x1a8] sm:$0xff] }
 0x645   :  { %11664 = vmatpush3.bf16.msra.mxu0 %v17315_v36  ;;  %v3759_v36 = vld [vmem:[%s14304_s11 + $0x50] sm:$0xff] }
 0x646   :  { %11665 = vmatprep.subr.bf16.mxu0 %v17313_v47 }
 0x649   :  { %11667 = vmatpush3.bf16.msra.mxu0 %v17316_v39  ;;  %v14331_v39 = vpack.c.bf16 %v3759_v36, %v3756_v55  ;;  %v14417_v55 = vpack.c.bf16 %v3800_v42, %v3797_v1  ;;  %v3751_v36 = vld [vmem:[%s14304_s11 + $0x10] sm:$0xff] }
 0x64a   :  { %11668 = vmatprep.subr.bf16.mxu0 %v17313_v47 }
 0x64d   :  { %11670 = vmatpush3.bf16.msra.mxu0 %v17317_v26  ;;  %v3765_v26 = vld [vmem:[%s14304_s11 + $0x80] sm:$0xff] }
 0x64e   :  { %11686 = vmatprep.subr.bf16.mxu0 %v11671_v33  ;;  %v14343_v51 = vpack.c.bf16 %v3765_v26, %v3762_v2  ;;  %v3768_v33 = vld [vmem:[%s14304_s11 + $0x98] sm:$0xff] }
 0x64f   :  { %v14357_v10 = vpack.c.bf16 %v3771_v63, %v3768_v33  ;;  %v3808_v26 = vld [vmem:[%s14304_s11 + $0x1d8] sm:$0xff]  ;;  %v14437_v63 = vpack.c.bf16 %v3806_v27, %v3803_v35  ;;  %v3826_v27 = vld [vmem:[%s14304_s11 + $0x268] sm:$0xff] }
 0x650   :  { %10923 = vmatmul.mubr.msk.f32.vlgmr.msra.gmra.mrb[28].mxu0 %vm1146_vm13, %v2688_v7  ;;  %v14341_v7 = vpack.c.bf16 %v3758_v32, %v3755_v44  ;;  %v3807_v44 = vld [vmem:[%s14304_s11 + $0x1d0] sm:$0xff]  ;;  %v3805_v32 = vld [vmem:[%s14304_s11 + $0x1c0] sm:$0xff] }
 0x651   :  { %3250 = vmatprep.mubr.f32.mxu0 %v14275_v41  ;;  %11688 = vmatpush1.bf16.msra.mxu0 %v11673_v20  ;;  %v3767_v20 = vld [vmem:[%s14304_s11 + $0x90] sm:$0xff]  ;;  %v14435_v33 = vpack.c.bf16 %v3808_v26, %v3805_v32  ;;  %v3825_v32 = vld [vmem:[%s14304_s11 + $0x260] sm:$0xff] }
 0x652   :  { %11690 = vmatprep.subr.bf16.mxu0 %v11675_v40  ;;  %v3770_v40 = vld [vmem:[%s14304_s11 + $0xa8] sm:$0xff]  ;;  %v3823_v26 = vld [vmem:[%s14304_s11 + $0x250] sm:$0xff] }
 0x653   :  { %17320 = vst [vmem:[#allocation24_spill] sm:$0xff] %v14435_v33 }
 0x655   :  { %11692 = vmatpush1.bf16.msra.mxu0 %v11677_v53  ;;  %v14364_v53 = vpack.c.bf16 %v3770_v40, %v3767_v20  ;;  %v3757_v20 = vld [vmem:[%s14304_s11 + $0x40] sm:$0xff]  ;;  %v3760_v40 = vld [vmem:[%s14304_s11 + $0x58] sm:$0xff] }
 0x656   :  { %11700 = vmatprep.subr.bf16.mxu0 %v14308_v48  ;;  %v14444_v5 = vpack.c.bf16 %v3760_v40, %v3757_v20  ;;  %v3821_v20 = vld [vmem:[%s14304_s11 + $0x240] sm:$0xff]  ;;  %v3824_v40 = vld [vmem:[%s14304_s11 + $0x258] sm:$0xff] }
 0x658   :  { %17321 = vst [vmem:[#allocation6_spill] sm:$0xff] %v14444_v5 }
 0x6f3   :  { %v9738_v11 = vpop.f32.mrb[16].mxu1  ;;  %v2868_v56 = vpop.f32.mrb[24].mxu0 }
 0x6f4   :  { %v9739_v12 = vpop.f32.mrb[17].mxu1  ;;  %v10905_v58 = vpop.f32.mrb[25].mxu0 }
 0x6f5   :  { %v9740_v14 = vadd.f32 %v9739_v12, %v9738_v11  ;;  %v3776_v11 = vld [vmem:[%s14304_s11 + $0xd8] sm:$0xff]  ;;  %v3783_v12 = vld [vmem:[%s14304_s11 + $0x110] sm:$0xff] }
 0x6f6   :  { %v14375_v58 = vpack.c.bf16 %v3776_v11, %v3773_v61  ;;  %v3813_v61 = vld [vmem:[%s14304_s11 + $0x200] sm:$0xff]  ;;  %v3811_v11 = vld [vmem:[%s14304_s11 + $0x1f0] sm:$0xff] }
 0x6f7   :  { %v2869_v54 = vadd.f32 %v9740_v14, %v2868_v56  ;;  %v3780_v56 = vld [vmem:[%s14304_s11 + $0xf8] sm:$0xff] }
 0x6f8   :  { %v14378_v14 = vpack.c.bf16 %v3783_v12, %v3780_v56  ;;  %v14452_v56 = vpack.c.bf16 %v3813_v61, %v3810_v50  ;;  %v3814_v12 = vld [vmem:[%s14304_s11 + $0x208] sm:$0xff]  ;;  %v14497_v50 = vpack.c.bf16 %v3826_v27, %v3823_v26  ;;  %v14499_v61 = vpack.c.bf16 %v3824_v40, %v3821_v20  ;;  %v3837_v26 = vld [vmem:[%s14304_s11 + $0x2c0] sm:$0xff]  ;;  %v3835_v27 = vld [vmem:[%s14304_s11 + $0x2b0] sm:$0xff] }
 0x6f9   :  { %v3016_v23 = vmul.f32 0.0078125, %v2869_v54  ;;  %v3779_v54 = vld [vmem:[%s14304_s11 + $0xf0] sm:$0xff]  ;;  %v3838_v40 = vld [vmem:[%s14304_s11 + $0x2c8] sm:$0xff] }
 0x6fa   :  { %17326 = vst [vmem:[#allocation14_spill] sm:$0xff] %v14497_v50 }
 0x6fb   :  { %v3018_v34 = vmul.f32 %v3016_v23, %v3016_v23 }
 0x713   :  { %v9782_v46 = vpop.f32.mrb[26].mxu0 }
 0x714   :  { %v9783_v57 = vpop.f32.mrb[27].mxu0 }
 0x715   :  { %v9784_v22 = vadd.f32 %v9783_v57, %v9782_v46  ;;  %v3782_v46 = vld [vmem:[%s14304_s11 + $0x108] sm:$0xff] }
 0x716   :  { %v14383_v57 = vpack.c.bf16 %v3782_v46, %v3779_v54  ;;  %v3809_v54 = vld [vmem:[%s14304_s11 + $0x1e0] sm:$0xff]  ;;  %v3812_v46 = vld [vmem:[%s14304_s11 + $0x1f8] sm:$0xff] }
 0x723   :  { %v3011_v28 = vpop.f32.mrb[28].mxu0 }
 0x724   :  { %v3012_v45 = vadd.f32 %v9784_v22, %v3011_v28  ;;  %v10924_v37 = vpop.f32.mrb[29].mxu0  ;;  %v3786_v22 = vld [vmem:[%s14304_s11 + $0x128] sm:$0xff] }
 0x725   :  { %v3788_v37 = vld [vmem:[%s14304_s11 + $0x138] sm:$0xff] }
 0x726   :  { %v3017_v9 = vmul.f32 0.0078125, %v3012_v45  ;;  %v3785_v45 = vld [vmem:[%s14304_s11 + $0x120] sm:$0xff] }
 0x728   :  { %v3019_v16 = vsub.f32 %v3017_v9, %v3018_v34  ;;  %v14393_v9 = vpack.c.bf16 %v3788_v37, %v3785_v45  ;;  %v3792_v34 = vld [vmem:[%s14304_s11 + $0x158] sm:$0xff]  ;;  %v3763_v45 = vld [vmem:[%s14304_s11 + $0x70] sm:$0xff]  ;;  %v3766_v37 = vld [vmem:[%s14304_s11 + $0x88] sm:$0xff] }
 0x72a   :  { %v3021_v4 = vadd.f32 1e-05, %v3019_v16  ;;  %v3795_v16 = vld [vmem:[%s14304_s11 + $0x170] sm:$0xff] }
 0x72c   :  { %13221 = vrsqrt.f32 %v3021_v4  ;;  %v14399_v4 = vpack.c.bf16 %v3795_v16, %v3792_v34  ;;  %v14464_v34 = vpack.c.bf16 %v3766_v37, %v3763_v45  ;;  %v3816_v16 = vld [vmem:[%s14304_s11 + $0x218] sm:$0xff]  ;;  %v3831_v45 = vld [vmem:[%s14304_s11 + $0x290] sm:$0xff]  ;;  %v3829_v37 = vld [vmem:[%s14304_s11 + $0x280] sm:$0xff] }
 0x72e   :  { %17323 = vst [vmem:[#allocation9_spill] sm:$0xff] %v14464_v34 }
 0x736   :  { %v13222_v6 = vpop.eup %13221 }
 0x737   :  { %v3023_v3 = vmul.f32 %v13222_v6, %v3020_v29  ;;  %v14403_v29 = vpack.c.bf16 %v3794_v38, %v3791_v17  ;;  %v3798_v6 = vld [vmem:[%s14304_s11 + $0x188] sm:$0xff]  ;;  %v3819_v17 = vld [vmem:[%s14304_s11 + $0x230] sm:$0xff]  ;;  %v3817_v38 = vld [vmem:[%s14304_s11 + $0x220] sm:$0xff] }
 0x739   :  { %9494 = vmatmul.mubr.msk.f32.vlgmr.msra.gmra.mrb[18].mxu1 %vm261_vm2, %v3023_v3  ;;  %v3025_v59 = vmul.f32 %v3023_v3, %v3016_v23  ;;  %v3789_v23 = vld [vmem:[%s14304_s11 + $0x140] sm:$0xff] }
 0x73a   :  { %11681 = vmatpush3.bf16.msra.mxu1 %v11680_v24  ;;  %10933 = vmatprep.mubr.msk.f32.mxu1 %vm13248_vm0, %v14275_v41  ;;  %v14389_v28 = vpack.c.bf16 %v3789_v23, %v3786_v22  ;;  %v14457_v22 = vpack.c.bf16 %v3814_v12, %v3811_v11  ;;  %v14459_v23 = vpack.c.bf16 %v3812_v46, %v3809_v54  ;;  %v3775_v11 = vld [vmem:[%s14304_s11 + $0xd0] sm:$0xff]  ;;  %v3778_v12 = vld [vmem:[%s14304_s11 + $0xe8] sm:$0xff]  ;;  %v3828_v46 = vld [vmem:[%s14304_s11 + $0x278] sm:$0xff] }
 0x73b   :  { %11682 = vmatprep.subr.bf16.mxu1 %v17313_v47  ;;  %v3026_v15 = vsub.f32 %v3024_v18, %v3025_v59  ;;  %v14415_v18 = vpack.c.bf16 %v3802_v43, %v3799_v25  ;;  %v3754_v59 = vld [vmem:[%s14304_s11 + $0x28] sm:$0xff]  ;;  %v3815_v25 = vld [vmem:[%s14304_s11 + $0x210] sm:$0xff]  ;;  %v14504_v54 = vpack.c.bf16 %v3778_v12, %v3775_v11  ;;  %v3833_v11 = vld [vmem:[%s14304_s11 + $0x2a0] sm:$0xff] }
 0x73c   :  { %17322 = vst [vmem:[#allocation8_spill] sm:$0xff] %v14457_v22  ;;  %v3818_v43 = vld [vmem:[%s14304_s11 + $0x228] sm:$0xff]  ;;  %v3836_v12 = vld [vmem:[%s14304_s11 + $0x2b8] sm:$0xff] }
 0x73d   :  { %9496 = vmatmul.mubr.msk.f32.vlgmr.msra.gmra.mrb[30].mxu0 %vm261_vm2, %v3026_v15  ;;  %17318 = vst [vmem:[#allocation22_spill] sm:$0xff] %v14415_v18  ;;  %v14479_v42 = vpack.c.bf16 %v3818_v43, %v3815_v25  ;;  %17327 = vst [vmem:[#allocation5_spill] sm:$0xff] %v14504_v54 }
 0x73e   :  { %11684 = vmatpush3.bf16.msra.mxu1 %v11683_v52  ;;  %11702 = vmatpush1.bf16.msra.mxu0 %v14328_v30 }
 0x73f   :  { %11693 = vmatprep.subr.bf16.mxu1 %v17313_v47  ;;  %11704 = vmatprep.subr.bf16.mxu0 %v14331_v39 }
 0x741   :  { %10934 = vmatmul.mubr.msk.f32.vlgmr.msra.gmra.mrb[20].mxu1 %vm261_vm2, %v3023_v3 }
 0x742   :  { %11695 = vmatpush3.bf16.msra.mxu1 %v11680_v24  ;;  %10944 = vmatprep.mubr.msk.f32.mxu1 %vm13248_vm0, %v14275_v41  ;;  %v3801_v24 = vld [vmem:[%s14304_s11 + $0x1a0] sm:$0xff] }
 0x743   :  { %11696 = vmatprep.subr.bf16.mxu1 %v17313_v47  ;;  %11706 = vmatpush1.bf16.msra.mxu0 %v14341_v7  ;;  %v14410_v3 = vpack.c.bf16 %v3801_v24, %v3798_v6  ;;  %v14472_v6 = vpack.c.bf16 %v3819_v17, %v3816_v16  ;;  %v3820_v24 = vld [vmem:[%s14304_s11 + $0x238] sm:$0xff]  ;;  %v14512_v16 = vpack.c.bf16 %v3831_v45, %v3828_v46 }
 0x744   :  { %11708 = vmatprep.subr.bf16.mxu0 %v14343_v51  ;;  %v14477_v1 = vpack.c.bf16 %v3820_v24, %v3817_v38  ;;  %v3832_v17 = vld [vmem:[%s14304_s11 + $0x298] sm:$0xff]  ;;  %v3827_v38 = vld [vmem:[%s14304_s11 + $0x270] sm:$0xff]  ;;  %v3830_v24 = vld [vmem:[%s14304_s11 + $0x288] sm:$0xff]  ;;  %v14537_v46 = vpack.c.bf16 %v3838_v40, %v3835_v27  ;;  %v14539_v45 = vpack.c.bf16 %v3836_v12, %v3833_v11 }
 0x745   :  { %17328 = vst [vmem:[#allocation7_spill] sm:$0xff] %v14512_v16  ;;  %v14517_v25 = vpack.c.bf16 %v3832_v17, %v3829_v37  ;;  %v14519_v43 = vpack.c.bf16 %v3830_v24, %v3827_v38  ;;  %v3787_v37 = vld [vmem:[%s14304_s11 + $0x130] sm:$0xff]  ;;  %v3790_v17 = vld [vmem:[%s14304_s11 + $0x148] sm:$0xff]  ;;  %v3840_v38 = vld [vmem:[%s14304_s11 + $0x2d8] sm:$0xff] }
 0x746   :  { %11698 = vmatpush3.bf16.msra.mxu1 %v11683_v52  ;;  %v14422_v52 = vpack.c.bf16 %v3754_v59, %v3751_v36  ;;  %17324 = vst [vmem:[#allocation11_spill] sm:$0xff] %v14477_v1  ;;  %v3769_v36 = vld [vmem:[%s14304_s11 + $0xa0] sm:$0xff]  ;;  %v3772_v59 = vld [vmem:[%s14304_s11 + $0xb8] sm:$0xff]  ;;  %17333 = vst [vmem:[#allocation27_spill] sm:$0xff] %v14537_v46  ;;  %v14545_v24 = vpack.c.bf16 %v3790_v17, %v3787_v37 }
 0x747   :  { %11710 = vmatpush1.bf16.msra.mxu0 %v14354_v49  ;;  %11780 = vmatprep.subr.bf16.mxu1 %v14415_v18  ;;  %17329 = vst [vmem:[#allocation10_spill] sm:$0xff] %v14517_v25  ;;  %17330 = vst [vmem:[#allocation13_spill] sm:$0xff] %v14519_v43  ;;  %v3839_v40 = vld [vmem:[%s14304_s11 + $0x2d0] sm:$0xff]  ;;  %v3842_v11 = vld [vmem:[%s14304_s11 + $0x2e8] sm:$0xff] }
 0x748   :  { %11712 = vmatprep.subr.bf16.mxu0 %v14357_v10  ;;  %17319 = vst [vmem:[#allocation23_spill] sm:$0xff] %v14422_v52  ;;  %17334 = vst [vmem:[#allocation28_spill] sm:$0xff] %v14539_v45  ;;  %v3793_v12 = vld [vmem:[%s14304_s11 + $0x160] sm:$0xff]  ;;  %v3796_v37 = vld [vmem:[%s14304_s11 + $0x178] sm:$0xff] }
 0x749   :  { %10945 = vmatmul.mubr.msk.f32.vlgmr.msra.gmra.mrb[22].mxu1 %vm261_vm2, %v3026_v15  ;;  %v3804_v15 = vld [vmem:[%s14304_s11 + $0x1b8] sm:$0xff]  ;;  %17335 = vst [vmem:[#allocation29_spill] sm:$0xff] %v14545_v24  ;;  %v14564_v17 = vpack.c.bf16 %v3796_v37, %v3793_v12  ;;  %v13281_v37 = vmov 1966171168  }
 0x74a   :  { %11782 = vmatpush3.bf16.msra.mxu1 %v14422_v52  ;;  %v14430_v2 = vpack.c.bf16 %v3807_v44, %v3804_v15  ;;  %v14484_v15 = vpack.c.bf16 %v3772_v59, %v3769_v36  ;;  %v3822_v44 = vld [vmem:[%s14304_s11 + $0x248] sm:$0xff]  ;;  %v3781_v36 = vld [vmem:[%s14304_s11 + $0x100] sm:$0xff]  ;;  %v3784_v59 = vld [vmem:[%s14304_s11 + $0x118] sm:$0xff] }
 0x74b   :  { %11714 = vmatpush1.bf16.msra.mxu0 %v14364_v53  ;;  %11784 = vmatprep.subr.bf16.mxu1 %v14435_v33  ;;  %v14492_v35 = vpack.c.bf16 %v3825_v32, %v3822_v44  ;;  %v14524_v44 = vpack.c.bf16 %v3784_v59, %v3781_v36  ;;  %v3834_v32 = vld [vmem:[%s14304_s11 + $0x2a8] sm:$0xff]  ;;  %v3843_v36 = vld [vmem:[%s14304_s11 + $0x2f0] sm:$0xff]  ;;  %v3841_v59 = vld [vmem:[%s14304_s11 + $0x2e0] sm:$0xff]  ;;  %17339 = vst [vmem:[#allocation33_spill] sm:$0xff] %v14564_v17 }
 0x74c   :  { %11716 = vmatprep.subr.bf16.mxu0 %v14367_v31  ;;  %17325 = vst [vmem:[#allocation12_spill] sm:$0xff] %v14484_v15  ;;  %v14531_v20 = vpack.c.bf16 %v3837_v26, %v3834_v32  ;;  %v3844_v32 = vld [vmem:[%s14304_s11 + $0x2f8] sm:$0xff]  ;;  %v14551_v26 = vpack.c.bf16 %v3843_v36, %v3840_v38  ;;  %v3846_v38 = vld [vmem:[%s14304_s11 + $0x308] sm:$0xff]  ;;  %v3849_v36 = vld [vmem:[%s14304_s11 + $0x320] sm:$0xff] }
 0x74d   :  { %17331 = vst [vmem:[#allocation25_spill] sm:$0xff] %v14524_v44  ;;  %v14553_v27 = vpack.c.bf16 %v3844_v32, %v3841_v59  ;;  %v14571_v59 = vpack.c.bf16 %v3849_v36, %v3846_v38  ;;  %v17346_v33 = vld [vmem:[#allocation21_spill] sm:$0xff] }
 0x74e   :  { %11786 = vmatpush3.bf16.msra.mxu1 %v14444_v5  ;;  %17332 = vst [vmem:[#allocation26_spill] sm:$0xff] %v14531_v20  ;;  %17336 = vst [vmem:[#allocation30_spill] sm:$0xff] %v14551_v26  ;;  %v17345_v5 = vld [vmem:[#allocation20_spill] sm:$0xff] }
 0x74f   :  { %11718 = vmatpush1.bf16.msra.mxu0 %v14375_v58  ;;  %11788 = vmatprep.subr.bf16.mxu1 %v14457_v22  ;;  %17337 = vst [vmem:[#allocation31_spill] sm:$0xff] %v14553_v27  ;;  %17340 = vst [vmem:[#allocation34_spill] sm:$0xff] %v14571_v59 }
 0x750   :  { %11720 = vmatprep.subr.bf16.mxu0 %v14378_v14 }
 0x752   :  { %11790 = vmatpush3.bf16.msra.mxu1 %v14464_v34 }
 0x753   :  { %11722 = vmatpush1.bf16.msra.mxu0 %v14383_v57  ;;  %11792 = vmatprep.subr.bf16.mxu1 %v14477_v1 }
 0x754   :  { %11724 = vmatprep.subr.bf16.mxu0 %v14389_v28 }
 0x756   :  { %11794 = vmatpush3.bf16.msra.mxu1 %v14484_v15 }
 0x757   :  { %11726 = vmatpush1.bf16.msra.mxu0 %v14393_v9  ;;  %11796 = vmatprep.subr.bf16.mxu1 %v14497_v50 }
 0x758   :  { %11728 = vmatprep.subr.bf16.mxu0 %v14399_v4 }
 0x75a   :  { %11798 = vmatpush3.bf16.msra.mxu1 %v14504_v54 }
 0x75b   :  { %11730 = vmatpush1.bf16.msra.mxu0 %v14403_v29  ;;  %11800 = vmatprep.subr.bf16.mxu1 %v14517_v25  ;;  %v17342_v25 = vld [vmem:[#allocation18_spill] sm:$0xff] }
 0x75c   :  { %11732 = vmatprep.subr.bf16.mxu0 %v14410_v3 }
 0x75e   :  { %11802 = vmatpush3.bf16.msra.mxu1 %v14524_v44  ;;  %v14559_v44 = vpack.c.bf16 %v3842_v11, %v3839_v40  ;;  %v17341_v40 = vld [vmem:[#allocation16_spill] sm:$0xff] }
 0x75f   :  { %11734 = vmatpush1.bf16.msra.mxu0 %v14417_v55  ;;  %11804 = vmatprep.subr.bf16.mxu1 %v14537_v46 }
 0x760   :  { %11736 = vmatprep.subr.bf16.mxu0 %v14430_v2  ;;  %17338 = vst [vmem:[#allocation32_spill] sm:$0xff] %v14559_v44 }
 0x762   :  { %11806 = vmatpush3.bf16.msra.mxu1 %v14545_v24 }
 0x763   :  { %11738 = vmatpush1.bf16.msra.mxu0 %v14437_v63  ;;  %11808 = vmatprep.subr.bf16.mxu1 %v14553_v27  ;;  %v3365_v27 = vunpack.c.l.s4 %v13281_v37 }
 0x764   :  { %11740 = vmatprep.subr.bf16.mxu0 %v14452_v56 }
 0x766   :  { %11810 = vmatpush3.bf16.msra.mxu1 %v14564_v17  ;;  %v17343_v17 = vld [vmem:[#allocation17_spill] sm:$0xff] }
 0x767   :  { %11742 = vmatpush1.bf16.msra.mxu0 %v14459_v23  ;;  %11811 = vmatprep.subr.bf16.mxu1 %v17313_v47 }
 0x768   :  { %11744 = vmatprep.subr.bf16.mxu0 %v14472_v6 }
 0x76b   :  { %11746 = vmatpush1.bf16.msra.mxu0 %v14479_v42 }
 0x76c   :  { %11748 = vmatprep.subr.bf16.mxu0 %v14492_v35 }
 0x76f   :  { %11750 = vmatpush1.bf16.msra.mxu0 %v14499_v61 }
 0x770   :  { %11752 = vmatprep.subr.bf16.mxu0 %v14512_v16 }
 0x773   :  { %11754 = vmatpush1.bf16.msra.mxu0 %v14519_v43 }
 0x774   :  { %11756 = vmatprep.subr.bf16.mxu0 %v14531_v20 }
 0x777   :  { %11758 = vmatpush1.bf16.msra.mxu0 %v14539_v45 }
 0x778   :  { %11760 = vmatprep.subr.bf16.mxu0 %v14551_v26 }
 0x77b   :  { %11762 = vmatpush1.bf16.msra.mxu0 %v14559_v44 }
 0x77c   :  { %11764 = vmatprep.subr.bf16.mxu0 %v14571_v59 }
 0x80c   :  { %v3108_v32 = vpop.f32.mrb[18].mxu1 }
 0x80d   :  { %v3330_v11 = vrot.slane %v3108_v32, %v17341_v40  ;;  %v3110_v24 = vpop.f32.mrb[19].mxu1  ;;  %v17344_v32 = vld [vmem:[#allocation19_spill] sm:$0xff] }
 0x80e   :  { %v3334_v12 = vrot.slane %v3110_v24, %v17341_v40 }
 0x80f   :  { %v3339_v46 = vmul.f32 %v3330_v11, %v14154_v62  ;;  %v3416_v54 = vmul.f32 %v3330_v11, %v17342_v25  ;;  %v3477_v38 = vmul.f32 %v3330_v11, %v14188_v19  ;;  %v3539_v36 = vmul.f32 %v3330_v11, %v14214_v60 }
 0x810   :  { %v3252_v50 = vpop.f32.mrb[30].mxu0  ;;  %v3340_v15 = vmul.f32 %v3334_v12, %v17343_v17  ;;  %v3417_v22 = vmul.f32 %v3334_v12, %v17344_v32  ;;  %v3478_v24 = vmul.f32 %v3334_v12, %v17345_v5  ;;  %v3540_v37 = vmul.f32 %v3334_v12, %v17346_v33 }
 0x811   :  { %v3345_v1 = vrot.slane %v3252_v50, %v17341_v40  ;;  %v3254_v34 = vpop.f32.mrb[31].mxu0 }
 0x812   :  { %v3349_v62 = vrot.slane %v3254_v34, %v17341_v40 }
 0x813   :  { %v3354_v52 = vadd.f32 %v3345_v1, %v3339_v46  ;;  %v3419_v25 = vadd.f32 %v3416_v54, %v3345_v1  ;;  %v3480_v18 = vadd.f32 %v3477_v38, %v3345_v1  ;;  %v3542_v59 = vadd.f32 %v3539_v36, %v3345_v1 }
 0x814   :  { %v3355_v19 = vadd.f32 %v3349_v62, %v3340_v15  ;;  %v3420_v44 = vadd.f32 %v3417_v22, %v3349_v62  ;;  %v3481_v60 = vadd.f32 %v3478_v24, %v3349_v62  ;;  %v3543_v11 = vadd.f32 %v3540_v37, %v3349_v62  ;;  %v3179_v17 = vpop.f32.mrb[20].mxu1  ;;  %v17347_v24 = vld [vmem:[#allocation15_spill] sm:$0xff] }
 0x815   :  { %v3357_v26 = vmax.f32 %v3354_v52, 0.0  ;;  %v3422_v50 = vmax.f32 %v3419_v25, 0.0  ;;  %v3483_v45 = vmax.f32 %v3480_v18, 0.0  ;;  %v3545_v20 = vmax.f32 %v3542_v59, 0.0  ;;  %v10935_v32 = vpop.f32.mrb[21].mxu1 }
 0x816   :  { %v3358_v43 = vmax.f32 %v3355_v19, 0.0  ;;  %v3423_v5 = vmax.f32 %v3420_v44, 0.0  ;;  %v3484_v16 = vmax.f32 %v3481_v60, 0.0  ;;  %v3546_v33 = vmax.f32 %v3543_v11, 0.0 }
 0x817   :  { %v3338_v34 = vrot.slane %v3179_v17, %v17341_v40  ;;  %v3366_v15 = vunpack.c.0.s8 %v3365_v27  ;;  %v17349_v11 = vlaneseq }
 0x818   :  { %v3363_v46 = vcombine.low %v3357_v26, %v3358_v43  ;;  %v3428_v54 = vcombine.low %v3422_v50, %v3423_v5  ;;  %v3489_v12 = vcombine.low %v3483_v45, %v3484_v16  ;;  %v3551_v1 = vcombine.low %v3545_v20, %v3546_v33 }
 0x819   :  { %v3341_v22 = vmul.f32 %v3338_v34, %v14158_v8  ;;  %v3418_v52 = vmul.f32 %v3338_v34, %v14183_v13  ;;  %v3479_v18 = vmul.f32 %v3338_v34, %v14191_v21  ;;  %v3541_v59 = vmul.f32 %v3338_v34, %v14223_v0 }
 0x81a   :  { %v14594_v37 = vsub.s32 %v3366_v15, %v17347_v24  ;;  %vm14603_vm15 = vcmp.lt.s32.totalorder %v17349_v11, 320  ;;  %v3637_v11 = vld [vmem:[%s14671_s23 + $0x70] sm:$0xff]  ;;  %v3644_v24 = vld [vmem:[%s14671_s23 + $0xa8] sm:$0xff] }
 0x81c   :  { %v3323_v38 = vpop.f32.mrb[22].mxu1  ;;  %17348 = vst [vmem:[#allocation18_spill] sm:$0xff] %v14594_v37  ;;  %v3370_v13 = vrot.slane %v3363_v46, %v14594_v37  ;;  %v3435_v21 = vrot.slane %v3428_v54, %v14594_v37  ;;  %v3496_v50 = vrot.slane %v3489_v12, %v14594_v37  ;;  %v3558_v32 = vrot.slane %v3551_v1, %v14594_v37 }
 0x81d   :  { %v3353_v44 = vrot.slane %v3323_v38, %v17341_v40  ;;  %v10946_v36 = vpop.f32.mrb[23].mxu1 }
 0x81f   :  { %v3356_v43 = vadd.f32 %v3353_v44, %v3341_v22  ;;  %v3421_v26 = vadd.f32 %v3418_v52, %v3353_v44  ;;  %v3482_v16 = vadd.f32 %v3479_v18, %v3353_v44  ;;  %v3544_v20 = vadd.f32 %v3541_v59, %v3353_v44 }
 0x821   :  { %v3359_v45 = vmax.f32 %v3356_v43, 0.0  ;;  %v3424_v27 = vmax.f32 %v3421_v26, 0.0  ;;  %v3485_v8 = vmax.f32 %v3482_v16, 0.0  ;;  %v3547_v62 = vmax.f32 %v3544_v20, 0.0 }
 0x823   :  { %v3377_v0 = vrot.slane %v3359_v45, %v14594_v37  ;;  %v3442_v25 = vrot.slane %v3424_v27, %v14594_v37  ;;  %v3503_v19 = vrot.slane %v3485_v8, %v14594_v37  ;;  %v3565_v60 = vrot.slane %v3547_v62, %v14594_v37 }
 0x825   :  { %v3378_v5 = vcombine.low %v3370_v13, %v3377_v0  ;;  %v3394_v33 = vcombine.high %v3370_v13, %v3377_v0  ;;  %v3443_v34 = vcombine.low %v3435_v21, %v3442_v25  ;;  %v3455_v46 = vcombine.high %v3435_v21, %v3442_v25  ;;  %v3845_v21 = vld [vmem:[%s14304_s11 + $0x300] sm:$0xff]  ;;  %v3848_v0 = vld [vmem:[%s14304_s11 + $0x318] sm:$0xff]  ;;  %v3847_v25 = vld [vmem:[%s14304_s11 + $0x310] sm:$0xff] }
 0x826   :  { %v3504_v54 = vcombine.low %v3496_v50, %v3503_v19  ;;  %v3517_v15 = vcombine.high %v3496_v50, %v3503_v19  ;;  %v3566_v22 = vcombine.low %v3558_v32, %v3565_v60  ;;  %v3578_v38 = vcombine.high %v3558_v32, %v3565_v60  ;;  %v3850_v19 = vld [vmem:[%s14304_s11 + $0x328] sm:$0xff]  ;;  %v3852_v60 = vld [vmem:[%s14304_s11 + $0x338] sm:$0xff]  ;;  %v3855_v50 = vld [vmem:[%s14304_s11 + $0x350] sm:$0xff] }
 0x827   :  { %v3385_v52 = vrot.slane %v3378_v5, %v14594_v37  ;;  %v3401_v18 = vrot.slane %v3394_v33, %v14594_v37  ;;  %v3450_v59 = vrot.slane %v3443_v34, %v14594_v37  ;;  %v3462_v44 = vrot.slane %v3455_v46, %v14594_v37 }
 0x828   :  { %v3511_v12 = vrot.slane %v3504_v54, %v14594_v37  ;;  %v3524_v1 = vrot.slane %v3517_v15, %v14594_v37  ;;  %v3573_v36 = vrot.slane %v3566_v22, %v14594_v37  ;;  %v3585_v43 = vrot.slane %v3578_v38, %v14594_v37  ;;  %v3639_v37 = vld [vmem:[%s14671_s23 + $0x80] sm:$0xff] }
 0x829   :  { %3392 = vst.msk [vmem:[#allocation3 + $0x1] ss:$8 sm:$0x7] %vm14603_vm15, %v3385_v52  ;;  %3404 = vst.msk [vmem:[#allocation3 + $0x3] ss:$8 sm:$0x7] %vm14603_vm15, %v3401_v18  ;;  %v3406_v26 = vcombine.high %v3385_v52, %v3385_v52  ;;  %v3411_v16 = vcombine.high %v3401_v18, %v3401_v18  ;;  %v3467_v20 = vcombine.high %v3450_v59, %v3450_v59 }
 0x82a   :  { %3453 = vst.msk [vmem:[#allocation3 + $0x2] ss:$8 sm:$0x7] %vm14603_vm15, %v3450_v59  ;;  %3465 = vst.msk [vmem:[#allocation3 + $0x4] ss:$8 sm:$0x7] %vm14603_vm15, %v3462_v44  ;;  %v3472_v45 = vcombine.high %v3462_v44, %v3462_v44  ;;  %v3529_v27 = vcombine.high %v3511_v12, %v3511_v12  ;;  %v3534_v8 = vcombine.high %v3524_v1, %v3524_v1 }
 0x82b   :  { %3515 = vst.msk [vmem:[#allocation3 + $0x31] ss:$8 sm:$0x7] %vm14603_vm15, %v3511_v12  ;;  %3527 = vst.msk [vmem:[#allocation3 + $0x33] ss:$8 sm:$0x7] %vm14603_vm15, %v3524_v1  ;;  %v3590_v62 = vcombine.high %v3573_v36, %v3573_v36  ;;  %v3595_v13 = vcombine.high %v3585_v43, %v3585_v43  ;;  %v14655_v22 = vpack.c.bf16 %v3848_v0, %v3845_v21 }
 0x82c   :  { %3576 = vst.msk [vmem:[#allocation3 + $0x32] ss:$8 sm:$0x7] %vm14603_vm15, %v3573_v36  ;;  %3588 = vst.msk [vmem:[#allocation3 + $0x34] ss:$8 sm:$0x7] %vm14603_vm15, %v3585_v43  ;;  %v14657_v38 = vpack.c.bf16 %v3850_v19, %v3847_v25  ;;  %v14663_v59 = vpack.c.bf16 %v3855_v50, %v3852_v60 }
 0x82d   :  { %3409 = vst.msk [vmem:[#allocation3 + $0x5] ss:$8 sm:$0x7] %vm14603_vm15, %v3406_v26  ;;  %3414 = vst.msk [vmem:[#allocation3 + $0x7] ss:$8 sm:$0x7] %vm14603_vm15, %v3411_v16 }
 0x82e   :  { %3470 = vst.msk [vmem:[#allocation3 + $0x6] ss:$8 sm:$0x7] %vm14603_vm15, %v3467_v20  ;;  %3475 = vst.msk [vmem:[#allocation3 + $0x18] ss:$8 sm:$0x7] %vm14603_vm15, %v3472_v45 }
 0x82f   :  { %3532 = vst.msk [vmem:[#allocation3 + $0x35] ss:$8 sm:$0x7] %vm14603_vm15, %v3529_v27  ;;  %3537 = vst.msk [vmem:[#allocation3 + $0x37] ss:$8 sm:$0x7] %vm14603_vm15, %v3534_v8 }
 0x830   :  { %3593 = vst.msk [vmem:[#allocation3 + $0x36] ss:$8 sm:$0x7] %vm14603_vm15, %v3590_v62  ;;  %3598 = vst.msk [vmem:[#allocation3 + $0x48] ss:$8 sm:$0x7] %vm14603_vm15, %v3595_v13 }
 0x831   :  { %17352 = vst [vmem:[#allocation17_spill] sm:$0xff] %v14657_v38  ;;  %v3851_v52 = vld [vmem:[%s14304_s11 + $0x330] sm:$0xff]  ;;  %v3854_v44 = vld [vmem:[%s14304_s11 + $0x348] sm:$0xff]  ;;  %v3853_v12 = vld [vmem:[%s14304_s11 + $0x340] sm:$0xff] }
 0x832   :  { %v3856_v1 = vld [vmem:[%s14304_s11 + $0x358] sm:$0xff]  ;;  %v3858_v43 = vld [vmem:[%s14304_s11 + $0x368] sm:$0xff]  ;;  %v3861_v26 = vld [vmem:[%s14304_s11 + $0x380] sm:$0xff]  ;;  %v14684_v16 = vpack.c.bf16 %v3854_v44, %v3851_v52 }
 0x833   :  { %v14686_v20 = vpack.c.bf16 %v3856_v1, %v3853_v12  ;;  %v3857_v45 = vld [vmem:[%s14304_s11 + $0x360] sm:$0xff]  ;;  %v14691_v27 = vpack.c.bf16 %v3861_v26, %v3858_v43  ;;  %v3860_v8 = vld [vmem:[%s14304_s11 + $0x378] sm:$0xff]  ;;  %v3859_v62 = vld [vmem:[%s14304_s11 + $0x370] sm:$0xff] }
 0x834   :  { %v3862_v13 = vld [vmem:[%s14304_s11 + $0x388] sm:$0xff]  ;;  %v3864_v21 = vld [vmem:[%s14304_s11 + $0x398] sm:$0xff]  ;;  %v3867_v0 = vld [vmem:[%s14304_s11 + $0x3b0] sm:$0xff]  ;;  %v14703_v25 = vpack.c.bf16 %v3860_v8, %v3857_v45 }
 0x835   :  { %v3744_v32 = vld [vmem:[#allocation3 + $0x8] sm:$0xfe]  ;;  %v3747_v5 = vld [vmem:[#allocation3 + $0x20] sm:$0x1]  ;;  %v3743_v33 = vld [vmem:[#allocation3] sm:$0xfe]  ;;  %v14705_v19 = vpack.c.bf16 %v3862_v13, %v3859_v62 }
 0x836   :  { %v3879_v34 = vrot.slane %v3744_v32, 1  ;;  %v3880_v46 = vrot.slane %v3747_v5, 1  ;;  %v3746_v54 = vld [vmem:[#allocation3 + $0x18] sm:$0x1]  ;;  %v3876_v17 = vrot.slane %v3743_v33, 1  ;;  %17353 = vst [vmem:[#allocation19_spill] sm:$0xff] %v14686_v20  ;;  %v14711_v32 = vpack.c.bf16 %v3867_v0, %v3864_v21 }
 0x837   :  { %v3877_v15 = vrot.slane %v3746_v54, 1  ;;  %17354 = vst [vmem:[#allocation20_spill] sm:$0xff] %v14705_v19  ;;  %v3863_v60 = vld [vmem:[%s14304_s11 + $0x390] sm:$0xff]  ;;  %v3866_v50 = vld [vmem:[%s14304_s11 + $0x3a8] sm:$0xff]  ;;  %v3865_v5 = vld [vmem:[%s14304_s11 + $0x3a0] sm:$0xff] }
 0x838   :  { %v14661_v18 = vsel %vm3875_vm1, %v3879_v34, %v3880_v46  ;;  %v3868_v33 = vld [vmem:[%s14304_s11 + $0x3b8] sm:$0xff]  ;;  %v3627_v34 = vld [vmem:[%s14671_s23 + $0x20] sm:$0xff]  ;;  %v3673_v46 = vld [vmem:[%s14671_s23 + $0x190] sm:$0xff]  ;;  %v14721_v52 = vpack.c.bf16 %v3866_v50, %v3863_v60  ;;  %s9451_s11 = sld [smem:[%s17021_s0 + %s13294_s8]]  }
 0x839   :  { %3953 = vmatprep.mubr.f32.mxu0 %v14661_v18  ;;  %4095 = vmatprep.mubr.f32.mxu1 %v14661_v18  ;;  %v14676_v36 = vsel %vm3875_vm1, %v3876_v17, %v3877_v15  ;;  %v3676_v54 = vld [vmem:[%s14671_s23 + $0x1a8] sm:$0xff]  ;;  %v3745_v17 = vld [vmem:[#allocation3 + $0x10] sm:$0xfe]  ;;  %v3748_v15 = vld [vmem:[#allocation3 + $0x28] sm:$0x1]  ;;  %v14723_v44 = vpack.c.bf16 %v3868_v33, %v3865_v5 }
 0x83a   :  { %3954 = vmatmul.mubr.f32.vlgmr.msra.gmra.mrb[32].mxu0 %v14676_v36  ;;  %4096 = vmatmul.mubr.f32.vlgmr.msra.gmra.mrb[24].mxu1 %v14676_v36  ;;  %v14729_v1 = vpack.c.bf16 %v3676_v54, %v3673_v46  ;;  %v3623_v43 = vld [vmem:[%s14671_s23] sm:$0xff]  ;;  %v3626_v26 = vld [vmem:[%s14671_s23 + $0x18] sm:$0xff]  ;;  %v3882_v45 = vrot.slane %v3745_v17, 1  ;;  %v3883_v8 = vrot.slane %v3748_v15, 1  ;;  %v3625_v62 = vld [vmem:[%s14671_s23 + $0x10] sm:$0xff] }
 0x83b   :  { %11766 = vmatpush1.bf16.msra.mxu0 %v14655_v22  ;;  %11813 = vmatpush3.bf16.msra.mxu1 %v14657_v38  ;;  %17355 = vst [vmem:[#allocation21_spill] sm:$0xff] %v14723_v44  ;;  %v3628_v13 = vld [vmem:[%s14671_s23 + $0x28] sm:$0xff]  ;;  %v3630_v21 = vld [vmem:[%s14671_s23 + $0x38] sm:$0xff]  ;;  %v3633_v0 = vld [vmem:[%s14671_s23 + $0x50] sm:$0xff]  ;;  %v14741_v5 = vpack.c.bf16 %v3626_v26, %v3623_v43 }
 0x83c   :  { %11768 = vmatprep.subr.bf16.mxu0 %v14663_v59  ;;  %11814 = vmatprep.subr.bf16.mxu1 %v17313_v47  ;;  %17356 = vst [vmem:[#allocation35_spill] sm:$0xff] %v14729_v1  ;;  %v3679_v60 = vld [vmem:[%s14671_s23 + $0x1c0] sm:$0xff]  ;;  %v3682_v50 = vld [vmem:[%s14671_s23 + $0x1d8] sm:$0xff]  ;;  %v14745_v33 = vpack.c.bf16 %v3628_v13, %v3625_v62  ;;  %v14751_v54 = vsel %vm3875_vm1, %v3882_v45, %v3883_v8  ;;  %v3636_v26 = vld [vmem:[%s14671_s23 + $0x68] sm:$0xff] }
 0x83d   :  { %4024 = vmatprep.mubr.f32.mxu0 %v14275_v41  ;;  %10963 = vmatprep.mubr.msk.f32.mxu1 %vm13248_vm0, %v14275_v41  ;;  %v3624_v41 = vld [vmem:[%s14671_s23 + $0x8] sm:$0xff]  ;;  %v3631_v46 = vld [vmem:[%s14671_s23 + $0x40] sm:$0xff]  ;;  %v14753_v17 = vpack.c.bf16 %v3633_v0, %v3630_v21  ;;  %v14755_v15 = vpack.c.bf16 %v3682_v50, %v3679_v60  ;;  %v3634_v43 = vld [vmem:[%s14671_s23 + $0x58] sm:$0xff]  ;;  %v14772_v0 = vpack.c.bf16 %v3639_v37, %v3636_v26 }
 0x83e   :  { %v14727_v12 = vpack.c.bf16 %v3627_v34, %v3624_v41  ;;  %17357 = vst [vmem:[#allocation36_spill] sm:$0xff] %v14745_v33  ;;  %v3629_v41 = vld [vmem:[%s14671_s23 + $0x30] sm:$0xff]  ;;  %v3632_v34 = vld [vmem:[%s14671_s23 + $0x48] sm:$0xff]  ;;  %v3621_v62 = vld [vmem:[#allocation3 + $0x8] sm:$0xff]  ;;  %v14770_v21 = vpack.c.bf16 %v3634_v43, %v3631_v46 }
 0x83f   :  { %11770 = vmatpush1.bf16.msra.mxu0 %v14684_v16  ;;  %11816 = vmatpush3.bf16.msra.mxu1 %v14686_v20  ;;  %17358 = vst [vmem:[#allocation37_spill] sm:$0xff] %v14755_v15  ;;  %v3685_v45 = vld [vmem:[%s14671_s23 + $0x1f0] sm:$0xff]  ;;  %v3688_v8 = vld [vmem:[%s14671_s23 + $0x208] sm:$0xff]  ;;  %v14767_v13 = vpack.c.bf16 %v3632_v34, %v3629_v41  ;;  %17361 = vst [vmem:[#allocation40_spill] sm:$0xff] %v14772_v0 }
 0x840   :  { %11772 = vmatprep.subr.bf16.mxu0 %v14691_v27  ;;  %11817 = vmatprep.subr.bf16.mxu1 %v17313_v47  ;;  %17360 = vst [vmem:[#allocation39_spill] sm:$0xff] %v14770_v21  ;;  %v3635_v60 = vld [vmem:[%s14671_s23 + $0x60] sm:$0xff]  ;;  %v3638_v50 = vld [vmem:[%s14671_s23 + $0x78] sm:$0xff]  ;;  %v14779_v40 = vpack.c.bf16 %v3688_v8, %v3685_v45  ;;  %v3640_v41 = vld [vmem:[%s14671_s23 + $0x88] sm:$0xff] }
 0x841   :  { %17359 = vst [vmem:[#allocation38_spill] sm:$0xff] %v14767_v13  ;;  %v3642_v34 = vld [vmem:[%s14671_s23 + $0x98] sm:$0xff]  ;;  %v3645_v46 = vld [vmem:[%s14671_s23 + $0xb0] sm:$0xff]  ;;  %v3691_v37 = vld [vmem:[%s14671_s23 + $0x220] sm:$0xff]  ;;  %v14787_v26 = vpack.c.bf16 %v3638_v50, %v3635_v60 }
 0x842   :  { %17362 = vst [vmem:[#allocation41_spill] sm:$0xff] %v14779_v40  ;;  %v3694_v43 = vld [vmem:[%s14671_s23 + $0x238] sm:$0xff]  ;;  %v14793_v45 = vpack.c.bf16 %v3645_v46, %v3642_v34  ;;  %v3641_v8 = vld [vmem:[%s14671_s23 + $0x90] sm:$0xff]  ;;  %v3648_v50 = vld [vmem:[%s14671_s23 + $0xc8] sm:$0xff] }
 0x843   :  { %11774 = vmatpush1.bf16.msra.mxu0 %v14703_v25  ;;  %11819 = vmatpush3.bf16.msra.mxu1 %v14705_v19  ;;  %17363 = vst [vmem:[#allocation42_spill] sm:$0xff] %v14787_v26  ;;  %v3646_v60 = vld [vmem:[%s14671_s23 + $0xb8] sm:$0xff]  ;;  %v14807_v34 = vpack.c.bf16 %v3644_v24, %v3641_v8  ;;  %v3652_v24 = vld [vmem:[%s14671_s23 + $0xe8] sm:$0xff]  ;;  %v3655_v19 = vld [vmem:[%s14671_s23 + $0x100] sm:$0xff] }
 0x844   :  { %11776 = vmatprep.subr.bf16.mxu0 %v14711_v32  ;;  %11820 = vmatprep.subr.bf16.mxu1 %v17313_v47  ;;  %17365 = vst [vmem:[#allocation44_spill] sm:$0xff] %v14793_v45  ;;  %v3654_v8 = vld [vmem:[%s14671_s23 + $0xf8] sm:$0xff]  ;;  %v3661_v38 = vld [vmem:[%s14671_s23 + $0x130] sm:$0xff] }
 0x845   :  { %17367 = vst [vmem:[#allocation46_spill] sm:$0xff] %v14807_v34 }
 0x847   :  { %11778 = vmatpush1.bf16.msra.mxu0 %v14721_v52  ;;  %11822 = vmatpush3.bf16.msra.mxu1 %v14723_v44 }
 0x848   :  { %11824 = vmatprep.subr.bf16.mxu0 %v14727_v12  ;;  %11904 = vmatprep.subr.bf16.mxu1 %v14729_v1  ;;  %v3649_v1 = vld [vmem:[%s14671_s23 + $0xd0] sm:$0xff] }
 0x84a   :  { %9498 = vmatmul.mubr.msk.f32.vlgmr.msra.gmra.mrb[32].mxu0 %vm1146_vm13, %v14751_v54  ;;  %10964 = vmatmul.mubr.msk.f32.vlgmr.msra.gmra.mrb[26].mxu1 %vm1146_vm13, %v14751_v54 }
 0x84b   :  { %11826 = vmatpush1.bf16.msra.mxu0 %v14741_v5  ;;  %4238 = vmatprep.mubr.f32.mxu0 %v3621_v62 }
 0x84c   :  { %11906 = vmatpush3.bf16.msra.mxu1 %v14745_v33  ;;  %4380 = vmatprep.mubr.f32.mxu1 %v3621_v62  ;;  %v14791_v62 = vpack.c.bf16 %v3640_v41, %v3637_v11  ;;  %v14799_v33 = vpack.c.bf16 %v3694_v43, %v3691_v37  ;;  %v3697_v11 = vld [vmem:[%s14671_s23 + $0x250] sm:$0xff]  ;;  %v3700_v41 = vld [vmem:[%s14671_s23 + $0x268] sm:$0xff]  ;;  %v3647_v43 = vld [vmem:[%s14671_s23 + $0xc0] sm:$0xff] }
 0x84d   :  { %11828 = vmatprep.subr.bf16.mxu0 %v14753_v17  ;;  %11908 = vmatprep.subr.bf16.mxu1 %v14755_v15  ;;  %v3643_v15 = vld [vmem:[%s14671_s23 + $0xa0] sm:$0xff]  ;;  %v14819_v44 = vpack.c.bf16 %v3700_v41, %v3697_v11  ;;  %v3653_v41 = vld [vmem:[%s14671_s23 + $0xf0] sm:$0xff] }
 0x84e   :  { %17364 = vst [vmem:[#allocation43_spill] sm:$0xff] %v14791_v62  ;;  %17366 = vst [vmem:[#allocation45_spill] sm:$0xff] %v14799_v33  ;;  %v14811_v46 = vpack.c.bf16 %v3646_v60, %v3643_v15  ;;  %v3703_v15 = vld [vmem:[%s14671_s23 + $0x280] sm:$0xff] }
 0x84f   :  { %11830 = vmatpush1.bf16.msra.mxu0 %v14767_v13  ;;  %17370 = vst [vmem:[#allocation49_spill] sm:$0xff] %v14819_v44  ;;  %v4660_v13 = vld [vmem:[%s14921_s27 + $0x60] sm:$0xff] }
 0x850   :  { %11910 = vmatpush3.bf16.msra.mxu1 %v14770_v21  ;;  %11832 = vmatprep.subr.bf16.mxu0 %v14772_v0  ;;  %v3651_v21 = vld [vmem:[%s14671_s23 + $0xe0] sm:$0xff]  ;;  %17368 = vst [vmem:[#allocation47_spill] sm:$0xff] %v14811_v46  ;;  %v4654_v0 = vld [vmem:[%s14921_s27 + $0x30] sm:$0xff] }
 0x851   :  { %11912 = vmatprep.subr.bf16.mxu1 %v14779_v40  ;;  %v14813_v37 = vpack.c.bf16 %v3651_v21, %v3648_v50  ;;  %v3650_v40 = vld [vmem:[%s14671_s23 + $0xd8] sm:$0xff]  ;;  %v14831_v50 = vpack.c.bf16 %v3652_v24, %v3649_v1  ;;  %v3709_v1 = vld [vmem:[%s14671_s23 + $0x2b0] sm:$0xff] }
 0x852   :  { %v3706_v21 = vld [vmem:[%s14671_s23 + $0x298] sm:$0xff]  ;;  %v14827_v60 = vpack.c.bf16 %v3650_v40, %v3647_v43  ;;  %v3660_v43 = vld [vmem:[%s14671_s23 + $0x128] sm:$0xff] }
 0x853   :  { %11834 = vmatpush1.bf16.msra.mxu0 %v14787_v26  ;;  %17369 = vst [vmem:[#allocation48_spill] sm:$0xff] %v14813_v37  ;;  %17372 = vst [vmem:[#allocation51_spill] sm:$0xff] %v14831_v50  ;;  %v14839_v20 = vpack.c.bf16 %v3706_v21, %v3703_v15  ;;  %v3658_v40 = vld [vmem:[%s14671_s23 + $0x118] sm:$0xff]  ;;  %v3659_v21 = vld [vmem:[%s14671_s23 + $0x120] sm:$0xff] }
 0x854   :  { %11914 = vmatpush3.bf16.msra.mxu1 %v14791_v62  ;;  %11836 = vmatprep.subr.bf16.mxu0 %v14793_v45  ;;  %v3657_v62 = vld [vmem:[%s14671_s23 + $0x110] sm:$0xff]  ;;  %17371 = vst [vmem:[#allocation50_spill] sm:$0xff] %v14827_v60  ;;  %v3702_v45 = vld [vmem:[%s14671_s23 + $0x278] sm:$0xff] }
 0x855   :  { %11916 = vmatprep.subr.bf16.mxu1 %v14799_v33  ;;  %v14833_v11 = vpack.c.bf16 %v3657_v62, %v3654_v8  ;;  %v3656_v33 = vld [vmem:[%s14671_s23 + $0x108] sm:$0xff]  ;;  %17374 = vst [vmem:[#allocation53_spill] sm:$0xff] %v14839_v20  ;;  %v14851_v8 = vpack.c.bf16 %v3658_v40, %v3655_v19  ;;  %v3715_v19 = vld [vmem:[%s14671_s23 + $0x2e0] sm:$0xff]  ;;  %v3718_v40 = vld [vmem:[%s14671_s23 + $0x2f8] sm:$0xff] }
 0x856   :  { %v3712_v62 = vld [vmem:[%s14671_s23 + $0x2c8] sm:$0xff]  ;;  %v14847_v24 = vpack.c.bf16 %v3656_v33, %v3653_v41  ;;  %v3666_v41 = vld [vmem:[%s14671_s23 + $0x158] sm:$0xff] }
 0x857   :  { %11838 = vmatpush1.bf16.msra.mxu0 %v14807_v34  ;;  %17373 = vst [vmem:[#allocation52_spill] sm:$0xff] %v14833_v11  ;;  %17376 = vst [vmem:[#allocation55_spill] sm:$0xff] %v14851_v8  ;;  %v3664_v33 = vld [vmem:[%s14671_s23 + $0x148] sm:$0xff]  ;;  %v4646_v34 = vld [vmem:[#allocation3 + $0x20] sm:$0x3] }
 0x858   :  { %11918 = vmatpush3.bf16.msra.mxu1 %v14811_v46  ;;  %11840 = vmatprep.subr.bf16.mxu0 %v14813_v37  ;;  %v3663_v46 = vld [vmem:[%s14671_s23 + $0x140] sm:$0xff]  ;;  %17375 = vst [vmem:[#allocation54_spill] sm:$0xff] %v14847_v24  ;;  %v14859_v37 = vpack.c.bf16 %v3712_v62, %v3709_v1  ;;  %v3665_v62 = vld [vmem:[%s14671_s23 + $0x150] sm:$0xff]  ;;  %v4655_v26 = vld [vmem:[%s14921_s27 + $0x38] sm:$0xff] }
 0x859   :  { %11920 = vmatprep.subr.bf16.mxu1 %v14819_v44  ;;  %v14853_v15 = vpack.c.bf16 %v3663_v46, %v3660_v43  ;;  %v3662_v44 = vld [vmem:[%s14671_s23 + $0x138] sm:$0xff]  ;;  %v14871_v43 = vpack.c.bf16 %v3664_v33, %v3661_v38 }
 0x85a   :  { %17378 = vst [vmem:[#allocation57_spill] sm:$0xff] %v14859_v37  ;;  %v14867_v46 = vpack.c.bf16 %v3662_v44, %v3659_v21  ;;  %v14879_v44 = vpack.c.bf16 %v3718_v40, %v3715_v19  ;;  %v3670_v21 = vld [vmem:[%s14671_s23 + $0x178] sm:$0xff]  ;;  %v3721_v40 = vld [vmem:[%s14671_s23 + $0x310] sm:$0xff] }
 0x85b   :  { %11842 = vmatpush1.bf16.msra.mxu0 %v14827_v60  ;;  %17377 = vst [vmem:[#allocation56_spill] sm:$0xff] %v14853_v15  ;;  %17380 = vst [vmem:[#allocation59_spill] sm:$0xff] %v14871_v43  ;;  %v3674_v19 = vld [vmem:[%s14671_s23 + $0x198] sm:$0xff]  ;;  %v3696_v60 = vld [vmem:[%s14671_s23 + $0x248] sm:$0xff] }
 0x85c   :  { %11922 = vmatpush3.bf16.msra.mxu1 %v14831_v50  ;;  %11844 = vmatprep.subr.bf16.mxu0 %v14833_v11  ;;  %v3669_v50 = vld [vmem:[%s14671_s23 + $0x170] sm:$0xff]  ;;  %17379 = vst [vmem:[#allocation58_spill] sm:$0xff] %v14867_v46  ;;  %v3667_v11 = vld [vmem:[%s14671_s23 + $0x160] sm:$0xff]  ;;  %17382 = vst [vmem:[#allocation61_spill] sm:$0xff] %v14879_v44 }
 0x85d   :  { %11924 = vmatprep.subr.bf16.mxu1 %v14839_v20  ;;  %v14873_v1 = vpack.c.bf16 %v3669_v50, %v3666_v41  ;;  %v3668_v20 = vld [vmem:[%s14671_s23 + $0x168] sm:$0xff]  ;;  %v14889_v50 = vpack.c.bf16 %v3670_v21, %v3667_v11  ;;  %v3671_v41 = vld [vmem:[%s14671_s23 + $0x180] sm:$0xff] }
 0x85e   :  { %v14885_v38 = vpack.c.bf16 %v3668_v20, %v3665_v62  ;;  %v3724_v20 = vld [vmem:[%s14671_s23 + $0x328] sm:$0xff]  ;;  %v3678_v62 = vld [vmem:[%s14671_s23 + $0x1b8] sm:$0xff] }
 0x85f   :  { %11846 = vmatpush1.bf16.msra.mxu0 %v14847_v24  ;;  %17381 = vst [vmem:[#allocation60_spill] sm:$0xff] %v14873_v1  ;;  %17384 = vst [vmem:[#allocation63_spill] sm:$0xff] %v14889_v50  ;;  %v14905_v11 = vpack.c.bf16 %v3724_v20, %v3721_v40  ;;  %v3680_v21 = vld [vmem:[%s14671_s23 + $0x1c8] sm:$0xff]  ;;  %v3742_v24 = vld [vmem:[%s14671_s23 + $0x3b8] sm:$0xff] }
 0x860   :  { %11926 = vmatpush3.bf16.msra.mxu1 %v14851_v8  ;;  %11848 = vmatprep.subr.bf16.mxu0 %v14853_v15  ;;  %v3672_v8 = vld [vmem:[%s14671_s23 + $0x188] sm:$0xff]  ;;  %v3675_v15 = vld [vmem:[%s14671_s23 + $0x1a0] sm:$0xff]  ;;  %17383 = vst [vmem:[#allocation62_spill] sm:$0xff] %v14885_v38 }
 0x861   :  { %11928 = vmatprep.subr.bf16.mxu1 %v14859_v37  ;;  %v14891_v33 = vpack.c.bf16 %v3675_v15, %v3672_v8  ;;  %v14901_v37 = vpack.c.bf16 %v3674_v19, %v3671_v41  ;;  %17387 = vst [vmem:[#allocation66_spill] sm:$0xff] %v14905_v11  ;;  %v3677_v15 = vld [vmem:[%s14671_s23 + $0x1b0] sm:$0xff]  ;;  %v3687_v41 = vld [vmem:[%s14671_s23 + $0x200] sm:$0xff] }
 0x862   :  { %v14916_v19 = vld [vmem:[#allocation3] sm:$0xff] }
 0x863   :  { %11850 = vmatpush1.bf16.msra.mxu0 %v14867_v46  ;;  %17385 = vst [vmem:[#allocation64_spill] sm:$0xff] %v14891_v33  ;;  %17386 = vst [vmem:[#allocation65_spill] sm:$0xff] %v14901_v37  ;;  %v3739_v46 = vld [vmem:[%s14671_s23 + $0x3a0] sm:$0xff] }
 0x864   :  { %11930 = vmatpush3.bf16.msra.mxu1 %v14871_v43  ;;  %11852 = vmatprep.subr.bf16.mxu0 %v14873_v1  ;;  %v3681_v43 = vld [vmem:[%s14671_s23 + $0x1d0] sm:$0xff]  ;;  %v3730_v1 = vld [vmem:[%s14671_s23 + $0x358] sm:$0xff] }
 0x865   :  { %11932 = vmatprep.subr.bf16.mxu1 %v14879_v44  ;;  %v14907_v8 = vpack.c.bf16 %v3681_v43, %v3678_v62  ;;  %v3727_v44 = vld [vmem:[%s14671_s23 + $0x340] sm:$0xff]  ;;  %v14925_v43 = vpack.c.bf16 %v3680_v21, %v3677_v15  ;;  %v3690_v15 = vld [vmem:[%s14671_s23 + $0x218] sm:$0xff]  ;;  %v3693_v21 = vld [vmem:[%s14671_s23 + $0x230] sm:$0xff] }
 0x866   :  { %v14929_v40 = vpack.c.bf16 %v3730_v1, %v3727_v44  ;;  %v3683_v62 = vld [vmem:[%s14671_s23 + $0x1e0] sm:$0xff] }
 0x867   :  { %11854 = vmatpush1.bf16.msra.mxu0 %v14885_v38  ;;  %17388 = vst [vmem:[#allocation67_spill] sm:$0xff] %v14907_v8  ;;  %v3684_v38 = vld [vmem:[%s14671_s23 + $0x1e8] sm:$0xff]  ;;  %17389 = vst [vmem:[#allocation68_spill] sm:$0xff] %v14925_v43 }
 0x868   :  { %11934 = vmatpush3.bf16.msra.mxu1 %v14889_v50  ;;  %11856 = vmatprep.subr.bf16.mxu0 %v14891_v33  ;;  %17390 = vst [vmem:[#allocation69_spill] sm:$0xff] %v14929_v40  ;;  %v14931_v20 = vpack.c.bf16 %v3687_v41, %v3684_v38  ;;  %v3686_v50 = vld [vmem:[%s14671_s23 + $0x1f8] sm:$0xff]  ;;  %v3733_v33 = vld [vmem:[%s14671_s23 + $0x370] sm:$0xff]  ;;  %v14951_v38 = vpack.c.bf16 %v3693_v21, %v3690_v15 }
 0x869   :  { %11935 = vmatprep.subr.bf16.mxu1 %v17313_v47  ;;  %v14945_v1 = vpack.c.bf16 %v3686_v50, %v3683_v62  ;;  %v3689_v41 = vld [vmem:[%s14671_s23 + $0x210] sm:$0xff]  ;;  %v3699_v50 = vld [vmem:[%s14671_s23 + $0x260] sm:$0xff]  ;;  %v4649_v62 = vld [vmem:[%s14921_s27 + $0x8] sm:$0xff]  ;;  %v14968_v15 = vpack.c.bf16 %v3742_v24, %v3739_v46 }
 0x86a   :  { %17391 = vst [vmem:[#allocation70_spill] sm:$0xff] %v14931_v20  ;;  %17394 = vst [vmem:[#allocation73_spill] sm:$0xff] %v14951_v38  ;;  %v14970_v21 = vpack.c.bf16 %v3699_v50, %v3696_v60  ;;  %v4658_v24 = vld [vmem:[%s14921_s27 + $0x50] sm:$0xff]  ;;  %v4779_v50 = vrot.slane %v4646_v34, 2  ;;  %v4657_v34 = vld [vmem:[%s14921_s27 + $0x48] sm:$0xff] }
 0x86b   :  { %4381 = vmatmul.mubr.f32.vlgmr.msra.gmra.mrb[28].mxu1 %v14916_v19  ;;  %11858 = vmatpush1.bf16.msra.mxu0 %v14901_v37  ;;  %v3736_v37 = vld [vmem:[%s14671_s23 + $0x388] sm:$0xff]  ;;  %17392 = vst [vmem:[#allocation71_spill] sm:$0xff] %v14945_v1  ;;  %17396 = vst [vmem:[#allocation75_spill] sm:$0xff] %v14968_v15 }
 0x86c   :  { %11937 = vmatpush3.bf16.msra.mxu1 %v14905_v11  ;;  %11860 = vmatprep.subr.bf16.mxu0 %v14907_v8  ;;  %v14940_v11 = vld [vmem:[#allocation4] sm:$0xff]  ;;  %v14949_v44 = vpack.c.bf16 %v3736_v37, %v3733_v33  ;;  %v3692_v8 = vld [vmem:[%s14671_s23 + $0x228] sm:$0xff]  ;;  %v3695_v33 = vld [vmem:[%s14671_s23 + $0x240] sm:$0xff]  ;;  %17397 = vst [vmem:[#allocation76_spill] sm:$0xff] %v14970_v21 }
 0x86d   :  { %11938 = vmatprep.subr.bf16.mxu1 %v17313_v47  ;;  %10982 = vmatprep.mubr.msk.f32.mxu1 %vm13248_vm0, %v14940_v11  ;;  %v14963_v37 = vpack.c.bf16 %v3692_v8, %v3689_v41  ;;  %v4648_v8 = vld [vmem:[%s14921_s27] sm:$0xff]  ;;  %v4651_v41 = vld [vmem:[%s14921_s27 + $0x18] sm:$0xff] }
 0x86e   :  { %17393 = vst [vmem:[#allocation72_spill] sm:$0xff] %v14949_v44 }
 0x86f   :  { %11862 = vmatpush1.bf16.msra.mxu0 %v14925_v43  ;;  %17395 = vst [vmem:[#allocation74_spill] sm:$0xff] %v14963_v37  ;;  %v4643_v43 = vld [vmem:[#allocation3 + $0x8] sm:$0xfc] }
 0x870   :  { %11940 = vmatpush3.bf16.msra.mxu1 %v14929_v40  ;;  %11864 = vmatprep.subr.bf16.mxu0 %v14931_v20  ;;  %v4652_v40 = vld [vmem:[%s14921_s27 + $0x20] sm:$0xff]  ;;  %v3698_v20 = vld [vmem:[%s14671_s23 + $0x258] sm:$0xff]  ;;  %v4778_v46 = vrot.slane %v4643_v43, 2  ;;  %v3708_v43 = vld [vmem:[%s14671_s23 + $0x2a8] sm:$0xff] }
 0x871   :  { %11941 = vmatprep.subr.bf16.mxu1 %v17313_v47  ;;  %v14983_v60 = vpack.c.bf16 %v3698_v20, %v3695_v33  ;;  %v14995_v20 = vpack.c.bf16 %v4658_v24, %v4655_v26  ;;  %v3711_v33 = vld [vmem:[%s14671_s23 + $0x2c0] sm:$0xff] }
 0x872   :  { %v15008_v26 = vsel %vm4774_vm4, %v4778_v46, %v4779_v50  ;;  %v15016_v24 = vpack.c.bf16 %v3711_v33, %v3708_v43  ;;  %v4663_v46 = vld [vmem:[%s14921_s27 + $0x78] sm:$0xff] }
 0x873   :  { %11866 = vmatpush1.bf16.msra.mxu0 %v14945_v1  ;;  %v14974_v1 = vpack.c.bf16 %v4652_v40, %v4649_v62  ;;  %v14987_v40 = vpack.c.bf16 %v4651_v41, %v4648_v8  ;;  %v3701_v62 = vld [vmem:[%s14671_s23 + $0x270] sm:$0xff]  ;;  %17401 = vst [vmem:[#allocation80_spill] sm:$0xff] %v14995_v20  ;;  %v4661_v8 = vld [vmem:[%s14921_s27 + $0x68] sm:$0xff]  ;;  %v4664_v41 = vld [vmem:[%s14921_s27 + $0x80] sm:$0xff]  ;;  %v15035_v33 = vpack.c.bf16 %v4663_v46, %v4660_v13 }
 0x874   :  { %11943 = vmatpush3.bf16.msra.mxu1 %v14949_v44  ;;  %11868 = vmatprep.subr.bf16.mxu0 %v14951_v38  ;;  %v3705_v44 = vld [vmem:[%s14671_s23 + $0x290] sm:$0xff]  ;;  %v3704_v38 = vld [vmem:[%s14671_s23 + $0x288] sm:$0xff]  ;;  %17404 = vst [vmem:[#allocation83_spill] sm:$0xff] %v15016_v24  ;;  %v3714_v50 = vld [vmem:[%s14671_s23 + $0x2d8] sm:$0xff] }
 0x875   :  { %11944 = vmatprep.subr.bf16.mxu1 %v17313_v47  ;;  %17398 = vst [vmem:[#allocation77_spill] sm:$0xff] %v14974_v1  ;;  %17399 = vst [vmem:[#allocation78_spill] sm:$0xff] %v14987_v40  ;;  %v4673_v13 = vld [vmem:[%s14921_s27 + $0xc8] sm:$0xff]  ;;  %v4676_v46 = vld [vmem:[%s14921_s27 + $0xe0] sm:$0xff] }
 0x876   :  { %17407 = vst [vmem:[#allocation86_spill] sm:$0xff] %v15035_v33 }
 0x877   :  { %11870 = vmatpush1.bf16.msra.mxu0 %v14963_v37  ;;  %v14993_v37 = vpack.c.bf16 %v3705_v44, %v3702_v45  ;;  %v15010_v45 = vpack.c.bf16 %v3704_v38, %v3701_v62  ;;  %v15014_v44 = vpack.c.bf16 %v4657_v34, %v4654_v0  ;;  %v15023_v38 = vpack.c.bf16 %v4664_v41, %v4661_v8  ;;  %v3717_v0 = vld [vmem:[%s14671_s23 + $0x2f0] sm:$0xff]  ;;  %v4667_v62 = vld [vmem:[%s14921_s27 + $0x98] sm:$0xff] }
 0x878   :  { %11946 = vmatpush3.bf16.msra.mxu1 %v14968_v15  ;;  %11872 = vmatprep.subr.bf16.mxu0 %v14970_v21  ;;  %v15000_v15 = vld [vmem:[#allocation3 + $0x10] sm:$0xff]  ;;  %v3710_v21 = vld [vmem:[%s14671_s23 + $0x2b8] sm:$0xff]  ;;  %v4670_v34 = vld [vmem:[%s14921_s27 + $0xb0] sm:$0xff]  ;;  %v15037_v8 = vpack.c.bf16 %v3717_v0, %v3714_v50 }
 0x879   :  { %11948 = vmatprep.subr.bf16.mxu1 %v14974_v1  ;;  %17400 = vst [vmem:[#allocation79_spill] sm:$0xff] %v14993_v37  ;;  %17402 = vst [vmem:[#allocation81_spill] sm:$0xff] %v15010_v45  ;;  %v3707_v1 = vld [vmem:[%s14671_s23 + $0x2a0] sm:$0xff]  ;;  %v3713_v41 = vld [vmem:[%s14671_s23 + $0x2d0] sm:$0xff] }
 0x87a   :  { %17403 = vst [vmem:[#allocation82_spill] sm:$0xff] %v15014_v44  ;;  %17405 = vst [vmem:[#allocation84_spill] sm:$0xff] %v15023_v38  ;;  %v15031_v43 = vpack.c.bf16 %v3710_v21, %v3707_v1  ;;  %v4669_v1 = vld [vmem:[%s14921_s27 + $0xa8] sm:$0xff] }
 0x87b   :  { %10983 = vmatmul.mubr.msk.f32.vlgmr.msra.gmra.mrb[30].mxu1 %vm1146_vm13, %v15000_v15  ;;  %11874 = vmatpush1.bf16.msra.mxu0 %v14983_v60  ;;  %17408 = vst [vmem:[#allocation87_spill] sm:$0xff] %v15037_v8  ;;  %v3720_v21 = vld [vmem:[%s14671_s23 + $0x308] sm:$0xff] }
 0x87c   :  { %11950 = vmatpush1.bf16.msra.mxu1 %v14987_v40  ;;  %4852 = vmatprep.mubr.f32.mxu1 %v15008_v26  ;;  %17406 = vst [vmem:[#allocation85_spill] sm:$0xff] %v15031_v43  ;;  %v4666_v40 = vld [vmem:[%s14921_s27 + $0x90] sm:$0xff] }
 0x87d   :  { %11876 = vmatprep.subr.bf16.mxu0 %v14993_v37  ;;  %11952 = vmatprep.subr.bf16.mxu1 %v14995_v20  ;;  %v3716_v20 = vld [vmem:[%s14671_s23 + $0x2e8] sm:$0xff]  ;;  %v15043_v37 = vpack.c.bf16 %v4670_v34, %v4667_v62  ;;  %v15055_v0 = vpack.c.bf16 %v4669_v1, %v4666_v40  ;;  %v3719_v34 = vld [vmem:[%s14671_s23 + $0x300] sm:$0xff]  ;;  %v4679_v40 = vld [vmem:[%s14921_s27 + $0xf8] sm:$0xff] }
 0x87e   :  { %v15051_v50 = vpack.c.bf16 %v3716_v20, %v3713_v41  ;;  %v4675_v20 = vld [vmem:[%s14921_s27 + $0xd8] sm:$0xff]  ;;  %v4682_v1 = vld [vmem:[%s14921_s27 + $0x110] sm:$0xff] }
 0x87f   :  { %11878 = vmatpush1.bf16.msra.mxu0 %v15010_v45  ;;  %17409 = vst [vmem:[#allocation88_spill] sm:$0xff] %v15043_v37  ;;  %17411 = vst [vmem:[#allocation90_spill] sm:$0xff] %v15055_v0  ;;  %v15063_v45 = vpack.c.bf16 %v4676_v46, %v4673_v13  ;;  %v3726_v41 = vld [vmem:[%s14671_s23 + $0x338] sm:$0xff]  ;;  %v3725_v46 = vld [vmem:[%s14671_s23 + $0x330] sm:$0xff] }
 0x880   :  { %11954 = vmatpush1.bf16.msra.mxu1 %v15014_v44  ;;  %11880 = vmatprep.subr.bf16.mxu0 %v15016_v24  ;;  %v3723_v44 = vld [vmem:[%s14671_s23 + $0x320] sm:$0xff]  ;;  %17410 = vst [vmem:[#allocation89_spill] sm:$0xff] %v15051_v50 }
 0x881   :  { %11956 = vmatprep.subr.bf16.mxu1 %v15023_v38  ;;  %v15057_v62 = vpack.c.bf16 %v3723_v44, %v3720_v21  ;;  %v3722_v38 = vld [vmem:[%s14671_s23 + $0x318] sm:$0xff]  ;;  %v4672_v24 = vld [vmem:[%s14921_s27 + $0xc0] sm:$0xff]  ;;  %17412 = vst [vmem:[#allocation91_spill] sm:$0xff] %v15063_v45 }
 0x882   :  { %v15071_v44 = vpack.c.bf16 %v3722_v38, %v3719_v34  ;;  %v15075_v21 = vpack.c.bf16 %v4675_v20, %v4672_v24  ;;  %v4681_v38 = vld [vmem:[%s14921_s27 + $0x108] sm:$0xff] }
 0x883   :  { %11882 = vmatpush1.bf16.msra.mxu0 %v15031_v43  ;;  %v15083_v43 = vpack.c.bf16 %v4682_v1, %v4679_v40  ;;  %v3732_v34 = vld [vmem:[%s14671_s23 + $0x368] sm:$0xff]  ;;  %v3734_v1 = vld [vmem:[%s14671_s23 + $0x378] sm:$0xff] }
 0x884   :  { %11958 = vmatpush1.bf16.msra.mxu1 %v15035_v33  ;;  %11884 = vmatprep.subr.bf16.mxu0 %v15037_v8  ;;  %v3729_v33 = vld [vmem:[%s14671_s23 + $0x350] sm:$0xff]  ;;  %17413 = vst [vmem:[#allocation92_spill] sm:$0xff] %v15071_v44  ;;  %17414 = vst [vmem:[#allocation93_spill] sm:$0xff] %v15075_v21  ;;  %v4685_v24 = vld [vmem:[%s14921_s27 + $0x128] sm:$0xff] }
 0x885   :  { %11960 = vmatprep.subr.bf16.mxu1 %v15043_v37  ;;  %v15077_v13 = vpack.c.bf16 %v3729_v33, %v3726_v41  ;;  %v3728_v37 = vld [vmem:[%s14671_s23 + $0x348] sm:$0xff]  ;;  %v4678_v8 = vld [vmem:[%s14921_s27 + $0xf0] sm:$0xff]  ;;  %17416 = vst [vmem:[#allocation95_spill] sm:$0xff] %v15083_v43  ;;  %v4688_v33 = vld [vmem:[%s14921_s27 + $0x140] sm:$0xff] }
 0x886   :  { %v15092_v20 = vpack.c.bf16 %v3728_v37, %v3725_v46  ;;  %v15097_v41 = vpack.c.bf16 %v4681_v38, %v4678_v8  ;;  %v15105_v37 = vpack.c.bf16 %v4688_v33, %v4685_v24  ;;  %v4687_v46 = vld [vmem:[%s14921_s27 + $0x138] sm:$0xff]  ;;  %v3737_v33 = vld [vmem:[%s14671_s23 + $0x390] sm:$0xff] }
 0x887   :  { %11886 = vmatpush1.bf16.msra.mxu0 %v15051_v50  ;;  %17415 = vst [vmem:[#allocation94_spill] sm:$0xff] %v15077_v13  ;;  %v3735_v50 = vld [vmem:[%s14671_s23 + $0x380] sm:$0xff]  ;;  %v4691_v8 = vld [vmem:[%s14921_s27 + $0x158] sm:$0xff] }
 0x888   :  { %11962 = vmatpush1.bf16.msra.mxu1 %v15055_v0  ;;  %11888 = vmatprep.subr.bf16.mxu0 %v15057_v62  ;;  %17417 = vst [vmem:[#allocation96_spill] sm:$0xff] %v15092_v20  ;;  %17418 = vst [vmem:[#allocation97_spill] sm:$0xff] %v15097_v41  ;;  %v15099_v40 = vpack.c.bf16 %v3735_v50, %v3732_v34  ;;  %v3738_v0 = vld [vmem:[%s14671_s23 + $0x398] sm:$0xff]  ;;  %v4694_v50 = vld [vmem:[%s14921_s27 + $0x170] sm:$0xff] }
 0x889   :  { %11964 = vmatprep.subr.bf16.mxu1 %v15063_v45  ;;  %v4684_v45 = vld [vmem:[%s14921_s27 + $0x120] sm:$0xff]  ;;  %17420 = vst [vmem:[#allocation99_spill] sm:$0xff] %v15105_v37 }
 0x88a   :  { %4239 = vmatmul.mubr.f32.vlgmr.msra.gmra.mrb[32].mxu0 %v14916_v19  ;;  %17419 = vst [vmem:[#allocation98_spill] sm:$0xff] %v15099_v40  ;;  %v3731_v19 = vld [vmem:[%s14671_s23 + $0x360] sm:$0xff]  ;;  %v15117_v34 = vpack.c.bf16 %v4687_v46, %v4684_v45  ;;  %v4697_v45 = vld [vmem:[%s14921_s27 + $0x188] sm:$0xff] }
 0x88b   :  { %11890 = vmatpush1.bf16.msra.mxu0 %v15071_v44  ;;  %4309 = vmatprep.mubr.f32.mxu0 %v14940_v11  ;;  %v15113_v38 = vpack.c.bf16 %v3734_v1, %v3731_v19  ;;  %v15125_v44 = vpack.c.bf16 %v4694_v50, %v4691_v8  ;;  %v4693_v19 = vld [vmem:[%s14921_s27 + $0x168] sm:$0xff]  ;;  %v4698_v1 = vld [vmem:[%s14921_s27 + $0x190] sm:$0xff]  ;;  %v4696_v50 = vld [vmem:[%s14921_s27 + $0x180] sm:$0xff] }
 0x88c   :  { %11966 = vmatpush1.bf16.msra.mxu1 %v15075_v21  ;;  %11892 = vmatprep.subr.bf16.mxu0 %v15077_v13  ;;  %v3741_v21 = vld [vmem:[%s14671_s23 + $0x3b0] sm:$0xff]  ;;  %17422 = vst [vmem:[#allocation101_spill] sm:$0xff] %v15117_v34 }
 0x88d   :  { %11968 = vmatprep.subr.bf16.mxu1 %v15083_v43  ;;  %17421 = vst [vmem:[#allocation100_spill] sm:$0xff] %v15113_v38  ;;  %v15119_v24 = vpack.c.bf16 %v3741_v21, %v3738_v0  ;;  %v3740_v43 = vld [vmem:[%s14671_s23 + $0x3a8] sm:$0xff]  ;;  %v4690_v13 = vld [vmem:[%s14921_s27 + $0x150] sm:$0xff]  ;;  %17424 = vst [vmem:[#allocation103_spill] sm:$0xff] %v15125_v44 }
 0x88e   :  { %v4700_v0 = vld [vmem:[%s14921_s27 + $0x1a0] sm:$0xff]  ;;  %v15133_v21 = vpack.c.bf16 %v3740_v43, %v3737_v33  ;;  %v15137_v46 = vpack.c.bf16 %v4693_v19, %v4690_v13  ;;  %v4699_v43 = vld [vmem:[%s14921_s27 + $0x198] sm:$0xff]  ;;  %v4706_v19 = vld [vmem:[%s14921_s27 + $0x1d0] sm:$0xff] }
 0x88f   :  { %11894 = vmatpush1.bf16.msra.mxu0 %v15092_v20  ;;  %17423 = vst [vmem:[#allocation102_spill] sm:$0xff] %v15119_v24  ;;  %v15145_v20 = vpack.c.bf16 %v4700_v0, %v4697_v45  ;;  %v4704_v33 = vld [vmem:[%s14921_s27 + $0x1c0] sm:$0xff]  ;;  %v4703_v13 = vld [vmem:[%s14921_s27 + $0x1b8] sm:$0xff]  ;;  %v4702_v0 = vld [vmem:[%s14921_s27 + $0x1b0] sm:$0xff] }
 0x890   :  { %11970 = vmatpush1.bf16.msra.mxu1 %v15097_v41  ;;  %11896 = vmatprep.subr.bf16.mxu0 %v15099_v40  ;;  %v4701_v41 = vld [vmem:[%s14921_s27 + $0x1a8] sm:$0xff]  ;;  %17425 = vst [vmem:[#allocation104_spill] sm:$0xff] %v15133_v21  ;;  %17426 = vst [vmem:[#allocation105_spill] sm:$0xff] %v15137_v46 }
 0x891   :  { %11972 = vmatprep.subr.bf16.mxu1 %v15105_v37  ;;  %v15139_v8 = vpack.c.bf16 %v4701_v41, %v4698_v1  ;;  %v4650_v37 = vld [vmem:[%s14921_s27 + $0x10] sm:$0xff]  ;;  %v4653_v40 = vld [vmem:[%s14921_s27 + $0x28] sm:$0xff]  ;;  %17428 = vst [vmem:[#allocation107_spill] sm:$0xff] %v15145_v20  ;;  %v15157_v1 = vpack.c.bf16 %v4699_v43, %v4696_v50  ;;  %v4712_v50 = vld [vmem:[%s14921_s27 + $0x200] sm:$0xff] }
 0x892   :  { %v15153_v41 = vpack.c.bf16 %v4653_v40, %v4650_v37  ;;  %v4705_v40 = vld [vmem:[%s14921_s27 + $0x1c8] sm:$0xff]  ;;  %v4710_v37 = vld [vmem:[%s14921_s27 + $0x1f0] sm:$0xff] }
 0x893   :  { %11898 = vmatpush1.bf16.msra.mxu0 %v15113_v38  ;;  %17427 = vst [vmem:[#allocation106_spill] sm:$0xff] %v15139_v8  ;;  %17430 = vst [vmem:[#allocation109_spill] sm:$0xff] %v15157_v1  ;;  %v15165_v38 = vpack.c.bf16 %v4706_v19, %v4703_v13  ;;  %v4662_v19 = vld [vmem:[%s14921_s27 + $0x70] sm:$0xff] }
 0x894   :  { %11974 = vmatpush1.bf16.msra.mxu1 %v15117_v34  ;;  %11900 = vmatprep.subr.bf16.mxu0 %v15119_v24  ;;  %v4707_v34 = vld [vmem:[%s14921_s27 + $0x1d8] sm:$0xff]  ;;  %17429 = vst [vmem:[#allocation108_spill] sm:$0xff] %v15153_v41 }
 0x895   :  { %11976 = vmatprep.subr.bf16.mxu1 %v15125_v44  ;;  %v15159_v45 = vpack.c.bf16 %v4707_v34, %v4704_v33  ;;  %v4656_v44 = vld [vmem:[%s14921_s27 + $0x40] sm:$0xff]  ;;  %v4659_v24 = vld [vmem:[%s14921_s27 + $0x58] sm:$0xff]  ;;  %17432 = vst [vmem:[#allocation111_spill] sm:$0xff] %v15165_v38  ;;  %v4709_v34 = vld [vmem:[%s14921_s27 + $0x1e8] sm:$0xff]  ;;  %v15180_v33 = vpack.c.bf16 %v4705_v40, %v4702_v0 }
 0x896   :  { %v15176_v43 = vpack.c.bf16 %v4659_v24, %v4656_v44  ;;  %v4716_v44 = vld [vmem:[%s14921_s27 + $0x220] sm:$0xff]  ;;  %v4719_v24 = vld [vmem:[%s14921_s27 + $0x238] sm:$0xff] }
 0x897   :  { %11902 = vmatpush1.bf16.msra.mxu0 %v15133_v21  ;;  %17431 = vst [vmem:[#allocation110_spill] sm:$0xff] %v15159_v45  ;;  %v4713_v21 = vld [vmem:[%s14921_s27 + $0x208] sm:$0xff]  ;;  %17434 = vst [vmem:[#allocation113_spill] sm:$0xff] %v15180_v33  ;;  %v4715_v0 = vld [vmem:[%s14921_s27 + $0x218] sm:$0xff] }
 0x898   :  { %11978 = vmatpush1.bf16.msra.mxu1 %v15137_v46  ;;  %12028 = vmatprep.subr.bf16.mxu0 %v15139_v8  ;;  %17433 = vst [vmem:[#allocation112_spill] sm:$0xff] %v15176_v43  ;;  %v15182_v13 = vpack.c.bf16 %v4713_v21, %v4710_v37  ;;  %v15188_v46 = vpack.c.bf16 %v4712_v50, %v4709_v34  ;;  %v4718_v21 = vld [vmem:[%s14921_s27 + $0x230] sm:$0xff]  ;;  %v4747_v8 = vld [vmem:[%s14921_s27 + $0x318] sm:$0xff] }
 0x899   :  { %11980 = vmatprep.subr.bf16.mxu1 %v15145_v20  ;;  %v4665_v20 = vld [vmem:[%s14921_s27 + $0x88] sm:$0xff]  ;;  %v15202_v34 = vpack.c.bf16 %v4719_v24, %v4716_v44  ;;  %v4714_v50 = vld [vmem:[%s14921_s27 + $0x210] sm:$0xff] }
 0x89a   :  { %9500 = vmatmul.mubr.msk.f32.vlgmr.msra.gmra.mrb[32].mxu0 %vm1146_vm13, %v15000_v15  ;;  %17435 = vst [vmem:[#allocation114_spill] sm:$0xff] %v15182_v13  ;;  %v4708_v15 = vld [vmem:[%s14921_s27 + $0x1e0] sm:$0xff]  ;;  %17436 = vst [vmem:[#allocation115_spill] sm:$0xff] %v15188_v46  ;;  %v15196_v40 = vpack.c.bf16 %v4665_v20, %v4662_v19  ;;  %v4717_v20 = vld [vmem:[%s14921_s27 + $0x228] sm:$0xff] }
 0x89b   :  { %12030 = vmatpush3.bf16.msra.mxu0 %v15153_v41  ;;  %4994 = vmatprep.mubr.f32.mxu0 %v15008_v26  ;;  %v4711_v26 = vld [vmem:[%s14921_s27 + $0x1f8] sm:$0xff]  ;;  %17439 = vst [vmem:[#allocation118_spill] sm:$0xff] %v15202_v34  ;;  %v4722_v19 = vld [vmem:[%s14921_s27 + $0x250] sm:$0xff]  ;;  %v15220_v24 = vpack.c.bf16 %v4717_v20, %v4714_v50  ;;  %v4575_v41 = vld [vmem:[%s15256_s1 + $0x1a8] sm:$0xff] }
 0x89c   :  { %11982 = vmatpush1.bf16.msra.mxu1 %v15157_v1  ;;  %12032 = vmatprep.subr.bf16.mxu0 %v15159_v45  ;;  %17437 = vst [vmem:[#allocation116_spill] sm:$0xff] %v15196_v40  ;;  %v15200_v37 = vpack.c.bf16 %v4711_v26, %v4708_v15  ;;  %v4671_v1 = vld [vmem:[%s14921_s27 + $0xb8] sm:$0xff]  ;;  %v15208_v45 = vpack.c.bf16 %v4718_v21, %v4715_v0  ;;  %v4721_v15 = vld [vmem:[%s14921_s27 + $0x248] sm:$0xff]  ;;  %v4724_v26 = vld [vmem:[%s14921_s27 + $0x260] sm:$0xff] }
 0x89d   :  { %11984 = vmatprep.subr.bf16.mxu1 %v15165_v38  ;;  %v4668_v38 = vld [vmem:[%s14921_s27 + $0xa0] sm:$0xff]  ;;  %17442 = vst [vmem:[#allocation121_spill] sm:$0xff] %v15220_v24  ;;  %v4727_v50 = vld [vmem:[%s14921_s27 + $0x278] sm:$0xff]  ;;  %v4730_v20 = vld [vmem:[%s14921_s27 + $0x290] sm:$0xff] }
 0x89e   :  { %17438 = vst [vmem:[#allocation117_spill] sm:$0xff] %v15200_v37  ;;  %17440 = vst [vmem:[#allocation119_spill] sm:$0xff] %v15208_v45  ;;  %v15216_v44 = vpack.c.bf16 %v4671_v1, %v4668_v38  ;;  %v4720_v21 = vld [vmem:[%s14921_s27 + $0x240] sm:$0xff]  ;;  %v4723_v38 = vld [vmem:[%s14921_s27 + $0x258] sm:$0xff] }
 0x89f   :  { %12034 = vmatpush3.bf16.msra.mxu0 %v15176_v43  ;;  %v15228_v43 = vpack.c.bf16 %v4724_v26, %v4721_v15  ;;  %v4728_v1 = vld [vmem:[%s14921_s27 + $0x280] sm:$0xff]  ;;  %v4726_v26 = vld [vmem:[%s14921_s27 + $0x270] sm:$0xff] }
 0x8a0   :  { %11986 = vmatpush1.bf16.msra.mxu1 %v15180_v33  ;;  %12036 = vmatprep.subr.bf16.mxu0 %v15182_v13  ;;  %v4725_v33 = vld [vmem:[%s14921_s27 + $0x268] sm:$0xff]  ;;  %17441 = vst [vmem:[#allocation120_spill] sm:$0xff] %v15216_v44 }
 0x8a1   :  { %11988 = vmatprep.subr.bf16.mxu1 %v15188_v46  ;;  %v15222_v0 = vpack.c.bf16 %v4725_v33, %v4722_v19  ;;  %v4674_v46 = vld [vmem:[%s14921_s27 + $0xd0] sm:$0xff]  ;;  %v4677_v13 = vld [vmem:[%s14921_s27 + $0xe8] sm:$0xff]  ;;  %17444 = vst [vmem:[#allocation123_spill] sm:$0xff] %v15228_v43  ;;  %v15240_v19 = vpack.c.bf16 %v4723_v38, %v4720_v21  ;;  %v4736_v21 = vld [vmem:[%s14921_s27 + $0x2c0] sm:$0xff] }
 0x8a2   :  { %v15236_v33 = vpack.c.bf16 %v4677_v13, %v4674_v46  ;;  %v4729_v46 = vld [vmem:[%s14921_s27 + $0x288] sm:$0xff]  ;;  %v4734_v13 = vld [vmem:[%s14921_s27 + $0x2b0] sm:$0xff] }
 0x8a3   :  { %12038 = vmatpush3.bf16.msra.mxu0 %v15196_v40  ;;  %17443 = vst [vmem:[#allocation122_spill] sm:$0xff] %v15222_v0  ;;  %17446 = vst [vmem:[#allocation125_spill] sm:$0xff] %v15240_v19  ;;  %v4737_v40 = vld [vmem:[%s14921_s27 + $0x2c8] sm:$0xff] }
 0x8a4   :  { %11990 = vmatpush1.bf16.msra.mxu1 %v15200_v37  ;;  %12040 = vmatprep.subr.bf16.mxu0 %v15202_v34  ;;  %v4731_v37 = vld [vmem:[%s14921_s27 + $0x298] sm:$0xff]  ;;  %17445 = vst [vmem:[#allocation124_spill] sm:$0xff] %v15236_v33 }
 0x8a5   :  { %11992 = vmatprep.subr.bf16.mxu1 %v15208_v45  ;;  %v15242_v15 = vpack.c.bf16 %v4731_v37, %v4728_v1  ;;  %v4680_v45 = vld [vmem:[%s14921_s27 + $0x100] sm:$0xff]  ;;  %v4683_v34 = vld [vmem:[%s14921_s27 + $0x118] sm:$0xff]  ;;  %v4733_v37 = vld [vmem:[%s14921_s27 + $0x2a8] sm:$0xff]  ;;  %v15265_v1 = vpack.c.bf16 %v4729_v46, %v4726_v26 }
 0x8a6   :  { %v15261_v38 = vpack.c.bf16 %v4683_v34, %v4680_v45  ;;  %v4735_v45 = vld [vmem:[%s14921_s27 + $0x2b8] sm:$0xff]  ;;  %v4740_v34 = vld [vmem:[%s14921_s27 + $0x2e0] sm:$0xff]  ;;  %v4742_v26 = vld [vmem:[%s14921_s27 + $0x2f0] sm:$0xff] }
 0x8a7   :  { %12042 = vmatpush3.bf16.msra.mxu0 %v15216_v44  ;;  %17447 = vst [vmem:[#allocation126_spill] sm:$0xff] %v15242_v15  ;;  %v15248_v44 = vpack.c.bf16 %v4730_v20, %v4727_v50  ;;  %17450 = vst [vmem:[#allocation129_spill] sm:$0xff] %v15265_v1  ;;  %v15267_v50 = vpack.c.bf16 %v4737_v40, %v4734_v13  ;;  %v4732_v20 = vld [vmem:[%s14921_s27 + $0x2a0] sm:$0xff]  ;;  %v4738_v46 = vld [vmem:[%s14921_s27 + $0x2d0] sm:$0xff] }
 0x8a8   :  { %11994 = vmatpush1.bf16.msra.mxu1 %v15220_v24  ;;  %12044 = vmatprep.subr.bf16.mxu0 %v15222_v0  ;;  %17449 = vst [vmem:[#allocation128_spill] sm:$0xff] %v15261_v38  ;;  %v4689_v24 = vld [vmem:[%s14921_s27 + $0x148] sm:$0xff]  ;;  %v4739_v0 = vld [vmem:[%s14921_s27 + $0x2d8] sm:$0xff]  ;;  %v15286_v13 = vpack.c.bf16 %v4735_v45, %v4732_v20  ;;  %v4748_v20 = vld [vmem:[%s14921_s27 + $0x320] sm:$0xff] }
 0x8a9   :  { %11996 = vmatprep.subr.bf16.mxu1 %v15228_v43  ;;  %17448 = vst [vmem:[#allocation127_spill] sm:$0xff] %v15248_v44  ;;  %17451 = vst [vmem:[#allocation130_spill] sm:$0xff] %v15267_v50  ;;  %v4686_v43 = vld [vmem:[%s14921_s27 + $0x130] sm:$0xff] }
 0x8aa   :  { %v15281_v40 = vpack.c.bf16 %v4689_v24, %v4686_v43  ;;  %17454 = vst [vmem:[#allocation133_spill] sm:$0xff] %v15286_v13  ;;  %v4642_v43 = vld [vmem:[#allocation3] sm:$0xfc] }
 0x8ab   :  { %12046 = vmatpush3.bf16.msra.mxu0 %v15236_v33  ;;  %v15273_v33 = vpack.c.bf16 %v4736_v21, %v4733_v37  ;;  %v4741_v21 = vld [vmem:[%s14921_s27 + $0x2e8] sm:$0xff]  ;;  %v4572_v24 = vld [vmem:[%s15256_s1 + $0x190] sm:$0xff] }
 0x8ac   :  { %11998 = vmatpush1.bf16.msra.mxu1 %v15240_v19  ;;  %12048 = vmatprep.subr.bf16.mxu0 %v15242_v15  ;;  %v4743_v19 = vld [vmem:[%s14921_s27 + $0x2f8] sm:$0xff]  ;;  %17453 = vst [vmem:[#allocation132_spill] sm:$0xff] %v15281_v40  ;;  %v15307_v45 = vpack.c.bf16 %v4575_v41, %v4572_v24 }
 0x8ad   :  { %12000 = vmatprep.subr.bf16.mxu1 %v15248_v44  ;;  %17452 = vst [vmem:[#allocation131_spill] sm:$0xff] %v15273_v33  ;;  %v15288_v37 = vpack.c.bf16 %v4743_v19, %v4740_v34  ;;  %v4692_v44 = vld [vmem:[%s14921_s27 + $0x160] sm:$0xff]  ;;  %v4695_v15 = vld [vmem:[%s14921_s27 + $0x178] sm:$0xff]  ;;  %v4524_v34 = vld [vmem:[%s15256_s1 + $0x10] sm:$0xff] }
 0x8ae   :  { %v15301_v19 = vpack.c.bf16 %v4695_v15, %v4692_v44  ;;  %v4744_v15 = vld [vmem:[%s14921_s27 + $0x300] sm:$0xff]  ;;  %v4581_v41 = vld [vmem:[%s15256_s1 + $0x1d8] sm:$0xff] }
 0x8af   :  { %12050 = vmatpush3.bf16.msra.mxu0 %v15261_v38  ;;  %17455 = vst [vmem:[#allocation134_spill] sm:$0xff] %v15288_v37  ;;  %v15294_v38 = vpack.c.bf16 %v4742_v26, %v4739_v0  ;;  %v15305_v0 = vpack.c.bf16 %v4741_v21, %v4738_v46  ;;  %v4527_v26 = vld [vmem:[%s15256_s1 + $0x28] sm:$0xff]  ;;  %v4578_v46 = vld [vmem:[%s15256_s1 + $0x1c0] sm:$0xff]  ;;  %v4533_v24 = vld [vmem:[%s15256_s1 + $0x58] sm:$0xff] }
 0x8b0   :  { %12002 = vmatpush1.bf16.msra.mxu1 %v15265_v1  ;;  %12052 = vmatprep.subr.bf16.mxu0 %v15267_v50  ;;  %v4645_v1 = vld [vmem:[#allocation3 + $0x18] sm:$0x3]  ;;  %17457 = vst [vmem:[#allocation136_spill] sm:$0xff] %v15301_v19  ;;  %v15321_v21 = vpack.c.bf16 %v4527_v26, %v4524_v34  ;;  %v15334_v34 = vpack.c.bf16 %v4581_v41, %v4578_v46  ;;  %v4536_v46 = vld [vmem:[%s15256_s1 + $0x70] sm:$0xff] }
 0x8b1   :  { %12004 = vmatprep.subr.bf16.mxu1 %v15273_v33  ;;  %17456 = vst [vmem:[#allocation135_spill] sm:$0xff] %v15294_v38  ;;  %v4745_v50 = vld [vmem:[%s14921_s27 + $0x308] sm:$0xff]  ;;  %17458 = vst [vmem:[#allocation137_spill] sm:$0xff] %v15305_v0  ;;  %v4775_v33 = vrot.slane %v4642_v43, 2  ;;  %v4530_v43 = vld [vmem:[%s15256_s1 + $0x40] sm:$0xff] }
 0x8b2   :  { %v15312_v44 = vpack.c.bf16 %v4748_v20, %v4745_v50  ;;  %17460 = vst [vmem:[#allocation139_spill] sm:$0xff] %v15321_v21  ;;  %v4750_v50 = vld [vmem:[%s14921_s27 + $0x330] sm:$0xff]  ;;  %17463 = vst [vmem:[#allocation142_spill] sm:$0xff] %v15334_v34  ;;  %v4753_v26 = vld [vmem:[%s14921_s27 + $0x348] sm:$0xff] }
 0x8b3   :  { %12054 = vmatpush3.bf16.msra.mxu0 %v15281_v40  ;;  %v4776_v40 = vrot.slane %v4645_v1, 2  ;;  %v15325_v1 = vpack.c.bf16 %v4747_v8, %v4744_v15  ;;  %v4757_v8 = vld [vmem:[%s14921_s27 + $0x368] sm:$0xff]  ;;  %v4760_v15 = vld [vmem:[%s14921_s27 + $0x380] sm:$0xff] }
 0x8b4   :  { %12006 = vmatpush1.bf16.msra.mxu1 %v15286_v13  ;;  %12056 = vmatprep.subr.bf16.mxu0 %v15288_v37  ;;  %17459 = vst [vmem:[#allocation138_spill] sm:$0xff] %v15312_v44  ;;  %v4751_v13 = vld [vmem:[%s14921_s27 + $0x338] sm:$0xff]  ;;  %v4754_v37 = vld [vmem:[%s14921_s27 + $0x350] sm:$0xff]  ;;  %v4539_v41 = vld [vmem:[%s15256_s1 + $0x88] sm:$0xff] }
 0x8b5   :  { %12008 = vmatprep.subr.bf16.mxu1 %v15294_v38  ;;  %17461 = vst [vmem:[#allocation140_spill] sm:$0xff] %v15325_v1  ;;  %v4777_v20 = vsel %vm4774_vm4, %v4775_v33, %v4776_v40  ;;  %v15332_v38 = vpack.c.bf16 %v4754_v37, %v4751_v13  ;;  %v15342_v33 = vpack.c.bf16 %v4533_v24, %v4530_v43  ;;  %v4756_v37 = vld [vmem:[%s14921_s27 + $0x360] sm:$0xff]  ;;  %v4759_v24 = vld [vmem:[%s14921_s27 + $0x378] sm:$0xff] }
 0x8b6   :  { %v15346_v40 = vpack.c.bf16 %v4753_v26, %v4750_v50  ;;  %v15355_v43 = vpack.c.bf16 %v4760_v15, %v4757_v8  ;;  %v4763_v50 = vld [vmem:[%s14921_s27 + $0x398] sm:$0xff]  ;;  %v15368_v26 = vpack.c.bf16 %v4759_v24, %v4756_v37  ;;  %v4762_v15 = vld [vmem:[%s14921_s27 + $0x390] sm:$0xff]  ;;  %v4644_v37 = vld [vmem:[#allocation3 + $0x10] sm:$0xfc] }
 0x8b7   :  { %12058 = vmatpush3.bf16.msra.mxu0 %v15301_v19  ;;  %17462 = vst [vmem:[#allocation141_spill] sm:$0xff] %v15332_v38  ;;  %v4587_v19 = vld [vmem:[%s15256_s1 + $0x208] sm:$0xff]  ;;  %17464 = vst [vmem:[#allocation143_spill] sm:$0xff] %v15342_v33  ;;  %v4647_v24 = vld [vmem:[#allocation3 + $0x28] sm:$0x3] }
 0x8b8   :  { %12010 = vmatpush1.bf16.msra.mxu1 %v15305_v0  ;;  %12152 = vmatprep.subr.bf16.mxu0 %v15307_v45  ;;  %v4584_v0 = vld [vmem:[%s15256_s1 + $0x1f0] sm:$0xff]  ;;  %17465 = vst [vmem:[#allocation144_spill] sm:$0xff] %v15346_v40  ;;  %17467 = vst [vmem:[#allocation146_spill] sm:$0xff] %v15355_v43 }
 0x8b9   :  { %12012 = vmatprep.subr.bf16.mxu1 %v15312_v44  ;;  %v15348_v13 = vpack.c.bf16 %v4587_v19, %v4584_v0  ;;  %v4766_v19 = vld [vmem:[%s14921_s27 + $0x3b0] sm:$0xff]  ;;  %v15364_v0 = vpack.c.bf16 %v4539_v41, %v4536_v46  ;;  %17469 = vst [vmem:[#allocation148_spill] sm:$0xff] %v15368_v26  ;;  %v4545_v44 = vld [vmem:[%s15256_s1 + $0xb8] sm:$0xff]  ;;  %v4765_v46 = vld [vmem:[%s14921_s27 + $0x3a8] sm:$0xff] }
 0x8ba   :  { %4995 = vmatmul.mubr.f32.vlgmr.msra.gmra.mrb[34].mxu0 %v4777_v20  ;;  %v4596_v41 = vld [vmem:[%s15256_s1 + $0x250] sm:$0xff] }
 0x8bb   :  { %4853 = vmatmul.mubr.f32.vlgmr.msra.gmra.mrb[32].mxu1 %v4777_v20  ;;  %12154 = vmatpush3.bf16.msra.mxu0 %v15321_v21  ;;  %17466 = vst [vmem:[#allocation145_spill] sm:$0xff] %v15348_v13  ;;  %v4590_v20 = vld [vmem:[%s15256_s1 + $0x220] sm:$0xff]  ;;  %17468 = vst [vmem:[#allocation147_spill] sm:$0xff] %v15364_v0  ;;  %v4531_v21 = vld [vmem:[%s15256_s1 + $0x48] sm:$0xff] }
 0x8bc   :  { %12014 = vmatpush1.bf16.msra.mxu1 %v15325_v1  ;;  %5276 = vmatprep.mubr.f32.mxu0 %v14661_v18  ;;  %v4593_v1 = vld [vmem:[%s15256_s1 + $0x238] sm:$0xff] }
 0x8bd   :  { %12016 = vmatprep.subr.bf16.mxu1 %v15332_v38  ;;  %12156 = vmatprep.subr.bf16.mxu0 %v15334_v34  ;;  %v15370_v8 = vpack.c.bf16 %v4593_v1, %v4590_v20  ;;  %v4542_v38 = vld [vmem:[%s15256_s1 + $0xa0] sm:$0xff]  ;;  %v15376_v34 = vpack.c.bf16 %v4766_v19, %v4763_v50  ;;  %v15386_v20 = vpack.c.bf16 %v4765_v46, %v4762_v15  ;;  %v4746_v19 = vld [vmem:[%s14921_s27 + $0x310] sm:$0xff] }
 0x8be   :  { %4923 = vmatprep.mubr.f32.mxu1 %v14940_v11  ;;  %v15382_v1 = vpack.c.bf16 %v4545_v44, %v4542_v38  ;;  %v4749_v38 = vld [vmem:[%s14921_s27 + $0x328] sm:$0xff]  ;;  %v4602_v44 = vld [vmem:[%s15256_s1 + $0x280] sm:$0xff] }
 0x8bf   :  { %12158 = vmatpush3.bf16.msra.mxu0 %v15342_v33  ;;  %17470 = vst [vmem:[#allocation149_spill] sm:$0xff] %v15370_v8  ;;  %17471 = vst [vmem:[#allocation150_spill] sm:$0xff] %v15376_v34  ;;  %v15402_v15 = vpack.c.bf16 %v4749_v38, %v4746_v19  ;;  %v4557_v33 = vld [vmem:[%s15256_s1 + $0x118] sm:$0xff] }
 0x8c0   :  { %12018 = vmatpush1.bf16.msra.mxu1 %v15346_v40  ;;  %12160 = vmatprep.subr.bf16.mxu0 %v15348_v13  ;;  %v4599_v40 = vld [vmem:[%s15256_s1 + $0x268] sm:$0xff]  ;;  %17472 = vst [vmem:[#allocation151_spill] sm:$0xff] %v15382_v1  ;;  %17473 = vst [vmem:[#allocation152_spill] sm:$0xff] %v15386_v20 }
 0x8c1   :  { %12020 = vmatprep.subr.bf16.mxu1 %v15355_v43  ;;  %v15388_v50 = vpack.c.bf16 %v4599_v40, %v4596_v41  ;;  %v4548_v43 = vld [vmem:[%s15256_s1 + $0xd0] sm:$0xff]  ;;  %v4551_v13 = vld [vmem:[%s15256_s1 + $0xe8] sm:$0xff]  ;;  %v4752_v41 = vld [vmem:[%s14921_s27 + $0x340] sm:$0xff] }
 0x8c2   :  { %v15398_v40 = vpack.c.bf16 %v4551_v13, %v4548_v43  ;;  %v4608_v13 = vld [vmem:[%s15256_s1 + $0x2b0] sm:$0xff]  ;;  %v4611_v43 = vld [vmem:[%s15256_s1 + $0x2c8] sm:$0xff] }
 0x8c3   :  { %12162 = vmatpush3.bf16.msra.mxu0 %v15364_v0  ;;  %17474 = vst [vmem:[#allocation153_spill] sm:$0xff] %v15388_v50  ;;  %v4781_v0 = vrot.slane %v4644_v37, 2  ;;  %v4755_v37 = vld [vmem:[%s14921_s27 + $0x358] sm:$0xff]  ;;  %v15422_v38 = vpack.c.bf16 %v4611_v43, %v4608_v13  ;;  %v4566_v43 = vld [vmem:[%s15256_s1 + $0x160] sm:$0xff] }
 0x8c4   :  { %12022 = vmatpush1.bf16.msra.mxu1 %v15368_v26  ;;  %12164 = vmatprep.subr.bf16.mxu0 %v15370_v8  ;;  %v4605_v26 = vld [vmem:[%s15256_s1 + $0x298] sm:$0xff]  ;;  %v4782_v8 = vrot.slane %v4647_v24, 2  ;;  %17475 = vst [vmem:[#allocation154_spill] sm:$0xff] %v15398_v40  ;;  %v15420_v19 = vpack.c.bf16 %v4755_v37, %v4752_v41 }
 0x8c5   :  { %12024 = vmatprep.subr.bf16.mxu1 %v15376_v34  ;;  %v15404_v46 = vpack.c.bf16 %v4605_v26, %v4602_v44  ;;  %v4554_v34 = vld [vmem:[%s15256_s1 + $0x100] sm:$0xff]  ;;  %17478 = vst [vmem:[#allocation157_spill] sm:$0xff] %v15422_v38  ;;  %v4758_v44 = vld [vmem:[%s14921_s27 + $0x370] sm:$0xff] }
 0x8c6   :  { %v4783_v24 = vsel %vm4774_vm4, %v4781_v0, %v4782_v8  ;;  %v15416_v26 = vpack.c.bf16 %v4557_v33, %v4554_v34  ;;  %v4563_v0 = vld [vmem:[%s15256_s1 + $0x148] sm:$0xff]  ;;  %v4614_v33 = vld [vmem:[%s15256_s1 + $0x2e0] sm:$0xff]  ;;  %v4617_v8 = vld [vmem:[%s15256_s1 + $0x2f8] sm:$0xff] }
 0x8c7   :  { %12166 = vmatpush3.bf16.msra.mxu0 %v15382_v1  ;;  %17476 = vst [vmem:[#allocation155_spill] sm:$0xff] %v15404_v46  ;;  %v4761_v34 = vld [vmem:[%s14921_s27 + $0x388] sm:$0xff]  ;;  %v15440_v13 = vpack.c.bf16 %v4617_v8, %v4614_v33  ;;  %v4528_v1 = vld [vmem:[%s15256_s1 + $0x30] sm:$0xff] }
 0x8c8   :  { %12026 = vmatpush1.bf16.msra.mxu1 %v15386_v20  ;;  %12168 = vmatprep.subr.bf16.mxu0 %v15388_v50  ;;  %17477 = vst [vmem:[#allocation156_spill] sm:$0xff] %v15416_v26  ;;  %v4560_v20 = vld [vmem:[%s15256_s1 + $0x130] sm:$0xff]  ;;  %v15438_v37 = vpack.c.bf16 %v4761_v34, %v4758_v44  ;;  %v4623_v33 = vld [vmem:[%s15256_s1 + $0x328] sm:$0xff]  ;;  %v4522_v50 = vld [vmem:[%s15256_s1] sm:$0xff] }
 0x8c9   :  { %12059 = vmatprep.subr.bf16.mxu1 %v17313_v47  ;;  %v15434_v41 = vpack.c.bf16 %v4563_v0, %v4560_v20  ;;  %17480 = vst [vmem:[#allocation159_spill] sm:$0xff] %v15440_v13  ;;  %v4767_v20 = vld [vmem:[%s14921_s27 + $0x3b8] sm:$0xff]  ;;  %v4523_v0 = vld [vmem:[%s15256_s1 + $0x8] sm:$0xff]  ;;  %v4620_v34 = vld [vmem:[%s15256_s1 + $0x310] sm:$0xff] }
 0x8cb   :  { %9502 = vmatmul.mubr.msk.f32.vlgmr.msra.gmra.mrb[32].mxu1 %vm1146_vm13, %v4783_v24  ;;  %12170 = vmatpush3.bf16.msra.mxu0 %v15398_v40  ;;  %17479 = vst [vmem:[#allocation158_spill] sm:$0xff] %v15434_v41  ;;  %v4526_v40 = vld [vmem:[%s15256_s1 + $0x20] sm:$0xff] }
 0x8cc   :  { %12061 = vmatpush3.bf16.msra.mxu1 %v15402_v15  ;;  %12172 = vmatprep.subr.bf16.mxu0 %v15404_v46  ;;  %v4569_v46 = vld [vmem:[%s15256_s1 + $0x178] sm:$0xff]  ;;  %v15459_v8 = vpack.c.bf16 %v4526_v40, %v4523_v0 }
 0x8cd   :  { %12062 = vmatprep.subr.bf16.mxu1 %v17313_v47  ;;  %11001 = vmatprep.mubr.msk.f32.mxu1 %vm13248_vm0, %v14940_v11  ;;  %v4629_v40 = vld [vmem:[%s15256_s1 + $0x358] sm:$0xff] }
 0x8ce   :  { %17481 = vst [vmem:[#allocation160_spill] sm:$0xff] %v15459_v8 }
 0x8cf   :  { %12174 = vmatpush3.bf16.msra.mxu0 %v15416_v26  ;;  %v4764_v26 = vld [vmem:[%s14921_s27 + $0x3a0] sm:$0xff] }
 0x8d0   :  { %12064 = vmatpush3.bf16.msra.mxu1 %v15420_v19  ;;  %12176 = vmatprep.subr.bf16.mxu0 %v15422_v38  ;;  %v15450_v38 = vpack.c.bf16 %v4569_v46, %v4566_v43  ;;  %v15454_v44 = vpack.c.bf16 %v4767_v20, %v4764_v26  ;;  %v4525_v46 = vld [vmem:[%s15256_s1 + $0x18] sm:$0xff]  ;;  %v4626_v20 = vld [vmem:[%s15256_s1 + $0x340] sm:$0xff] }
 0x8d1   :  { %12065 = vmatprep.subr.bf16.mxu1 %v17313_v47  ;;  %v4529_v43 = vld [vmem:[%s15256_s1 + $0x38] sm:$0xff]  ;;  %v15470_v26 = vpack.c.bf16 %v4525_v46, %v4522_v50  ;;  %v15484_v50 = vpack.c.bf16 %v4629_v40, %v4626_v20  ;;  %v4632_v46 = vld [vmem:[%s15256_s1 + $0x370] sm:$0xff]  ;;  %v4534_v20 = vld [vmem:[%s15256_s1 + $0x60] sm:$0xff] }
 0x8d2   :  { %v4537_v40 = vld [vmem:[%s15256_s1 + $0x78] sm:$0xff] }
 0x8d3   :  { %12178 = vmatpush3.bf16.msra.mxu0 %v15434_v41  ;;  %v4532_v41 = vld [vmem:[%s15256_s1 + $0x50] sm:$0xff]  ;;  %17483 = vst [vmem:[#allocation162_spill] sm:$0xff] %v15470_v26  ;;  %17485 = vst [vmem:[#allocation164_spill] sm:$0xff] %v15484_v50 }
 0x8d4   :  { %12067 = vmatpush3.bf16.msra.mxu1 %v15438_v37  ;;  %12180 = vmatprep.subr.bf16.mxu0 %v15440_v13  ;;  %v15466_v13 = vpack.c.bf16 %v4623_v33, %v4620_v34  ;;  %v15475_v0 = vpack.c.bf16 %v4532_v41, %v4529_v43  ;;  %v4535_v34 = vld [vmem:[%s15256_s1 + $0x68] sm:$0xff]  ;;  %v4538_v33 = vld [vmem:[%s15256_s1 + $0x80] sm:$0xff]  ;;  %v15488_v41 = vpack.c.bf16 %v4531_v21, %v4528_v1 }
 0x8d5   :  { %12068 = vmatprep.subr.bf16.mxu1 %v17313_v47  ;;  %v4635_v43 = vld [vmem:[%s15256_s1 + $0x388] sm:$0xff]  ;;  %v15507_v1 = vpack.c.bf16 %v4537_v40, %v4534_v20  ;;  %v5409_v40 = vld [vmem:[#allocation3 + $0x50] sm:$0x1] }
 0x8d6   :  { %17482 = vst [vmem:[#allocation161_spill] sm:$0xff] %v15466_v13  ;;  %17484 = vst [vmem:[#allocation163_spill] sm:$0xff] %v15475_v0  ;;  %v15503_v21 = vpack.c.bf16 %v4635_v43, %v4632_v46  ;;  %v4550_v46 = vld [vmem:[%s15256_s1 + $0xe0] sm:$0xff]  ;;  %v5406_v20 = vld [vmem:[#allocation3 + $0x38] sm:$0xfe] }
 0x8d7   :  { %12182 = vmatpush3.bf16.msra.mxu0 %v15450_v38  ;;  %17486 = vst [vmem:[#allocation165_spill] sm:$0xff] %v15488_v41 }
 0x8d8   :  { %12070 = vmatpush3.bf16.msra.mxu1 %v15454_v44  ;;  %12183 = vmatprep.subr.bf16.mxu0 %v17313_v47  ;;  %17488 = vst [vmem:[#allocation167_spill] sm:$0xff] %v15503_v21 }
 0x8d9   :  { %12072 = vmatprep.subr.bf16.mxu1 %v15459_v8  ;;  %v4556_v8 = vld [vmem:[%s15256_s1 + $0x110] sm:$0xff] }
 0x8da   :  { %5277 = vmatmul.mubr.f32.vlgmr.msra.gmra.mrb[36].mxu0 %v14676_v36 }
 0x8db   :  { %11002 = vmatmul.mubr.msk.f32.vlgmr.msra.gmra.mrb[34].mxu1 %vm1146_vm13, %v4783_v24  ;;  %12185 = vmatpush3.bf16.msra.mxu0 %v15466_v13  ;;  %v15494_v24 = vpack.c.bf16 %v4538_v33, %v4535_v34  ;;  %v4638_v34 = vld [vmem:[%s15256_s1 + $0x3a0] sm:$0xff]  ;;  %v4641_v33 = vld [vmem:[%s15256_s1 + $0x3b8] sm:$0xff]  ;;  %v4540_v13 = vld [vmem:[%s15256_s1 + $0x90] sm:$0xff] }
 0x8dc   :  { %12074 = vmatpush1.bf16.msra.mxu1 %v15470_v26  ;;  %5134 = vmatprep.mubr.f32.mxu1 %v14661_v18  ;;  %v4541_v26 = vld [vmem:[%s15256_s1 + $0x98] sm:$0xff]  ;;  %v4544_v18 = vld [vmem:[%s15256_s1 + $0xb0] sm:$0xff]  ;;  %v15519_v43 = vpack.c.bf16 %v4641_v33, %v4638_v34  ;;  %v5420_v34 = vrot.slane %v5406_v20, 1  ;;  %v5421_v33 = vrot.slane %v5409_v40, 1  ;;  %v4559_v40 = vld [vmem:[%s15256_s1 + $0x128] sm:$0xff] }
 0x8dd   :  { %12076 = vmatprep.subr.bf16.mxu1 %v15475_v0  ;;  %12186 = vmatprep.subr.bf16.mxu0 %v17313_v47  ;;  %17487 = vst [vmem:[#allocation166_spill] sm:$0xff] %v15494_v24  ;;  %v15512_v0 = vpack.c.bf16 %v4544_v18, %v4541_v26  ;;  %v4546_v18 = vld [vmem:[%s15256_s1 + $0xc0] sm:$0xff] }
 0x8de   :  { %11020 = vmatprep.mubr.msk.f32.mxu0 %vm13248_vm0, %v14940_v11  ;;  %v4543_v11 = vld [vmem:[%s15256_s1 + $0xa8] sm:$0xff]  ;;  %v15545_v20 = vsel %vm3875_vm1, %v5420_v34, %v5421_v33  ;;  %v4565_v34 = vld [vmem:[%s15256_s1 + $0x158] sm:$0xff] }
 0x8df   :  { %12188 = vmatpush3.bf16.msra.mxu0 %v15484_v50  ;;  %v4547_v50 = vld [vmem:[%s15256_s1 + $0xc8] sm:$0xff] }
 0x8e0   :  { %12078 = vmatpush1.bf16.msra.mxu1 %v15488_v41  ;;  %12189 = vmatprep.subr.bf16.mxu0 %v17313_v47  ;;  %v15526_v26 = vpack.c.bf16 %v4550_v46, %v4547_v50  ;;  %v4549_v41 = vld [vmem:[%s15256_s1 + $0xd8] sm:$0xff]  ;;  %v4555_v46 = vld [vmem:[%s15256_s1 + $0x108] sm:$0xff] }
 0x8e1   :  { %12080 = vmatprep.subr.bf16.mxu1 %v15494_v24  ;;  %v15523_v24 = vpack.c.bf16 %v4543_v11, %v4540_v13  ;;  %v15535_v13 = vpack.c.bf16 %v4549_v41, %v4546_v18  ;;  %v4552_v11 = vld [vmem:[%s15256_s1 + $0xf0] sm:$0xff]  ;;  %v4561_v18 = vld [vmem:[%s15256_s1 + $0x138] sm:$0xff] }
 0x8e3   :  { %12191 = vmatpush3.bf16.msra.mxu0 %v15503_v21  ;;  %v4553_v21 = vld [vmem:[%s15256_s1 + $0xf8] sm:$0xff] }
 0x8e4   :  { %12082 = vmatpush1.bf16.msra.mxu1 %v15507_v1  ;;  %12192 = vmatprep.subr.bf16.mxu0 %v17313_v47  ;;  %v15538_v50 = vpack.c.bf16 %v4556_v8, %v4553_v21  ;;  %v15553_v8 = vpack.c.bf16 %v4555_v46, %v4552_v11  ;;  %v4558_v21 = vld [vmem:[%s15256_s1 + $0x120] sm:$0xff]  ;;  %v4564_v11 = vld [vmem:[%s15256_s1 + $0x150] sm:$0xff]  ;;  %v4567_v46 = vld [vmem:[%s15256_s1 + $0x168] sm:$0xff] }
 0x8e5   :  { %12084 = vmatprep.subr.bf16.mxu1 %v15512_v0 }
 0x8e7   :  { %12194 = vmatpush3.bf16.msra.mxu0 %v15519_v43 }
 0x8e8   :  { %12086 = vmatpush1.bf16.msra.mxu1 %v15523_v24  ;;  %12196 = vmatprep.subr.bf16.mxu0 %v14308_v48  ;;  %v4562_v48 = vld [vmem:[%s15256_s1 + $0x140] sm:$0xff] }
 0x8e9   :  { %12088 = vmatprep.subr.bf16.mxu1 %v15526_v26  ;;  %v15556_v41 = vpack.c.bf16 %v4562_v48, %v4559_v40  ;;  %v4571_v40 = vld [vmem:[%s15256_s1 + $0x188] sm:$0xff]  ;;  %v4574_v48 = vld [vmem:[%s15256_s1 + $0x1a0] sm:$0xff] }
 0x8ea   :  { %11021 = vmatmul.mubr.msk.f32.vlgmr.msra.gmra.mrb[38].mxu0 %vm1146_vm13, %v14751_v54 }
 0x8eb   :  { %12198 = vmatpush1.bf16.msra.mxu0 %v14328_v30  ;;  %5494 = vmatprep.mubr.f32.mxu0 %v15545_v20  ;;  %v4568_v30 = vld [vmem:[%s15256_s1 + $0x170] sm:$0xff] }
 0x8ec   :  { %12090 = vmatpush1.bf16.msra.mxu1 %v15535_v13  ;;  %12200 = vmatprep.subr.bf16.mxu0 %v14331_v39  ;;  %v15565_v39 = vpack.c.bf16 %v4561_v18, %v4558_v21  ;;  %v15568_v33 = vpack.c.bf16 %v4568_v30, %v4565_v34  ;;  %v4570_v21 = vld [vmem:[%s15256_s1 + $0x180] sm:$0xff]  ;;  %v4573_v18 = vld [vmem:[%s15256_s1 + $0x198] sm:$0xff]  ;;  %v4580_v30 = vld [vmem:[%s15256_s1 + $0x1d0] sm:$0xff] }
 0x8ed   :  { %12092 = vmatprep.subr.bf16.mxu1 %v15538_v50  ;;  %v4577_v34 = vld [vmem:[%s15256_s1 + $0x1b8] sm:$0xff] }
 0x8ef   :  { %12202 = vmatpush1.bf16.msra.mxu0 %v14341_v7  ;;  %v15577_v7 = vpack.c.bf16 %v4567_v46, %v4564_v11  ;;  %v4576_v11 = vld [vmem:[%s15256_s1 + $0x1b0] sm:$0xff]  ;;  %v4579_v46 = vld [vmem:[%s15256_s1 + $0x1c8] sm:$0xff] }
 0x8f0   :  { %12094 = vmatpush1.bf16.msra.mxu1 %v15553_v8  ;;  %12204 = vmatprep.subr.bf16.mxu0 %v14343_v51  ;;  %v15580_v51 = vpack.c.bf16 %v4574_v48, %v4571_v40  ;;  %v4583_v40 = vld [vmem:[%s15256_s1 + $0x1e8] sm:$0xff]  ;;  %v4586_v48 = vld [vmem:[%s15256_s1 + $0x200] sm:$0xff] }
 0x8f1   :  { %12096 = vmatprep.subr.bf16.mxu1 %v15556_v41 }
 0x8f3   :  { %12206 = vmatpush1.bf16.msra.mxu0 %v14354_v49  ;;  %v15589_v49 = vpack.c.bf16 %v4573_v18, %v4570_v21  ;;  %v4582_v21 = vld [vmem:[%s15256_s1 + $0x1e0] sm:$0xff]  ;;  %v4585_v18 = vld [vmem:[%s15256_s1 + $0x1f8] sm:$0xff] }
 0x8f4   :  { %12098 = vmatpush1.bf16.msra.mxu1 %v15565_v39  ;;  %12208 = vmatprep.subr.bf16.mxu0 %v14357_v10  ;;  %v15592_v10 = vpack.c.bf16 %v4580_v30, %v4577_v34  ;;  %v4589_v34 = vld [vmem:[%s15256_s1 + $0x218] sm:$0xff]  ;;  %v4592_v30 = vld [vmem:[%s15256_s1 + $0x230] sm:$0xff] }
 0x8f5   :  { %12100 = vmatprep.subr.bf16.mxu1 %v15568_v33 }
 0x8f7   :  { %12210 = vmatpush1.bf16.msra.mxu0 %v14364_v53  ;;  %v15601_v53 = vpack.c.bf16 %v4579_v46, %v4576_v11  ;;  %v4588_v11 = vld [vmem:[%s15256_s1 + $0x210] sm:$0xff]  ;;  %v4591_v46 = vld [vmem:[%s15256_s1 + $0x228] sm:$0xff] }
 0x8f8   :  { %12102 = vmatpush1.bf16.msra.mxu1 %v15577_v7  ;;  %12212 = vmatprep.subr.bf16.mxu0 %v14367_v31  ;;  %v15604_v31 = vpack.c.bf16 %v4586_v48, %v4583_v40  ;;  %v4595_v40 = vld [vmem:[%s15256_s1 + $0x248] sm:$0xff]  ;;  %v4598_v48 = vld [vmem:[%s15256_s1 + $0x260] sm:$0xff] }
 0x8f9   :  { %12104 = vmatprep.subr.bf16.mxu1 %v15580_v51 }
 0x8fb   :  { %12214 = vmatpush1.bf16.msra.mxu0 %v14375_v58  ;;  %v15613_v58 = vpack.c.bf16 %v4585_v18, %v4582_v21  ;;  %v4594_v21 = vld [vmem:[%s15256_s1 + $0x240] sm:$0xff]  ;;  %v4597_v18 = vld [vmem:[%s15256_s1 + $0x258] sm:$0xff] }
 0x8fc   :  { %12106 = vmatpush1.bf16.msra.mxu1 %v15589_v49  ;;  %12216 = vmatprep.subr.bf16.mxu0 %v14378_v14  ;;  %v15616_v14 = vpack.c.bf16 %v4592_v30, %v4589_v34  ;;  %v4601_v34 = vld [vmem:[%s15256_s1 + $0x278] sm:$0xff]  ;;  %v4604_v30 = vld [vmem:[%s15256_s1 + $0x290] sm:$0xff] }
 0x8fd   :  { %12108 = vmatprep.subr.bf16.mxu1 %v15592_v10 }
 0x8ff   :  { %12218 = vmatpush1.bf16.msra.mxu0 %v14383_v57  ;;  %v15625_v57 = vpack.c.bf16 %v4591_v46, %v4588_v11  ;;  %v4600_v11 = vld [vmem:[%s15256_s1 + $0x270] sm:$0xff]  ;;  %v4603_v46 = vld [vmem:[%s15256_s1 + $0x288] sm:$0xff] }
 0x900   :  { %12110 = vmatpush1.bf16.msra.mxu1 %v15601_v53  ;;  %12220 = vmatprep.subr.bf16.mxu0 %v14389_v28  ;;  %v15628_v28 = vpack.c.bf16 %v4598_v48, %v4595_v40  ;;  %v4607_v40 = vld [vmem:[%s15256_s1 + $0x2a8] sm:$0xff]  ;;  %v4610_v48 = vld [vmem:[%s15256_s1 + $0x2c0] sm:$0xff] }
 0x901   :  { %12112 = vmatprep.subr.bf16.mxu1 %v15604_v31  ;;  %17489 = vst [vmem:[#allocation168_spill] sm:$0xff] %v15625_v57 }
 0x902   :  { %17490 = vst [vmem:[#allocation169_spill] sm:$0xff] %v15628_v28 }
 0x903   :  { %12222 = vmatpush1.bf16.msra.mxu0 %v14393_v9  ;;  %v15637_v9 = vpack.c.bf16 %v4597_v18, %v4594_v21  ;;  %v15652_v21 = vpack.c.bf16 %v4610_v48, %v4607_v40  ;;  %v4606_v18 = vld [vmem:[%s15256_s1 + $0x2a0] sm:$0xff]  ;;  %v4615_v40 = vld [vmem:[%s15256_s1 + $0x2e8] sm:$0xff] }
 0x904   :  { %12114 = vmatpush1.bf16.msra.mxu1 %v15613_v58  ;;  %12224 = vmatprep.subr.bf16.mxu0 %v14399_v4  ;;  %v15640_v4 = vpack.c.bf16 %v4604_v30, %v4601_v34  ;;  %v4609_v34 = vld [vmem:[%s15256_s1 + $0x2b8] sm:$0xff]  ;;  %v4619_v48 = vld [vmem:[%s15256_s1 + $0x308] sm:$0xff] }
 0x905   :  { %12116 = vmatprep.subr.bf16.mxu1 %v15616_v14 }
 0x907   :  { %12226 = vmatpush1.bf16.msra.mxu0 %v14403_v29  ;;  %v15649_v29 = vpack.c.bf16 %v4603_v46, %v4600_v11  ;;  %v4612_v46 = vld [vmem:[%s15256_s1 + $0x2d0] sm:$0xff] }
 0x908   :  { %12118 = vmatpush1.bf16.msra.mxu1 %v15625_v57  ;;  %12228 = vmatprep.subr.bf16.mxu0 %v14410_v3 }
 0x909   :  { %12120 = vmatprep.subr.bf16.mxu1 %v15628_v28  ;;  %v4613_v28 = vld [vmem:[%s15256_s1 + $0x2d8] sm:$0xff] }
 0x90b   :  { %12230 = vmatpush1.bf16.msra.mxu0 %v14417_v55  ;;  %v4616_v55 = vld [vmem:[%s15256_s1 + $0x2f0] sm:$0xff] }
 0x90c   :  { %12122 = vmatpush1.bf16.msra.mxu1 %v15637_v9  ;;  %12232 = vmatprep.subr.bf16.mxu0 %v14430_v2  ;;  %v15661_v2 = vpack.c.bf16 %v4609_v34, %v4606_v18  ;;  %v15664_v11 = vpack.c.bf16 %v4616_v55, %v4613_v28  ;;  %v4618_v28 = vld [vmem:[%s15256_s1 + $0x300] sm:$0xff]  ;;  %v4621_v18 = vld [vmem:[%s15256_s1 + $0x318] sm:$0xff]  ;;  %v4624_v55 = vld [vmem:[%s15256_s1 + $0x330] sm:$0xff] }
 0x90d   :  { %v9836_v3 = vpop.f32.mrb[24].mxu1  ;;  %12124 = vmatprep.subr.bf16.mxu1 %v15640_v4  ;;  %v4625_v34 = vld [vmem:[%s15256_s1 + $0x338] sm:$0xff] }
 0x90e   :  { %v9837_v30 = vpop.f32.mrb[25].mxu1 }
 0x90f   :  { %v9838_v57 = vadd.f32 %v9837_v30, %v9836_v3  ;;  %12234 = vmatpush1.bf16.msra.mxu0 %v14437_v63  ;;  %v4622_v3 = vld [vmem:[%s15256_s1 + $0x320] sm:$0xff]  ;;  %v15673_v63 = vpack.c.bf16 %v4615_v40, %v4612_v46  ;;  %v4628_v30 = vld [vmem:[%s15256_s1 + $0x350] sm:$0xff]  ;;  %v4627_v46 = vld [vmem:[%s15256_s1 + $0x348] sm:$0xff] }
 0x910   :  { %12126 = vmatpush1.bf16.msra.mxu1 %v15649_v29  ;;  %12236 = vmatprep.subr.bf16.mxu0 %v14452_v56  ;;  %v15676_v56 = vpack.c.bf16 %v4622_v3, %v4619_v48  ;;  %v4631_v40 = vld [vmem:[%s15256_s1 + $0x368] sm:$0xff]  ;;  %v4634_v48 = vld [vmem:[%s15256_s1 + $0x380] sm:$0xff] }
 0x911   :  { %12128 = vmatprep.subr.bf16.mxu1 %v15652_v21  ;;  %17491 = vst [vmem:[#allocation170_spill] sm:$0xff] %v15673_v63 }
 0x912   :  { %17492 = vst [vmem:[#allocation171_spill] sm:$0xff] %v15676_v56 }
 0x913   :  { %12238 = vmatpush1.bf16.msra.mxu0 %v14459_v23  ;;  %v15685_v23 = vpack.c.bf16 %v4621_v18, %v4618_v28  ;;  %v15701_v28 = vpack.c.bf16 %v4634_v48, %v4631_v40  ;;  %v4630_v18 = vld [vmem:[%s15256_s1 + $0x360] sm:$0xff] }
 0x914   :  { %12130 = vmatpush1.bf16.msra.mxu1 %v15661_v2  ;;  %12240 = vmatprep.subr.bf16.mxu0 %v14472_v6  ;;  %v15688_v6 = vpack.c.bf16 %v4628_v30, %v4625_v34  ;;  %v4633_v34 = vld [vmem:[%s15256_s1 + $0x378] sm:$0xff]  ;;  %v15705_v30 = vld [vmem:[#allocation4] sm:$0xff] }
 0x915   :  { %12132 = vmatprep.subr.bf16.mxu1 %v15664_v11  ;;  %17493 = vst [vmem:[#allocation172_spill] sm:$0xff] %v15685_v23  ;;  %v15715_v40 = vpack.c.bf16 %v4633_v34, %v4630_v18 }
 0x916   :  { %17494 = vst [vmem:[#allocation173_spill] sm:$0xff] %v15688_v6 }
 0x917   :  { %12242 = vmatpush1.bf16.msra.mxu0 %v14479_v42  ;;  %v17495_v42 = vld [vmem:[#allocation7_spill] sm:$0xff] }
 0x918   :  { %12134 = vmatpush1.bf16.msra.mxu1 %v15673_v63  ;;  %12244 = vmatprep.subr.bf16.mxu0 %v14492_v35  ;;  %v15698_v35 = vpack.c.bf16 %v4627_v46, %v4624_v55  ;;  %v17496_v55 = vld [vmem:[#allocation13_spill] sm:$0xff]  ;;  %v17497_v46 = vld [vmem:[#allocation26_spill] sm:$0xff] }
 0x919   :  { %12136 = vmatprep.subr.bf16.mxu1 %v15676_v56  ;;  %v4639_v56 = vld [vmem:[%s15256_s1 + $0x3a8] sm:$0xff]  ;;  %v5405_v63 = vld [vmem:[#allocation3 + $0x30] sm:$0xfe] }
 0x91a   :  { %v5417_v18 = vrot.slane %v5405_v63, 1  ;;  %v17503_v63 = vld [vmem:[#allocation23_spill] sm:$0xff] }
 0x91b   :  { %5135 = vmatmul.mubr.f32.vlgmr.msra.gmra.mrb[32].mxu1 %v14676_v36  ;;  %12246 = vmatpush1.bf16.msra.mxu0 %v14499_v61 }
 0x91c   :  { %12138 = vmatpush1.bf16.msra.mxu1 %v15685_v23  ;;  %12248 = vmatprep.subr.bf16.mxu0 %v17495_v42  ;;  %v4637_v23 = vld [vmem:[%s15256_s1 + $0x398] sm:$0xff]  ;;  %v4640_v42 = vld [vmem:[%s15256_s1 + $0x3b0] sm:$0xff] }
 0x91d   :  { %v4167_v3 = vpop.f32.mrb[26].mxu1  ;;  %12140 = vmatprep.subr.bf16.mxu1 %v15688_v6  ;;  %5205 = vmatprep.mubr.f32.mxu1 %v15705_v30  ;;  %v15718_v48 = vpack.c.bf16 %v4640_v42, %v4637_v23  ;;  %v4636_v6 = vld [vmem:[%s15256_s1 + $0x390] sm:$0xff]  ;;  %v17501_v23 = vld [vmem:[#allocation34_spill] sm:$0xff] }
 0x91e   :  { %v15708_v61 = vadd.f32 %v9838_v57, %v4167_v3  ;;  %v10965_v36 = vpop.f32.mrb[27].mxu1  ;;  %v5408_v57 = vld [vmem:[#allocation3 + $0x48] sm:$0x1] }
 0x91f   :  { %12250 = vmatpush1.bf16.msra.mxu0 %v17496_v55  ;;  %v17498_v3 = vld [vmem:[#allocation28_spill] sm:$0xff]  ;;  %v17499_v36 = vld [vmem:[#allocation30_spill] sm:$0xff]  ;;  %v15725_v55 = vpack.c.bf16 %v4639_v56, %v4636_v6  ;;  %v5418_v34 = vrot.slane %v5408_v57, 1 }
 0x920   :  { %12142 = vmatpush1.bf16.msra.mxu1 %v15698_v35  ;;  %12252 = vmatprep.subr.bf16.mxu0 %v17497_v46  ;;  %v17500_v46 = vld [vmem:[#allocation32_spill] sm:$0xff]  ;;  %v17505_v6 = vld [vmem:[#allocation6_spill] sm:$0xff] }
 0x921   :  { %12144 = vmatprep.subr.bf16.mxu1 %v15701_v28  ;;  %v15732_v42 = vsel %vm3875_vm1, %v5417_v18, %v5418_v34  ;;  %v17504_v56 = vld [vmem:[#allocation24_spill] sm:$0xff] }
 0x922   :  { %v17506_v57 = vld [vmem:[#allocation8_spill] sm:$0xff] }
 0x923   :  { %12254 = vmatpush1.bf16.msra.mxu0 %v17498_v3  ;;  %v17502_v3 = vld [vmem:[#allocation22_spill] sm:$0xff] }
 0x924   :  { %12146 = vmatpush1.bf16.msra.mxu1 %v15715_v40  ;;  %12256 = vmatprep.subr.bf16.mxu0 %v17499_v36  ;;  %v17507_v36 = vld [vmem:[#allocation9_spill] sm:$0xff] }
 0x925   :  { %12148 = vmatprep.subr.bf16.mxu1 %v15718_v48 }
 0x927   :  { %12258 = vmatpush1.bf16.msra.mxu0 %v17500_v46  ;;  %v17510_v46 = vld [vmem:[#allocation14_spill] sm:$0xff] }
 0x928   :  { %12150 = vmatpush1.bf16.msra.mxu1 %v15725_v55  ;;  %12260 = vmatprep.subr.bf16.mxu0 %v17501_v23 }
 0x929   :  { %12276 = vmatprep.subr.bf16.mxu1 %v17502_v3  ;;  %v17513_v3 = vld [vmem:[#allocation38_spill] sm:$0xff] }
 0x92a   :  { %5495 = vmatmul.mubr.f32.vlgmr.msra.gmra.mrb[40].mxu0 %v15732_v42 }
 0x92b   :  { %9504 = vmatmul.mubr.msk.f32.vlgmr.msra.gmra.mrb[32].mxu1 %vm1146_vm13, %v14751_v54  ;;  %12262 = vmatpush1.bf16.msra.mxu0 %v14655_v22  ;;  %v5407_v54 = vld [vmem:[#allocation3 + $0x40] sm:$0xfe]  ;;  %v5410_v22 = vld [vmem:[#allocation3 + $0x58] sm:$0x1] }
 0x92c   :  { %12278 = vmatpush3.bf16.msra.mxu1 %v17503_v63  ;;  %5636 = vmatprep.mubr.f32.mxu1 %v15545_v20  ;;  %v5423_v18 = vrot.slane %v5407_v54, 1  ;;  %v5424_v34 = vrot.slane %v5410_v22, 1  ;;  %v17517_v54 = vld [vmem:[#allocation42_spill] sm:$0xff]  ;;  %v17518_v22 = vld [vmem:[#allocation29_spill] sm:$0xff] }
 0x92d   :  { %12264 = vmatprep.subr.bf16.mxu0 %v14663_v59  ;;  %12280 = vmatprep.subr.bf16.mxu1 %v17504_v56  ;;  %v17508_v59 = vld [vmem:[#allocation11_spill] sm:$0xff]  ;;  %v17514_v56 = vld [vmem:[#allocation25_spill] sm:$0xff] }
 0x92e   :  { %5565 = vmatprep.mubr.f32.mxu0 %v15705_v30 }
 0x92f   :  { %12266 = vmatpush1.bf16.msra.mxu0 %v14684_v16  ;;  %v17509_v16 = vld [vmem:[#allocation12_spill] sm:$0xff] }
 0x930   :  { %12282 = vmatpush3.bf16.msra.mxu1 %v17505_v6  ;;  %12268 = vmatprep.subr.bf16.mxu0 %v14691_v27  ;;  %v15756_v27 = vsel %vm3875_vm1, %v5423_v18, %v5424_v34  ;;  %v17515_v6 = vld [vmem:[#allocation40_spill] sm:$0xff]  ;;  %v17522_v18 = vld [vmem:[#allocation33_spill] sm:$0xff] }
 0x931   :  { %12284 = vmatprep.subr.bf16.mxu1 %v17506_v57  ;;  %v17516_v57 = vld [vmem:[#allocation27_spill] sm:$0xff]  ;;  %v17523_v34 = vld [vmem:[#allocation48_spill] sm:$0xff] }
 0x933   :  { %12270 = vmatpush1.bf16.msra.mxu0 %v14703_v25  ;;  %v5403_v25 = vld [vmem:[#allocation3 + $0x38] sm:$0xff] }
 0x934   :  { %12286 = vmatpush3.bf16.msra.mxu1 %v17507_v36  ;;  %12272 = vmatprep.subr.bf16.mxu0 %v14711_v32  ;;  %v17511_v32 = vld [vmem:[#allocation5_spill] sm:$0xff]  ;;  %v17520_v36 = vld [vmem:[#allocation31_spill] sm:$0xff] }
 0x935   :  { %12288 = vmatprep.subr.bf16.mxu1 %v17508_v59  ;;  %v17521_v59 = vld [vmem:[#allocation46_spill] sm:$0xff] }
 0x937   :  { %12274 = vmatpush1.bf16.msra.mxu0 %v14721_v52  ;;  %v17512_v52 = vld [vmem:[#allocation10_spill] sm:$0xff] }
 0x938   :  { %12290 = vmatpush3.bf16.msra.mxu1 %v17509_v16  ;;  %12320 = vmatprep.subr.bf16.mxu0 %v14727_v12  ;;  %v17524_v16 = vld [vmem:[#allocation50_spill] sm:$0xff] }
 0x939   :  { %12292 = vmatprep.subr.bf16.mxu1 %v17510_v46  ;;  %v17526_v46 = vld [vmem:[#allocation52_spill] sm:$0xff] }
 0x93a   :  { %9506 = vmatmul.mubr.msk.f32.vlgmr.msra.gmra.mrb[40].mxu0 %vm1146_vm13, %v15756_v27 }
 0x93b   :  { %12322 = vmatpush1.bf16.msra.mxu0 %v14741_v5  ;;  %5779 = vmatprep.mubr.f32.mxu0 %v5403_v25 }
 0x93c   :  { %12294 = vmatpush3.bf16.msra.mxu1 %v17511_v32  ;;  %12324 = vmatprep.subr.bf16.mxu0 %v14753_v17  ;;  %v17519_v17 = vld [vmem:[#allocation44_spill] sm:$0xff] }
 0x93d   :  { %12296 = vmatprep.subr.bf16.mxu1 %v17512_v52 }
 0x93e   :  { %v9880_v23 = vpop.f32.mrb[28].mxu1 }
 0x93f   :  { %v9881_v12 = vpop.f32.mrb[29].mxu1  ;;  %12326 = vmatpush1.bf16.msra.mxu0 %v17513_v3  ;;  %v17528_v3 = vld [vmem:[#allocation19_spill] sm:$0xff] }
 0x940   :  { %v9882_v63 = vadd.f32 %v9881_v12, %v9880_v23  ;;  %12298 = vmatpush3.bf16.msra.mxu1 %v17514_v56  ;;  %12328 = vmatprep.subr.bf16.mxu0 %v17515_v6  ;;  %v17527_v12 = vld [vmem:[#allocation54_spill] sm:$0xff]  ;;  %v17531_v6 = vld [vmem:[#allocation20_spill] sm:$0xff] }
 0x941   :  { %12300 = vmatprep.subr.bf16.mxu1 %v17516_v57  ;;  %v17530_v56 = vld [vmem:[#allocation58_spill] sm:$0xff]  ;;  %v17532_v57 = vld [vmem:[#allocation60_spill] sm:$0xff] }
 0x942   :  { %v4383_v5 = vadd.f32 %v9882_v63, %v15708_v61  ;;  %v17525_v61 = vld [vmem:[#allocation17_spill] sm:$0xff]  ;;  %v17529_v63 = vld [vmem:[#allocation56_spill] sm:$0xff] }
 0x943   :  { %12330 = vmatpush1.bf16.msra.mxu0 %v17517_v54  ;;  %v17533_v54 = vld [vmem:[#allocation62_spill] sm:$0xff] }
 0x944   :  { %12302 = vmatpush3.bf16.msra.mxu1 %v17518_v22  ;;  %12332 = vmatprep.subr.bf16.mxu0 %v17519_v17  ;;  %v17535_v22 = vld [vmem:[#allocation64_spill] sm:$0xff]  ;;  %v17536_v17 = vld [vmem:[#allocation35_spill] sm:$0xff] }
 0x945   :  { %12304 = vmatprep.subr.bf16.mxu1 %v17520_v36  ;;  %v17537_v36 = vld [vmem:[#allocation65_spill] sm:$0xff] }
 0x947   :  { %12334 = vmatpush1.bf16.msra.mxu0 %v17521_v59  ;;  %v17538_v59 = vld [vmem:[#allocation36_spill] sm:$0xff] }
 0x948   :  { %12306 = vmatpush3.bf16.msra.mxu1 %v17522_v18  ;;  %12336 = vmatprep.subr.bf16.mxu0 %v17523_v34  ;;  %v17539_v18 = vld [vmem:[#allocation67_spill] sm:$0xff]  ;;  %v17540_v34 = vld [vmem:[#allocation37_spill] sm:$0xff] }
 0x949   :  { %12307 = vmatprep.subr.bf16.mxu1 %v17313_v47 }
 0x94b   :  { %5637 = vmatmul.mubr.f32.vlgmr.msra.gmra.mrb[36].mxu1 %v15732_v42  ;;  %12338 = vmatpush1.bf16.msra.mxu0 %v17524_v16  ;;  %v17541_v16 = vld [vmem:[#allocation68_spill] sm:$0xff] }
 0x94c   :  { %12309 = vmatpush3.bf16.msra.mxu1 %v17525_v61  ;;  %12340 = vmatprep.subr.bf16.mxu0 %v17526_v46  ;;  %v17542_v61 = vld [vmem:[#allocation39_spill] sm:$0xff]  ;;  %v17543_v46 = vld [vmem:[#allocation70_spill] sm:$0xff] }
 0x94d   :  { %12310 = vmatprep.subr.bf16.mxu1 %v17313_v47  ;;  %11039 = vmatprep.mubr.msk.f32.mxu1 %vm13248_vm0, %v15705_v30 }
 0x94e   :  { %v4452_v32 = vpop.f32.mrb[30].mxu1 }
 0x94f   :  { %v15785_v52 = vadd.f32 %v4452_v32, %v4383_v5  ;;  %v10984_v23 = vpop.f32.mrb[31].mxu1  ;;  %12342 = vmatpush1.bf16.msra.mxu0 %v17527_v12  ;;  %v17534_v5 = vld [vmem:[#allocation21_spill] sm:$0xff]  ;;  %v17546_v12 = vld [vmem:[#allocation43_spill] sm:$0xff] }
 0x950   :  { %12312 = vmatpush3.bf16.msra.mxu1 %v17528_v3  ;;  %12344 = vmatprep.subr.bf16.mxu0 %v17529_v63  ;;  %v17544_v32 = vld [vmem:[#allocation41_spill] sm:$0xff]  ;;  %v17545_v23 = vld [vmem:[#allocation71_spill] sm:$0xff] }
 0x951   :  { %12313 = vmatprep.subr.bf16.mxu1 %v17313_v47  ;;  %v17547_v3 = vld [vmem:[#allocation73_spill] sm:$0xff] }
 0x952   :  { %v17548_v63 = vld [vmem:[#allocation45_spill] sm:$0xff] }
 0x953   :  { %12346 = vmatpush1.bf16.msra.mxu0 %v17530_v56  ;;  %v17550_v56 = vld [vmem:[#allocation47_spill] sm:$0xff] }
 0x954   :  { %12315 = vmatpush3.bf16.msra.mxu1 %v17531_v6  ;;  %12348 = vmatprep.subr.bf16.mxu0 %v17532_v57  ;;  %v17551_v6 = vld [vmem:[#allocation76_spill] sm:$0xff]  ;;  %v17552_v57 = vld [vmem:[#allocation49_spill] sm:$0xff] }
 0x955   :  { %12316 = vmatprep.subr.bf16.mxu1 %v17313_v47 }
 0x957   :  { %12350 = vmatpush1.bf16.msra.mxu0 %v17533_v54  ;;  %v17553_v54 = vld [vmem:[#allocation51_spill] sm:$0xff] }
 0x958   :  { %12318 = vmatpush3.bf16.msra.mxu1 %v17534_v5  ;;  %12352 = vmatprep.subr.bf16.mxu0 %v17535_v22  ;;  %v17554_v5 = vld [vmem:[#allocation79_spill] sm:$0xff] }
 0x959   :  { %12400 = vmatprep.subr.bf16.mxu1 %v17536_v17  ;;  %v17555_v17 = vld [vmem:[#allocation53_spill] sm:$0xff] }
 0x95b   :  { %11040 = vmatmul.mubr.msk.f32.vlgmr.msra.gmra.mrb[38].mxu1 %vm1146_vm13, %v15756_v27  ;;  %12354 = vmatpush1.bf16.msra.mxu0 %v17537_v36 }
 0x95c   :  { %12402 = vmatpush3.bf16.msra.mxu1 %v17538_v59  ;;  %5921 = vmatprep.mubr.f32.mxu1 %v5403_v25  ;;  %v17549_v25 = vld [vmem:[#allocation74_spill] sm:$0xff]  ;;  %v17556_v59 = vld [vmem:[#allocation81_spill] sm:$0xff] }
 0x95d   :  { %12356 = vmatprep.subr.bf16.mxu0 %v17539_v18  ;;  %12404 = vmatprep.subr.bf16.mxu1 %v17540_v34  ;;  %v17557_v18 = vld [vmem:[#allocation55_spill] sm:$0xff] }
 0x95e   :  { %v17558_v34 = vld [vmem:[#allocation83_spill] sm:$0xff] }
 0x95f   :  { %12358 = vmatpush1.bf16.msra.mxu0 %v17541_v16  ;;  %v17559_v16 = vld [vmem:[#allocation57_spill] sm:$0xff] }
 0x960   :  { %12406 = vmatpush3.bf16.msra.mxu1 %v17542_v61  ;;  %12360 = vmatprep.subr.bf16.mxu0 %v17543_v46  ;;  %v17560_v61 = vld [vmem:[#allocation85_spill] sm:$0xff]  ;;  %v17562_v46 = vld [vmem:[#allocation87_spill] sm:$0xff] }
 0x961   :  { %12408 = vmatprep.subr.bf16.mxu1 %v17544_v32  ;;  %v17563_v32 = vld [vmem:[#allocation61_spill] sm:$0xff] }
 0x963   :  { %12362 = vmatpush1.bf16.msra.mxu0 %v17545_v23  ;;  %v17564_v23 = vld [vmem:[#allocation89_spill] sm:$0xff] }
 0x964   :  { %12410 = vmatpush3.bf16.msra.mxu1 %v17546_v12  ;;  %12364 = vmatprep.subr.bf16.mxu0 %v17547_v3  ;;  %v17565_v12 = vld [vmem:[#allocation63_spill] sm:$0xff]  ;;  %v5402_v3 = vld [vmem:[#allocation3 + $0x30] sm:$0xff] }
 0x965   :  { %12412 = vmatprep.subr.bf16.mxu1 %v17548_v63  ;;  %v17566_v63 = vld [vmem:[#allocation92_spill] sm:$0xff] }
 0x967   :  { %12366 = vmatpush1.bf16.msra.mxu0 %v17549_v25  ;;  %v17567_v25 = vld [vmem:[#allocation66_spill] sm:$0xff] }
 0x968   :  { %12414 = vmatpush3.bf16.msra.mxu1 %v17550_v56  ;;  %12368 = vmatprep.subr.bf16.mxu0 %v17551_v6  ;;  %v17568_v56 = vld [vmem:[#allocation94_spill] sm:$0xff]  ;;  %v17569_v6 = vld [vmem:[#allocation96_spill] sm:$0xff] }
 0x969   :  { %12416 = vmatprep.subr.bf16.mxu1 %v17552_v57  ;;  %v17571_v57 = vld [vmem:[#allocation98_spill] sm:$0xff] }
 0x96b   :  { %12370 = vmatpush1.bf16.msra.mxu0 %v14983_v60  ;;  %v17561_v60 = vld [vmem:[#allocation59_spill] sm:$0xff] }
 0x96c   :  { %12418 = vmatpush3.bf16.msra.mxu1 %v17553_v54  ;;  %12372 = vmatprep.subr.bf16.mxu0 %v17554_v5  ;;  %v17572_v54 = vld [vmem:[#allocation100_spill] sm:$0xff] }
 0x96d   :  { %v15820_v22 = vpop.f32.mrb[32].mxu0  ;;  %12420 = vmatprep.subr.bf16.mxu1 %v17555_v17  ;;  %v17573_v5 = vld [vmem:[#allocation72_spill] sm:$0xff]  ;;  %v17574_v17 = vld [vmem:[#allocation102_spill] sm:$0xff] }
 0x96e   :  { %v15823_v36 = vpop.f32.mrb[33].mxu0 }
 0x96f   :  { %12374 = vmatpush1.bf16.msra.mxu0 %v17556_v59  ;;  %v6048_v59 = vld [vmem:[#allocation3 + $0x38] sm:$0xfc] }
 0x970   :  { %12422 = vmatpush3.bf16.msra.mxu1 %v17557_v18  ;;  %12376 = vmatprep.subr.bf16.mxu0 %v17558_v34  ;;  %v6051_v18 = vld [vmem:[#allocation3 + $0x50] sm:$0x3]  ;;  %v17575_v34 = vld [vmem:[#allocation104_spill] sm:$0xff] }
 0x971   :  { %12424 = vmatprep.subr.bf16.mxu1 %v17559_v16  ;;  %v6062_v16 = vrot.slane %v6048_v59, 2  ;;  %v17586_v59 = vld [vmem:[#allocation84_spill] sm:$0xff] }
 0x973   :  { %12378 = vmatpush1.bf16.msra.mxu0 %v17560_v61  ;;  %v6063_v61 = vrot.slane %v6051_v18, 2  ;;  %v17587_v18 = vld [vmem:[#allocation116_spill] sm:$0xff] }
 0x974   :  { %12426 = vmatpush3.bf16.msra.mxu1 %v17561_v60  ;;  %12380 = vmatprep.subr.bf16.mxu0 %v17562_v46  ;;  %v17576_v60 = vld [vmem:[#allocation75_spill] sm:$0xff]  ;;  %v17577_v46 = vld [vmem:[#allocation106_spill] sm:$0xff] }
 0x975   :  { %12428 = vmatprep.subr.bf16.mxu1 %v17563_v32  ;;  %v5404_v32 = vld [vmem:[#allocation3 + $0x40] sm:$0xff] }
 0x977   :  { %12382 = vmatpush1.bf16.msra.mxu0 %v17564_v23  ;;  %v17578_v23 = vld [vmem:[#allocation77_spill] sm:$0xff] }
 0x978   :  { %12430 = vmatpush3.bf16.msra.mxu1 %v17565_v12  ;;  %12384 = vmatprep.subr.bf16.mxu0 %v15057_v62  ;;  %v17570_v62 = vld [vmem:[#allocation69_spill] sm:$0xff]  ;;  %v6064_v12 = vsel %vm4774_vm4, %v6062_v16, %v6063_v61  ;;  %v17589_v16 = vld [vmem:[#allocation118_spill] sm:$0xff]  ;;  %v17590_v61 = vld [vmem:[#allocation88_spill] sm:$0xff] }
 0x979   :  { %12431 = vmatprep.subr.bf16.mxu1 %v17313_v47 }
 0x97a   :  { %5780 = vmatmul.mubr.f32.vlgmr.msra.gmra.mrb[40].mxu0 %v5402_v3 }
 0x97b   :  { %5922 = vmatmul.mubr.f32.vlgmr.msra.gmra.mrb[40].mxu1 %v5402_v3  ;;  %12386 = vmatpush1.bf16.msra.mxu0 %v17566_v63  ;;  %v17579_v3 = vld [vmem:[#allocation108_spill] sm:$0xff]  ;;  %v17580_v63 = vld [vmem:[#allocation78_spill] sm:$0xff] }
 0x97c   :  { %12433 = vmatpush3.bf16.msra.mxu1 %v17567_v25  ;;  %12388 = vmatprep.subr.bf16.mxu0 %v17568_v56  ;;  %v17581_v56 = vld [vmem:[#allocation80_spill] sm:$0xff] }
 0x97d   :  { %12434 = vmatprep.subr.bf16.mxu1 %v17313_v47  ;;  %5850 = vmatprep.mubr.f32.mxu0 %v15705_v30 }
 0x97e   :  { %11058 = vmatprep.mubr.msk.f32.mxu1 %vm13248_vm0, %v15705_v30 }
 0x97f   :  { %12390 = vmatpush1.bf16.msra.mxu0 %v17569_v6 }
 0x980   :  { %12436 = vmatpush3.bf16.msra.mxu1 %v17570_v62  ;;  %12392 = vmatprep.subr.bf16.mxu0 %v17571_v57  ;;  %v17582_v62 = vld [vmem:[#allocation110_spill] sm:$0xff] }
 0x981   :  { %12437 = vmatprep.subr.bf16.mxu1 %v17313_v47 }
 0x983   :  { %12394 = vmatpush1.bf16.msra.mxu0 %v17572_v54  ;;  %v17583_v54 = vld [vmem:[#allocation112_spill] sm:$0xff] }
 0x984   :  { %12439 = vmatpush3.bf16.msra.mxu1 %v17573_v5  ;;  %12396 = vmatprep.subr.bf16.mxu0 %v17574_v17  ;;  %v17584_v5 = vld [vmem:[#allocation82_spill] sm:$0xff] }
 0x985   :  { %12440 = vmatprep.subr.bf16.mxu1 %v17313_v47  ;;  %v17585_v17 = vld [vmem:[#allocation114_spill] sm:$0xff] }
 0x987   :  { %12398 = vmatpush1.bf16.msra.mxu0 %v17575_v34  ;;  %v17588_v34 = vld [vmem:[#allocation86_spill] sm:$0xff] }
 0x988   :  { %12442 = vmatpush3.bf16.msra.mxu1 %v17576_v60  ;;  %12524 = vmatprep.subr.bf16.mxu0 %v17577_v46  ;;  %v17591_v60 = vld [vmem:[#allocation120_spill] sm:$0xff]  ;;  %v17592_v46 = vld [vmem:[#allocation90_spill] sm:$0xff] }
 0x989   :  { %12444 = vmatprep.subr.bf16.mxu1 %v17578_v23  ;;  %v17594_v23 = vld [vmem:[#allocation91_spill] sm:$0xff] }
 0x98a   :  { %9508 = vmatmul.mubr.msk.f32.vlgmr.msra.gmra.mrb[40].mxu0 %vm1146_vm13, %v5404_v32 }
 0x98b   :  { %11059 = vmatmul.mubr.msk.f32.vlgmr.msra.gmra.mrb[42].mxu1 %vm1146_vm13, %v5404_v32  ;;  %12526 = vmatpush3.bf16.msra.mxu0 %v17579_v3  ;;  %v17593_v32 = vld [vmem:[#allocation122_spill] sm:$0xff]  ;;  %v17596_v3 = vld [vmem:[#allocation93_spill] sm:$0xff] }
 0x98c   :  { %12446 = vmatpush1.bf16.msra.mxu1 %v17580_v63  ;;  %6136 = vmatprep.mubr.f32.mxu1 %v6064_v12  ;;  %v17597_v63 = vld [vmem:[#allocation126_spill] sm:$0xff] }
 0x98d   :  { %6278 = vmatprep.mubr.f32.mxu0 %v6064_v12  ;;  %v9924_v25 = vpop.f32.mrb[34].mxu0  ;;  %12448 = vmatprep.subr.bf16.mxu1 %v17581_v56  ;;  %v17595_v12 = vld [vmem:[#allocation124_spill] sm:$0xff] }
 0x98e   :  { %v9925_v6 = vpop.f32.mrb[35].mxu0  ;;  %12528 = vmatprep.subr.bf16.mxu0 %v17582_v62  ;;  %v17599_v56 = vld [vmem:[#allocation128_spill] sm:$0xff]  ;;  %v17601_v62 = vld [vmem:[#allocation130_spill] sm:$0xff] }
 0x98f   :  { %v9926_v57 = vadd.f32 %v9925_v6, %v9924_v25  ;;  %12530 = vmatpush3.bf16.msra.mxu0 %v17583_v54  ;;  %v17598_v25 = vld [vmem:[#allocation95_spill] sm:$0xff]  ;;  %v17600_v6 = vld [vmem:[#allocation97_spill] sm:$0xff] }
 0x990   :  { %12450 = vmatpush1.bf16.msra.mxu1 %v17584_v5  ;;  %12532 = vmatprep.subr.bf16.mxu0 %v17585_v17  ;;  %v17602_v54 = vld [vmem:[#allocation99_spill] sm:$0xff]  ;;  %v6047_v5 = vld [vmem:[#allocation3 + $0x30] sm:$0xfc]  ;;  %v6050_v17 = vld [vmem:[#allocation3 + $0x48] sm:$0x3] }
 0x991   :  { %12452 = vmatprep.subr.bf16.mxu1 %v17586_v59  ;;  %v17603_v59 = vld [vmem:[#allocation132_spill] sm:$0xff] }
 0x993   :  { %12534 = vmatpush3.bf16.msra.mxu0 %v17587_v18  ;;  %v17604_v18 = vld [vmem:[#allocation101_spill] sm:$0xff] }
 0x994   :  { %12454 = vmatpush1.bf16.msra.mxu1 %v17588_v34  ;;  %12536 = vmatprep.subr.bf16.mxu0 %v17589_v16  ;;  %v17605_v34 = vld [vmem:[#allocation134_spill] sm:$0xff]  ;;  %v17606_v16 = vld [vmem:[#allocation103_spill] sm:$0xff] }
 0x995   :  { %12456 = vmatprep.subr.bf16.mxu1 %v17590_v61  ;;  %v6059_v61 = vrot.slane %v6047_v5, 2 }
 0x997   :  { %12538 = vmatpush3.bf16.msra.mxu0 %v17591_v60  ;;  %v6060_v60 = vrot.slane %v6050_v17, 2  ;;  %v17612_v17 = vld [vmem:[#allocation113_spill] sm:$0xff] }
 0x998   :  { %12458 = vmatpush1.bf16.msra.mxu1 %v17592_v46  ;;  %12540 = vmatprep.subr.bf16.mxu0 %v17593_v32  ;;  %v17607_v46 = vld [vmem:[#allocation136_spill] sm:$0xff]  ;;  %v17608_v32 = vld [vmem:[#allocation105_spill] sm:$0xff] }
 0x999   :  { %12460 = vmatprep.subr.bf16.mxu1 %v17594_v23  ;;  %v17609_v23 = vld [vmem:[#allocation107_spill] sm:$0xff] }
 0x99b   :  { %12542 = vmatpush3.bf16.msra.mxu0 %v17595_v12  ;;  %v6061_v12 = vsel %vm4774_vm4, %v6059_v61, %v6060_v60 }
 0x99c   :  { %12462 = vmatpush1.bf16.msra.mxu1 %v17596_v3  ;;  %12544 = vmatprep.subr.bf16.mxu0 %v17597_v63  ;;  %v17610_v3 = vld [vmem:[#allocation109_spill] sm:$0xff] }
 0x99d   :  { %12464 = vmatprep.subr.bf16.mxu1 %v17598_v25  ;;  %v17611_v25 = vld [vmem:[#allocation111_spill] sm:$0xff] }
 0x99f   :  { %12546 = vmatpush3.bf16.msra.mxu0 %v17599_v56 }
 0x9a0   :  { %12466 = vmatpush1.bf16.msra.mxu1 %v17600_v6  ;;  %12548 = vmatprep.subr.bf16.mxu0 %v17601_v62 }
 0x9a1   :  { %12468 = vmatprep.subr.bf16.mxu1 %v17602_v54 }
 0x9a3   :  { %12550 = vmatpush3.bf16.msra.mxu0 %v17603_v59 }
 0x9a4   :  { %12470 = vmatpush1.bf16.msra.mxu1 %v17604_v18  ;;  %12552 = vmatprep.subr.bf16.mxu0 %v17605_v34  ;;  %v6049_v18 = vld [vmem:[#allocation3 + $0x40] sm:$0xfc]  ;;  %v6052_v34 = vld [vmem:[#allocation3 + $0x58] sm:$0x3] }
 0x9a5   :  { %12472 = vmatprep.subr.bf16.mxu1 %v17606_v16  ;;  %v17614_v16 = vld [vmem:[#allocation117_spill] sm:$0xff]  ;;  %v6065_v61 = vrot.slane %v6049_v18, 2  ;;  %v6066_v60 = vrot.slane %v6052_v34, 2  ;;  %v17629_v18 = vld [vmem:[#allocation135_spill] sm:$0xff] }
 0x9a6   :  { %v17630_v34 = vld [vmem:[#allocation151_spill] sm:$0xff] }
 0x9a7   :  { %12554 = vmatpush3.bf16.msra.mxu0 %v17607_v46  ;;  %v17617_v46 = vld [vmem:[#allocation123_spill] sm:$0xff] }
 0x9a8   :  { %12474 = vmatpush1.bf16.msra.mxu1 %v17608_v32  ;;  %12555 = vmatprep.subr.bf16.mxu0 %v17313_v47  ;;  %v6067_v32 = vsel %vm4774_vm4, %v6065_v61, %v6066_v60  ;;  %v17634_v61 = vld [vmem:[#allocation154_spill] sm:$0xff]  ;;  %v17635_v60 = vld [vmem:[#allocation140_spill] sm:$0xff] }
 0x9a9   :  { %12476 = vmatprep.subr.bf16.mxu1 %v17609_v23  ;;  %v17619_v23 = vld [vmem:[#allocation125_spill] sm:$0xff] }
 0x9aa   :  { %6279 = vmatmul.mubr.f32.vlgmr.msra.gmra.mrb[42].mxu0 %v6061_v12 }
 0x9ab   :  { %12557 = vmatpush3.bf16.msra.mxu0 %v15402_v15  ;;  %11077 = vmatprep.mubr.msk.f32.mxu0 %vm13248_vm0, %v15705_v30  ;;  %v17613_v15 = vld [vmem:[#allocation115_spill] sm:$0xff] }
 0x9ac   :  { %12478 = vmatpush1.bf16.msra.mxu1 %v17610_v3  ;;  %12558 = vmatprep.subr.bf16.mxu0 %v17313_v47  ;;  %v17620_v3 = vld [vmem:[#allocation142_spill] sm:$0xff] }
 0x9ad   :  { %v9968_v63 = vpop.f32.mrb[36].mxu0  ;;  %12480 = vmatprep.subr.bf16.mxu1 %v17611_v25 }
 0x9ae   :  { %v5066_v56 = vpop.f32.mrb[34].mxu1  ;;  %v9969_v6 = vpop.f32.mrb[37].mxu0 }
 0x9af   :  { %v5067_v62 = vadd.f32 %v9926_v57, %v5066_v56  ;;  %v11003_v54 = vpop.f32.mrb[35].mxu1  ;;  %v9970_v5 = vadd.f32 %v9969_v6, %v9968_v63  ;;  %12560 = vmatpush3.bf16.msra.mxu0 %v15420_v19  ;;  %v17615_v57 = vld [vmem:[#allocation119_spill] sm:$0xff]  ;;  %v17616_v19 = vld [vmem:[#allocation121_spill] sm:$0xff] }
 0x9b0   :  { %12482 = vmatpush1.bf16.msra.mxu1 %v17612_v17  ;;  %12561 = vmatprep.subr.bf16.mxu0 %v17313_v47  ;;  %v17622_v56 = vld [vmem:[#allocation143_spill] sm:$0xff]  ;;  %v17623_v6 = vld [vmem:[#allocation129_spill] sm:$0xff] }
 0x9b1   :  { %12484 = vmatprep.subr.bf16.mxu1 %v17613_v15  ;;  %v5279_v59 = vadd.f32 %v9970_v5, %v5067_v62  ;;  %v17624_v62 = vld [vmem:[#allocation145_spill] sm:$0xff]  ;;  %v17625_v54 = vld [vmem:[#allocation131_spill] sm:$0xff] }
 0x9b2   :  { %v17626_v5 = vld [vmem:[#allocation147_spill] sm:$0xff]  ;;  %v17627_v17 = vld [vmem:[#allocation133_spill] sm:$0xff] }
 0x9b3   :  { %12563 = vmatpush3.bf16.msra.mxu0 %v15438_v37  ;;  %v17618_v37 = vld [vmem:[#allocation139_spill] sm:$0xff]  ;;  %v17628_v15 = vld [vmem:[#allocation149_spill] sm:$0xff] }
 0x9b4   :  { %12486 = vmatpush1.bf16.msra.mxu1 %v17614_v16  ;;  %12564 = vmatprep.subr.bf16.mxu0 %v17313_v47  ;;  %v17632_v16 = vld [vmem:[#allocation153_spill] sm:$0xff] }
 0x9b5   :  { %12488 = vmatprep.subr.bf16.mxu1 %v17615_v57  ;;  %v17633_v57 = vld [vmem:[#allocation138_spill] sm:$0xff] }
 0x9b7   :  { %12566 = vmatpush3.bf16.msra.mxu0 %v15454_v44  ;;  %v17621_v44 = vld [vmem:[#allocation127_spill] sm:$0xff] }
 0x9b8   :  { %12490 = vmatpush1.bf16.msra.mxu1 %v17616_v19  ;;  %12648 = vmatprep.subr.bf16.mxu0 %v15307_v45  ;;  %v17636_v19 = vld [vmem:[#allocation155_spill] sm:$0xff] }
 0x9b9   :  { %12492 = vmatprep.subr.bf16.mxu1 %v17617_v46  ;;  %v17637_v46 = vld [vmem:[#allocation141_spill] sm:$0xff] }
 0x9ba   :  { %11078 = vmatmul.mubr.msk.f32.vlgmr.msra.gmra.mrb[44].mxu0 %vm1146_vm13, %v6067_v32 }
 0x9bb   :  { %12650 = vmatpush3.bf16.msra.mxu0 %v17618_v37  ;;  %6560 = vmatprep.mubr.f32.mxu0 %v15545_v20  ;;  %v17638_v37 = vld [vmem:[#allocation156_spill] sm:$0xff] }
 0x9bc   :  { %12494 = vmatpush1.bf16.msra.mxu1 %v17619_v23  ;;  %12652 = vmatprep.subr.bf16.mxu0 %v17620_v3  ;;  %v17639_v23 = vld [vmem:[#allocation144_spill] sm:$0xff]  ;;  %v17640_v3 = vld [vmem:[#allocation157_spill] sm:$0xff] }
 0x9bd   :  { %v5348_v63 = vpop.f32.mrb[38].mxu0  ;;  %12496 = vmatprep.subr.bf16.mxu1 %v17621_v44  ;;  %v17642_v44 = vld [vmem:[#allocation158_spill] sm:$0xff] }
 0x9be   :  { %v15917_v25 = vadd.f32 %v5348_v63, %v5279_v59  ;;  %v11022_v45 = vpop.f32.mrb[39].mxu0  ;;  %v17631_v59 = vld [vmem:[#allocation137_spill] sm:$0xff]  ;;  %v17641_v63 = vld [vmem:[#allocation146_spill] sm:$0xff] }
 0x9bf   :  { %12654 = vmatpush3.bf16.msra.mxu0 %v17622_v56  ;;  %v17644_v45 = vld [vmem:[#allocation159_spill] sm:$0xff]  ;;  %v17645_v56 = vld [vmem:[#allocation150_spill] sm:$0xff] }
 0x9c0   :  { %12498 = vmatpush1.bf16.msra.mxu1 %v17623_v6  ;;  %12656 = vmatprep.subr.bf16.mxu0 %v17624_v62  ;;  %v17646_v6 = vld [vmem:[#allocation152_spill] sm:$0xff] }
 0x9c1   :  { %12500 = vmatprep.subr.bf16.mxu1 %v17625_v54  ;;  %v17647_v62 = vld [vmem:[#allocation160_spill] sm:$0xff]  ;;  %v17648_v54 = vld [vmem:[#allocation161_spill] sm:$0xff] }
 0x9c3   :  { %12658 = vmatpush3.bf16.msra.mxu0 %v17626_v5  ;;  %v17649_v5 = vld [vmem:[#allocation162_spill] sm:$0xff] }
 0x9c4   :  { %12502 = vmatpush1.bf16.msra.mxu1 %v17627_v17  ;;  %12660 = vmatprep.subr.bf16.mxu0 %v17628_v15  ;;  %v17650_v17 = vld [vmem:[#allocation163_spill] sm:$0xff]  ;;  %v17652_v15 = vld [vmem:[#allocation165_spill] sm:$0xff] }
 0x9c5   :  { %12504 = vmatprep.subr.bf16.mxu1 %v17629_v18  ;;  %v17654_v18 = vld [vmem:[#allocation167_spill] sm:$0xff] }
 0x9c7   :  { %12662 = vmatpush3.bf16.msra.mxu0 %v17630_v34  ;;  %v6691_v34 = vld [vmem:[%s16012_s5 + $0x28] sm:$0xff] }
 0x9c8   :  { %12506 = vmatpush1.bf16.msra.mxu1 %v17631_v59  ;;  %12664 = vmatprep.subr.bf16.mxu0 %v17632_v16  ;;  %v6708_v59 = vld [vmem:[%s16012_s5 + $0xb0] sm:$0xff]  ;;  %v6709_v16 = vld [vmem:[%s16012_s5 + $0xb8] sm:$0xff] }
 0x9c9   :  { %12508 = vmatprep.subr.bf16.mxu1 %v17633_v57 }
 0x9cb   :  { %6137 = vmatmul.mubr.f32.vlgmr.msra.gmra.mrb[44].mxu1 %v6061_v12  ;;  %12666 = vmatpush3.bf16.msra.mxu0 %v17634_v61  ;;  %v17643_v12 = vld [vmem:[#allocation148_spill] sm:$0xff] }
 0x9cc   :  { %12510 = vmatpush1.bf16.msra.mxu1 %v17635_v60  ;;  %12668 = vmatprep.subr.bf16.mxu0 %v17636_v19  ;;  %v12703_v60 = vpack.c.bf16 %v6709_v16, %v6708_v59  ;;  %v6692_v19 = vld [vmem:[%s16012_s5 + $0x30] sm:$0xff] }
 0x9cd   :  { %12512 = vmatprep.subr.bf16.mxu1 %v17637_v46  ;;  %6207 = vmatprep.mubr.f32.mxu1 %v15705_v30  ;;  %v6693_v46 = vld [vmem:[%s16012_s5 + $0x38] sm:$0xff] }
 0x9cf   :  { %12670 = vmatpush3.bf16.msra.mxu0 %v17638_v37 }
 0x9d0   :  { %12514 = vmatpush1.bf16.msra.mxu1 %v17639_v23  ;;  %12672 = vmatprep.subr.bf16.mxu0 %v17640_v3 }
 0x9d1   :  { %12516 = vmatprep.subr.bf16.mxu1 %v17641_v63 }
 0x9d3   :  { %12674 = vmatpush3.bf16.msra.mxu0 %v17642_v44  ;;  %v12705_v44 = vpack.c.bf16 %v6693_v46, %v6692_v19 }
 0x9d4   :  { %12518 = vmatpush1.bf16.msra.mxu1 %v17643_v12  ;;  %12676 = vmatprep.subr.bf16.mxu0 %v17644_v45 }
 0x9d5   :  { %12520 = vmatprep.subr.bf16.mxu1 %v17645_v56 }
 0x9d7   :  { %12678 = vmatpush3.bf16.msra.mxu0 %v15450_v38  ;;  %v17651_v38 = vld [vmem:[#allocation164_spill] sm:$0xff] }
 0x9d8   :  { %12522 = vmatpush1.bf16.msra.mxu1 %v17646_v6  ;;  %12679 = vmatprep.subr.bf16.mxu0 %v17313_v47  ;;  %v6710_v6 = vld [vmem:[%s16012_s5 + $0xc0] sm:$0xff] }
 0x9d9   :  { %12568 = vmatprep.subr.bf16.mxu1 %v17647_v62  ;;  %v6711_v62 = vld [vmem:[%s16012_s5 + $0xc8] sm:$0xff] }
 0x9da   :  { %6561 = vmatmul.mubr.f32.vlgmr.msra.gmra.mrb[46].mxu0 %v15732_v42 }
 0x9db   :  { %9510 = vmatmul.mubr.msk.f32.vlgmr.msra.gmra.mrb[44].mxu1 %vm1146_vm13, %v6067_v32  ;;  %12681 = vmatpush3.bf16.msra.mxu0 %v17648_v54  ;;  %v17653_v32 = vld [vmem:[#allocation166_spill] sm:$0xff]  ;;  %v6694_v54 = vld [vmem:[%s16012_s5 + $0x40] sm:$0xff] }
 0x9dc   :  { %12570 = vmatpush1.bf16.msra.mxu1 %v17649_v5  ;;  %6418 = vmatprep.mubr.f32.mxu1 %v15545_v20  ;;  %v17660_v20 = vld [vmem:[#allocation173_spill] sm:$0xff]  ;;  %v12707_v5 = vpack.c.bf16 %v6711_v62, %v6710_v6 }
 0x9dd   :  { %12572 = vmatprep.subr.bf16.mxu1 %v17650_v17  ;;  %12682 = vmatprep.subr.bf16.mxu0 %v17313_v47  ;;  %v6695_v17 = vld [vmem:[%s16012_s5 + $0x48] sm:$0xff] }
 0x9de   :  { %11096 = vmatprep.mubr.msk.f32.mxu0 %vm13248_vm0, %v15705_v30 }
 0x9df   :  { %12684 = vmatpush3.bf16.msra.mxu0 %v17651_v38  ;;  %v6712_v38 = vld [vmem:[%s16012_s5 + $0xd0] sm:$0xff] }
 0x9e0   :  { %12574 = vmatpush1.bf16.msra.mxu1 %v17652_v15  ;;  %12685 = vmatprep.subr.bf16.mxu0 %v17313_v47  ;;  %v6713_v15 = vld [vmem:[%s16012_s5 + $0xd8] sm:$0xff] }
 0x9e1   :  { %12576 = vmatprep.subr.bf16.mxu1 %v17653_v32  ;;  %v12709_v32 = vpack.c.bf16 %v6695_v17, %v6694_v54 }
 0x9e3   :  { %12687 = vmatpush3.bf16.msra.mxu0 %v17654_v18  ;;  %v12711_v18 = vpack.c.bf16 %v6713_v15, %v6712_v38 }
 0x9e4   :  { %12578 = vmatpush1.bf16.msra.mxu1 %v15507_v1  ;;  %12688 = vmatprep.subr.bf16.mxu0 %v17313_v47  ;;  %v17655_v1 = vld [vmem:[#allocation168_spill] sm:$0xff] }
 0x9e5   :  { %12580 = vmatprep.subr.bf16.mxu1 %v15512_v0 }
 0x9e7   :  { %12690 = vmatpush3.bf16.msra.mxu0 %v15519_v43  ;;  %v17656_v43 = vld [vmem:[#allocation169_spill] sm:$0xff] }
 0x9e8   :  { %12582 = vmatpush1.bf16.msra.mxu1 %v15523_v24 }
 0x9e9   :  { %12584 = vmatprep.subr.bf16.mxu1 %v15526_v26  ;;  %v17657_v26 = vld [vmem:[#allocation170_spill] sm:$0xff] }
 0x9ea   :  { %11097 = vmatmul.mubr.msk.f32.vlgmr.msra.gmra.mrb[48].mxu0 %vm1146_vm13, %v15756_v27 }
 0x9ec   :  { %12586 = vmatpush1.bf16.msra.mxu1 %v15535_v13  ;;  %v17658_v13 = vld [vmem:[#allocation171_spill] sm:$0xff] }
 0x9ed   :  { %12588 = vmatprep.subr.bf16.mxu1 %v15538_v50  ;;  %v17659_v50 = vld [vmem:[#allocation172_spill] sm:$0xff] }
 0x9f0   :  { %12590 = vmatpush1.bf16.msra.mxu1 %v15553_v8 }
 0x9f1   :  { %12592 = vmatprep.subr.bf16.mxu1 %v15556_v41 }
 0x9f4   :  { %12594 = vmatpush1.bf16.msra.mxu1 %v15565_v39 }
 0x9f5   :  { %12596 = vmatprep.subr.bf16.mxu1 %v15568_v33 }
 0x9f8   :  { %12598 = vmatpush1.bf16.msra.mxu1 %v15577_v7 }
 0x9f9   :  { %12600 = vmatprep.subr.bf16.mxu1 %v15580_v51 }
 0x9fc   :  { %12602 = vmatpush1.bf16.msra.mxu1 %v15589_v49 }
 0x9fd   :  { %12604 = vmatprep.subr.bf16.mxu1 %v15592_v10 }
 0x9fe   :  { %v15980_v0 = vpop.f32.mrb[32].mxu1 }
 0x9ff   :  { %v15982_v24 = vpop.f32.mrb[33].mxu1 }
 0xa00   :  { %12606 = vmatpush1.bf16.msra.mxu1 %v15601_v53 }
 0xa01   :  { %12608 = vmatprep.subr.bf16.mxu1 %v15604_v31 }
 0xa04   :  { %12610 = vmatpush1.bf16.msra.mxu1 %v15613_v58  ;;  %v6702_v58 = vld [vmem:[%s16012_s5 + $0x80] sm:$0xff] }
 0xa05   :  { %12612 = vmatprep.subr.bf16.mxu1 %v15616_v14  ;;  %v6703_v14 = vld [vmem:[%s16012_s5 + $0x88] sm:$0xff] }
 0xa08   :  { %12614 = vmatpush1.bf16.msra.mxu1 %v17655_v1  ;;  %v6696_v1 = vld [vmem:[%s16012_s5 + $0x50] sm:$0xff] }
 0xa09   :  { %12616 = vmatprep.subr.bf16.mxu1 %v17656_v43  ;;  %v6697_v43 = vld [vmem:[%s16012_s5 + $0x58] sm:$0xff] }
 0xa0c   :  { %12618 = vmatpush1.bf16.msra.mxu1 %v15637_v9  ;;  %v6686_v9 = vld [vmem:[%s16012_s5] sm:$0xff] }
 0xa0d   :  { %12620 = vmatprep.subr.bf16.mxu1 %v15640_v4  ;;  %v12691_v4 = vpack.c.bf16 %v6703_v14, %v6702_v58  ;;  %v6701_v58 = vld [vmem:[%s16012_s5 + $0x78] sm:$0xff] }
 0xa0f   :  { %12692 = vmatprep.subr.bf16.mxu0 %v12691_v4 }
 0xa10   :  { %12622 = vmatpush1.bf16.msra.mxu1 %v15649_v29  ;;  %v6687_v29 = vld [vmem:[%s16012_s5 + $0x8] sm:$0xff] }
 0xa11   :  { %12624 = vmatprep.subr.bf16.mxu1 %v15652_v21  ;;  %v6704_v21 = vld [vmem:[%s16012_s5 + $0x90] sm:$0xff] }
 0xa14   :  { %12626 = vmatpush1.bf16.msra.mxu1 %v15661_v2  ;;  %v6705_v2 = vld [vmem:[%s16012_s5 + $0x98] sm:$0xff] }
 0xa15   :  { %12628 = vmatprep.subr.bf16.mxu1 %v15664_v11  ;;  %v12693_v11 = vpack.c.bf16 %v6687_v29, %v6686_v9 }
 0xa17   :  { %12694 = vmatpush3.bf16.msra.mxu0 %v12693_v11 }
 0xa18   :  { %12630 = vmatpush1.bf16.msra.mxu1 %v17657_v26  ;;  %v6714_v26 = vld [vmem:[%s16012_s5 + $0xe0] sm:$0xff] }
 0xa19   :  { %12632 = vmatprep.subr.bf16.mxu1 %v17658_v13  ;;  %v6715_v13 = vld [vmem:[%s16012_s5 + $0xe8] sm:$0xff] }
 0xa1b   :  { %6419 = vmatmul.mubr.f32.vlgmr.msra.gmra.mrb[44].mxu1 %v15732_v42 }
 0xa1c   :  { %12634 = vmatpush1.bf16.msra.mxu1 %v17659_v50  ;;  %6489 = vmatprep.mubr.f32.mxu1 %v15705_v30  ;;  %v6689_v30 = vld [vmem:[%s16012_s5 + $0x18] sm:$0xff]  ;;  %v12713_v50 = vpack.c.bf16 %v6697_v43, %v6696_v1 }
 0xa1d   :  { %12636 = vmatprep.subr.bf16.mxu1 %v17660_v20  ;;  %v12715_v20 = vpack.c.bf16 %v6715_v13, %v6714_v26 }
 0xa1e   :  { %v10012_v8 = vpop.f32.mrb[36].mxu1 }
 0xa1f   :  { %v10013_v41 = vpop.f32.mrb[37].mxu1 }
 0xa20   :  { %v10014_v39 = vadd.f32 %v10013_v41, %v10012_v8  ;;  %12638 = vmatpush1.bf16.msra.mxu1 %v15698_v35  ;;  %v12695_v35 = vpack.c.bf16 %v6705_v2, %v6704_v21  ;;  %v6698_v8 = vld [vmem:[%s16012_s5 + $0x60] sm:$0xff]  ;;  %v6699_v41 = vld [vmem:[%s16012_s5 + $0x68] sm:$0xff] }
 0xa21   :  { %12640 = vmatprep.subr.bf16.mxu1 %v15701_v28  ;;  %v6688_v28 = vld [vmem:[%s16012_s5 + $0x10] sm:$0xff] }
 0xa22   :  { %12696 = vmatprep.subr.bf16.mxu0 %v12695_v35 }
 0xa24   :  { %12642 = vmatpush1.bf16.msra.mxu1 %v15715_v40  ;;  %v6706_v40 = vld [vmem:[%s16012_s5 + $0xa0] sm:$0xff] }
 0xa25   :  { %12644 = vmatprep.subr.bf16.mxu1 %v15718_v48  ;;  %v6707_v48 = vld [vmem:[%s16012_s5 + $0xa8] sm:$0xff] }
 0xa26   :  { %v12699_v42 = vpack.c.bf16 %v6707_v48, %v6706_v40 }
 0xa28   :  { %12646 = vmatpush1.bf16.msra.mxu1 %v15725_v55  ;;  %v12697_v55 = vpack.c.bf16 %v6689_v30, %v6688_v28  ;;  %v3619_v28 = vld [vmem:[%s9442_s9] sm:$0x7]  ;;  %v17661_v30 = vld [vmem:[#allocation15_spill] sm:$0xff] }
 0xa29   :  { %12730 = vmatprep.subr.bf16.mxu1 %v12691_v4  ;;  %v17662_v40 = vsub.s32 2, %v17661_v30 }
 0xa2a   :  { %12698 = vmatpush3.bf16.msra.mxu0 %v12697_v55 }
 0xa2b   :  { %9512 = vmatmul.mubr.msk.f32.vlgmr.msra.gmra.mrb[44].mxu1 %vm1146_vm13, %v15756_v27  ;;  %v6690_v27 = vld [vmem:[%s16012_s5 + $0x20] sm:$0xff]  ;;  %12700 = vmatprep.subr.bf16.mxu0 %v12699_v42  ;;  %v16060_v48 = vrot.slane %v3619_v28, %v17662_v40 }
 0xa2c   :  { %12732 = vmatpush3.bf16.msra.mxu1 %v12693_v11  ;;  %v12701_v57 = vpack.c.bf16 %v6691_v34, %v6690_v27  ;;  %v17664_v27 = vsub.s32 1, %v17661_v30 }
 0xa2d   :  { %12734 = vmatprep.subr.bf16.mxu1 %v12695_v35  ;;  %v16071_v59 = vadd.f32 %v16060_v48, %v15785_v52  ;;  %v16091_v52 = vadd.f32 %v15917_v25, %v16060_v48 }
 0xa2e   :  { %v5708_v33 = vpop.f32.mrb[38].mxu1  ;;  %12702 = vmatpush3.bf16.msra.mxu0 %v12701_v57  ;;  %v16067_v34 = vrot.slane %v3619_v28, %v17664_v27 }
 0xa2f   :  { %v5709_v7 = vadd.f32 %v10014_v39, %v5708_v33  ;;  %v11041_v51 = vpop.f32.mrb[39].mxu1  ;;  %12704 = vmatprep.subr.bf16.mxu0 %v12703_v60  ;;  %v6716_v33 = vld [vmem:[%s16012_s5 + $0xf0] sm:$0xff]  ;;  %v4487_v19 = vsel %vm261_vm2, %v16071_v59, 0.0  ;;  %v4499_v46 = vmul.f32 %v16071_v59, %v16071_v59  ;;  %v5379_v1 = vmul.f32 %v16091_v52, %v16091_v52 }
 0xa30   :  { %12736 = vmatpush3.bf16.msra.mxu1 %v12697_v55  ;;  %v17663_v55 = vld [vmem:[#allocation16_spill] sm:$0xff] }
 0xa31   :  { %12738 = vmatprep.subr.bf16.mxu1 %v12699_v42  ;;  %v16063_v42 = vrot.slane %v3619_v28, %v17663_v55  ;;  %v4512_v25 = vsel %vm261_vm2, %v4499_v46, 0.0 }
 0xa32   :  { %12706 = vmatpush3.bf16.msra.mxu0 %v12705_v44  ;;  %v4513_v15 = vrot.slane %v4512_v25, 4 }
 0xa33   :  { %12708 = vmatprep.subr.bf16.mxu0 %v12707_v5  ;;  %v16075_v16 = vadd.f32 %v16063_v42, %v15820_v22  ;;  %v16095_v22 = vadd.f32 %v15982_v24, %v16067_v34  ;;  %v5367_v24 = vsel %vm261_vm2, %v16091_v52, 0.0 }
 0xa34   :  { %12740 = vmatpush3.bf16.msra.mxu1 %v12701_v57  ;;  %v16079_v57 = vadd.f32 %v15980_v0, %v16063_v42 }
 0xa35   :  { %12742 = vmatprep.subr.bf16.mxu1 %v12703_v60  ;;  %v16083_v60 = vadd.f32 %v16067_v34, %v15823_v36  ;;  %v4497_v0 = vmul.f32 %v16075_v16, %v16075_v16  ;;  %v5378_v54 = vmul.f32 %v16095_v22, %v16095_v22 }
 0xa36   :  { %12710 = vmatpush3.bf16.msra.mxu0 %v12709_v32  ;;  %v5377_v36 = vmul.f32 %v16079_v57, %v16079_v57 }
 0xa37   :  { %12712 = vmatprep.subr.bf16.mxu0 %v12711_v18  ;;  %v4481_v6 = vrot.slane %v16083_v60, 4 }
 0xa38   :  { %12744 = vmatpush3.bf16.msra.mxu1 %v12705_v44  ;;  %v4498_v44 = vmul.f32 %v16083_v60, %v16083_v60  ;;  %v5380_v62 = vrot.slane %v5377_v36, 4 }
 0xa39   :  { %12746 = vmatprep.subr.bf16.mxu1 %v12707_v5  ;;  %v4482_v13 = vadd.f32 %v4481_v6, %v16083_v60 }
 0xa3a   :  { %12714 = vmatpush3.bf16.msra.mxu0 %v12713_v50  ;;  %v4506_v38 = vrot.slane %v4498_v44, 4 }
 0xa3b   :  { %12716 = vmatprep.subr.bf16.mxu0 %v12715_v20 }
 0xa3c   :  { %12748 = vmatpush3.bf16.msra.mxu1 %v12709_v32  ;;  %v5368_v32 = vrot.slane %v5367_v24, 4 }
 0xa3d   :  { %12750 = vmatprep.subr.bf16.mxu1 %v12711_v18 }
 0xa40   :  { %12752 = vmatpush3.bf16.msra.mxu1 %v12713_v50  ;;  %v5381_v50 = vadd.f32 %v5380_v62, %v5377_v36 }
 0xa41   :  { %12754 = vmatprep.subr.bf16.mxu1 %v12715_v20  ;;  %v5386_v20 = vrot.slane %v5378_v54, 4 }
 0xa4e   :  { %v10056_v49 = vpop.f32.mrb[40].mxu1 }
 0xa4f   :  { %v10057_v10 = vpop.f32.mrb[41].mxu1 }
 0xa50   :  { %v10058_v53 = vadd.f32 %v10057_v10, %v10056_v49  ;;  %v12717_v10 = vpack.c.bf16 %v6699_v41, %v6698_v8 }
 0xa52   :  { %v5924_v31 = vadd.f32 %v10058_v53, %v5709_v7  ;;  %v6717_v7 = vld [vmem:[%s16012_s5 + $0xf8] sm:$0xff]  ;;  %12718 = vmatpush3.bf16.msra.mxu0 %v12717_v10  ;;  %12756 = vmatpush3.bf16.msra.mxu1 %v12717_v10 }
 0xa53   :  { %v12719_v53 = vpack.c.bf16 %v6717_v7, %v6716_v33  ;;  %v16118_v33 = vadd.f32 %v4513_v15, %v4512_v25  ;;  %v5369_v7 = vadd.f32 %v5368_v32, %v5367_v24 }
 0xa55   :  { %12720 = vmatprep.subr.bf16.mxu0 %v12719_v53  ;;  %12758 = vmatprep.subr.bf16.mxu1 %v12719_v53 }
 0xa5d   :  { %v16028_v61 = vpop.f32.mrb[40].mxu0 }
 0xa5e   :  { %v5993_v37 = vpop.f32.mrb[42].mxu1  ;;  %v16032_v23 = vpop.f32.mrb[41].mxu0  ;;  %v16123_v53 = vadd.f32 %v16028_v61, %v16063_v42 }
 0xa5f   :  { %v16034_v3 = vadd.f32 %v5993_v37, %v5924_v31  ;;  %v11060_v63 = vpop.f32.mrb[43].mxu1  ;;  %v6700_v31 = vld [vmem:[%s16012_s5 + $0x70] sm:$0xff]  ;;  %v4488_v37 = vrot.slane %v4487_v19, 4 }
 0xa60   :  { %v12721_v14 = vpack.c.bf16 %v6701_v58, %v6700_v31  ;;  %v4475_v63 = vrot.slane %v16075_v16, 4  ;;  %v16127_v31 = vadd.f32 %v16032_v23, %v16067_v34  ;;  %v6022_v61 = vmul.f32 %v16123_v53, %v16123_v53 }
 0xa61   :  { %v4489_v5 = vadd.f32 %v4488_v37, %v4487_v19  ;;  %v16141_v62 = vadd.f32 %v16034_v3, %v16060_v48  ;;  %v6718_v37 = vld [vmem:[%s16012_s5 + $0x100] sm:$0xff] }
 0xa62   :  { %12722 = vmatpush3.bf16.msra.mxu0 %v12721_v14  ;;  %12760 = vmatpush3.bf16.msra.mxu1 %v12721_v14  ;;  %v4476_v17 = vadd.f32 %v4475_v63, %v16075_v16  ;;  %v4483_v14 = vrot.slane %v4482_v13, 2  ;;  %v6023_v23 = vmul.f32 %v16127_v31, %v16127_v31  ;;  %v6025_v6 = vrot.slane %v6022_v61, 4 }
 0xa63   :  { %12723 = vmatprep.subr.bf16.mxu0 %v17313_v47  ;;  %v4490_v8 = vrot.slane %v4489_v5, 2 }
 0xa64   :  { %v4477_v41 = vrot.slane %v4476_v17, 2  ;;  %v4484_v46 = vadd.f32 %v4483_v14, %v4482_v13 }
 0xa66   :  { %v4485_v15 = vrot.slane %v4484_v46, 1 }
 0xa7d   :  { %v10100_v12 = vpop.f32.mrb[42].mxu0 }
 0xa7e   :  { %v10101_v45 = vpop.f32.mrb[43].mxu0 }
 0xa7f   :  { %v10102_v56 = vadd.f32 %v10101_v45, %v10100_v12  ;;  %v5355_v12 = vrot.slane %v16079_v57, 4  ;;  %v5361_v45 = vrot.slane %v16095_v22, 4 }
 0xa81   :  { %v5356_v18 = vadd.f32 %v5355_v12, %v16079_v57  ;;  %v5362_v43 = vadd.f32 %v5361_v45, %v16095_v22 }
 0xa83   :  { %v5363_v10 = vrot.slane %v5362_v43, 2 }
 0xa85   :  { %v5364_v27 = vadd.f32 %v5363_v10, %v5362_v43 }
 0xa8d   :  { %v6350_v39 = vpop.f32.mrb[44].mxu0 }
 0xa8e   :  { %v6351_v51 = vadd.f32 %v10102_v56, %v6350_v39  ;;  %v11079_v49 = vpop.f32.mrb[45].mxu0  ;;  %v4500_v56 = vrot.slane %v4497_v0, 4  ;;  %v4507_v39 = vadd.f32 %v4506_v38, %v4498_v44  ;;  %v6006_v44 = vrot.slane %v16127_v31, 4 }
 0xa8f   :  { %v5392_v49 = vsel %vm261_vm2, %v5379_v1, 0.0 }
 0xa90   :  { %v4501_v26 = vadd.f32 %v4500_v56, %v4497_v0  ;;  %v5393_v28 = vrot.slane %v5392_v49, 4  ;;  %v6000_v56 = vrot.slane %v16123_v53, 4  ;;  %v6007_v1 = vadd.f32 %v6006_v44, %v16127_v31 }
 0xa92   :  { %v4502_v58 = vrot.slane %v4501_v26, 2  ;;  %v5394_v24 = vadd.f32 %v5393_v28, %v5392_v49  ;;  %v6001_v3 = vadd.f32 %v6000_v56, %v16123_v53 }
 0xa94   :  { %v4503_v19 = vadd.f32 %v4502_v58, %v4501_v26 }
 0xaad   :  { %v10144_v9 = vpop.f32.mrb[46].mxu0 }
 0xaae   :  { %v10145_v4 = vpop.f32.mrb[47].mxu0 }
 0xaaf   :  { %v10146_v29 = vadd.f32 %v10145_v4, %v10144_v9  ;;  %v5382_v9 = vrot.slane %v5381_v50, 2  ;;  %v5387_v4 = vadd.f32 %v5386_v20, %v5378_v54  ;;  %v6031_v54 = vrot.slane %v6023_v23, 4 }
 0xab1   :  { %v6563_v21 = vadd.f32 %v10146_v29, %v6351_v51  ;;  %v5357_v51 = vrot.slane %v5356_v18, 2  ;;  %v16129_v29 = vadd.f32 %v4490_v8, %v4489_v5  ;;  %v5383_v0 = vadd.f32 %v5382_v9, %v5381_v50 }
 0xab2   :  { %v5388_v36 = vrot.slane %v5387_v4, 2  ;;  %v5365_v5 = vrot.slane %v5364_v27, 1  ;;  %v5395_v50 = vrot.slane %v5394_v24, 2  ;;  %v6026_v8 = vadd.f32 %v6025_v6, %v6022_v61 }
 0xab3   :  { %v5358_v30 = vadd.f32 %v5357_v51, %v5356_v18  ;;  %v5384_v38 = vrot.slane %v5383_v0, 1  ;;  %v4486_v51 = vadd.f32 %v4485_v15, %v4484_v46 }
 0xab4   :  { %v5389_v32 = vadd.f32 %v5388_v36, %v5387_v4  ;;  %v6027_v28 = vrot.slane %v6026_v8, 2 }
 0xab5   :  { %v5359_v45 = vrot.slane %v5358_v30, 1  ;;  %v5385_v58 = vadd.f32 %v5384_v38, %v5383_v0 }
 0xab6   :  { %v5390_v49 = vrot.slane %v5389_v32, 1 }
 0xab7   :  { %v5360_v20 = vadd.f32 %v5359_v45, %v5358_v30 }
 0xab8   :  { %v5391_v36 = vadd.f32 %v5390_v49, %v5389_v32 }
 0xabd   :  { %v6632_v2 = vpop.f32.mrb[48].mxu0 }
 0xabe   :  { %v16053_v11 = vadd.f32 %v6632_v2, %v6563_v21  ;;  %v11098_v35 = vpop.f32.mrb[49].mxu0  ;;  %v4478_v21 = vadd.f32 %v4477_v41, %v4476_v17  ;;  %v4508_v2 = vrot.slane %v4507_v39, 2  ;;  %v4504_v17 = vrot.slane %v4503_v19, 1 }
 0xabf   :  { %v5370_v35 = vrot.slane %v5369_v7, 2  ;;  %v6012_v41 = vsel %vm261_vm2, %v16141_v62, 0.0 }
 0xac0   :  { %v4479_v63 = vrot.slane %v4478_v21, 1  ;;  %v4509_v12 = vadd.f32 %v4508_v2, %v4507_v39  ;;  %v16146_v43 = vadd.f32 %v16053_v11, %v16060_v48  ;;  %v6032_v39 = vadd.f32 %v6031_v54, %v6023_v23 }
 0xac1   :  { %v5371_v25 = vadd.f32 %v5370_v35, %v5369_v7  ;;  %v5366_v7 = vadd.f32 %v5365_v5, %v5364_v27  ;;  %v4505_v10 = vadd.f32 %v4504_v17, %v4503_v19  ;;  %v6024_v11 = vmul.f32 %v16141_v62, %v16141_v62 }
 0xac2   :  { %v4480_v18 = vadd.f32 %v4479_v63, %v4478_v21  ;;  %v4510_v26 = vrot.slane %v4509_v12, 1  ;;  %v6008_v48 = vrot.slane %v6007_v1, 2  ;;  %v6651_v14 = vsel %vm261_vm2, %v16146_v43, 0.0 }
 0xac3   :  { %v5372_v13 = vrot.slane %v5371_v25, 1  ;;  %v16159_v21 = vadd.f32 %v5395_v50, %v5394_v24  ;;  %v6002_v2 = vrot.slane %v6001_v3, 2  ;;  %v6013_v35 = vrot.slane %v6012_v41, 4 }
 0xac4   :  { %v16155_v9 = vadd.f32 %v4510_v26, %v4509_v12  ;;  %v5375_v27 = vadd.f32 %v5366_v7, %v4486_v51  ;;  %v16161_v61 = vadd.f32 %v5360_v20, %v4480_v18  ;;  %v6033_v23 = vrot.slane %v6032_v39, 2 }
 0xac5   :  { %v16157_v4 = vadd.f32 %v5372_v13, %v5371_v25  ;;  %v6652_v19 = vrot.slane %v6651_v14, 4  ;;  %v16166_v63 = vadd.f32 %v5385_v58, %v4505_v10  ;;  %v6037_v44 = vsel %vm261_vm2, %v6024_v11, 0.0 }
 0xac6   :  { %v6663_v12 = vmul.f32 %v16146_v43, %v16146_v43  ;;  %v6009_v24 = vadd.f32 %v6008_v48, %v6007_v1  ;;  %v6003_v45 = vadd.f32 %v6002_v2, %v6001_v3  ;;  %v6014_v56 = vadd.f32 %v6013_v35, %v6012_v41 }
 0xac7   :  { %v6028_v54 = vadd.f32 %v6027_v28, %v6026_v8  ;;  %v6034_v38 = vadd.f32 %v6033_v23, %v6032_v39  ;;  %v6038_v15 = vrot.slane %v6037_v44, 4  ;;  %v6653_v32 = vadd.f32 %v6652_v19, %v6651_v14 }
 0xac8   :  { %v6676_v1 = vsel %vm261_vm2, %v6663_v12, 0.0  ;;  %v6010_v50 = vrot.slane %v6009_v24, 1  ;;  %v6004_v20 = vrot.slane %v6003_v45, 1  ;;  %v6015_v3 = vrot.slane %v6014_v56, 2 }
 0xac9   :  { %v6035_v51 = vrot.slane %v6034_v38, 1  ;;  %v6029_v10 = vrot.slane %v6028_v54, 1  ;;  %v6654_v39 = vrot.slane %v6653_v32, 2  ;;  %v6677_v58 = vrot.slane %v6676_v1, 4 }
 0xaca   :  { %v6039_v14 = vadd.f32 %v6038_v15, %v6037_v44  ;;  %v6011_v2 = vadd.f32 %v6010_v50, %v6009_v24  ;;  %v6005_v23 = vadd.f32 %v6004_v20, %v6003_v45  ;;  %v5400_v24 = vadd.f32 %v5391_v36, %v16155_v9 }
 0xacb   :  { %v17665_v9 = vrot.slane %v16118_v33, 2 }
 0xacc   :  { %v6020_v40 = vadd.f32 %v6011_v2, %v5375_v27  ;;  %v6040_v15 = vrot.slane %v6039_v14, 2 }
 0xacd   :  { %v4516_v36 = vadd.f32 %v17665_v9, %v16118_v33  ;;  %v16199_v33 = vld [vmem:[#allocation4] sm:$0xff]  ;;  %v7025_v9 = vld [vmem:[%s16214_s13 + $0x28] sm:$0xff] }
 0xace   :  { %3609 = vst.msk [vmem:[#allocation4 + $0x40] sm:$0x3] %vm3608_vm5, %v16199_v33  ;;  %3618 = vst.msk [vmem:[#allocation4 + $0x88] sm:$0x3] %vm3608_vm5, %v16199_v33 }
 0xafe   :  { %v6491_v30 = vpop.f32.mrb[44].mxu1 }
 0xaff   :  { %v16164_v46 = vadd.f32 %v6491_v30, %v16063_v42  ;;  %v6493_v0 = vpop.f32.mrb[45].mxu1  ;;  %v6016_v30 = vadd.f32 %v6015_v3, %v6014_v56 }
 0xb00   :  { %v16172_v25 = vadd.f32 %v6493_v0, %v16067_v34 }
 0xb01   :  { %v6639_v6 = vrot.slane %v16164_v46, 4  ;;  %v6661_v42 = vmul.f32 %v16164_v46, %v16164_v46  ;;  %v6017_v45 = vrot.slane %v6016_v30, 1 }
 0xb02   :  { %v6645_v5 = vrot.slane %v16172_v25, 4  ;;  %v6662_v17 = vmul.f32 %v16172_v25, %v16172_v25 }
 0xb03   :  { %v6640_v34 = vadd.f32 %v6639_v6, %v16164_v46  ;;  %v6664_v18 = vrot.slane %v6661_v42, 4  ;;  %v6036_v6 = vadd.f32 %v6035_v51, %v6034_v38  ;;  %v6721_v51 = vld [vmem:[%s16012_s5 + $0x118] sm:$0xff] }
 0xb04   :  { %v6646_v26 = vadd.f32 %v6645_v5, %v16172_v25  ;;  %v6670_v13 = vrot.slane %v6662_v17, 4  ;;  %v6030_v5 = vadd.f32 %v6029_v10, %v6028_v54  ;;  %v6041_v10 = vadd.f32 %v6040_v15, %v6039_v14 }
 0xb05   :  { %v6641_v8 = vrot.slane %v6640_v34, 2  ;;  %v6665_v41 = vadd.f32 %v6664_v18, %v6661_v42  ;;  %v6678_v18 = vadd.f32 %v6677_v58, %v6676_v1 }
 0xb06   :  { %v6647_v7 = vrot.slane %v6646_v26, 2  ;;  %v6671_v49 = vadd.f32 %v6670_v13, %v6662_v17  ;;  %v6655_v17 = vadd.f32 %v6654_v39, %v6653_v32  ;;  %v6045_v32 = vadd.f32 %v6036_v6, %v5400_v24 }
 0xb07   :  { %v6642_v11 = vadd.f32 %v6641_v8, %v6640_v34  ;;  %v6666_v48 = vrot.slane %v6665_v41, 2  ;;  %v6719_v34 = vld [vmem:[%s16012_s5 + $0x108] sm:$0xff]  ;;  %v6679_v3 = vrot.slane %v6678_v18, 2  ;;  %v6044_v27 = vadd.f32 %v6030_v5, %v16166_v63  ;;  %v7024_v5 = vld [vmem:[%s16214_s13 + $0x20] sm:$0xff] }
 0xb08   :  { %v6648_v35 = vadd.f32 %v6647_v7, %v6646_v26  ;;  %v6672_v28 = vrot.slane %v6671_v49, 2  ;;  %v6019_v26 = vadd.f32 %v6005_v23, %v16161_v61  ;;  %v12724_v54 = vpack.c.bf16 %v6719_v34, %v6718_v37  ;;  %v6720_v7 = vld [vmem:[%s16012_s5 + $0x110] sm:$0xff] }
 0xb09   :  { %v6643_v19 = vrot.slane %v6642_v11, 1  ;;  %v6667_v0 = vadd.f32 %v6666_v48, %v6665_v41  ;;  %v6656_v20 = vrot.slane %v6655_v17, 1  ;;  %v17666_v61 = vrot.slane %v16129_v29, 1 }
 0xb0a   :  { %v6649_v12 = vrot.slane %v6648_v35, 1  ;;  %v6673_v42 = vadd.f32 %v6672_v28, %v6671_v49  ;;  %v6018_v37 = vadd.f32 %v6017_v45, %v6016_v30  ;;  %v12727_v58 = vpack.c.bf16 %v6721_v51, %v6720_v7  ;;  %v7022_v51 = vld [vmem:[%s16214_s13 + $0x10] sm:$0xff] }
 0xb0b   :  { %v6644_v13 = vadd.f32 %v6643_v19, %v6642_v11  ;;  %v6668_v8 = vrot.slane %v6667_v0, 1  ;;  %v5397_v11 = vrot.slane %v16159_v21, 1  ;;  %v6657_v48 = vadd.f32 %v6656_v20, %v6655_v17  ;;  %v7020_v17 = vld [vmem:[%s16214_s13] sm:$0xff] }
 0xb0c   :  { %v6650_v44 = vadd.f32 %v6649_v12, %v6648_v35  ;;  %v6674_v56 = vrot.slane %v6673_v42, 1  ;;  %v6680_v2 = vadd.f32 %v6679_v3, %v6678_v18  ;;  %v6042_v14 = vrot.slane %v6041_v10, 1 }
 0xb0d   :  { %v6669_v38 = vadd.f32 %v6668_v8, %v6667_v0  ;;  %v6658_v41 = vadd.f32 %v6644_v13, %v6019_v26  ;;  %v5398_v28 = vadd.f32 %v5397_v11, %v16159_v21  ;;  %v7021_v21 = vld [vmem:[%s16214_s13 + $0x8] sm:$0xff]  ;;  %v7023_v13 = vld [vmem:[%s16214_s13 + $0x18] sm:$0xff] }
 0xb0e   :  { %v6659_v50 = vadd.f32 %v6650_v44, %v6020_v40  ;;  %v6675_v1 = vadd.f32 %v6674_v56, %v6673_v42  ;;  %v4493_v40 = vadd.f32 %v17666_v61, %v16129_v29  ;;  %v4517_v29 = vrot.slane %v4516_v36, 1 }
 0xb0f   :  { %v6683_v39 = vadd.f32 %v6669_v38, %v6044_v27  ;;  %v6681_v30 = vrot.slane %v6680_v2, 1  ;;  %v6043_v19 = vadd.f32 %v6042_v14, %v6041_v10  ;;  %v12767_v18 = vpack.c.bf16 %v7024_v5, %v7021_v21  ;;  %v7017_v10 = vld [vmem:[%s9444_s21] sm:$0x1]  ;;  %v7853_v14 = vld [vmem:[%s16242_s25 + $0x98] sm:$0xff] }
 0xb10   :  { %6789 = vmatprep.mubr.f32.mxu0 %v6659_v50  ;;  %v6684_v49 = vadd.f32 %v6675_v1, %v6045_v32  ;;  %v5376_v63 = vadd.f32 %v16157_v4, %v4493_v40  ;;  %v4518_v23 = vadd.f32 %v4517_v29, %v4516_v36  ;;  %v12769_v34 = vpack.c.bf16 %v7023_v13, %v7020_v17  ;;  %v7013_v36 = vld [vmem:[%s9443_s17] sm:$0x1]  ;;  %v7852_v29 = vld [vmem:[%s16242_s25 + $0x90] sm:$0xff]  ;;  %v7857_v21 = vld [vmem:[%s16242_s25 + $0xb8] sm:$0xff] }
 0xb11   :  { %6790 = vmatmul.mubr.f32.vlgmr.msra.gmra.mrb[50].mxu0 %v6658_v41  ;;  %v6682_v12 = vadd.f32 %v6681_v30, %v6680_v2  ;;  %v12772_v61 = vpack.c.bf16 %v7025_v9, %v7022_v51  ;;  %v7840_v17 = vld [vmem:[%s16242_s25 + $0x30] sm:$0xff] }
 0xb12   :  { %12725 = vmatpush3.bf16.msra.mxu0 %v12724_v54  ;;  %6932 = vmatprep.mubr.f32.mxu1 %v6684_v49  ;;  %v6021_v35 = vadd.f32 %v6018_v37, %v5376_v63  ;;  %v5401_v0 = vadd.f32 %v5398_v28, %v4518_v23  ;;  %v7834_v63 = vld [vmem:[%s16242_s25] sm:$0xff]  ;;  %v7836_v28 = vld [vmem:[%s16242_s25 + $0x10] sm:$0xff]  ;;  %v7855_v23 = vld [vmem:[%s16242_s25 + $0xa8] sm:$0xff] }
 0xb13   :  { %6933 = vmatmul.mubr.f32.vlgmr.msra.gmra.mrb[46].mxu1 %v6683_v39  ;;  %12726 = vmatprep.subr.bf16.mxu0 %v17313_v47 }
 0xb14   :  { %11107 = vmatprep.mubr.msk.f32.mxu0 %vm13248_vm0, %v16199_v33  ;;  %v6660_v4 = vadd.f32 %v6657_v48, %v6021_v35  ;;  %v6046_v6 = vadd.f32 %v6043_v19, %v5401_v0  ;;  %v7835_v48 = vld [vmem:[%s16242_s25 + $0x8] sm:$0xff]  ;;  %v16258_v35 = vpack.c.bf16 %v7853_v14, %v7852_v29  ;;  %v7838_v0 = vld [vmem:[%s16242_s25 + $0x20] sm:$0xff] }
 0xb15   :  { %v16252_v2 = vpack.c.bf16 %v7835_v48, %v7834_v63  ;;  %v7808_v63 = vld [vmem:[%s16312_s29 + $0x80] sm:$0xff]  ;;  %v7809_v48 = vld [vmem:[%s16312_s29 + $0x88] sm:$0xff] }
 0xb16   :  { %12728 = vmatpush3.bf16.msra.mxu0 %v12727_v58  ;;  %v6685_v42 = vadd.f32 %v6682_v12, %v6046_v6  ;;  %v7839_v12 = vld [vmem:[%s16242_s25 + $0x28] sm:$0xff]  ;;  %v16345_v29 = vpack.c.bf16 %v7809_v48, %v7808_v63  ;;  %v8273_v14 = vld [vmem:[%s16317_s3 + $0x80] sm:$0xff] }
 0xb17   :  { %12761 = vmatprep.subr.bf16.mxu0 %v17313_v47  ;;  %v16272_v6 = vpack.c.bf16 %v7839_v12, %v7838_v0 }
 0xb19   :  { %11108 = vmatmul.mubr.msk.f32.vlgmr.msra.gmra.mrb[52].mxu0 %vm261_vm2, %v6660_v4  ;;  %v7854_v4 = vld [vmem:[%s16242_s25 + $0xa0] sm:$0xff] }
 0xb1a   :  { %12763 = vmatpush3.bf16.msra.mxu0 %v12724_v54  ;;  %11118 = vmatprep.mubr.msk.f32.mxu0 %vm13248_vm0, %v16199_v33  ;;  %v16268_v19 = vpack.c.bf16 %v7855_v23, %v7854_v4 }
 0xb1b   :  { %12764 = vmatprep.subr.bf16.mxu0 %v17313_v47 }
 0xb1e   :  { %12766 = vmatpush3.bf16.msra.mxu0 %v12727_v58  ;;  %v7851_v58 = vld [vmem:[%s16242_s25 + $0x88] sm:$0xff] }
 0xb1f   :  { %12768 = vmatprep.subr.bf16.mxu0 %v12767_v18 }
 0xb21   :  { %11119 = vmatmul.mubr.msk.f32.vlgmr.msra.gmra.mrb[54].mxu0 %vm261_vm2, %v6685_v42  ;;  %v7856_v42 = vld [vmem:[%s16242_s25 + $0xb0] sm:$0xff] }
 0xb22   :  { %7093 = vmatprep.mubr.f32.mxu0 %v16199_v33  ;;  %12770 = vmatpush1.bf16.msra.mxu0 %v12769_v34  ;;  %v16278_v5 = vpack.c.bf16 %v7857_v21, %v7856_v42 }
 0xb23   :  { %12771 = vmatprep.subr.bf16.mxu0 %v17313_v47 }
 0xbe4   :  { %v10188_v8 = vpop.f32.mrb[50].mxu0 }
 0xbe5   :  { %v10189_v44 = vpop.f32.mrb[51].mxu0 }
 0xbe6   :  { %v10190_v24 = vadd.f32 %v10189_v44, %v10188_v8  ;;  %v10228_v56 = vpop.f32.mrb[46].mxu1  ;;  %v7859_v8 = vld [vmem:[%s16242_s25 + $0xc8] sm:$0xff]  ;;  %v7842_v44 = vld [vmem:[%s16242_s25 + $0x40] sm:$0xff] }
 0xbe7   :  { %v10229_v45 = vpop.f32.mrb[47].mxu1 }
 0xbe8   :  { %v10230_v15 = vadd.f32 %v10229_v45, %v10228_v56  ;;  %v7843_v56 = vld [vmem:[%s16242_s25 + $0x48] sm:$0xff]  ;;  %v7860_v45 = vld [vmem:[%s16242_s25 + $0xd0] sm:$0xff] }
 0xbec   :  { %v6861_v26 = vpop.f32.mrb[52].mxu0 }
 0xbed   :  { %v6862_v38 = vadd.f32 %v10190_v24, %v6861_v26  ;;  %v11109_v50 = vpop.f32.mrb[53].mxu0  ;;  %v16294_v26 = vpack.c.bf16 %v7843_v56, %v7842_v44 }
 0xbef   :  { %v7009_v54 = vmul.f32 0.001953125, %v6862_v38  ;;  %v7844_v38 = vld [vmem:[%s16242_s25 + $0x50] sm:$0xff] }
 0xbf1   :  { %v7011_v3 = vmul.f32 %v7009_v54, %v7009_v54 }
 0xbf4   :  { %v7004_v32 = vpop.f32.mrb[54].mxu0 }
 0xbf5   :  { %v7005_v1 = vadd.f32 %v10230_v15, %v7004_v32  ;;  %v11120_v20 = vpop.f32.mrb[55].mxu0  ;;  %v7861_v15 = vld [vmem:[%s16242_s25 + $0xd8] sm:$0xff]  ;;  %v7866_v32 = vld [vmem:[%s16242_s25 + $0x100] sm:$0xff] }
 0xbf6   :  { %v16298_v50 = vpack.c.bf16 %v7861_v15, %v7860_v45  ;;  %v7862_v20 = vld [vmem:[%s16242_s25 + $0xe0] sm:$0xff] }
 0xbf7   :  { %v7010_v41 = vmul.f32 0.001953125, %v7005_v1  ;;  %v7867_v1 = vld [vmem:[%s16242_s25 + $0x108] sm:$0xff] }
 0xbf9   :  { %v7012_v27 = vsub.f32 %v7010_v41, %v7011_v3  ;;  %v7863_v3 = vld [vmem:[%s16242_s25 + $0xe8] sm:$0xff]  ;;  %v16305_v41 = vpack.c.bf16 %v7867_v1, %v7866_v32 }
 0xbfb   :  { %v7014_v7 = vadd.f32 1e-05, %v7012_v27  ;;  %v7868_v27 = vld [vmem:[%s16242_s25 + $0x110] sm:$0xff]  ;;  %12814 = vmatprep.subr.bf16.mxu1 %v16305_v41 }
 0xbfc   :  { %12816 = vmatpush3.bf16.msra.mxu1 %v16305_v41 }
 0xbfd   :  { %13223 = vrsqrt.f32 %v7014_v7  ;;  %v7869_v7 = vld [vmem:[%s16242_s25 + $0x118] sm:$0xff] }
 0xbfe   :  { %v16323_v9 = vpack.c.bf16 %v7869_v7, %v7868_v27 }
 0xc00   :  { %12818 = vmatprep.subr.bf16.mxu1 %v16323_v9 }
 0xc01   :  { %12820 = vmatpush3.bf16.msra.mxu1 %v16323_v9 }
 0xc02   :  { %12822 = vmatprep.subr.bf16.mxu1 %v16345_v29 }
 0xc07   :  { %v13224_v49 = vpop.eup %13223 }
 0xc08   :  { %v7016_v40 = vmul.f32 %v13224_v49, %v7013_v36  ;;  %v16326_v36 = vpack.c.bf16 %v7863_v3, %v7862_v20  ;;  %v7846_v49 = vld [vmem:[%s16242_s25 + $0x60] sm:$0xff] }
 0xc0a   :  { %9516 = vmatmul.mubr.msk.f32.vlgmr.msra.gmra.mrb[56].mxu0 %vm986_vm7, %v7016_v40  ;;  %v7018_v37 = vmul.f32 %v7016_v40, %v7009_v54  ;;  %v7845_v54 = vld [vmem:[%s16242_s25 + $0x58] sm:$0xff] }
 0xc0b   :  { %12773 = vmatpush3.bf16.msra.mxu0 %v12772_v61  ;;  %11125 = vmatprep.mubr.msk.f32.mxu0 %vm13248_vm0, %v16199_v33  ;;  %v16320_v51 = vpack.c.bf16 %v7845_v54, %v7844_v38 }
 0xc0c   :  { %12775 = vmatprep.subr.bf16.mxu0 %v12767_v18  ;;  %v7019_v39 = vsub.f32 %v7017_v10, %v7018_v37  ;;  %v7841_v18 = vld [vmem:[%s16242_s25 + $0x38] sm:$0xff] }
 0xc0d   :  { %v16282_v13 = vpack.c.bf16 %v7841_v18, %v7840_v17  ;;  %v7865_v37 = vld [vmem:[%s16242_s25 + $0xf8] sm:$0xff] }
 0xc0e   :  { %11126 = vmatmul.mubr.msk.f32.vlgmr.msra.gmra.mrb[58].mxu0 %vm986_vm7, %v7016_v40  ;;  %v7864_v40 = vld [vmem:[%s16242_s25 + $0xf0] sm:$0xff] }
 0xc0f   :  { %12777 = vmatpush1.bf16.msra.mxu0 %v12769_v34  ;;  %7237 = vmatprep.mubr.f32.mxu0 %v16199_v33  ;;  %v7858_v34 = vld [vmem:[%s16242_s25 + $0xc0] sm:$0xff] }
 0xc10   :  { %12778 = vmatprep.subr.bf16.mxu0 %v17313_v47  ;;  %v7850_v47 = vld [vmem:[%s16242_s25 + $0x80] sm:$0xff]  ;;  %v16288_v24 = vpack.c.bf16 %v7859_v8, %v7858_v34 }
 0xc11   :  { %v16249_v11 = vpack.c.bf16 %v7851_v58, %v7850_v47  ;;  %v16339_v47 = vpack.c.bf16 %v7865_v37, %v7864_v40  ;;  %v7849_v58 = vld [vmem:[%s16242_s25 + $0x78] sm:$0xff] }
 0xc12   :  { %9518 = vmatmul.mubr.msk.f32.vlgmr.msra.gmra.mrb[60].mxu0 %vm986_vm7, %v7019_v39 }
 0xc13   :  { %12780 = vmatpush3.bf16.msra.mxu0 %v12772_v61  ;;  %11132 = vmatprep.mubr.msk.f32.mxu0 %vm13248_vm0, %v16199_v33  ;;  %v7837_v33 = vld [vmem:[%s16242_s25 + $0x18] sm:$0xff]  ;;  %v7847_v61 = vld [vmem:[%s16242_s25 + $0x68] sm:$0xff] }
 0xc14   :  { %12782 = vmatprep.subr.bf16.mxu0 %v16249_v11  ;;  %v16262_v30 = vpack.c.bf16 %v7837_v33, %v7836_v28  ;;  %v16335_v10 = vpack.c.bf16 %v7847_v61, %v7846_v49  ;;  %v8274_v28 = vld [vmem:[%s16317_s3 + $0x88] sm:$0xff] }
 0xc15   :  { %v16354_v4 = vpack.c.bf16 %v8274_v28, %v8273_v14 }
 0xc16   :  { %11133 = vmatmul.mubr.msk.f32.vlgmr.msra.gmra.mrb[62].mxu0 %vm986_vm7, %v7019_v39  ;;  %v7848_v39 = vld [vmem:[%s16242_s25 + $0x70] sm:$0xff] }
 0xc17   :  { %12784 = vmatpush3.bf16.msra.mxu0 %v16252_v2  ;;  %v16350_v33 = vpack.c.bf16 %v7849_v58, %v7848_v39 }
 0xc18   :  { %12786 = vmatprep.subr.bf16.mxu0 %v16258_v35 }
 0xc1b   :  { %12788 = vmatpush3.bf16.msra.mxu0 %v16262_v30 }
 0xc1c   :  { %12790 = vmatprep.subr.bf16.mxu0 %v16268_v19 }
 0xc1f   :  { %12792 = vmatpush3.bf16.msra.mxu0 %v16272_v6 }
 0xc20   :  { %12794 = vmatprep.subr.bf16.mxu0 %v16278_v5 }
 0xc23   :  { %12796 = vmatpush3.bf16.msra.mxu0 %v16282_v13 }
 0xc24   :  { %12798 = vmatprep.subr.bf16.mxu0 %v16288_v24 }
 0xc27   :  { %12800 = vmatpush3.bf16.msra.mxu0 %v16294_v26 }
 0xc28   :  { %12802 = vmatprep.subr.bf16.mxu0 %v16298_v50 }
 0xc2b   :  { %12804 = vmatpush3.bf16.msra.mxu0 %v16320_v51 }
 0xc2c   :  { %12806 = vmatprep.subr.bf16.mxu0 %v16326_v36 }
 0xc2f   :  { %12808 = vmatpush3.bf16.msra.mxu0 %v16335_v10 }
 0xc30   :  { %12810 = vmatprep.subr.bf16.mxu0 %v16339_v47 }
 0xc33   :  { %12812 = vmatpush3.bf16.msra.mxu0 %v16350_v33 }
 0xc34   :  { %12862 = vmatprep.subr.bf16.mxu0 %v16354_v4 }
 0xcdd   :  { %v7095_v23 = vpop.f32.mrb[56].mxu0 }
 0xcde   :  { %v7097_v0 = vpop.f32.mrb[57].mxu0  ;;  %v7317_v12 = vrot.slane %v7095_v23, %v17663_v55 }
 0xcdf   :  { %v7321_v21 = vrot.slane %v7097_v0, %v17663_v55 }
 0xce0   :  { %v7326_v18 = vmul.f32 %v7317_v12, %v16075_v16  ;;  %v7451_v34 = vmul.f32 %v7317_v12, %v16079_v57  ;;  %v7562_v8 = vmul.f32 %v7317_v12, %v16123_v53  ;;  %v7674_v56 = vmul.f32 %v7317_v12, %v16164_v46 }
 0xce1   :  { %v7166_v42 = vpop.f32.mrb[58].mxu0  ;;  %v7327_v45 = vmul.f32 %v7321_v21, %v16083_v60  ;;  %v7452_v15 = vmul.f32 %v7321_v21, %v16095_v22  ;;  %v7563_v32 = vmul.f32 %v7321_v21, %v16127_v31  ;;  %v7675_v1 = vmul.f32 %v7321_v21, %v16172_v25 }
 0xce2   :  { %v11127_v17 = vpop.f32.mrb[59].mxu0  ;;  %v7325_v16 = vrot.slane %v7166_v42, %v17663_v55 }
 0xce5   :  { %v7239_v44 = vpop.f32.mrb[60].mxu0 }
 0xce6   :  { %v7332_v38 = vrot.slane %v7239_v44, %v17663_v55  ;;  %v7241_v54 = vpop.f32.mrb[61].mxu0  ;;  %v7564_v44 = vmul.f32 %v7325_v16, %v16141_v62 }
 0xce7   :  { %v7336_v57 = vrot.slane %v7241_v54, %v17663_v55 }
 0xce8   :  { %v7341_v20 = vadd.f32 %v7332_v38, %v7326_v18  ;;  %v7454_v53 = vadd.f32 %v7451_v34, %v7332_v38  ;;  %v7565_v3 = vadd.f32 %v7562_v8, %v7332_v38  ;;  %v7677_v27 = vadd.f32 %v7674_v56, %v7332_v38 }
 0xce9   :  { %v7342_v46 = vadd.f32 %v7336_v57, %v7327_v45  ;;  %v7455_v7 = vadd.f32 %v7452_v15, %v7336_v57  ;;  %v7566_v60 = vadd.f32 %v7563_v32, %v7336_v57  ;;  %v7678_v49 = vadd.f32 %v7675_v1, %v7336_v57  ;;  %v7310_v22 = vpop.f32.mrb[62].mxu0  ;;  %v17670_v1 = vld [vmem:[#allocation18_spill] sm:$0xff] }
 0xcea   :  { %v7344_v61 = vmax.f32 %v7341_v20, 0.0  ;;  %v7457_v40 = vmax.f32 %v7454_v53, 0.0  ;;  %v7568_v37 = vmax.f32 %v7565_v3, 0.0  ;;  %v7680_v39 = vmax.f32 %v7677_v27, 0.0  ;;  %v11134_v31 = vpop.f32.mrb[63].mxu0 }
 0xceb   :  { %v7345_v58 = vmax.f32 %v7342_v46, 0.0  ;;  %v7458_v25 = vmax.f32 %v7455_v7, 0.0  ;;  %v7569_v63 = vmax.f32 %v7566_v60, 0.0  ;;  %v7681_v48 = vmax.f32 %v7678_v49, 0.0 }
 0xcec   :  { %v7340_v14 = vrot.slane %v7310_v22, %v17663_v55  ;;  %v7328_v34 = vmul.f32 %v7325_v16, %v16071_v59  ;;  %v7453_v8 = vmul.f32 %v7325_v16, %v16091_v52  ;;  %v7676_v56 = vmul.f32 %v7325_v16, %v16146_v43 }
 0xced   :  { %v7350_v28 = vcombine.low %v7344_v61, %v7345_v58  ;;  %v7401_v23 = vcombine.high %v7344_v61, %v7345_v58  ;;  %v7463_v0 = vcombine.low %v7457_v40, %v7458_v25  ;;  %v7512_v12 = vcombine.high %v7457_v40, %v7458_v25 }
 0xcee   :  { %v7574_v42 = vcombine.low %v7568_v37, %v7569_v63  ;;  %v7624_v21 = vcombine.high %v7568_v37, %v7569_v63  ;;  %v7686_v17 = vcombine.low %v7680_v39, %v7681_v48  ;;  %v7735_v18 = vcombine.high %v7680_v39, %v7681_v48 }
 0xcef   :  { %v17667_v45 = vlaneseq  ;;  %v7343_v55 = vadd.f32 %v7340_v14, %v7328_v34  ;;  %v7456_v38 = vadd.f32 %v7453_v8, %v7340_v14  ;;  %v7567_v54 = vadd.f32 %v7564_v44, %v7340_v14 }
 0xcf0   :  { %v7679_v32 = vadd.f32 %v7676_v56, %v7340_v14  ;;  %v7357_v57 = vrot.slane %v7350_v28, %v17670_v1  ;;  %v7409_v20 = vrot.slane %v7401_v23, %v17670_v1  ;;  %v7470_v59 = vrot.slane %v7463_v0, %v17670_v1 }
 0xcf1   :  { %vm16377_vm0 = vcmp.lt.s32.totalorder %v17667_v45, 288  ;;  %v7520_v52 = vrot.slane %v7512_v12, %v17670_v1  ;;  %v7346_v62 = vmax.f32 %v7343_v55, 0.0  ;;  %v7459_v53 = vmax.f32 %v7456_v38, 0.0 }
 0xcf2   :  { %v7570_v43 = vmax.f32 %v7567_v54, 0.0  ;;  %v16385_v16 = vmax.f32 %v7679_v32, 0.0  ;;  %v7581_v3 = vrot.slane %v7574_v42, %v17670_v1  ;;  %v16389_v27 = vrot.slane %v7624_v21, %v17670_v1 }
 0xcf3   :  { %v16392_v46 = vrot.slane %v7686_v17, %v17670_v1  ;;  %v16395_v7 = vrot.slane %v7735_v18, %v17670_v1  ;;  %v7364_v60 = vrot.slane %v7346_v62, %v17670_v1  ;;  %v7402_v49 = vcombine.high %v7346_v62, %v7346_v62 }
 0xcf4   :  { %v7477_v22 = vrot.slane %v7459_v53, %v17670_v1  ;;  %v7513_v61 = vcombine.high %v7459_v53, %v7459_v53  ;;  %v7588_v40 = vrot.slane %v7570_v43, %v17670_v1  ;;  %v7625_v37 = vcombine.high %v7570_v43, %v7570_v43 }
 0xcf5   :  { %v7700_v39 = vrot.slane %v16385_v16, %v17670_v1  ;;  %v7736_v31 = vcombine.high %v16385_v16, %v16385_v16  ;;  %v7365_v58 = vcombine.low %v7357_v57, %v7364_v60  ;;  %v7379_v25 = vcombine.high %v7357_v57, %v7364_v60 }
 0xcf6   :  { %v7416_v63 = vrot.slane %v7402_v49, %v17670_v1  ;;  %v7478_v48 = vcombine.low %v7470_v59, %v7477_v22  ;;  %v7490_v14 = vcombine.high %v7470_v59, %v7477_v22  ;;  %v7527_v28 = vrot.slane %v7513_v61, %v17670_v1 }
 0xcf7   :  { %v7589_v23 = vcombine.low %v7581_v3, %v7588_v40  ;;  %v7602_v0 = vcombine.high %v7581_v3, %v7588_v40  ;;  %v7372_v12 = vrot.slane %v7365_v58, %v17670_v1  ;;  %v7386_v42 = vrot.slane %v7379_v25, %v17670_v1 }
 0xcf8   :  { %v7417_v21 = vcombine.low %v7409_v20, %v7416_v63  ;;  %v7429_v17 = vcombine.high %v7409_v20, %v7416_v63  ;;  %v7485_v18 = vrot.slane %v7478_v48, %v17670_v1  ;;  %v7497_v34 = vrot.slane %v7490_v14, %v17670_v1 }
 0xcf9   :  { %v7528_v8 = vcombine.low %v7520_v52, %v7527_v28  ;;  %v7540_v44 = vcombine.high %v7520_v52, %v7527_v28  ;;  %7377 = vst.msk [vmem:[#allocation4 + $0x1] ss:$8 sm:$0x7] %vm16377_vm0, %v7372_v12  ;;  %7389 = vst.msk [vmem:[#allocation4 + $0x3] ss:$8 sm:$0x7] %vm16377_vm0, %v7386_v42  ;;  %v7391_v56 = vcombine.high %v7372_v12, %v7372_v12 }
 0xcfa   :  { %v7396_v45 = vcombine.high %v7386_v42, %v7386_v42  ;;  %v7424_v55 = vrot.slane %v7417_v21, %v17670_v1  ;;  %v7436_v38 = vrot.slane %v7429_v17, %v17670_v1  ;;  %7488 = vst.msk [vmem:[#allocation4 + $0x2] ss:$8 sm:$0x7] %vm16377_vm0, %v7485_v18  ;;  %7500 = vst.msk [vmem:[#allocation4 + $0x4] ss:$8 sm:$0x7] %vm16377_vm0, %v7497_v34 }
 0xcfb   :  { %v7502_v54 = vcombine.high %v7485_v18, %v7485_v18  ;;  %v7507_v32 = vcombine.high %v7497_v34, %v7497_v34  ;;  %v7535_v57 = vrot.slane %v7528_v8, %v17670_v1  ;;  %v7547_v20 = vrot.slane %v7540_v44, %v17670_v1  ;;  %7394 = vst.msk [vmem:[#allocation4 + $0x5] ss:$8 sm:$0x7] %vm16377_vm0, %v7391_v56  ;;  %v7792_v12 = vld [vmem:[%s16312_s29] sm:$0xff]  ;;  %v7793_v42 = vld [vmem:[%s16312_s29 + $0x8] sm:$0xff]  ;;  %v7810_v56 = vld [vmem:[%s16312_s29 + $0x90] sm:$0xff] }
 0xcfc   :  { %7399 = vst.msk [vmem:[#allocation4 + $0x7] ss:$8 sm:$0x7] %vm16377_vm0, %v7396_v45  ;;  %7427 = vst.msk [vmem:[#allocation4 + $0x19] ss:$8 sm:$0x7] %vm16377_vm0, %v7424_v55  ;;  %v7441_v59 = vcombine.high %v7424_v55, %v7424_v55  ;;  %v7446_v52 = vcombine.high %v7436_v38, %v7436_v38  ;;  %v7596_v62 = vrot.slane %v7589_v23, %v17670_v1 }
 0xcfd   :  { %7439 = vst.msk [vmem:[#allocation4 + $0x1b] ss:$8 sm:$0x7] %vm16377_vm0, %v7436_v38  ;;  %v7609_v53 = vrot.slane %v7602_v0, %v17670_v1  ;;  %7505 = vst.msk [vmem:[#allocation4 + $0x6] ss:$8 sm:$0x7] %vm16377_vm0, %v7502_v54  ;;  %v7552_v43 = vcombine.high %v7535_v57, %v7535_v57  ;;  %v7557_v16 = vcombine.high %v7547_v20, %v7547_v20 }
 0xcfe   :  { %7510 = vst.msk [vmem:[#allocation4 + $0x18] ss:$8 sm:$0x7] %vm16377_vm0, %v7507_v32  ;;  %7538 = vst.msk [vmem:[#allocation4 + $0x1a] ss:$8 sm:$0x7] %vm16377_vm0, %v7535_v57  ;;  %v7639_v3 = vrot.slane %v7625_v37, %v17670_v1  ;;  %v7701_v60 = vcombine.low %v16392_v46, %v7700_v39  ;;  %v7614_v49 = vcombine.high %v7596_v62, %v7596_v62 }
 0xcff   :  { %7550 = vst.msk [vmem:[#allocation4 + $0x1c] ss:$8 sm:$0x7] %vm16377_vm0, %v7547_v20  ;;  %7444 = vst.msk [vmem:[#allocation4 + $0x1d] ss:$8 sm:$0x7] %vm16377_vm0, %v7441_v59  ;;  %v7619_v22 = vcombine.high %v7609_v53, %v7609_v53  ;;  %v7713_v61 = vcombine.high %v16392_v46, %v7700_v39  ;;  %v7750_v40 = vrot.slane %v7736_v31, %v17670_v1 }
 0xd00   :  { %7449 = vst.msk [vmem:[#allocation4 + $0x1f] ss:$8 sm:$0x7] %vm16377_vm0, %v7446_v52  ;;  %7600 = vst.msk [vmem:[#allocation4 + $0x49] ss:$8 sm:$0x7] %vm16377_vm0, %v7596_v62  ;;  %v7640_v37 = vcombine.low %v16389_v27, %v7639_v3  ;;  %v7652_v58 = vcombine.high %v16389_v27, %v7639_v3  ;;  %v7708_v25 = vrot.slane %v7701_v60, %v17670_v1 }
 0xd01   :  { %7612 = vst.msk [vmem:[#allocation4 + $0x4b] ss:$8 sm:$0x7] %vm16377_vm0, %v7609_v53  ;;  %7555 = vst.msk [vmem:[#allocation4 + $0x1e] ss:$8 sm:$0x7] %vm16377_vm0, %v7552_v43  ;;  %v7720_v46 = vrot.slane %v7713_v61, %v17670_v1  ;;  %v7751_v39 = vcombine.low %v16395_v7, %v7750_v40  ;;  %v7763_v31 = vcombine.high %v16395_v7, %v7750_v40 }
 0xd02   :  { %7560 = vst.msk [vmem:[#allocation4 + $0x30] ss:$8 sm:$0x7] %vm16377_vm0, %v7557_v16  ;;  %7617 = vst.msk [vmem:[#allocation4 + $0x4d] ss:$8 sm:$0x7] %vm16377_vm0, %v7614_v49  ;;  %v7647_v63 = vrot.slane %v7640_v37, %v17670_v1  ;;  %v7659_v27 = vrot.slane %v7652_v58, %v17670_v1  ;;  %v7725_v48 = vcombine.high %v7708_v25, %v7708_v25 }
 0xd03   :  { %7622 = vst.msk [vmem:[#allocation4 + $0x4f] ss:$8 sm:$0x7] %vm16377_vm0, %v7619_v22  ;;  %7711 = vst.msk [vmem:[#allocation4 + $0x4a] ss:$8 sm:$0x7] %vm16377_vm0, %v7708_v25  ;;  %v7730_v14 = vcombine.high %v7720_v46, %v7720_v46  ;;  %v7758_v28 = vrot.slane %v7751_v39, %v17670_v1  ;;  %v7770_v23 = vrot.slane %v7763_v31, %v17670_v1 }
 0xd04   :  { %7723 = vst.msk [vmem:[#allocation4 + $0x4c] ss:$8 sm:$0x7] %vm16377_vm0, %v7720_v46  ;;  %7650 = vst.msk [vmem:[#allocation4 + $0x61] ss:$8 sm:$0x7] %vm16377_vm0, %v7647_v63  ;;  %v7664_v7 = vcombine.high %v7647_v63, %v7647_v63  ;;  %v7669_v0 = vcombine.high %v7659_v27, %v7659_v27  ;;  %v16511_v3 = vpack.c.bf16 %v7793_v42, %v7792_v12 }
 0xd05   :  { %7662 = vst.msk [vmem:[#allocation4 + $0x63] ss:$8 sm:$0x7] %vm16377_vm0, %v7659_v27  ;;  %7728 = vst.msk [vmem:[#allocation4 + $0x4e] ss:$8 sm:$0x7] %vm16377_vm0, %v7725_v48  ;;  %v7775_v1 = vcombine.high %v7758_v28, %v7758_v28  ;;  %v7780_v18 = vcombine.high %v7770_v23, %v7770_v23 }
 0xd06   :  { %v8257_v21 = vld [vmem:[%s16317_s3] sm:$0xff]  ;;  %v8258_v17 = vld [vmem:[%s16317_s3 + $0x8] sm:$0xff]  ;;  %7733 = vst.msk [vmem:[#allocation4 + $0x60] ss:$8 sm:$0x7] %vm16377_vm0, %v7730_v14  ;;  %v7811_v45 = vld [vmem:[%s16312_s29 + $0x98] sm:$0xff] }
 0xd07   :  { %7761 = vst.msk [vmem:[#allocation4 + $0x62] ss:$8 sm:$0x7] %vm16377_vm0, %v7758_v28  ;;  %7773 = vst.msk [vmem:[#allocation4 + $0x64] ss:$8 sm:$0x7] %vm16377_vm0, %v7770_v23  ;;  %v16513_v60 = vpack.c.bf16 %v8258_v17, %v8257_v21  ;;  %v16534_v27 = vpack.c.bf16 %v7811_v45, %v7810_v56 }
 0xd08   :  { %v7829_v34 = vld [vmem:[#allocation4 + $0x8] sm:$0xfe]  ;;  %v7830_v8 = vld [vmem:[#allocation4 + $0x10] sm:$0xfe]  ;;  %v7828_v44 = vld [vmem:[#allocation4] sm:$0xfe] }
 0xd09   :  { %7667 = vst.msk [vmem:[#allocation4 + $0x65] ss:$8 sm:$0x7] %vm16377_vm0, %v7664_v7  ;;  %7672 = vst.msk [vmem:[#allocation4 + $0x67] ss:$8 sm:$0x7] %vm16377_vm0, %v7669_v0 }
 0xd0a   :  { %v8275_v55 = vld [vmem:[%s16317_s3 + $0x90] sm:$0xff]  ;;  %v8276_v38 = vld [vmem:[%s16317_s3 + $0x98] sm:$0xff]  ;;  %7778 = vst.msk [vmem:[#allocation4 + $0x66] ss:$8 sm:$0x7] %vm16377_vm0, %v7775_v1  ;;  %v7882_v32 = vrot.slane %v7829_v34, 1 }
 0xd0b   :  { %7783 = vst.msk [vmem:[#allocation4 + $0x78] ss:$8 sm:$0x7] %vm16377_vm0, %v7780_v18  ;;  %v16502_v54 = vld [vmem:[#allocation4 + $0x20] sm:$0xff]  ;;  %v16504_v57 = vld [vmem:[#allocation4 + $0x28] sm:$0xff]  ;;  %v7885_v20 = vrot.slane %v7830_v8, 1  ;;  %v16536_v48 = vpack.c.bf16 %v8276_v38, %v8275_v55 }
 0xd0c   :  { %v16506_v59 = vld [vmem:[#allocation4 + $0x18] sm:$0xff]  ;;  %v7883_v52 = vrot.slane %v16502_v54, 1  ;;  %v7886_v62 = vrot.slane %v16504_v57, 1  ;;  %v7879_v53 = vrot.slane %v7828_v44, 1  ;;  %v7833_v43 = vld [vmem:[#allocation4 + $0x40] sm:$0x1] }
 0xd0d   :  { %v7880_v15 = vrot.slane %v16506_v59, 1  ;;  %v7892_v16 = vrot.slane %v7833_v43, 1  ;;  %v7832_v49 = vld [vmem:[#allocation4 + $0x38] sm:$0x1]  ;;  %v7831_v22 = vld [vmem:[#allocation4 + $0x30] sm:$0x1] }
 0xd0e   :  { %v7794_v61 = vld [vmem:[%s16312_s29 + $0x10] sm:$0xff]  ;;  %v16517_v40 = vsel %vm3875_vm1, %v7882_v32, %v7883_v52  ;;  %v16520_v37 = vsel %vm3875_vm1, %v7885_v20, %v7886_v62  ;;  %v7890_v25 = vrot.slane %v7832_v49, 1  ;;  %v7795_v46 = vld [vmem:[%s16312_s29 + $0x18] sm:$0xff]  ;;  %v7888_v14 = vrot.slane %v7831_v22, 1  ;;  %v7812_v28 = vld [vmem:[%s16312_s29 + $0xa0] sm:$0xff] }
 0xd0f   :  { %v16523_v58 = vsel %vm3875_vm1, %v7879_v53, %v7880_v15  ;;  %v8259_v39 = vld [vmem:[%s16317_s3 + $0x10] sm:$0xff]  ;;  %v8260_v31 = vld [vmem:[%s16317_s3 + $0x18] sm:$0xff]  ;;  %7966 = vmatprep.mubr.f32.mxu0 %v16517_v40  ;;  %11143 = vmatprep.mubr.msk.f32.mxu1 %vm261_vm2, %v16520_v37  ;;  %v16532_v63 = vsel %vm3875_vm1, %v7886_v62, %v7892_v16  ;;  %v7813_v23 = vld [vmem:[%s16312_s29 + $0xa8] sm:$0xff]  ;;  %v16550_v17 = vpack.c.bf16 %v7795_v46, %v7794_v61  ;;  %v17236_v18 = vrot.slane %v16502_v54, 2 }
 0xd10   :  { %7967 = vmatmul.mubr.f32.vlgmr.msra.gmra.mrb[64].mxu0 %v16523_v58  ;;  %11144 = vmatmul.mubr.msk.f32.vlgmr.msra.gmra.mrb[48].mxu1 %vm261_vm2, %v16532_v63  ;;  %v8252_v7 = vld [vmem:[#allocation4 + $0x8] sm:$0xfc]  ;;  %v8277_v0 = vld [vmem:[%s16317_s3 + $0xa0] sm:$0xff]  ;;  %v8278_v12 = vld [vmem:[%s16317_s3 + $0xa8] sm:$0xff]  ;;  %v16548_v42 = vsel %vm3875_vm1, %v7883_v52, %v7890_v25  ;;  %v16552_v1 = vpack.c.bf16 %v8260_v31, %v8259_v39  ;;  %v16558_v44 = vpack.c.bf16 %v7813_v23, %v7812_v28 }
 0xd11   :  { %12824 = vmatpush3.bf16.msra.mxu1 %v16511_v3  ;;  %12864 = vmatpush3.bf16.msra.mxu0 %v16513_v60  ;;  %v7787_v21 = vld [vmem:[#allocation4 + $0x8] sm:$0xff]  ;;  %v7796_v34 = vld [vmem:[%s16312_s29 + $0x20] sm:$0xff]  ;;  %v7797_v8 = vld [vmem:[%s16312_s29 + $0x28] sm:$0xff]  ;;  %v16566_v38 = vsel %vm3875_vm1, %v7880_v15, %v7888_v14  ;;  %v8302_v32 = vrot.slane %v8252_v7, 2  ;;  %v16568_v20 = vpack.c.bf16 %v8278_v12, %v8277_v0 }
 0xd12   :  { %7971 = vmatprep.mubr.f32.mxu0 %v16548_v42  ;;  %8121 = vmatprep.mubr.f32.mxu1 %v7787_v21  ;;  %v8261_v56 = vld [vmem:[%s16317_s3 + $0x20] sm:$0xff]  ;;  %v8262_v45 = vld [vmem:[%s16317_s3 + $0x28] sm:$0xff]  ;;  %v7814_v55 = vld [vmem:[%s16312_s29 + $0xb0] sm:$0xff]  ;;  %v16579_v43 = vpack.c.bf16 %v7797_v8, %v7796_v34 }
 0xd13   :  { %12826 = vmatprep.subr.bf16.mxu1 %v16534_v27  ;;  %12866 = vmatprep.subr.bf16.mxu0 %v16536_v48  ;;  %v7815_v52 = vld [vmem:[%s16312_s29 + $0xb8] sm:$0xff]  ;;  %v8279_v62 = vld [vmem:[%s16317_s3 + $0xb0] sm:$0xff]  ;;  %v8304_v15 = vsel %vm4774_vm4, %v8302_v32, %v17236_v18  ;;  %v16581_v16 = vpack.c.bf16 %v8262_v45, %v8261_v56  ;;  %v7816_v31 = vld [vmem:[%s16312_s29 + $0xc0] sm:$0xff] }
 0xd14   :  { %v8280_v53 = vld [vmem:[%s16317_s3 + $0xb8] sm:$0xff]  ;;  %7972 = vmatmul.mubr.f32.gmra.mrb[66].mxu0 %v16566_v38  ;;  %v7798_v49 = vld [vmem:[%s16312_s29 + $0x30] sm:$0xff]  ;;  %v16586_v61 = vpack.c.bf16 %v7815_v52, %v7814_v55  ;;  %v7817_v14 = vld [vmem:[%s16312_s29 + $0xc8] sm:$0xff] }
 0xd15   :  { %12828 = vmatpush3.bf16.msra.mxu1 %v16550_v17  ;;  %12868 = vmatpush3.bf16.msra.mxu0 %v16552_v1  ;;  %v7799_v22 = vld [vmem:[%s16312_s29 + $0x38] sm:$0xff]  ;;  %v16588_v25 = vpack.c.bf16 %v8280_v53, %v8279_v62  ;;  %v8263_v46 = vld [vmem:[%s16317_s3 + $0x30] sm:$0xff]  ;;  %v8281_v28 = vld [vmem:[%s16317_s3 + $0xc0] sm:$0xff]  ;;  %v16607_v34 = vpack.c.bf16 %v7817_v14, %v7816_v31 }
 0xd16   :  { %8386 = vmatprep.mubr.f32.mxu0 %v8304_v15  ;;  %12830 = vmatprep.subr.bf16.mxu1 %v16558_v44  ;;  %v8264_v39 = vld [vmem:[%s16317_s3 + $0x38] sm:$0xff]  ;;  %v8282_v23 = vld [vmem:[%s16317_s3 + $0xc8] sm:$0xff]  ;;  %v16599_v7 = vpack.c.bf16 %v7799_v22, %v7798_v49  ;;  %v7800_v12 = vld [vmem:[%s16312_s29 + $0x40] sm:$0xff] }
 0xd17   :  { %12870 = vmatprep.subr.bf16.mxu0 %v16568_v20  ;;  %v16601_v0 = vpack.c.bf16 %v8264_v39, %v8263_v46  ;;  %v7801_v21 = vld [vmem:[%s16312_s29 + $0x48] sm:$0xff]  ;;  %17672 = vst [vmem:[#allocation13_spill] sm:$0xff] %v16607_v34  ;;  %v16609_v8 = vpack.c.bf16 %v8282_v23, %v8281_v28  ;;  %v8265_v56 = vld [vmem:[%s16317_s3 + $0x40] sm:$0xff]  ;;  %v7818_v55 = vld [vmem:[%s16312_s29 + $0xd0] sm:$0xff] }
 0xd18   :  { %17671 = vst [vmem:[#allocation7_spill] sm:$0xff] %v16599_v7  ;;  %v8266_v45 = vld [vmem:[%s16317_s3 + $0x48] sm:$0xff]  ;;  %v7819_v32 = vld [vmem:[%s16312_s29 + $0xd8] sm:$0xff]  ;;  %v8283_v52 = vld [vmem:[%s16317_s3 + $0xd0] sm:$0xff]  ;;  %v16619_v53 = vpack.c.bf16 %v7801_v21, %v7800_v12 }
 0xd19   :  { %12832 = vmatpush3.bf16.msra.mxu1 %v16579_v43  ;;  %12872 = vmatpush3.bf16.msra.mxu0 %v16581_v16  ;;  %v8284_v62 = vld [vmem:[%s16317_s3 + $0xd8] sm:$0xff]  ;;  %v16621_v15 = vpack.c.bf16 %v8266_v45, %v8265_v56  ;;  %v7802_v49 = vld [vmem:[%s16312_s29 + $0x50] sm:$0xff]  ;;  %v16627_v46 = vpack.c.bf16 %v7819_v32, %v7818_v55  ;;  %v7820_v28 = vld [vmem:[%s16312_s29 + $0xe0] sm:$0xff] }
 0xd1a   :  { %12834 = vmatprep.subr.bf16.mxu1 %v16586_v61  ;;  %12874 = vmatprep.subr.bf16.mxu0 %v16588_v25  ;;  %17673 = vst [vmem:[#allocation26_spill] sm:$0xff] %v16619_v53  ;;  %v7803_v22 = vld [vmem:[%s16312_s29 + $0x58] sm:$0xff]  ;;  %v16629_v39 = vpack.c.bf16 %v8284_v62, %v8283_v52  ;;  %v8267_v31 = vld [vmem:[%s16317_s3 + $0x50] sm:$0xff]  ;;  %v7821_v23 = vld [vmem:[%s16312_s29 + $0xe8] sm:$0xff] }
 0xd1b   :  { %17674 = vst [vmem:[#allocation28_spill] sm:$0xff] %v16627_v46  ;;  %v8268_v14 = vld [vmem:[%s16317_s3 + $0x58] sm:$0xff]  ;;  %v8285_v12 = vld [vmem:[%s16317_s3 + $0xe0] sm:$0xff]  ;;  %v8286_v21 = vld [vmem:[%s16317_s3 + $0xe8] sm:$0xff]  ;;  %v16639_v56 = vpack.c.bf16 %v7803_v22, %v7802_v49  ;;  %v16647_v52 = vpack.c.bf16 %v7821_v23, %v7820_v28 }
 0xd1c   :  { %17675 = vst [vmem:[#allocation30_spill] sm:$0xff] %v16629_v39  ;;  %v16641_v45 = vpack.c.bf16 %v8268_v14, %v8267_v31  ;;  %v7804_v55 = vld [vmem:[%s16312_s29 + $0x60] sm:$0xff]  ;;  %v7805_v32 = vld [vmem:[%s16312_s29 + $0x68] sm:$0xff]  ;;  %v16649_v62 = vpack.c.bf16 %v8286_v21, %v8285_v12  ;;  %v7822_v49 = vld [vmem:[%s16312_s29 + $0xf0] sm:$0xff] }
 0xd1d   :  { %12836 = vmatpush3.bf16.msra.mxu1 %v16599_v7  ;;  %12876 = vmatpush3.bf16.msra.mxu0 %v16601_v0  ;;  %17676 = vst [vmem:[#allocation32_spill] sm:$0xff] %v16639_v56  ;;  %17678 = vst [vmem:[#allocation22_spill] sm:$0xff] %v16647_v52  ;;  %v8269_v18 = vld [vmem:[%s16317_s3 + $0x60] sm:$0xff]  ;;  %v7823_v22 = vld [vmem:[%s16312_s29 + $0xf8] sm:$0xff] }
 0xd1e   :  { %12838 = vmatprep.subr.bf16.mxu1 %v16607_v34  ;;  %12878 = vmatprep.subr.bf16.mxu0 %v16609_v8  ;;  %17677 = vst [vmem:[#allocation34_spill] sm:$0xff] %v16641_v45  ;;  %v8287_v31 = vld [vmem:[%s16317_s3 + $0xf0] sm:$0xff]  ;;  %v8288_v14 = vld [vmem:[%s16317_s3 + $0xf8] sm:$0xff]  ;;  %v16666_v12 = vpack.c.bf16 %v7823_v22, %v7822_v49  ;;  %v8255_v49 = vld [vmem:[#allocation4 + $0x38] sm:$0x3]  ;;  %v8300_v22 = vrot.slane %v16506_v59, 2 }
 0xd1f   :  { %v7806_v23 = vld [vmem:[%s16312_s29 + $0x70] sm:$0xff]  ;;  %v16668_v21 = vpack.c.bf16 %v8288_v14, %v8287_v31  ;;  %v7807_v34 = vld [vmem:[%s16312_s29 + $0x78] sm:$0xff] }
 0xd20   :  { %17680 = vst [vmem:[#allocation24_spill] sm:$0xff] %v16666_v12  ;;  %v8271_v7 = vld [vmem:[%s16317_s3 + $0x70] sm:$0xff]  ;;  %v7827_v14 = vld [vmem:[%s16312_s29 + $0x118] sm:$0xff] }
 0xd21   :  { %12840 = vmatpush3.bf16.msra.mxu1 %v16619_v53  ;;  %12880 = vmatpush3.bf16.msra.mxu0 %v16621_v15  ;;  %v8270_v53 = vld [vmem:[%s16317_s3 + $0x68] sm:$0xff]  ;;  %v7826_v31 = vld [vmem:[%s16312_s29 + $0x110] sm:$0xff] }
 0xd22   :  { %12842 = vmatprep.subr.bf16.mxu1 %v16627_v46  ;;  %12882 = vmatprep.subr.bf16.mxu0 %v16629_v39  ;;  %v16659_v46 = vpack.c.bf16 %v7805_v32, %v7804_v55  ;;  %v16661_v28 = vpack.c.bf16 %v8270_v53, %v8269_v18  ;;  %v7824_v39 = vld [vmem:[%s16312_s29 + $0x100] sm:$0xff]  ;;  %v16677_v18 = vpack.c.bf16 %v7807_v34, %v7806_v23  ;;  %v8251_v32 = vld [vmem:[#allocation4] sm:$0xfc]  ;;  %v8310_v34 = vrot.slane %v8255_v49, 2  ;;  %v8290_v49 = vld [vmem:[%s16317_s3 + $0x108] sm:$0xff] }
 0xd23   :  { %v16695_v23 = vpack.c.bf16 %v7827_v14, %v7826_v31  ;;  %v17682_v31 = vrot.slane %v16502_v54, 2 }
 0xd24   :  { %17679 = vst [vmem:[#allocation23_spill] sm:$0xff] %v16659_v46  ;;  %17681 = vst [vmem:[#allocation6_spill] sm:$0xff] %v16677_v18 }
 0xd25   :  { %12844 = vmatpush3.bf16.msra.mxu1 %v16639_v56  ;;  %12884 = vmatpush3.bf16.msra.mxu0 %v16641_v45  ;;  %v8272_v56 = vld [vmem:[%s16317_s3 + $0x78] sm:$0xff]  ;;  %v7825_v45 = vld [vmem:[%s16312_s29 + $0x108] sm:$0xff] }
 0xd26   :  { %12846 = vmatprep.subr.bf16.mxu1 %v16647_v52  ;;  %12886 = vmatprep.subr.bf16.mxu0 %v16649_v62  ;;  %v16679_v53 = vpack.c.bf16 %v8272_v56, %v8271_v7  ;;  %v16683_v55 = vpack.c.bf16 %v7825_v45, %v7824_v39  ;;  %v8254_v52 = vld [vmem:[#allocation4 + $0x30] sm:$0x3]  ;;  %v8299_v7 = vrot.slane %v8251_v32, 2  ;;  %v16692_v39 = vld [vmem:[#allocation4 + $0x68] sm:$0xff]  ;;  %v7786_v56 = vld [vmem:[#allocation4] sm:$0xff] }
 0xd27   :  { %v8631_v32 = vld [vmem:[#allocation4 + $0x50] sm:$0xfe]  ;;  %v8649_v14 = vrot.slane %v16692_v39, 1 }
 0xd28   :  { %v8301_v45 = vsel %vm4774_vm4, %v8299_v7, %v8300_v22 }
 0xd29   :  { %12848 = vmatpush3.bf16.msra.mxu1 %v16659_v46  ;;  %12888 = vmatpush3.bf16.msra.mxu0 %v16661_v28  ;;  %v8291_v46 = vld [vmem:[%s16317_s3 + $0x110] sm:$0xff] }
 0xd2a   :  { %12850 = vmatprep.subr.bf16.mxu1 %v16666_v12  ;;  %12890 = vmatprep.subr.bf16.mxu0 %v16668_v21  ;;  %v8308_v12 = vrot.slane %v8254_v52, 2  ;;  %v8311_v52 = vsel %vm4774_vm4, %v17682_v31, %v8310_v34  ;;  %v7788_v34 = vld [vmem:[#allocation4 + $0x10] sm:$0xff]  ;;  %v8234_v31 = vld [vmem:[%s16700_s7 + $0x98] sm:$0xff] }
 0xd2c   :  { %v8309_v7 = vsel %vm4774_vm4, %v8300_v22, %v8308_v12  ;;  %v8231_v22 = vld [vmem:[%s16700_s7 + $0x80] sm:$0xff] }
 0xd2d   :  { %12852 = vmatpush3.bf16.msra.mxu1 %v16677_v18  ;;  %12892 = vmatpush3.bf16.msra.mxu0 %v16679_v53  ;;  %v8253_v18 = vld [vmem:[#allocation4 + $0x10] sm:$0xfc] }
 0xd2e   :  { %12854 = vmatprep.subr.bf16.mxu1 %v16683_v55  ;;  %12942 = vmatprep.subr.bf16.mxu0 %v16249_v11  ;;  %v8289_v11 = vld [vmem:[%s16317_s3 + $0x100] sm:$0xff] }
 0xd30   :  { %8122 = vmatmul.mubr.f32.vlgmr.msra.gmra.mrb[50].mxu1 %v7786_v56  ;;  %8387 = vmatmul.mubr.f32.vlgmr.msra.gmra.mrb[68].mxu0 %v8301_v45  ;;  %v8648_v56 = vrot.slane %v8631_v32, 1  ;;  %v16714_v45 = vpack.c.bf16 %v8290_v49, %v8289_v11  ;;  %v8232_v32 = vld [vmem:[%s16700_s7 + $0x88] sm:$0xff]  ;;  %v8256_v11 = vld [vmem:[#allocation4 + $0x40] sm:$0x3] }
 0xd31   :  { %8126 = vmatprep.mubr.f32.mxu1 %v16502_v54  ;;  %12856 = vmatpush3.bf16.msra.mxu1 %v16683_v55  ;;  %v8292_v54 = vld [vmem:[%s16317_s3 + $0x118] sm:$0xff]  ;;  %v8233_v49 = vld [vmem:[%s16700_s7 + $0x90] sm:$0xff] }
 0xd32   :  { %8391 = vmatprep.mubr.f32.mxu0 %v8311_v52  ;;  %12944 = vmatpush3.bf16.msra.mxu0 %v16252_v2  ;;  %v8306_v2 = vrot.slane %v16504_v57, 2  ;;  %v16729_v12 = vpack.c.bf16 %v8292_v54, %v8291_v46  ;;  %v8215_v46 = vld [vmem:[%s16700_s7] sm:$0xff] }
 0xd33   :  { %12858 = vmatprep.subr.bf16.mxu1 %v16695_v23  ;;  %12946 = vmatprep.subr.bf16.mxu0 %v16258_v35  ;;  %v16725_v35 = vsel %vm3875_vm1, %v8648_v56, %v8649_v14  ;;  %v8218_v56 = vld [vmem:[%s16700_s7 + $0x18] sm:$0xff]  ;;  %v8235_v54 = vld [vmem:[%s16700_s7 + $0xa0] sm:$0xff] }
 0xd34   :  { %8127 = vmatmul.mubr.f32.gmra.mrb[52].mxu1 %v16506_v59  ;;  %8392 = vmatmul.mubr.f32.gmra.mrb[70].mxu0 %v8309_v7  ;;  %v8305_v59 = vrot.slane %v8253_v18, 2  ;;  %v8216_v18 = vld [vmem:[%s16700_s7 + $0x8] sm:$0xff]  ;;  %v8217_v7 = vld [vmem:[%s16700_s7 + $0x10] sm:$0xff] }
 0xd35   :  { %12860 = vmatpush3.bf16.msra.mxu1 %v16695_v23  ;;  %11154 = vmatprep.mubr.msk.f32.mxu1 %vm261_vm2, %v7788_v34  ;;  %v16750_v52 = vpack.c.bf16 %v8216_v18, %v8215_v46  ;;  %v8236_v34 = vld [vmem:[%s16700_s7 + $0xa8] sm:$0xff] }
 0xd36   :  { %12948 = vmatpush3.bf16.msra.mxu0 %v16262_v30  ;;  %8732 = vmatprep.mubr.f32.mxu0 %v16725_v35  ;;  %v8307_v30 = vsel %vm4774_vm4, %v8305_v59, %v8306_v2  ;;  %v8220_v59 = vld [vmem:[%s16700_s7 + $0x28] sm:$0xff] }
 0xd37   :  { %12894 = vmatprep.subr.bf16.mxu1 %v16714_v45  ;;  %12950 = vmatprep.subr.bf16.mxu0 %v16268_v19  ;;  %v16742_v19 = vpack.c.bf16 %v8232_v32, %v8231_v22  ;;  %v8237_v22 = vld [vmem:[%s16700_s7 + $0xb0] sm:$0xff]  ;;  %v8238_v32 = vld [vmem:[%s16700_s7 + $0xb8] sm:$0xff]  ;;  %v8240_v46 = vld [vmem:[%s16700_s7 + $0xc8] sm:$0xff] }
 0xd38   :  { %11155 = vmatmul.mubr.msk.f32.vlgmr.msra.gmra.mrb[48].mxu1 %vm261_vm2, %v16504_v57  ;;  %v8312_v57 = vrot.slane %v8256_v11, 2  ;;  %v8222_v11 = vld [vmem:[%s16700_s7 + $0x38] sm:$0xff] }
 0xd39   :  { %12896 = vmatpush3.bf16.msra.mxu1 %v16714_v45  ;;  %11165 = vmatprep.mubr.msk.f32.mxu1 %vm261_vm2, %v8307_v30  ;;  %v8221_v30 = vld [vmem:[%s16700_s7 + $0x30] sm:$0xff] }
 0xd3a   :  { %12952 = vmatpush3.bf16.msra.mxu0 %v16272_v6  ;;  %12898 = vmatprep.subr.bf16.mxu1 %v16729_v12  ;;  %v16754_v6 = vpack.c.bf16 %v8234_v31, %v8233_v49  ;;  %v16789_v18 = vpack.c.bf16 %v8222_v11, %v8221_v30  ;;  %v8223_v49 = vld [vmem:[%s16700_s7 + $0x40] sm:$0xff]  ;;  %v8224_v31 = vld [vmem:[%s16700_s7 + $0x48] sm:$0xff] }
 0xd3b   :  { %12954 = vmatprep.subr.bf16.mxu0 %v16278_v5  ;;  %v8313_v5 = vsel %vm4774_vm4, %v8306_v2, %v8312_v57  ;;  %v16769_v2 = vpack.c.bf16 %v8236_v34, %v8235_v54  ;;  %v16791_v57 = vld [vmem:[#allocation4 + $0x60] sm:$0xff]  ;;  %v8242_v54 = vld [vmem:[%s16700_s7 + $0xd8] sm:$0xff] }
 0xd3d   :  { %12900 = vmatpush3.bf16.msra.mxu1 %v16729_v12 }
 0xd3e   :  { %12956 = vmatpush3.bf16.msra.mxu0 %v16282_v13  ;;  %12902 = vmatprep.subr.bf16.mxu1 %v16742_v19  ;;  %v16765_v13 = vpack.c.bf16 %v8218_v56, %v8217_v7  ;;  %v8630_v7 = vld [vmem:[#allocation4 + $0x48] sm:$0xfe]  ;;  %v8646_v56 = vrot.slane %v16791_v57, 1 }
 0xd3f   :  { %12958 = vmatprep.subr.bf16.mxu0 %v16288_v24  ;;  %v8219_v24 = vld [vmem:[%s16700_s7 + $0x20] sm:$0xff] }
 0xd40   :  { %11166 = vmatmul.mubr.msk.f32.vlgmr.msra.gmra.mrb[54].mxu1 %vm261_vm2, %v8313_v5  ;;  %v8241_v5 = vld [vmem:[%s16700_s7 + $0xd0] sm:$0xff] }
 0xd41   :  { %12904 = vmatpush3.bf16.msra.mxu1 %v16750_v52  ;;  %8536 = vmatprep.mubr.f32.mxu1 %v16517_v40  ;;  %v16777_v40 = vpack.c.bf16 %v8220_v59, %v8219_v24  ;;  %v8633_v24 = vld [vmem:[#allocation4 + $0x78] sm:$0x1]  ;;  %v8645_v59 = vrot.slane %v8630_v7, 1  ;;  %v16813_v30 = vpack.c.bf16 %v8242_v54, %v8241_v5  ;;  %v8635_v5 = vld [vmem:[#allocation4 + $0x88] sm:$0x1]  ;;  %v8227_v54 = vld [vmem:[%s16700_s7 + $0x60] sm:$0xff] }
 0xd42   :  { %12960 = vmatpush3.bf16.msra.mxu0 %v16294_v26  ;;  %12906 = vmatprep.subr.bf16.mxu1 %v16754_v6  ;;  %v16781_v26 = vpack.c.bf16 %v8238_v32, %v8237_v22  ;;  %v8225_v22 = vld [vmem:[%s16700_s7 + $0x50] sm:$0xff]  ;;  %v16810_v32 = vld [vmem:[#allocation4 + $0x70] sm:$0xff] }
 0xd43   :  { %12962 = vmatprep.subr.bf16.mxu0 %v16298_v50  ;;  %v8239_v50 = vld [vmem:[%s16700_s7 + $0xc0] sm:$0xff]  ;;  %v16816_v11 = vsel %vm3875_vm1, %v8645_v59, %v8646_v56  ;;  %v8652_v7 = vrot.slane %v16810_v32, 1 }
 0xd44   :  { %17683 = vst [vmem:[#allocation8_spill] sm:$0xff] %v16816_v11 }
 0xd45   :  { %12908 = vmatpush3.bf16.msra.mxu1 %v16765_v13 }
 0xd46   :  { %12964 = vmatpush3.bf16.msra.mxu0 %v16320_v51  ;;  %12910 = vmatprep.subr.bf16.mxu1 %v16769_v2  ;;  %v16795_v51 = vpack.c.bf16 %v8240_v46, %v8239_v50  ;;  %v8654_v50 = vrot.slane %v8633_v24, 1  ;;  %v8632_v46 = vld [vmem:[#allocation4 + $0x58] sm:$0xfe] }
 0xd47   :  { %12966 = vmatprep.subr.bf16.mxu0 %v16326_v36  ;;  %v8634_v36 = vld [vmem:[#allocation4 + $0x80] sm:$0x1]  ;;  %v8228_v24 = vld [vmem:[%s16700_s7 + $0x68] sm:$0xff]  ;;  %v8651_v59 = vrot.slane %v8632_v46, 1 }
 0xd48   :  { %v8656_v34 = vrot.slane %v8634_v36, 1 }
 0xd49   :  { %12912 = vmatpush3.bf16.msra.mxu1 %v16777_v40 }
 0xd4a   :  { %12968 = vmatpush3.bf16.msra.mxu0 %v16335_v10  ;;  %12914 = vmatprep.subr.bf16.mxu1 %v16781_v26  ;;  %v16804_v10 = vpack.c.bf16 %v8224_v31, %v8223_v49  ;;  %v8243_v49 = vld [vmem:[%s16700_s7 + $0xe0] sm:$0xff]  ;;  %v16825_v31 = vsel %vm3875_vm1, %v8649_v14, %v8656_v34  ;;  %v16839_v34 = vsel %vm3875_vm1, %v8646_v56, %v8654_v50  ;;  %v8229_v56 = vld [vmem:[%s16700_s7 + $0x70] sm:$0xff]  ;;  %v8230_v50 = vld [vmem:[%s16700_s7 + $0x78] sm:$0xff] }
 0xd4b   :  { %12970 = vmatprep.subr.bf16.mxu0 %v16339_v47  ;;  %v8226_v47 = vld [vmem:[%s16700_s7 + $0x58] sm:$0xff]  ;;  %17684 = vst [vmem:[#allocation9_spill] sm:$0xff] %v16825_v31 }
 0xd4c   :  { %v16827_v36 = vpack.c.bf16 %v8226_v47, %v8225_v22  ;;  %v8658_v22 = vrot.slane %v8635_v5, 1  ;;  %v8245_v47 = vld [vmem:[%s16700_s7 + $0xf0] sm:$0xff] }
 0xd4d   :  { %12916 = vmatpush3.bf16.msra.mxu1 %v16789_v18 }
 0xd4e   :  { %12972 = vmatpush3.bf16.msra.mxu0 %v16350_v33  ;;  %12918 = vmatprep.subr.bf16.mxu1 %v16795_v51  ;;  %v8244_v33 = vld [vmem:[%s16700_s7 + $0xe8] sm:$0xff]  ;;  %v16862_v5 = vsel %vm3875_vm1, %v8652_v7, %v8658_v22  ;;  %v8991_v22 = vrot.slane %v16692_v39, 2 }
 0xd4f   :  { %12974 = vmatprep.subr.bf16.mxu0 %v16305_v41  ;;  %v16836_v14 = vpack.c.bf16 %v8244_v33, %v8243_v49  ;;  %v8247_v49 = vld [vmem:[%s16700_s7 + $0x100] sm:$0xff]  ;;  %v8248_v33 = vld [vmem:[%s16700_s7 + $0x108] sm:$0xff] }
 0xd51   :  { %8733 = vmatmul.mubr.f32.vlgmr.msra.gmra.mrb[72].mxu0 %v16816_v11  ;;  %12920 = vmatpush3.bf16.msra.mxu1 %v16804_v10  ;;  %v16848_v11 = vpack.c.bf16 %v8228_v24, %v8227_v54  ;;  %v16867_v54 = vpack.c.bf16 %v8230_v50, %v8229_v56  ;;  %v16871_v24 = vpack.c.bf16 %v8248_v33, %v8247_v49 }
 0xd52   :  { %8737 = vmatprep.mubr.f32.mxu0 %v16825_v31  ;;  %12976 = vmatpush3.bf16.msra.mxu0 %v16305_v41  ;;  %v8246_v31 = vld [vmem:[%s16700_s7 + $0xf8] sm:$0xff]  ;;  %v16846_v41 = vsel %vm3875_vm1, %v8651_v59, %v8652_v7  ;;  %v8976_v59 = vld [vmem:[#allocation4 + $0x50] sm:$0xfc] }
 0xd53   :  { %12922 = vmatprep.subr.bf16.mxu1 %v16813_v30  ;;  %12978 = vmatprep.subr.bf16.mxu0 %v16323_v9  ;;  %v16857_v46 = vpack.c.bf16 %v8246_v31, %v8245_v47  ;;  %v8249_v31 = vld [vmem:[%s16700_s7 + $0x110] sm:$0xff]  ;;  %v8250_v7 = vld [vmem:[%s16700_s7 + $0x118] sm:$0xff]  ;;  %v8990_v47 = vrot.slane %v8976_v59, 2 }
 0xd55   :  { %8738 = vmatmul.mubr.f32.gmra.mrb[74].mxu0 %v16839_v34  ;;  %12924 = vmatpush3.bf16.msra.mxu1 %v16827_v36 }
 0xd56   :  { %12980 = vmatpush3.bf16.msra.mxu0 %v16323_v9  ;;  %11187 = vmatprep.mubr.msk.f32.mxu0 %vm261_vm2, %v16846_v41  ;;  %v8626_v9 = vld [vmem:[#allocation4 + $0x58] sm:$0xff] }
 0xd57   :  { %12926 = vmatprep.subr.bf16.mxu1 %v16836_v14  ;;  %13014 = vmatprep.subr.bf16.mxu0 %v16683_v55 }
 0xd59   :  { %11188 = vmatmul.mubr.msk.f32.vlgmr.msra.gmra.mrb[76].mxu0 %vm261_vm2, %v16862_v5  ;;  %12928 = vmatpush3.bf16.msra.mxu1 %v16848_v11 }
 0xd5a   :  { %13016 = vmatpush3.bf16.msra.mxu0 %v16683_v55  ;;  %11198 = vmatprep.mubr.msk.f32.mxu0 %vm261_vm2, %v8626_v9  ;;  %v16882_v55 = vpack.c.bf16 %v8250_v7, %v8249_v31 }
 0xd5b   :  { %12930 = vmatprep.subr.bf16.mxu1 %v16857_v46  ;;  %13018 = vmatprep.subr.bf16.mxu0 %v16695_v23 }
 0xd5d   :  { %12932 = vmatpush3.bf16.msra.mxu1 %v16867_v54 }
 0xd5e   :  { %13020 = vmatpush3.bf16.msra.mxu0 %v16695_v23  ;;  %12934 = vmatprep.subr.bf16.mxu1 %v16871_v24  ;;  %v8992_v23 = vsel %vm4774_vm4, %v8990_v47, %v8991_v22 }
 0xd5f   :  { %13022 = vmatprep.subr.bf16.mxu0 %v16354_v4  ;;  %v8625_v4 = vld [vmem:[#allocation4 + $0x50] sm:$0xff] }
 0xd60   :  { %8537 = vmatmul.mubr.f32.vlgmr.msra.gmra.mrb[56].mxu1 %v16523_v58  ;;  %v17689_v58 = vld [vmem:[#allocation26_spill] sm:$0xff] }
 0xd61   :  { %11199 = vmatmul.mubr.msk.f32.vlgmr.msra.gmra.mrb[76].mxu0 %vm261_vm2, %v16810_v32  ;;  %8541 = vmatprep.mubr.f32.mxu1 %v16548_v42  ;;  %v8988_v42 = vrot.slane %v16791_v57, 2 }
 0xd62   :  { %12936 = vmatpush3.bf16.msra.mxu1 %v16871_v24  ;;  %13024 = vmatpush3.bf16.msra.mxu0 %v16513_v60  ;;  %v17687_v60 = vld [vmem:[#allocation34_spill] sm:$0xff] }
 0xd63   :  { %9074 = vmatprep.mubr.f32.mxu0 %v8992_v23  ;;  %12938 = vmatprep.subr.bf16.mxu1 %v16882_v55 }
 0xd64   :  { %8542 = vmatmul.mubr.f32.gmra.mrb[58].mxu1 %v16566_v38  ;;  %13026 = vmatprep.subr.bf16.mxu0 %v16536_v48  ;;  %v8975_v48 = vld [vmem:[#allocation4 + $0x48] sm:$0xfc]  ;;  %v17692_v38 = vld [vmem:[#allocation22_spill] sm:$0xff] }
 0xd65   :  { %11176 = vmatprep.mubr.msk.f32.mxu1 %vm261_vm2, %v16520_v37  ;;  %v17688_v37 = vld [vmem:[#allocation13_spill] sm:$0xff] }
 0xd66   :  { %12940 = vmatpush3.bf16.msra.mxu1 %v16882_v55  ;;  %13028 = vmatpush3.bf16.msra.mxu0 %v16552_v1 }
 0xd67   :  { %12982 = vmatprep.subr.bf16.mxu1 %v16345_v29  ;;  %13030 = vmatprep.subr.bf16.mxu0 %v16568_v20  ;;  %v17685_v29 = vld [vmem:[#allocation30_spill] sm:$0xff]  ;;  %v8987_v20 = vrot.slane %v8975_v48, 2 }
 0xd69   :  { %11177 = vmatmul.mubr.msk.f32.vlgmr.msra.gmra.mrb[54].mxu1 %vm261_vm2, %v16532_v63  ;;  %v17690_v63 = vld [vmem:[#allocation28_spill] sm:$0xff] }
 0xd6a   :  { %12984 = vmatpush3.bf16.msra.mxu1 %v16511_v3  ;;  %8887 = vmatprep.mubr.f32.mxu1 %v8625_v4  ;;  %v17686_v3 = vld [vmem:[#allocation7_spill] sm:$0xff] }
 0xd6b   :  { %13032 = vmatpush3.bf16.msra.mxu0 %v16581_v16  ;;  %12986 = vmatprep.subr.bf16.mxu1 %v16534_v27  ;;  %v8979_v27 = vld [vmem:[#allocation4 + $0x80] sm:$0x3] }
 0xd6c   :  { %13034 = vmatprep.subr.bf16.mxu0 %v16588_v25  ;;  %v8998_v1 = vrot.slane %v8979_v27, 2 }
 0xd6e   :  { %12988 = vmatpush3.bf16.msra.mxu1 %v16550_v17  ;;  %v17691_v17 = vld [vmem:[#allocation32_spill] sm:$0xff]  ;;  %v8999_v25 = vsel %vm4774_vm4, %v8991_v22, %v8998_v1 }
 0xd6f   :  { %13036 = vmatpush3.bf16.msra.mxu0 %v16601_v0  ;;  %12990 = vmatprep.subr.bf16.mxu1 %v16558_v44  ;;  %v8978_v44 = vld [vmem:[#allocation4 + $0x78] sm:$0x3]  ;;  %v17694_v0 = vld [vmem:[#allocation24_spill] sm:$0xff] }
 0xd70   :  { %13038 = vmatprep.subr.bf16.mxu0 %v16609_v8  ;;  %v8996_v16 = vrot.slane %v8978_v44, 2 }
 0xd72   :  { %12992 = vmatpush3.bf16.msra.mxu1 %v16579_v43  ;;  %v8989_v43 = vsel %vm4774_vm4, %v8987_v20, %v8988_v42  ;;  %v8997_v8 = vsel %vm4774_vm4, %v8988_v42, %v8996_v16 }
 0xd73   :  { %13040 = vmatpush3.bf16.msra.mxu0 %v16621_v15  ;;  %12994 = vmatprep.subr.bf16.mxu1 %v16586_v61  ;;  %v17693_v61 = vld [vmem:[#allocation23_spill] sm:$0xff]  ;;  %v17695_v15 = vld [vmem:[#allocation6_spill] sm:$0xff] }
 0xd74   :  { %13042 = vmatprep.subr.bf16.mxu0 %v17685_v29 }
 0xd76   :  { %12996 = vmatpush3.bf16.msra.mxu1 %v17686_v3 }
 0xd77   :  { %13044 = vmatpush3.bf16.msra.mxu0 %v17687_v60  ;;  %12998 = vmatprep.subr.bf16.mxu1 %v17688_v37 }
 0xd78   :  { %13046 = vmatprep.subr.bf16.mxu0 %v16649_v62  ;;  %v8624_v62 = vld [vmem:[#allocation4 + $0x48] sm:$0xff] }
 0xd7a   :  { %13000 = vmatpush3.bf16.msra.mxu1 %v17689_v58 }
 0xd7b   :  { %13048 = vmatpush3.bf16.msra.mxu0 %v16661_v28  ;;  %13002 = vmatprep.subr.bf16.mxu1 %v17690_v63  ;;  %v8977_v28 = vld [vmem:[#allocation4 + $0x58] sm:$0xfc] }
 0xd7c   :  { %13050 = vmatprep.subr.bf16.mxu0 %v16668_v21  ;;  %v8994_v21 = vrot.slane %v16810_v32, 2  ;;  %v8993_v56 = vrot.slane %v8977_v28, 2 }
 0xd7e   :  { %13004 = vmatpush3.bf16.msra.mxu1 %v17691_v17  ;;  %v8995_v49 = vsel %vm4774_vm4, %v8993_v56, %v8994_v21 }
 0xd7f   :  { %13052 = vmatpush3.bf16.msra.mxu0 %v16679_v53  ;;  %13006 = vmatprep.subr.bf16.mxu1 %v17692_v38  ;;  %v8980_v53 = vld [vmem:[#allocation4 + $0x88] sm:$0x3] }
 0xd80   :  { %v9000_v50 = vrot.slane %v8980_v53, 2 }
 0xd82   :  { %9075 = vmatmul.mubr.f32.vlgmr.msra.gmra.mrb[78].mxu0 %v8989_v43  ;;  %13008 = vmatpush3.bf16.msra.mxu1 %v17693_v61  ;;  %v9001_v32 = vsel %vm4774_vm4, %v8994_v21, %v9000_v50 }
 0xd83   :  { %9079 = vmatprep.mubr.f32.mxu0 %v8999_v25  ;;  %13010 = vmatprep.subr.bf16.mxu1 %v17694_v0 }
 0xd86   :  { %9080 = vmatmul.mubr.f32.gmra.mrb[80].mxu0 %v8997_v8  ;;  %13012 = vmatpush3.bf16.msra.mxu1 %v17695_v15 }
 0xd87   :  { %13054 = vmatprep.subr.bf16.mxu1 %v16714_v45 }
 0xd89   :  { %8888 = vmatmul.mubr.f32.vlgmr.msra.gmra.mrb[60].mxu1 %v8624_v62 }
 0xd8a   :  { %8892 = vmatprep.mubr.f32.mxu1 %v16692_v39  ;;  %13056 = vmatpush3.bf16.msra.mxu1 %v16714_v45  ;;  %v17696_v39 = vld [vmem:[#allocation8_spill] sm:$0xff]  ;;  %v17697_v45 = vld [vmem:[#allocation9_spill] sm:$0xff] }
 0xd8b   :  { %13058 = vmatprep.subr.bf16.mxu1 %v16729_v12 }
 0xd8d   :  { %8893 = vmatmul.mubr.f32.gmra.mrb[62].mxu1 %v16791_v57 }
 0xd8e   :  { %13060 = vmatpush3.bf16.msra.mxu1 %v16729_v12  ;;  %11209 = vmatprep.mubr.msk.f32.mxu1 %vm261_vm2, %v8995_v49 }
 0xd8f   :  { %13062 = vmatprep.subr.bf16.mxu1 %v16742_v19 }
 0xd91   :  { %11210 = vmatmul.mubr.msk.f32.vlgmr.msra.gmra.mrb[64].mxu1 %vm261_vm2, %v9001_v32 }
 0xd92   :  { %13064 = vmatpush3.bf16.msra.mxu1 %v16750_v52  ;;  %9224 = vmatprep.mubr.f32.mxu1 %v16725_v35 }
 0xd93   :  { %13066 = vmatprep.subr.bf16.mxu1 %v16754_v6 }
 0xd96   :  { %13068 = vmatpush3.bf16.msra.mxu1 %v16765_v13 }
 0xd97   :  { %13070 = vmatprep.subr.bf16.mxu1 %v16769_v2 }
 0xd9a   :  { %13072 = vmatpush3.bf16.msra.mxu1 %v16777_v40 }
 0xd9b   :  { %13074 = vmatprep.subr.bf16.mxu1 %v16781_v26 }
 0xd9e   :  { %13076 = vmatpush3.bf16.msra.mxu1 %v16789_v18 }
 0xd9f   :  { %13078 = vmatprep.subr.bf16.mxu1 %v16795_v51 }
 0xda2   :  { %13080 = vmatpush3.bf16.msra.mxu1 %v16804_v10 }
 0xda3   :  { %13082 = vmatprep.subr.bf16.mxu1 %v16813_v30 }
 0xda6   :  { %13084 = vmatpush3.bf16.msra.mxu1 %v16827_v36 }
 0xda7   :  { %13086 = vmatprep.subr.bf16.mxu1 %v16836_v14 }
 0xdaa   :  { %13088 = vmatpush3.bf16.msra.mxu1 %v16848_v11 }
 0xdab   :  { %13090 = vmatprep.subr.bf16.mxu1 %v16857_v46 }
 0xdae   :  { %13092 = vmatpush3.bf16.msra.mxu1 %v16867_v54 }
 0xdaf   :  { %13094 = vmatprep.subr.bf16.mxu1 %v16871_v24 }
 0xdb1   :  { %9225 = vmatmul.mubr.f32.vlgmr.msra.gmra.mrb[66].mxu1 %v17696_v39 }
 0xdb2   :  { %9229 = vmatprep.mubr.f32.mxu1 %v17697_v45  ;;  %13096 = vmatpush3.bf16.msra.mxu1 %v16871_v24 }
 0xdb3   :  { %13098 = vmatprep.subr.bf16.mxu1 %v16882_v55 }
 0xdb5   :  { %9230 = vmatmul.mubr.f32.gmra.mrb[68].mxu1 %v16839_v34 }
 0xdb6   :  { %13100 = vmatpush3.bf16.msra.mxu1 %v16882_v55  ;;  %11220 = vmatprep.mubr.msk.f32.mxu1 %vm261_vm2, %v16846_v41 }
 0xdb9   :  { %11221 = vmatmul.mubr.msk.f32.vlgmr.msra.gmra.mrb[64].mxu1 %vm261_vm2, %v16862_v5  ;;  %v16974_v5 = vld [vmem:[%s9451_s11] ss:$0 sm:$0xff] }
 0xde3   :  { %v10274_v35 = vpop.f32.mrb[64].mxu0 }
 0xde4   :  { %v10275_v12 = vpop.f32.mrb[65].mxu0 }
 0xde5   :  { %v10276_v19 = vadd.f32 %v10275_v12, %v10274_v35 }
 0xde7   :  { %v10277_v52 = vpop.f32.mrb[66].mxu0 }
 0xde8   :  { %v10278_v6 = vpop.f32.mrb[67].mxu0 }
 0xde9   :  { %v10279_v13 = vadd.f32 %v10278_v6, %v10277_v52 }
 0xe03   :  { %v10318_v2 = vpop.f32.mrb[50].mxu1  ;;  %v10362_v40 = vpop.f32.mrb[68].mxu0 }
 0xe04   :  { %v10319_v26 = vpop.f32.mrb[51].mxu1  ;;  %v10363_v18 = vpop.f32.mrb[69].mxu0 }
 0xe05   :  { %v10320_v57 = vadd.f32 %v10319_v26, %v10318_v2  ;;  %v10364_v51 = vadd.f32 %v10363_v18, %v10362_v40 }
 0xe07   :  { %v10321_v10 = vpop.f32.mrb[52].mxu1  ;;  %v10365_v30 = vpop.f32.mrb[70].mxu0  ;;  %v13103_v11 = vadd.f32 %v10320_v57, %v10276_v19 }
 0xe08   :  { %v10322_v36 = vpop.f32.mrb[53].mxu1  ;;  %v10366_v14 = vpop.f32.mrb[71].mxu0 }
 0xe09   :  { %v10323_v34 = vadd.f32 %v10322_v36, %v10321_v10  ;;  %v10367_v41 = vadd.f32 %v10366_v14, %v10365_v30 }
 0xe0b   :  { %v11156_v46 = vpop.f32.mrb[48].mxu1  ;;  %v13101_v33 = vadd.f32 %v10323_v34, %v10279_v13 }
 0xe0c   :  { %v8198_v9 = vpop.f32.mrb[49].mxu1 }
 0xe0d   :  { %v13102_v54 = vadd.f32 %v13101_v33, %v11156_v46  ;;  %v13104_v24 = vadd.f32 %v13103_v11, %v8198_v9 }
 0xe0f   :  { %v8214_v31 = vadd.f32 %v13102_v54, %v16974_v5  ;;  %v8213_v7 = vadd.f32 %v13104_v24, %v16974_v5 }
 0xe11   :  { %13225 = vtanh.f32 %v8214_v31 }
 0xe12   :  { %13227 = vtanh.f32 %v8213_v7 }
 0xe1b   :  { %v13226_v59 = vpop.eup %13225 }
 0xe1c   :  { %v13228_v22 = vpop.eup %13227  ;;  %9322 = vst [vmem:[%s16981_s15 + $0x10] ss:$8 sps:$4 sm:$0x11] %v13226_v59   ;;  %9323 = vst [vmem:[%s16981_s15 + $0x11] ss:$8 sps:$4 sm:$0x22] %v13226_v59  }
 0xe1d   :  { %9324 = vst [vmem:[%s16981_s15 + $0x12] ss:$8 sps:$4 sm:$0x44] %v13226_v59   ;;  %9325 = vst [vmem:[%s16981_s15 + $0x13] ss:$8 sps:$4 sm:$0x88] %v13226_v59  }
 0xe1e   :  { %9314 = vst [vmem:[%s16981_s15] ss:$8 sps:$4 sm:$0x11] %v13228_v22   ;;  %9315 = vst [vmem:[%s16981_s15 + $0x1] ss:$8 sps:$4 sm:$0x22] %v13228_v22  }
 0xe1f   :  { %9316 = vst [vmem:[%s16981_s15 + $0x2] ss:$8 sps:$4 sm:$0x44] %v13228_v22   ;;  %9317 = vst [vmem:[%s16981_s15 + $0x3] ss:$8 sps:$4 sm:$0x88] %v13228_v22  }
 0xe24   :  { %v10450_v55 = vpop.f32.mrb[72].mxu0 }
 0xe25   :  { %v10451_v47 = vpop.f32.mrb[73].mxu0 }
 0xe26   :  { %v10452_v23 = vadd.f32 %v10451_v47, %v10450_v55 }
 0xe28   :  { %v10453_v4 = vpop.f32.mrb[74].mxu0 }
 0xe29   :  { %v10454_v29 = vpop.f32.mrb[75].mxu0 }
 0xe2a   :  { %v10455_v3 = vadd.f32 %v10454_v29, %v10453_v4 }
 0xe33   :  { %v10406_v60 = vpop.f32.mrb[56].mxu1 }
 0xe34   :  { %v11200_v37 = vpop.f32.mrb[76].mxu0  ;;  %v10407_v58 = vpop.f32.mrb[57].mxu1 }
 0xe35   :  { %v10408_v63 = vadd.f32 %v10407_v58, %v10406_v60  ;;  %v8964_v27 = vpop.f32.mrb[77].mxu0 }
 0xe37   :  { %v10409_v48 = vpop.f32.mrb[58].mxu1  ;;  %v13107_v42 = vadd.f32 %v10408_v63, %v10364_v51 }
 0xe38   :  { %v10410_v17 = vpop.f32.mrb[59].mxu1 }
 0xe39   :  { %v10411_v1 = vadd.f32 %v10410_v17, %v10409_v48 }
 0xe3b   :  { %v13105_v44 = vadd.f32 %v10411_v1, %v10367_v41 }
 0xe3c   :  { %v11178_v38 = vpop.f32.mrb[54].mxu1 }
 0xe3d   :  { %v13106_v20 = vadd.f32 %v13105_v44, %v11178_v38  ;;  %v8613_v43 = vpop.f32.mrb[55].mxu1 }
 0xe3e   :  { %v13108_v16 = vadd.f32 %v13107_v42, %v8613_v43 }
 0xe3f   :  { %v8623_v61 = vadd.f32 %v13106_v20, %v16974_v5 }
 0xe40   :  { %v8622_v25 = vadd.f32 %v13108_v16, %v16974_v5 }
 0xe41   :  { %13229 = vtanh.f32 %v8623_v61 }
 0xe42   :  { %13231 = vtanh.f32 %v8622_v25 }
 0xe4b   :  { %v13230_v0 = vpop.eup %13229 }
 0xe4c   :  { %v13232_v8 = vpop.eup %13231  ;;  %9340 = vst [vmem:[%s16981_s15 + $0x11] ss:$8 sps:$4 sm:$0x11] %v13230_v0   ;;  %9341 = vst [vmem:[%s16981_s15 + $0x12] ss:$8 sps:$4 sm:$0x22] %v13230_v0  }
 0xe4d   :  { %9342 = vst [vmem:[%s16981_s15 + $0x13] ss:$8 sps:$4 sm:$0x44] %v13230_v0   ;;  %9343 = vst [vmem:[%s16981_s15 + $0x14] ss:$8 sps:$4 sm:$0x88] %v13230_v0  }
 0xe4e   :  { %9332 = vst [vmem:[%s16981_s15 + $0x1] ss:$8 sps:$4 sm:$0x11] %v13232_v8   ;;  %9333 = vst [vmem:[%s16981_s15 + $0x2] ss:$8 sps:$4 sm:$0x22] %v13232_v8  }
 0xe4f   :  { %9334 = vst [vmem:[%s16981_s15 + $0x3] ss:$8 sps:$4 sm:$0x44] %v13232_v8   ;;  %9335 = vst [vmem:[%s16981_s15 + $0x4] ss:$8 sps:$4 sm:$0x88] %v13232_v8  }
 0xe55   :  { %v10538_v15 = vpop.f32.mrb[78].mxu0 }
 0xe56   :  { %v10539_v62 = vpop.f32.mrb[79].mxu0 }
 0xe57   :  { %v10540_v28 = vadd.f32 %v10539_v62, %v10538_v15 }
 0xe59   :  { %v10541_v21 = vpop.f32.mrb[80].mxu0 }
 0xe5a   :  { %v10542_v53 = vpop.f32.mrb[81].mxu0 }
 0xe5b   :  { %v10543_v56 = vadd.f32 %v10542_v53, %v10541_v21 }
 0xe5c   :  { %v10494_v50 = vpop.f32.mrb[60].mxu1 }
 0xe5d   :  { %v10495_v49 = vpop.f32.mrb[61].mxu1 }
 0xe5e   :  { %v10496_v32 = vadd.f32 %v10495_v49, %v10494_v50 }
 0xe60   :  { %v13111_v39 = vadd.f32 %v10496_v32, %v10452_v23  ;;  %v10497_v45 = vpop.f32.mrb[62].mxu1 }
 0xe61   :  { %v10498_v35 = vpop.f32.mrb[63].mxu1 }
 0xe62   :  { %v13112_v12 = vadd.f32 %v13111_v39, %v8964_v27  ;;  %v10499_v19 = vadd.f32 %v10498_v35, %v10497_v45 }
 0xe64   :  { %v8973_v52 = vadd.f32 %v13112_v12, %v16974_v5  ;;  %v13109_v6 = vadd.f32 %v10499_v19, %v10455_v3 }
 0xe66   :  { %13233 = vtanh.f32 %v8973_v52  ;;  %v13110_v13 = vadd.f32 %v13109_v6, %v11200_v37 }
 0xe68   :  { %v8974_v2 = vadd.f32 %v13110_v13, %v16974_v5 }
 0xe6a   :  { %13235 = vtanh.f32 %v8974_v2 }
 0xe70   :  { %v13234_v40 = vpop.eup %13233 }
 0xe71   :  { %9537 = vst [vmem:[%s16981_s15 + $0x20] ss:$8 sps:$4 sm:$0x11] %v13234_v40   ;;  %9538 = vst [vmem:[%s16981_s15 + $0x21] ss:$8 sps:$4 sm:$0x22] %v13234_v40  }
 0xe72   :  { %9539 = vst [vmem:[%s16981_s15 + $0x22] ss:$8 sps:$4 sm:$0x44] %v13234_v40   ;;  %9540 = vst [vmem:[%s16981_s15 + $0x23] ss:$8 sps:$4 sm:$0x88] %v13234_v40  }
 0xe74   :  { %v13236_v26 = vpop.eup %13235 }
 0xe75   :  { %9545 = vst [vmem:[%s16981_s15 + $0x30] ss:$8 sps:$4 sm:$0x11] %v13236_v26   ;;  %9546 = vst [vmem:[%s16981_s15 + $0x31] ss:$8 sps:$4 sm:$0x22] %v13236_v26  }
 0xe76   :  { %9547 = vst [vmem:[%s16981_s15 + $0x32] ss:$8 sps:$4 sm:$0x44] %v13236_v26   ;;  %9548 = vst [vmem:[%s16981_s15 + $0x33] ss:$8 sps:$4 sm:$0x88] %v13236_v26  }
 0xe84   :  { %v10582_v18 = vpop.f32.mrb[66].mxu1 }
 0xe85   :  { %v10583_v57 = vpop.f32.mrb[67].mxu1 }
 0xe86   :  { %v10584_v51 = vadd.f32 %v10583_v57, %v10582_v18 }
 0xe88   :  { %v10585_v10 = vpop.f32.mrb[68].mxu1  ;;  %v13115_v30 = vadd.f32 %v10584_v51, %v10540_v28 }
 0xe89   :  { %v10586_v11 = vpop.f32.mrb[69].mxu1 }
 0xe8a   :  { %v10587_v36 = vadd.f32 %v10586_v11, %v10585_v10 }
 0xe8c   :  { %v11222_v14 = vpop.f32.mrb[64].mxu1  ;;  %v13113_v34 = vadd.f32 %v10587_v36, %v10543_v56 }
 0xe8d   :  { %v9301_v41 = vpop.f32.mrb[65].mxu1 }
 0xe8e   :  { %v13114_v46 = vadd.f32 %v13113_v34, %v11222_v14  ;;  %v13116_v33 = vadd.f32 %v13115_v30, %v9301_v41 }
 0xe90   :  { %v9311_v9 = vadd.f32 %v13114_v46, %v16974_v5  ;;  %v9310_v54 = vadd.f32 %v13116_v33, %v16974_v5 }
 0xe92   :  { %13237 = vtanh.f32 %v9311_v9 }
 0xe93   :  { %13239 = vtanh.f32 %v9310_v54 }
 0xe9c   :  { %v13238_v24 = vpop.eup %13237 }
 0xe9d   :  { %v13240_v31 = vpop.eup %13239  ;;  %9561 = vst [vmem:[%s16981_s15 + $0x31] ss:$8 sps:$4 sm:$0x11] %v13238_v24   ;;  %9562 = vst [vmem:[%s16981_s15 + $0x32] ss:$8 sps:$4 sm:$0x22] %v13238_v24  }
 0xe9e   :  { %9563 = vst [vmem:[%s16981_s15 + $0x33] ss:$8 sps:$4 sm:$0x44] %v13238_v24   ;;  %9564 = vst [vmem:[%s16981_s15 + $0x34] ss:$8 sps:$4 sm:$0x88] %v13238_v24  }
 0xe9f   :  { %9553 = vst [vmem:[%s16981_s15 + $0x21] ss:$8 sps:$4 sm:$0x11] %v13240_v31   ;;  %9554 = vst [vmem:[%s16981_s15 + $0x22] ss:$8 sps:$4 sm:$0x22] %v13240_v31  }
 0xea0   :  { %9555 = vst [vmem:[%s16981_s15 + $0x23] ss:$8 sps:$4 sm:$0x44] %v13240_v31   ;;  %9556 = vst [vmem:[%s16981_s15 + $0x24] ss:$8 sps:$4 sm:$0x88] %v13240_v31  }

</bundles_post_ra>
